<compile_context>
chip_gen: v7x
topology: tpu7x:2x2x1
jax: 0.10.0
libtpu: 0.0.40
codegen_flags: <defaults>
</compile_context>

<pallas_src>
import jax
import jax.numpy as jnp
from jax import lax
from jax.experimental import pallas as pl
from jax.experimental.pallas import tpu as pltpu


# -----------------------------------------------------------------------------
# Fused conv1 + conv2 + conv3 kernel (per-batch grid step, all VMEM resident)
# -----------------------------------------------------------------------------
def _fused_conv_kernel(x_ref, w1_ref, b1_ref, w2_ref, b2_ref, w3_ref, b3_ref,
                       out_ref, a2_ref):
    # conv1 + conv2 fused per kh2 tap.  x_ref[0, kh2] is (1152, 54):
    #   row  = t3 * 128 + p3   (t3 = kh3*3 + kw3, p3 = oy3*11 + ox3, 7 pad rows)
    #   lane = kw2*18 + kh1*6 + kw1*2 + ci
    # w1 is block-diagonal over kw2, so one matmul gives relu(conv1) at the
    # three kw2-shifted columns (96 lanes) = exactly conv2's K=96 operand.
    acc2 = jnp.zeros((1152, 64), jnp.float32)
    for kh2 in range(3):
        a1 = jnp.dot(x_ref[0, kh2], w1_ref[...],
                     preferred_element_type=jnp.float32)
        a1 = jnp.maximum(a1 + b1_ref[...], 0.0)            # relu(conv1), (1152, 96)
        acc2 = acc2 + jnp.dot(a1, w2_ref[kh2],
                              preferred_element_type=jnp.float32)
    a2_ref[...] = jnp.maximum(acc2 + b2_ref[...], 0.0)     # relu(conv2), (1152, 64)

    # conv3: nine tap matmuls over contiguous, 128-aligned row sections of a2.
    acc3 = jnp.zeros((121, 128), jnp.float32)
    for t3 in range(9):
        acc3 = acc3 + jnp.dot(a2_ref[pl.ds(t3 * 128, 121), :], w3_ref[t3],
                              preferred_element_type=jnp.float32)
    out_ref[0] = jnp.maximum(acc3 + b3_ref[...], 0.0).astype(out_ref.dtype)


def _fused_convs(planes, p):
    """planes: (B, 3, 1152, 54) f32 -> h3: (B, 121, 128) bf16 (relu(conv3))."""
    bsz = planes.shape[0]
    return pl.pallas_call(
        _fused_conv_kernel,
        out_shape=jax.ShapeDtypeStruct((bsz, 121, 128), jnp.bfloat16),
        grid=(bsz,),
        in_specs=[
            pl.BlockSpec((1, 3, 1152, 54), lambda i: (i, 0, 0, 0)),   # input planes
            pl.BlockSpec((54, 96), lambda i: (0, 0)),                 # conv1 (block-diag)
            pl.BlockSpec((1, 96), lambda i: (0, 0)),
            pl.BlockSpec((3, 96, 64), lambda i: (0, 0, 0)),           # conv2
            pl.BlockSpec((1, 64), lambda i: (0, 0)),
            pl.BlockSpec((9, 64, 128), lambda i: (0, 0, 0)),          # conv3
            pl.BlockSpec((1, 128), lambda i: (0, 0)),
        ],
        out_specs=pl.BlockSpec((1, 121, 128), lambda i: (i, 0, 0)),
        scratch_shapes=[pltpu.VMEM((1152, 64), jnp.float32)],
        compiler_params=pltpu.CompilerParams(
            dimension_semantics=("parallel",)),
    )(planes, p["w1f"], p["b1f"], p["w2f"], p["b2f"], p["w3f"], p["b3f"])


# -----------------------------------------------------------------------------
# Fused FC head: fc1 (bf16 weight, f32 accum) + ReLU + fc2 + softmax, single step
# -----------------------------------------------------------------------------
def _fc_head_kernel(x_ref, w1_ref, b1_ref, w2_ref, b2_ref, o_ref):
    h = jnp.dot(x_ref[...], w1_ref[...], preferred_element_type=jnp.float32)
    h = jnp.maximum(h + b1_ref[...], 0.0)                               # fc1 + ReLU
    y = jnp.dot(h, w2_ref[...], preferred_element_type=jnp.float32)     # fc2
    y = y + b2_ref[...]
    y = y - jnp.max(y, axis=-1, keepdims=True)                          # softmax
    e = jnp.exp(y)
    o_ref[...] = e / jnp.sum(e, axis=-1, keepdims=True)


def _fc_head(flat, w1, b1, w2, b2):
    bsz, kdim = flat.shape
    hidden = w1.shape[1]
    nact = w2.shape[1]
    return pl.pallas_call(
        _fc_head_kernel,
        out_shape=jax.ShapeDtypeStruct((bsz, nact), jnp.float32),
        grid=(1,),
        in_specs=[
            pl.BlockSpec((bsz, kdim), lambda i: (0, 0)),       # flat activations (bf16)
            pl.BlockSpec((kdim, hidden), lambda i: (0, 0)),    # wfc1 (bf16, resident)
            pl.BlockSpec((1, hidden), lambda i: (0, 0)),
            pl.BlockSpec((hidden, nact), lambda i: (0, 0)),
            pl.BlockSpec((1, nact), lambda i: (0, 0)),
        ],
        out_specs=pl.BlockSpec((bsz, nact), lambda i: (0, 0)),
        compiler_params=pltpu.CompilerParams(
            dimension_semantics=("arbitrary",)),
    )(flat, w1, b1, w2, b2)


# -----------------------------------------------------------------------------
# Wrapper-side nested im2col: (B, 95, 95, 2) -> (B, 3, 1152, 54)
#   value[b, kh2, t3*128 + p3, kw2*18 + kh1*6 + kw1*2 + ci]
#     = x[b, 8*oy3 + 4*kh3 + 2*kh2 + kh1, 8*ox3 + 4*kw3 + 2*kw2 + kw1, ci]
# -----------------------------------------------------------------------------
def _build_conv_input(x_nhwc):
    assert x_nhwc.shape[1:] == (95, 95, 2), x_nhwc.shape
    bsz = x_nhwc.shape[0]

    def expand(a, axis):
        # window-3 / stride-2 decomposition along `axis`; the tap index becomes
        # a new axis at position `axis`, the decimated position stays after it.
        n = (a.shape[axis] - 3) // 2 + 1
        taps = [lax.slice_in_dim(a, k, k + 2 * (n - 1) + 1, 2, axis)
                for k in range(3)]
        return jnp.stack(taps, axis=axis)

    t = expand(x_nhwc, 1)   # (B, kh1, i1, col, ci)
    t = expand(t, 2)        # (B, kh1, kh2, i2, col, ci)
    t = expand(t, 3)        # (B, kh1, kh2, kh3, oy3, col, ci)
    t = expand(t, 5)        # (B, kh1, kh2, kh3, oy3, kw1, j1, ci)
    t = expand(t, 6)        # (B, kh1, kh2, kh3, oy3, kw1, kw2, j2, ci)
    t = expand(t, 7)        # (B, kh1, kh2, kh3, oy3, kw1, kw2, kw3, ox3, ci)
    # -> (B, kh2, kh3, kw3, oy3, ox3, kw2, kh1, kw1, ci)
    t = jnp.transpose(t, (0, 2, 3, 7, 4, 8, 6, 1, 5, 9))
    t = t.reshape(bsz, 3, 9, 121, 54)
    t = jnp.pad(t, ((0, 0), (0, 0), (0, 0), (0, 7), (0, 0)))   # p3: 121 -> 128
    return t.reshape(bsz, 3, 1152, 54)


# -----------------------------------------------------------------------------
# Parameters: torch-layout init (matching PolicyConv.init_weights) + packing
# -----------------------------------------------------------------------------
def init_torch_params(key, action_space, hidden=64):
    ks = jax.random.split(key, 8)

    def xavier_conv(k, cout, cin):
        std = (2.0 / (9 * cin + 9 * cout)) ** 0.5     # xavier_normal_ on (cout,cin,3,3)
        return jax.random.normal(k, (cout, cin, 3, 3), jnp.float32) * std

    return {
        "conv1_w": xavier_conv(ks[0], 32, 2),
        "conv1_b": jax.random.normal(ks[1], (32,), jnp.float32),
        "conv2_w": xavier_conv(ks[2], 64, 32),
        "conv2_b": jax.random.normal(ks[3], (64,), jnp.float32),
        "conv3_w": xavier_conv(ks[4], 128, 64),
        "conv3_b": jax.random.normal(ks[5], (128,), jnp.float32),
        "fc1_w": jax.random.uniform(ks[6], (hidden, 128 * 11 * 11), jnp.float32),
        "fc1_b": jnp.zeros((hidden,), jnp.float32),
        "fc2_w": jax.random.uniform(ks[7], (action_space, hidden), jnp.float32),
        "fc2_b": jnp.zeros((action_space,), jnp.float32),
    }


def _block_diag3(w):
    k, n = w.shape
    z = jnp.zeros((k, n), w.dtype)
    return jnp.concatenate([
        jnp.concatenate([w, z, z], axis=1),
        jnp.concatenate([z, w, z], axis=1),
        jnp.concatenate([z, z, w], axis=1)], axis=0)


def pack_params(raw):
    """torch-layout params -> fused Pallas kernel layouts."""
    # conv1: (kh1, kw1, ci, co) -> (18, 32), block-diagonal over the folded kw2 tap.
    w1_km = jnp.transpose(raw["conv1_w"], (2, 3, 1, 0)).reshape(18, 32)
    p = {
        "w1f": _block_diag3(w1_km),                                         # (54, 96)
        "b1f": jnp.tile(raw["conv1_b"], 3).reshape(1, 96),
        "w2f": jnp.transpose(raw["conv2_w"], (2, 3, 1, 0)).reshape(3, 96, 64),
        "b2f": raw["conv2_b"].reshape(1, 64),
        "w3f": jnp.transpose(raw["conv3_w"], (2, 3, 1, 0)).reshape(9, 64, 128),
        "b3f": raw["conv3_b"].reshape(1, 128),
    }
    hidden = raw["fc1_w"].shape[0]
    nact = raw["fc2_w"].shape[0]
    # fc1 weight: (hidden, 15488) with NCHW-flatten input (c*121 + h*11 + w)
    #   -> (15488, hidden) with rows in NHWC-flatten order ((h*11 + w)*128 + c),
    #   stored bf16 (halves the dominant HBM read; f32 accumulation in-kernel).
    wfc1 = raw["fc1_w"].reshape(hidden, 128, 121)
    wfc1 = jnp.transpose(wfc1, (2, 1, 0)).reshape(121 * 128, hidden)
    p["wfc1"] = wfc1.astype(jnp.bfloat16)
    p["bfc1"] = raw["fc1_b"].reshape(1, hidden)
    p["wfc2"] = jnp.transpose(raw["fc2_w"]).astype(jnp.float32)             # (hidden, A)
    p["bfc2"] = raw["fc2_b"].reshape(1, nact)
    return p


# -----------------------------------------------------------------------------
# Forward pass
# -----------------------------------------------------------------------------
def policy_conv_forward(params, x_nchw):
    x = jnp.transpose(x_nchw, (0, 2, 3, 1))          # NCHW -> NHWC
    bsz = x.shape[0]
    planes = _build_conv_input(x)                    # (B, 3, 1152, 54)
    h3 = _fused_convs(planes, params)                # (B, 121, 128) bf16
    flat = h3.reshape(bsz, 121 * 128)                # free bitcast; NHWC flatten order
    probs = _fc_head(flat, params["wfc1"], params["bfc1"],
                     params["wfc2"], params["bfc2"])
    # TODO(synk): torch.distributions.Categorical has no Pallas equivalent; we
    # return the categorical probabilities that parameterize the distribution.
    return probs


# -----------------------------------------------------------------------------
# Pure-XLA reference for the conv stack (validation only)
# -----------------------------------------------------------------------------
def _reference_conv_flat(raw, x_nchw):
    x = jnp.transpose(x_nchw, (0, 2, 3, 1))

    def conv(h, w, b):
        w_hwio = jnp.transpose(w, (2, 3, 1, 0))
        y = lax.conv_general_dilated(h, w_hwio, (2, 2), "VALID",
                                     dimension_numbers=("NHWC", "HWIO", "NHWC"))
        return jnp.maximum(y + b, 0.0)

    h = conv(x, raw["conv1_w"], raw["conv1_b"])
    h = conv(h, raw["conv2_w"], raw["conv2_b"])
    h = conv(h, raw["conv3_w"], raw["conv3_b"])
    return h.reshape(x.shape[0], -1)                 # NHWC flatten


if __name__ == "__main__":
    key = jax.random.PRNGKey(0)
    pkey, xkey = jax.random.split(key)

    action_space = 3
    raw = init_torch_params(pkey, action_space, hidden=64)
    params = pack_params(raw)

    # 95x95 input -> 47 -> 23 -> 11 spatial, matching reshaped_size = 128*11*11.
    x = jax.random.uniform(xkey, (2, 2, 95, 95), dtype=jnp.float32)   # NCHW

    probs = jax.jit(policy_conv_forward)(params, x)
    jax.block_until_ready(probs)

    assert probs.shape == (2, action_space), probs.shape
    assert bool(jnp.all(jnp.isfinite(probs)))
    assert bool(jnp.allclose(jnp.sum(probs, axis=-1), 1.0, atol=1e-5))

    # Validate the fused conv stack against a pure-XLA reference (the only
    # sub-f32 step in the conv path is the final bf16 output cast).
    planes = _build_conv_input(jnp.transpose(x, (0, 2, 3, 1)))
    h3 = _fused_convs(planes, params).astype(jnp.float32).reshape(2, -1)
    ref = _reference_conv_flat(raw, x)
    assert bool(jnp.allclose(h3, ref, rtol=2e-2, atol=5e-2)), \
        float(jnp.max(jnp.abs(h3 - ref)))

    print("KERNEL_OK")
</pallas_src>

<mosaic_0001>
module attributes {stable_mosaic.version = 11 : i64} {
  func.func @_fused_conv_kernel(%arg0: i32, %arg1: memref<1x3x1152x54xf32, #tpu.memory_space<vmem>>, %arg2: memref<54x96xf32, #tpu.memory_space<vmem>>, %arg3: memref<1x96xf32, #tpu.memory_space<vmem>>, %arg4: memref<3x96x64xf32, #tpu.memory_space<vmem>>, %arg5: memref<1x64xf32, #tpu.memory_space<vmem>>, %arg6: memref<9x64x128xf32, #tpu.memory_space<vmem>>, %arg7: memref<1x128xf32, #tpu.memory_space<vmem>>, %arg8: memref<1x121x128xbf16, #tpu.memory_space<vmem>>, %arg9: memref<1152x64xf32, #tpu.memory_space<vmem>>) attributes {dimension_semantics = [#tpu.dimension_semantics<parallel>], iteration_bounds = array<i64: 2>, scalar_prefetch = 0 : i64, scratch_operands = 1 : i64, tpu.core_type = #tpu.core_type<tc>, window_params = [{transform_indices = @transform_0, window_bounds = array<i64: 1, 3, 1152, 54>}, {pipeline_mode = #tpu.pipeline_mode<synchronous>, transform_indices = @transform_1, window_bounds = array<i64: 54, 96>}, {pipeline_mode = #tpu.pipeline_mode<synchronous>, transform_indices = @transform_2, window_bounds = array<i64: 1, 96>}, {pipeline_mode = #tpu.pipeline_mode<synchronous>, transform_indices = @transform_3, window_bounds = array<i64: 3, 96, 64>}, {pipeline_mode = #tpu.pipeline_mode<synchronous>, transform_indices = @transform_4, window_bounds = array<i64: 1, 64>}, {pipeline_mode = #tpu.pipeline_mode<synchronous>, transform_indices = @transform_5, window_bounds = array<i64: 9, 64, 128>}, {pipeline_mode = #tpu.pipeline_mode<synchronous>, transform_indices = @transform_6, window_bounds = array<i64: 1, 128>}, {transform_indices = @transform_7, window_bounds = array<i64: 1, 121, 128>}]} {
    %cst = arith.constant 0.000000e+00 : f32
    %0 = vector.broadcast %cst : f32 to vector<1152x64xf32>
    %c0 = arith.constant 0 : index
    %c0_0 = arith.constant 0 : index
    %c0_1 = arith.constant 0 : index
    %c0_2 = arith.constant 0 : index
    %1 = vector.load %arg1[%c0, %c0_0, %c0_1, %c0_2] : memref<1x3x1152x54xf32, #tpu.memory_space<vmem>>, vector<1x1x1152x54xf32>
    %2 = vector.shape_cast %1 : vector<1x1x1152x54xf32> to vector<1152x54xf32>
    %c0_3 = arith.constant 0 : index
    %c0_4 = arith.constant 0 : index
    %3 = vector.load %arg2[%c0_3, %c0_4] : memref<54x96xf32, #tpu.memory_space<vmem>>, vector<54x96xf32>
    %cst_5 = arith.constant dense<0.000000e+00> : vector<1152x96xf32>
    %4 = tpu.matmul %2, %3, %cst_5 {dimension_numbers = #tpu.dot_dimension_numbers<[1], [0], [0], [1], [0, 0, 1, 1], [], []>} : vector<1152x54xf32>, vector<54x96xf32>, vector<1152x96xf32> -> vector<1152x96xf32>
    %c0_6 = arith.constant 0 : index
    %c0_7 = arith.constant 0 : index
    %5 = vector.load %arg3[%c0_6, %c0_7] : memref<1x96xf32, #tpu.memory_space<vmem>>, vector<1x96xf32>
    %6 = vector.broadcast %5 : vector<1x96xf32> to vector<1152x96xf32>
    %7 = arith.addf %4, %6 : vector<1152x96xf32>
    %cst_8 = arith.constant 0.000000e+00 : f32
    %8 = vector.broadcast %cst_8 : f32 to vector<1152x96xf32>
    %9 = arith.maximumf %7, %8 : vector<1152x96xf32>
    %c0_9 = arith.constant 0 : index
    %c0_10 = arith.constant 0 : index
    %c0_11 = arith.constant 0 : index
    %10 = vector.load %arg4[%c0_9, %c0_10, %c0_11] : memref<3x96x64xf32, #tpu.memory_space<vmem>>, vector<1x96x64xf32>
    %11 = vector.shape_cast %10 : vector<1x96x64xf32> to vector<96x64xf32>
    %cst_12 = arith.constant dense<0.000000e+00> : vector<1152x64xf32>
    %12 = tpu.matmul %9, %11, %cst_12 {dimension_numbers = #tpu.dot_dimension_numbers<[1], [0], [0], [1], [0, 0, 1, 1], [], []>} : vector<1152x96xf32>, vector<96x64xf32>, vector<1152x64xf32> -> vector<1152x64xf32>
    %13 = arith.addf %0, %12 : vector<1152x64xf32>
    %c0_13 = arith.constant 0 : index
    %c1 = arith.constant 1 : index
    %c0_14 = arith.constant 0 : index
    %c0_15 = arith.constant 0 : index
    %14 = vector.load %arg1[%c0_13, %c1, %c0_14, %c0_15] : memref<1x3x1152x54xf32, #tpu.memory_space<vmem>>, vector<1x1x1152x54xf32>
    %15 = vector.shape_cast %14 : vector<1x1x1152x54xf32> to vector<1152x54xf32>
    %c0_16 = arith.constant 0 : index
    %c0_17 = arith.constant 0 : index
    %16 = vector.load %arg2[%c0_16, %c0_17] : memref<54x96xf32, #tpu.memory_space<vmem>>, vector<54x96xf32>
    %cst_18 = arith.constant dense<0.000000e+00> : vector<1152x96xf32>
    %17 = tpu.matmul %15, %16, %cst_18 {dimension_numbers = #tpu.dot_dimension_numbers<[1], [0], [0], [1], [0, 0, 1, 1], [], []>} : vector<1152x54xf32>, vector<54x96xf32>, vector<1152x96xf32> -> vector<1152x96xf32>
    %c0_19 = arith.constant 0 : index
    %c0_20 = arith.constant 0 : index
    %18 = vector.load %arg3[%c0_19, %c0_20] : memref<1x96xf32, #tpu.memory_space<vmem>>, vector<1x96xf32>
    %19 = vector.broadcast %18 : vector<1x96xf32> to vector<1152x96xf32>
    %20 = arith.addf %17, %19 : vector<1152x96xf32>
    %cst_21 = arith.constant 0.000000e+00 : f32
    %21 = vector.broadcast %cst_21 : f32 to vector<1152x96xf32>
    %22 = arith.maximumf %20, %21 : vector<1152x96xf32>
    %c1_22 = arith.constant 1 : index
    %c0_23 = arith.constant 0 : index
    %c0_24 = arith.constant 0 : index
    %23 = vector.load %arg4[%c1_22, %c0_23, %c0_24] : memref<3x96x64xf32, #tpu.memory_space<vmem>>, vector<1x96x64xf32>
    %24 = vector.shape_cast %23 : vector<1x96x64xf32> to vector<96x64xf32>
    %cst_25 = arith.constant dense<0.000000e+00> : vector<1152x64xf32>
    %25 = tpu.matmul %22, %24, %cst_25 {dimension_numbers = #tpu.dot_dimension_numbers<[1], [0], [0], [1], [0, 0, 1, 1], [], []>} : vector<1152x96xf32>, vector<96x64xf32>, vector<1152x64xf32> -> vector<1152x64xf32>
    %26 = arith.addf %13, %25 : vector<1152x64xf32>
    %c0_26 = arith.constant 0 : index
    %c2 = arith.constant 2 : index
    %c0_27 = arith.constant 0 : index
    %c0_28 = arith.constant 0 : index
    %27 = vector.load %arg1[%c0_26, %c2, %c0_27, %c0_28] : memref<1x3x1152x54xf32, #tpu.memory_space<vmem>>, vector<1x1x1152x54xf32>
    %28 = vector.shape_cast %27 : vector<1x1x1152x54xf32> to vector<1152x54xf32>
    %c0_29 = arith.constant 0 : index
    %c0_30 = arith.constant 0 : index
    %29 = vector.load %arg2[%c0_29, %c0_30] : memref<54x96xf32, #tpu.memory_space<vmem>>, vector<54x96xf32>
    %cst_31 = arith.constant dense<0.000000e+00> : vector<1152x96xf32>
    %30 = tpu.matmul %28, %29, %cst_31 {dimension_numbers = #tpu.dot_dimension_numbers<[1], [0], [0], [1], [0, 0, 1, 1], [], []>} : vector<1152x54xf32>, vector<54x96xf32>, vector<1152x96xf32> -> vector<1152x96xf32>
    %c0_32 = arith.constant 0 : index
    %c0_33 = arith.constant 0 : index
    %31 = vector.load %arg3[%c0_32, %c0_33] : memref<1x96xf32, #tpu.memory_space<vmem>>, vector<1x96xf32>
    %32 = vector.broadcast %31 : vector<1x96xf32> to vector<1152x96xf32>
    %33 = arith.addf %30, %32 : vector<1152x96xf32>
    %cst_34 = arith.constant 0.000000e+00 : f32
    %34 = vector.broadcast %cst_34 : f32 to vector<1152x96xf32>
    %35 = arith.maximumf %33, %34 : vector<1152x96xf32>
    %c2_35 = arith.constant 2 : index
    %c0_36 = arith.constant 0 : index
    %c0_37 = arith.constant 0 : index
    %36 = vector.load %arg4[%c2_35, %c0_36, %c0_37] : memref<3x96x64xf32, #tpu.memory_space<vmem>>, vector<1x96x64xf32>
    %37 = vector.shape_cast %36 : vector<1x96x64xf32> to vector<96x64xf32>
    %cst_38 = arith.constant dense<0.000000e+00> : vector<1152x64xf32>
    %38 = tpu.matmul %35, %37, %cst_38 {dimension_numbers = #tpu.dot_dimension_numbers<[1], [0], [0], [1], [0, 0, 1, 1], [], []>} : vector<1152x96xf32>, vector<96x64xf32>, vector<1152x64xf32> -> vector<1152x64xf32>
    %39 = arith.addf %26, %38 : vector<1152x64xf32>
    %c0_39 = arith.constant 0 : index
    %c0_40 = arith.constant 0 : index
    %40 = vector.load %arg5[%c0_39, %c0_40] : memref<1x64xf32, #tpu.memory_space<vmem>>, vector<1x64xf32>
    %41 = vector.broadcast %40 : vector<1x64xf32> to vector<1152x64xf32>
    %42 = arith.addf %39, %41 : vector<1152x64xf32>
    %cst_41 = arith.constant 0.000000e+00 : f32
    %43 = vector.broadcast %cst_41 : f32 to vector<1152x64xf32>
    %44 = arith.maximumf %42, %43 : vector<1152x64xf32>
    %c0_42 = arith.constant 0 : index
    %c0_43 = arith.constant 0 : index
    %45 = vector.load %arg9[%c0_42, %c0_43] : memref<1152x64xf32, #tpu.memory_space<vmem>>, vector<1152x64xf32>
    tpu.vector_store %arg9[%c0_42, %c0_43], %44 {strides = array<i32>} : memref<1152x64xf32, #tpu.memory_space<vmem>>, vector<1152x64xf32>,
    %cst_44 = arith.constant 0.000000e+00 : f32
    %46 = vector.broadcast %cst_44 : f32 to vector<121x128xf32>
    %c0_45 = arith.constant 0 : index
    %c0_46 = arith.constant 0 : index
    %47 = vector.load %arg9[%c0_45, %c0_46] : memref<1152x64xf32, #tpu.memory_space<vmem>>, vector<121x64xf32>
    %c0_47 = arith.constant 0 : index
    %c0_48 = arith.constant 0 : index
    %c0_49 = arith.constant 0 : index
    %48 = vector.load %arg6[%c0_47, %c0_48, %c0_49] : memref<9x64x128xf32, #tpu.memory_space<vmem>>, vector<1x64x128xf32>
    %49 = vector.shape_cast %48 : vector<1x64x128xf32> to vector<64x128xf32>
    %cst_50 = arith.constant dense<0.000000e+00> : vector<121x128xf32>
    %50 = tpu.matmul %47, %49, %cst_50 {dimension_numbers = #tpu.dot_dimension_numbers<[1], [0], [0], [1], [0, 0, 1, 1], [], []>} : vector<121x64xf32>, vector<64x128xf32>, vector<121x128xf32> -> vector<121x128xf32>
    %51 = arith.addf %46, %50 : vector<121x128xf32>
    %c128 = arith.constant 128 : index
    %c0_51 = arith.constant 0 : index
    %52 = vector.load %arg9[%c128, %c0_51] : memref<1152x64xf32, #tpu.memory_space<vmem>>, vector<121x64xf32>
    %c1_52 = arith.constant 1 : index
    %c0_53 = arith.constant 0 : index
    %c0_54 = arith.constant 0 : index
    %53 = vector.load %arg6[%c1_52, %c0_53, %c0_54] : memref<9x64x128xf32, #tpu.memory_space<vmem>>, vector<1x64x128xf32>
    %54 = vector.shape_cast %53 : vector<1x64x128xf32> to vector<64x128xf32>
    %cst_55 = arith.constant dense<0.000000e+00> : vector<121x128xf32>
    %55 = tpu.matmul %52, %54, %cst_55 {dimension_numbers = #tpu.dot_dimension_numbers<[1], [0], [0], [1], [0, 0, 1, 1], [], []>} : vector<121x64xf32>, vector<64x128xf32>, vector<121x128xf32> -> vector<121x128xf32>
    %56 = arith.addf %51, %55 : vector<121x128xf32>
    %c256 = arith.constant 256 : index
    %c0_56 = arith.constant 0 : index
    %57 = vector.load %arg9[%c256, %c0_56] : memref<1152x64xf32, #tpu.memory_space<vmem>>, vector<121x64xf32>
    %c2_57 = arith.constant 2 : index
    %c0_58 = arith.constant 0 : index
    %c0_59 = arith.constant 0 : index
    %58 = vector.load %arg6[%c2_57, %c0_58, %c0_59] : memref<9x64x128xf32, #tpu.memory_space<vmem>>, vector<1x64x128xf32>
    %59 = vector.shape_cast %58 : vector<1x64x128xf32> to vector<64x128xf32>
    %cst_60 = arith.constant dense<0.000000e+00> : vector<121x128xf32>
    %60 = tpu.matmul %57, %59, %cst_60 {dimension_numbers = #tpu.dot_dimension_numbers<[1], [0], [0], [1], [0, 0, 1, 1], [], []>} : vector<121x64xf32>, vector<64x128xf32>, vector<121x128xf32> -> vector<121x128xf32>
    %61 = arith.addf %56, %60 : vector<121x128xf32>
    %c384 = arith.constant 384 : index
    %c0_61 = arith.constant 0 : index
    %62 = vector.load %arg9[%c384, %c0_61] : memref<1152x64xf32, #tpu.memory_space<vmem>>, vector<121x64xf32>
    %c3 = arith.constant 3 : index
    %c0_62 = arith.constant 0 : index
    %c0_63 = arith.constant 0 : index
    %63 = vector.load %arg6[%c3, %c0_62, %c0_63] : memref<9x64x128xf32, #tpu.memory_space<vmem>>, vector<1x64x128xf32>
    %64 = vector.shape_cast %63 : vector<1x64x128xf32> to vector<64x128xf32>
    %cst_64 = arith.constant dense<0.000000e+00> : vector<121x128xf32>
    %65 = tpu.matmul %62, %64, %cst_64 {dimension_numbers = #tpu.dot_dimension_numbers<[1], [0], [0], [1], [0, 0, 1, 1], [], []>} : vector<121x64xf32>, vector<64x128xf32>, vector<121x128xf32> -> vector<121x128xf32>
    %66 = arith.addf %61, %65 : vector<121x128xf32>
    %c512 = arith.constant 512 : index
    %c0_65 = arith.constant 0 : index
    %67 = vector.load %arg9[%c512, %c0_65] : memref<1152x64xf32, #tpu.memory_space<vmem>>, vector<121x64xf32>
    %c4 = arith.constant 4 : index
    %c0_66 = arith.constant 0 : index
    %c0_67 = arith.constant 0 : index
    %68 = vector.load %arg6[%c4, %c0_66, %c0_67] : memref<9x64x128xf32, #tpu.memory_space<vmem>>, vector<1x64x128xf32>
    %69 = vector.shape_cast %68 : vector<1x64x128xf32> to vector<64x128xf32>
    %cst_68 = arith.constant dense<0.000000e+00> : vector<121x128xf32>
    %70 = tpu.matmul %67, %69, %cst_68 {dimension_numbers = #tpu.dot_dimension_numbers<[1], [0], [0], [1], [0, 0, 1, 1], [], []>} : vector<121x64xf32>, vector<64x128xf32>, vector<121x128xf32> -> vector<121x128xf32>
    %71 = arith.addf %66, %70 : vector<121x128xf32>
    %c640 = arith.constant 640 : index
    %c0_69 = arith.constant 0 : index
    %72 = vector.load %arg9[%c640, %c0_69] : memref<1152x64xf32, #tpu.memory_space<vmem>>, vector<121x64xf32>
    %c5 = arith.constant 5 : index
    %c0_70 = arith.constant 0 : index
    %c0_71 = arith.constant 0 : index
    %73 = vector.load %arg6[%c5, %c0_70, %c0_71] : memref<9x64x128xf32, #tpu.memory_space<vmem>>, vector<1x64x128xf32>
    %74 = vector.shape_cast %73 : vector<1x64x128xf32> to vector<64x128xf32>
    %cst_72 = arith.constant dense<0.000000e+00> : vector<121x128xf32>
    %75 = tpu.matmul %72, %74, %cst_72 {dimension_numbers = #tpu.dot_dimension_numbers<[1], [0], [0], [1], [0, 0, 1, 1], [], []>} : vector<121x64xf32>, vector<64x128xf32>, vector<121x128xf32> -> vector<121x128xf32>
    %76 = arith.addf %71, %75 : vector<121x128xf32>
    %c768 = arith.constant 768 : index
    %c0_73 = arith.constant 0 : index
    %77 = vector.load %arg9[%c768, %c0_73] : memref<1152x64xf32, #tpu.memory_space<vmem>>, vector<121x64xf32>
    %c6 = arith.constant 6 : index
    %c0_74 = arith.constant 0 : index
    %c0_75 = arith.constant 0 : index
    %78 = vector.load %arg6[%c6, %c0_74, %c0_75] : memref<9x64x128xf32, #tpu.memory_space<vmem>>, vector<1x64x128xf32>
    %79 = vector.shape_cast %78 : vector<1x64x128xf32> to vector<64x128xf32>
    %cst_76 = arith.constant dense<0.000000e+00> : vector<121x128xf32>
    %80 = tpu.matmul %77, %79, %cst_76 {dimension_numbers = #tpu.dot_dimension_numbers<[1], [0], [0], [1], [0, 0, 1, 1], [], []>} : vector<121x64xf32>, vector<64x128xf32>, vector<121x128xf32> -> vector<121x128xf32>
    %81 = arith.addf %76, %80 : vector<121x128xf32>
    %c896 = arith.constant 896 : index
    %c0_77 = arith.constant 0 : index
    %82 = vector.load %arg9[%c896, %c0_77] : memref<1152x64xf32, #tpu.memory_space<vmem>>, vector<121x64xf32>
    %c7 = arith.constant 7 : index
    %c0_78 = arith.constant 0 : index
    %c0_79 = arith.constant 0 : index
    %83 = vector.load %arg6[%c7, %c0_78, %c0_79] : memref<9x64x128xf32, #tpu.memory_space<vmem>>, vector<1x64x128xf32>
    %84 = vector.shape_cast %83 : vector<1x64x128xf32> to vector<64x128xf32>
    %cst_80 = arith.constant dense<0.000000e+00> : vector<121x128xf32>
    %85 = tpu.matmul %82, %84, %cst_80 {dimension_numbers = #tpu.dot_dimension_numbers<[1], [0], [0], [1], [0, 0, 1, 1], [], []>} : vector<121x64xf32>, vector<64x128xf32>, vector<121x128xf32> -> vector<121x128xf32>
    %86 = arith.addf %81, %85 : vector<121x128xf32>
    %c1024 = arith.constant 1024 : index
    %c0_81 = arith.constant 0 : index
    %87 = vector.load %arg9[%c1024, %c0_81] : memref<1152x64xf32, #tpu.memory_space<vmem>>, vector<121x64xf32>
    %c8 = arith.constant 8 : index
    %c0_82 = arith.constant 0 : index
    %c0_83 = arith.constant 0 : index
    %88 = vector.load %arg6[%c8, %c0_82, %c0_83] : memref<9x64x128xf32, #tpu.memory_space<vmem>>, vector<1x64x128xf32>
    %89 = vector.shape_cast %88 : vector<1x64x128xf32> to vector<64x128xf32>
    %cst_84 = arith.constant dense<0.000000e+00> : vector<121x128xf32>
    %90 = tpu.matmul %87, %89, %cst_84 {dimension_numbers = #tpu.dot_dimension_numbers<[1], [0], [0], [1], [0, 0, 1, 1], [], []>} : vector<121x64xf32>, vector<64x128xf32>, vector<121x128xf32> -> vector<121x128xf32>
    %91 = arith.addf %86, %90 : vector<121x128xf32>
    %c0_85 = arith.constant 0 : index
    %c0_86 = arith.constant 0 : index
    %92 = vector.load %arg7[%c0_85, %c0_86] : memref<1x128xf32, #tpu.memory_space<vmem>>, vector<1x128xf32>
    %93 = vector.broadcast %92 : vector<1x128xf32> to vector<121x128xf32>
    %94 = arith.addf %91, %93 : vector<121x128xf32>
    %cst_87 = arith.constant 0.000000e+00 : f32
    %95 = vector.broadcast %cst_87 : f32 to vector<121x128xf32>
    %96 = arith.maximumf %94, %95 : vector<121x128xf32>
    %97 = arith.truncf %96 : vector<121x128xf32> to vector<121x128xbf16>
    %c0_88 = arith.constant 0 : index
    %c0_89 = arith.constant 0 : index
    %c0_90 = arith.constant 0 : index
    %98 = vector.load %arg8[%c0_88, %c0_89, %c0_90] : memref<1x121x128xbf16, #tpu.memory_space<vmem>>, vector<1x121x128xbf16>
    %99 = vector.shape_cast %98 : vector<1x121x128xbf16> to vector<121x128xbf16>
    %100 = vector.shape_cast %97 : vector<121x128xbf16> to vector<1x121x128xbf16>
    tpu.vector_store %arg8[%c0_88, %c0_89, %c0_90], %100 {strides = array<i32>} : memref<1x121x128xbf16, #tpu.memory_space<vmem>>, vector<1x121x128xbf16>,
    return
  }
  func.func @transform_0(%arg0: i32) -> (i32, i32, i32, i32) {
    %c0_i32 = arith.constant 0 : i32
    %c0_i32_0 = arith.constant 0 : i32
    %c0_i32_1 = arith.constant 0 : i32
    %c0_i32_2 = arith.constant 0 : i32
    return %arg0, %c0_i32, %c0_i32_0, %c0_i32_1 : i32, i32, i32, i32
  }
  func.func @transform_1(%arg0: i32) -> (i32, i32) {
    %c0_i32 = arith.constant 0 : i32
    %c0_i32_0 = arith.constant 0 : i32
    %c0_i32_1 = arith.constant 0 : i32
    return %c0_i32, %c0_i32_0 : i32, i32
  }
  func.func @transform_2(%arg0: i32) -> (i32, i32) {
    %c0_i32 = arith.constant 0 : i32
    %c0_i32_0 = arith.constant 0 : i32
    %c0_i32_1 = arith.constant 0 : i32
    return %c0_i32, %c0_i32_0 : i32, i32
  }
  func.func @transform_3(%arg0: i32) -> (i32, i32, i32) {
    %c0_i32 = arith.constant 0 : i32
    %c0_i32_0 = arith.constant 0 : i32
    %c0_i32_1 = arith.constant 0 : i32
    %c0_i32_2 = arith.constant 0 : i32
    return %c0_i32, %c0_i32_0, %c0_i32_1 : i32, i32, i32
  }
  func.func @transform_4(%arg0: i32) -> (i32, i32) {
    %c0_i32 = arith.constant 0 : i32
    %c0_i32_0 = arith.constant 0 : i32
    %c0_i32_1 = arith.constant 0 : i32
    return %c0_i32, %c0_i32_0 : i32, i32
  }
  func.func @transform_5(%arg0: i32) -> (i32, i32, i32) {
    %c0_i32 = arith.constant 0 : i32
    %c0_i32_0 = arith.constant 0 : i32
    %c0_i32_1 = arith.constant 0 : i32
    %c0_i32_2 = arith.constant 0 : i32
    return %c0_i32, %c0_i32_0, %c0_i32_1 : i32, i32, i32
  }
  func.func @transform_6(%arg0: i32) -> (i32, i32) {
    %c0_i32 = arith.constant 0 : i32
    %c0_i32_0 = arith.constant 0 : i32
    %c0_i32_1 = arith.constant 0 : i32
    return %c0_i32, %c0_i32_0 : i32, i32
  }
  func.func @transform_7(%arg0: i32) -> (i32, i32, i32) {
    %c0_i32 = arith.constant 0 : i32
    %c0_i32_0 = arith.constant 0 : i32
    %c0_i32_1 = arith.constant 0 : i32
    return %arg0, %c0_i32, %c0_i32_0 : i32, i32, i32
  }
}

module attributes {stable_mosaic.version = 11 : i64} {
  func.func @_fc_head_kernel(%arg0: i32, %arg1: memref<2x15488xbf16, #tpu.memory_space<vmem>>, %arg2: memref<15488x64xbf16, #tpu.memory_space<vmem>>, %arg3: memref<1x64xf32, #tpu.memory_space<vmem>>, %arg4: memref<64x3xf32, #tpu.memory_space<vmem>>, %arg5: memref<1x3xf32, #tpu.memory_space<vmem>>, %arg6: memref<2x3xf32, #tpu.memory_space<vmem>>) attributes {dimension_semantics = [#tpu.dimension_semantics<arbitrary>], iteration_bounds = array<i64: 1>, scalar_prefetch = 0 : i64, scratch_operands = 0 : i64, tpu.core_type = #tpu.core_type<tc>, window_params = [{pipeline_mode = #tpu.pipeline_mode<synchronous>, transform_indices = @transform_0, window_bounds = array<i64: 2, 15488>}, {pipeline_mode = #tpu.pipeline_mode<synchronous>, transform_indices = @transform_1, window_bounds = array<i64: 15488, 64>}, {pipeline_mode = #tpu.pipeline_mode<synchronous>, transform_indices = @transform_2, window_bounds = array<i64: 1, 64>}, {pipeline_mode = #tpu.pipeline_mode<synchronous>, transform_indices = @transform_3, window_bounds = array<i64: 64, 3>}, {pipeline_mode = #tpu.pipeline_mode<synchronous>, transform_indices = @transform_4, window_bounds = array<i64: 1, 3>}, {pipeline_mode = #tpu.pipeline_mode<synchronous>, transform_indices = @transform_5, window_bounds = array<i64: 2, 3>}]} {
    %c0 = arith.constant 0 : index
    %c0_0 = arith.constant 0 : index
    %0 = vector.load %arg1[%c0, %c0_0] : memref<2x15488xbf16, #tpu.memory_space<vmem>>, vector<2x15488xbf16>
    %c0_1 = arith.constant 0 : index
    %c0_2 = arith.constant 0 : index
    %1 = vector.load %arg2[%c0_1, %c0_2] : memref<15488x64xbf16, #tpu.memory_space<vmem>>, vector<15488x64xbf16>
    %cst = arith.constant dense<0.000000e+00> : vector<2x64xf32>
    %2 = tpu.matmul %0, %1, %cst {dimension_numbers = #tpu.dot_dimension_numbers<[1], [0], [0], [1], [0, 0, 1, 1], [], []>} : vector<2x15488xbf16>, vector<15488x64xbf16>, vector<2x64xf32> -> vector<2x64xf32>
    %c0_3 = arith.constant 0 : index
    %c0_4 = arith.constant 0 : index
    %3 = vector.load %arg3[%c0_3, %c0_4] : memref<1x64xf32, #tpu.memory_space<vmem>>, vector<1x64xf32>
    %4 = vector.broadcast %3 : vector<1x64xf32> to vector<2x64xf32>
    %5 = arith.addf %2, %4 : vector<2x64xf32>
    %cst_5 = arith.constant 0.000000e+00 : f32
    %6 = vector.broadcast %cst_5 : f32 to vector<2x64xf32>
    %7 = arith.maximumf %5, %6 : vector<2x64xf32>
    %c0_6 = arith.constant 0 : index
    %c0_7 = arith.constant 0 : index
    %8 = vector.load %arg4[%c0_6, %c0_7] : memref<64x3xf32, #tpu.memory_space<vmem>>, vector<64x3xf32>
    %cst_8 = arith.constant dense<0.000000e+00> : vector<2x3xf32>
    %9 = tpu.matmul %7, %8, %cst_8 {dimension_numbers = #tpu.dot_dimension_numbers<[1], [0], [0], [1], [0, 0, 1, 1], [], []>} : vector<2x64xf32>, vector<64x3xf32>, vector<2x3xf32> -> vector<2x3xf32>
    %c0_9 = arith.constant 0 : index
    %c0_10 = arith.constant 0 : index
    %10 = vector.load %arg5[%c0_9, %c0_10] : memref<1x3xf32, #tpu.memory_space<vmem>>, vector<1x3xf32>
    %11 = vector.broadcast %10 : vector<1x3xf32> to vector<2x3xf32>
    %12 = arith.addf %9, %11 : vector<2x3xf32>
    %cst_11 = arith.constant dense<0xFF800000> : vector<2xf32>
    %13 = vector.multi_reduction <maximumf>, %12, %cst_11 [1] : vector<2x3xf32> to vector<2xf32>
    %14 = vector.shape_cast %13 : vector<2xf32> to vector<2x1xf32>
    %15 = vector.broadcast %14 : vector<2x1xf32> to vector<2x3xf32>
    %16 = arith.subf %12, %15 : vector<2x3xf32>
    %17 = math.exp %16 : vector<2x3xf32>
    %cst_12 = arith.constant dense<0.000000e+00> : vector<2xf32>
    %18 = vector.multi_reduction <add>, %17, %cst_12 [1] : vector<2x3xf32> to vector<2xf32>
    %19 = vector.shape_cast %18 : vector<2xf32> to vector<2x1xf32>
    %20 = vector.broadcast %19 : vector<2x1xf32> to vector<2x3xf32>
    %21 = arith.divf %17, %20 : vector<2x3xf32>
    %c0_13 = arith.constant 0 : index
    %c0_14 = arith.constant 0 : index
    %22 = vector.load %arg6[%c0_13, %c0_14] : memref<2x3xf32, #tpu.memory_space<vmem>>, vector<2x3xf32>
    tpu.vector_store %arg6[%c0_13, %c0_14], %21 {strides = array<i32>} : memref<2x3xf32, #tpu.memory_space<vmem>>, vector<2x3xf32>,
    return
  }
  func.func @transform_0(%arg0: i32) -> (i32, i32) {
    %c0_i32 = arith.constant 0 : i32
    %c0_i32_0 = arith.constant 0 : i32
    %c0_i32_1 = arith.constant 0 : i32
    return %c0_i32, %c0_i32_0 : i32, i32
  }
  func.func @transform_1(%arg0: i32) -> (i32, i32) {
    %c0_i32 = arith.constant 0 : i32
    %c0_i32_0 = arith.constant 0 : i32
    %c0_i32_1 = arith.constant 0 : i32
    return %c0_i32, %c0_i32_0 : i32, i32
  }
  func.func @transform_2(%arg0: i32) -> (i32, i32) {
    %c0_i32 = arith.constant 0 : i32
    %c0_i32_0 = arith.constant 0 : i32
    %c0_i32_1 = arith.constant 0 : i32
    return %c0_i32, %c0_i32_0 : i32, i32
  }
  func.func @transform_3(%arg0: i32) -> (i32, i32) {
    %c0_i32 = arith.constant 0 : i32
    %c0_i32_0 = arith.constant 0 : i32
    %c0_i32_1 = arith.constant 0 : i32
    return %c0_i32, %c0_i32_0 : i32, i32
  }
  func.func @transform_4(%arg0: i32) -> (i32, i32) {
    %c0_i32 = arith.constant 0 : i32
    %c0_i32_0 = arith.constant 0 : i32
    %c0_i32_1 = arith.constant 0 : i32
    return %c0_i32, %c0_i32_0 : i32, i32
  }
  func.func @transform_5(%arg0: i32) -> (i32, i32) {
    %c0_i32 = arith.constant 0 : i32
    %c0_i32_0 = arith.constant 0 : i32
    %c0_i32_1 = arith.constant 0 : i32
    return %c0_i32, %c0_i32_0 : i32, i32
  }
}

</mosaic_0001>

<bundles_post_ra>
// kernel: policy_conv_forward.2
= control target key start
LH: loop header
LB: loop body
LE: loop exit
PB: predicated region body
PF: predicated region fallthrough
CT: control target
= control target key end

     0   :  { %s16461_s24 = smov 0   ;;  %s20004_s0 = inlined_call_operand.vmem [shape: f32[2,3,1152,54], index: 0, kind: input, shape index: {}]   ;;  %s20005_s1 = inlined_call_operand.vmem [shape: f32[54,96], index: 1, kind: input, shape index: {}]   ;;  %s20006_s2 = inlined_call_operand.vmem [shape: f32[1,96], index: 2, kind: input, shape index: {}]   ;;  %s20007_s3 = inlined_call_operand.vmem [shape: f32[3,96,64], index: 3, kind: input, shape index: {}]   ;;  %s20008_s4 = inlined_call_operand.vmem [shape: f32[1,64], index: 4, kind: input, shape index: {}]   ;;  %s20009_s5 = inlined_call_operand.vmem [shape: f32[9,64,128], index: 5, kind: input, shape index: {}]   ;;  %s20010_s6 = inlined_call_operand.vmem [shape: f32[1,128], index: 6, kind: input, shape index: {}]   ;;  %s20011_s7 = inlined_call_operand.vmem [shape: bf16[2,121,128], index: 7, kind: output, shape index: {}]  }
   0x1 LB: > { %s11341_s25 = sadd.s32 4294967295, %s16419_s24   ;;  %p11345_p0 = scmp.ge.s32.totalorder %s16419_s24, 1  ;;  %s16419_s24 = sphi %s16461_s24, %s17_s24  }
   0x2   : > { %p237_p1 = scmp.lt.s32.totalorder %s16419_s24, 3 }
   0x4   : > { %p238_p2 = pnand %p11345_p0, %p237_p1 }
   0x6   : > { %241 = sbr.rel (%p238_p2) target bundleno = 1730 (0x6c2), region = 48 }
   0xd   : > { %v423_v0 = vld [vmem:[%s20005_s1] sm:$0xff]  ;;  %v424_v1 = vld [vmem:[%s20005_s1 + $0x8] sm:$0xff]  ;;  %v425_v2 = vld [vmem:[%s20005_s1 + $0x10] sm:$0xff]  ;;  %p269_p3 = scmp.lt.s32.totalorder %s11341_s25, 1  ;;  %vm437_vm0 = vcmask 441344   ;;  %vm870_vm1 = vcmask 1045504  }
   0xe   : > { %v16478_v3 = vpack.c.bf16 %v424_v1, %v423_v0  ;;  %v426_v4 = vld [vmem:[%s20005_s1 + $0x18] sm:$0xff]  ;;  %v427_v6 = vld [vmem:[%s20005_s1 + $0x20] sm:$0xff]  ;;  %v428_v7 = vld [vmem:[%s20005_s1 + $0x28] sm:$0xff]  ;;  %vm3334_vm2 = vcmask 785408   ;;  %vm8944_vm3 = vcmask 523264   ;;  %vm11280_vm4 = vcmask 1040384  }
   0xf   : > { %v16483_v5 = vpack.c.bf16 %v426_v4, %v425_v2  ;;  %s20253_s25 = smov (!%p269_p3, %s11341_s25), 1  ;;  %v16499_v8 = vpack.c.bf16 %v428_v7, %v427_v6  ;;  %v16515_v10 = vld [vmem:[%s20005_s1 + $0x30] sm:$0x3f]  ;;  %v11784_v61 = vld [vmem:[%s20007_s3 + $0x60] sm:$0xff]  ;;  %v11785_v62 = vld [vmem:[%s20007_s3 + $0x68] sm:$0xff] }
  0x10   : > { %15974 = vmatprep.subr.bf16.mxu1 %v16478_v3  ;;  %15723 = vmatprep.subr.bf16.mxu0 %v16478_v3  ;;  %s16398_s15 = smul.u32 3456, %s20253_s25  ;;  %v15746_v63 = vpack.c.bf16 %v11785_v62, %v11784_v61  ;;  %s12757_s29 = sshll.u32 %s20253_s25, 6  ;;  %vm11281_vm5 = vsmask.f32 256 }
  0x11   : > { %15978 = vmatpush3.bf16.msra.mxu1 %v16478_v3  ;;  %15725 = vmatpush3.bf16.msra.mxu0 %v16478_v3  ;;  %s19975_s9 = scalar_lea.vmem %s20011_s7, %s12757_s29  ;;  %vm11282_vm6 = vmand %vm11280_vm4, %vm11281_vm5 }
  0x12   : > { %15975 = vmatprep.subr.bf16.mxu1 %v16483_v5  ;;  %15727 = vmatprep.subr.bf16.mxu0 %v16483_v5  ;;  %s16505_s18 = scalar_lea.vmem %s20004_s0, %s16398_s15 }
  0x13   : > { %v351_v9 = vld [vmem:[%s16505_s18 + $0x240] sm:$0xff]  ;;  %v352_v11 = vld [vmem:[%s16505_s18 + $0x248] sm:$0xff]  ;;  %v353_v12 = vld [vmem:[%s16505_s18 + $0x250] sm:$0xff] }
  0x14   : > { %14074 = vmatprep.mubr.msk.f32.mxu1 %vm437_vm0, %v351_v9  ;;  %v354_v13 = vld [vmem:[%s16505_s18 + $0x258] sm:$0xff]  ;;  %v355_v14 = vld [vmem:[%s16505_s18 + $0x260] sm:$0xff]  ;;  %v356_v15 = vld [vmem:[%s16505_s18 + $0x268] sm:$0xff] }
  0x15   : > { %15979 = vmatpush3.bf16.msra.mxu1 %v16483_v5  ;;  %15729 = vmatpush3.bf16.msra.mxu0 %v16483_v5  ;;  %v357_v16 = vld [vmem:[%s16505_s18 + $0x270] sm:$0xff]  ;;  %v358_v17 = vld [vmem:[%s16505_s18 + $0x278] sm:$0xff]  ;;  %v359_v18 = vld [vmem:[%s16505_s18 + $0x280] sm:$0xff] }
  0x16   : > { %15976 = vmatprep.subr.bf16.mxu1 %v16499_v8  ;;  %15731 = vmatprep.subr.bf16.mxu0 %v16499_v8  ;;  %v360_v19 = vld [vmem:[%s16505_s18 + $0x288] sm:$0xff]  ;;  %v361_v20 = vld [vmem:[%s16505_s18 + $0x290] sm:$0xff]  ;;  %v362_v21 = vld [vmem:[%s16505_s18 + $0x298] sm:$0xff] }
  0x17   : > { %v363_v22 = vld [vmem:[%s16505_s18 + $0x2a0] sm:$0xff]  ;;  %v364_v23 = vld [vmem:[%s16505_s18 + $0x2a8] sm:$0xff]  ;;  %v365_v24 = vld [vmem:[%s16505_s18 + $0x2b0] sm:$0xff] }
  0x18   : > { %v366_v25 = vld [vmem:[%s16505_s18 + $0x2b8] sm:$0xff]  ;;  %v367_v26 = vld [vmem:[%s16505_s18 + $0x2c0] sm:$0xff]  ;;  %v368_v27 = vld [vmem:[%s16505_s18 + $0x2c8] sm:$0xff] }
  0x19   : > { %15980 = vmatpush3.bf16.msra.mxu1 %v16499_v8  ;;  %15733 = vmatpush3.bf16.msra.mxu0 %v16499_v8  ;;  %v369_v28 = vld [vmem:[%s16505_s18 + $0x2d0] sm:$0xff]  ;;  %v370_v29 = vld [vmem:[%s16505_s18 + $0x2d8] sm:$0xff]  ;;  %v371_v30 = vld [vmem:[%s16505_s18 + $0x2e0] sm:$0xff] }
  0x1a   : > { %15977 = vmatprep.subr.msk.mxu1 %vm870_vm1, %v16515_v10  ;;  %13964 = vmatprep.subr.msk.mxu0 %vm870_vm1, %v16515_v10  ;;  %v372_v31 = vld [vmem:[%s16505_s18 + $0x2e8] sm:$0xff]  ;;  %v373_v32 = vld [vmem:[%s16505_s18 + $0x2f0] sm:$0xff]  ;;  %v374_v33 = vld [vmem:[%s16505_s18 + $0x2f8] sm:$0xff] }
  0x1b   : > { %v375_v34 = vld [vmem:[%s16505_s18 + $0x300] sm:$0xff]  ;;  %v376_v35 = vld [vmem:[%s16505_s18 + $0x308] sm:$0xff]  ;;  %v377_v36 = vld [vmem:[%s16505_s18 + $0x310] sm:$0xff] }
  0x1c   : > { %v378_v37 = vld [vmem:[%s16505_s18 + $0x318] sm:$0xff]  ;;  %v379_v38 = vld [vmem:[%s16505_s18 + $0x320] sm:$0xff]  ;;  %v380_v39 = vld [vmem:[%s16505_s18 + $0x328] sm:$0xff] }
  0x1d   : > { %15981 = vmatpush3.msk.msra.mxu1 %vm870_vm1, %v16515_v10  ;;  %13965 = vmatpush3.msk.msra.mxu0 %vm870_vm1, %v16515_v10  ;;  %v381_v40 = vld [vmem:[%s16505_s18 + $0x330] sm:$0xff]  ;;  %v382_v41 = vld [vmem:[%s16505_s18 + $0x338] sm:$0xff]  ;;  %v383_v42 = vld [vmem:[%s16505_s18 + $0x340] sm:$0xff] }
  0x1e   : > { %14075 = vmatmul.mubr.msk.f32.vlgmr.msra.gmra.mrb[0].mxu1 %vm437_vm0, %v352_v11  ;;  %15735 = vmatprep.subr.bf16.mxu1 %v16478_v3  ;;  %v384_v43 = vld [vmem:[%s16505_s18 + $0x348] sm:$0xff]  ;;  %v385_v44 = vld [vmem:[%s16505_s18 + $0x350] sm:$0xff]  ;;  %v386_v45 = vld [vmem:[%s16505_s18 + $0x358] sm:$0xff] }
  0x1f   : > { %15737 = vmatpush3.bf16.msra.mxu1 %v16478_v3  ;;  %14077 = vmatprep.mubr.msk.f32.mxu1 %vm437_vm0, %v353_v12  ;;  %v387_v46 = vld [vmem:[%s16505_s18 + $0x360] sm:$0xff]  ;;  %v388_v47 = vld [vmem:[%s16505_s18 + $0x368] sm:$0xff]  ;;  %v389_v48 = vld [vmem:[%s16505_s18 + $0x370] sm:$0xff] }
  0x20   : > { %15739 = vmatprep.subr.bf16.mxu1 %v16483_v5  ;;  %v390_v49 = vld [vmem:[%s16505_s18 + $0x378] sm:$0xff]  ;;  %v391_v50 = vld [vmem:[%s16505_s18 + $0x380] sm:$0xff]  ;;  %v392_v51 = vld [vmem:[%s16505_s18 + $0x388] sm:$0xff]  ;;  %15747 = vmatprep.subr.bf16.mxu0 %v15746_v63 }
  0x21   : > { %v393_v52 = vld [vmem:[%s16505_s18 + $0x390] sm:$0xff]  ;;  %v394_v53 = vld [vmem:[%s16505_s18 + $0x398] sm:$0xff]  ;;  %v395_v54 = vld [vmem:[%s16505_s18 + $0x3a0] sm:$0xff] }
  0x22   : > { %14078 = vmatmul.mubr.msk.f32.gmra.mrb[2].mxu1 %vm437_vm0, %v354_v13  ;;  %v396_v55 = vld [vmem:[%s16505_s18 + $0x3a8] sm:$0xff]  ;;  %v397_v56 = vld [vmem:[%s16505_s18 + $0x3b0] sm:$0xff]  ;;  %v279_v57 = vld [vmem:[%s16505_s18] sm:$0xff] }
  0x23   : > { %14080 = vmatprep.mubr.msk.f32.mxu1 %vm437_vm0, %v355_v14  ;;  %15741 = vmatpush3.bf16.msra.mxu1 %v16483_v5  ;;  %v280_v58 = vld [vmem:[%s16505_s18 + $0x8] sm:$0xff]  ;;  %v398_v59 = vld [vmem:[%s16505_s18 + $0x3b8] sm:$0xff]  ;;  %v399_v60 = vld [vmem:[%s16505_s18 + $0x3c0] sm:$0xff] }
  0x24   : > { %15743 = vmatprep.subr.bf16.mxu1 %v16499_v8  ;;  %13966 = vmatprep.mubr.msk.f32.mxu0 %vm437_vm0, %v279_v57  ;;  %v281_v0 = vld [vmem:[%s16505_s18 + $0x10] sm:$0xff]  ;;  %v282_v1 = vld [vmem:[%s16505_s18 + $0x18] sm:$0xff]  ;;  %v400_v2 = vld [vmem:[%s16505_s18 + $0x3c8] sm:$0xff] }
  0x25   : > { %13967 = vmatmul.mubr.msk.f32.vlgmr.msra.gmra.mrb[0].mxu0 %vm437_vm0, %v280_v58  ;;  %v401_v4 = vld [vmem:[%s16505_s18 + $0x3d0] sm:$0xff]  ;;  %v283_v6 = vld [vmem:[%s16505_s18 + $0x20] sm:$0xff]  ;;  %v284_v7 = vld [vmem:[%s16505_s18 + $0x28] sm:$0xff] }
  0x26   : > { %14081 = vmatmul.mubr.msk.f32.gmra.mrb[4].mxu1 %vm437_vm0, %v356_v15  ;;  %13969 = vmatprep.mubr.msk.f32.mxu0 %vm437_vm0, %v281_v0  ;;  %v402_v9 = vld [vmem:[%s16505_s18 + $0x3d8] sm:$0xff]  ;;  %v403_v11 = vld [vmem:[%s16505_s18 + $0x3e0] sm:$0xff]  ;;  %v285_v12 = vld [vmem:[%s16505_s18 + $0x30] sm:$0xff] }
  0x27   : > { %14083 = vmatprep.mubr.msk.f32.mxu1 %vm437_vm0, %v357_v16  ;;  %15745 = vmatpush3.bf16.msra.mxu1 %v16499_v8  ;;  %v286_v13 = vld [vmem:[%s16505_s18 + $0x38] sm:$0xff]  ;;  %v404_v14 = vld [vmem:[%s16505_s18 + $0x3e8] sm:$0xff]  ;;  %v405_v15 = vld [vmem:[%s16505_s18 + $0x3f0] sm:$0xff] }
  0x28   : > { %14194 = vmatprep.subr.msk.mxu1 %vm870_vm1, %v16515_v10  ;;  %15749 = vmatpush3.bf16.msra.mxu0 %v15746_v63  ;;  %v287_v16 = vld [vmem:[%s16505_s18 + $0x40] sm:$0xff]  ;;  %v305_v58 = vld [vmem:[%s16505_s18 + $0xd0] sm:$0xff]  ;;  %v308_v63 = vld [vmem:[%s16505_s18 + $0xe8] sm:$0xff] }
  0x29   : > { %13970 = vmatmul.mubr.msk.f32.gmra.mrb[2].mxu0 %vm437_vm0, %v282_v1  ;;  %v11497_v61 = vld [vmem:[%s16505_s18 + $0x490] sm:$0xff]  ;;  %v307_v62 = vld [vmem:[%s16505_s18 + $0xe0] sm:$0xff]  ;;  %v11498_v0 = vld [vmem:[%s16505_s18 + $0x498] sm:$0xff] }
  0x2a   : > { %14084 = vmatmul.mubr.msk.f32.gmra.mrb[6].mxu1 %vm437_vm0, %v358_v17  ;;  %13972 = vmatprep.mubr.msk.f32.mxu0 %vm437_vm0, %v283_v6  ;;  %v288_v17 = vld [vmem:[%s16505_s18 + $0x48] sm:$0xff]  ;;  %v11499_v1 = vld [vmem:[%s16505_s18 + $0x4a0] sm:$0xff] }
  0x2b   : > { %14086 = vmatprep.mubr.msk.f32.mxu1 %vm437_vm0, %v359_v18  ;;  %14195 = vmatpush3.msk.msra.mxu1 %vm870_vm1, %v16515_v10  ;;  %v406_v18 = vld [vmem:[%s16505_s18 + $0x3f8] sm:$0xff]  ;;  %v11500_v6 = vld [vmem:[%s16505_s18 + $0x4a8] sm:$0xff] }
  0x2c   : > { %15795 = vmatprep.subr.bf16.mxu1 %v16478_v3 }
  0x2d   : > { %13973 = vmatmul.mubr.msk.f32.gmra.mrb[4].mxu0 %vm437_vm0, %v284_v7  ;;  %v311_v7 = vld [vmem:[%s16505_s18 + $0x100] sm:$0xff] }
  0x2e   : > { %14087 = vmatmul.mubr.msk.f32.gmra.mrb[8].mxu1 %vm437_vm0, %v360_v19  ;;  %13975 = vmatprep.mubr.msk.f32.mxu0 %vm437_vm0, %v285_v12  ;;  %v407_v19 = vld [vmem:[%s16505_s18 + $0x400] sm:$0xff]  ;;  %v313_v12 = vld [vmem:[%s16505_s18 + $0x110] sm:$0xff] }
  0x2f   : > { %14089 = vmatprep.mubr.msk.f32.mxu1 %vm437_vm0, %v361_v20  ;;  %v289_v20 = vld [vmem:[%s16505_s18 + $0x50] sm:$0xff] }
  0x31   : > { %13976 = vmatmul.mubr.msk.f32.gmra.mrb[6].mxu0 %vm437_vm0, %v286_v13  ;;  %v314_v13 = vld [vmem:[%s16505_s18 + $0x118] sm:$0xff] }
  0x32   : > { %14090 = vmatmul.mubr.msk.f32.gmra.mrb[10].mxu1 %vm437_vm0, %v362_v21  ;;  %13978 = vmatprep.mubr.msk.f32.mxu0 %vm437_vm0, %v287_v16  ;;  %v290_v21 = vld [vmem:[%s16505_s18 + $0x58] sm:$0xff]  ;;  %v316_v16 = vld [vmem:[%s16505_s18 + $0x128] sm:$0xff] }
  0x33   : > { %14092 = vmatprep.mubr.msk.f32.mxu1 %vm437_vm0, %v363_v22  ;;  %v408_v22 = vld [vmem:[%s16505_s18 + $0x408] sm:$0xff] }
  0x35   : > { %13979 = vmatmul.mubr.msk.f32.gmra.mrb[8].mxu0 %vm437_vm0, %v288_v17  ;;  %v11506_v17 = vld [vmem:[%s16505_s18 + $0x4d8] sm:$0xff] }
  0x36   : > { %14093 = vmatmul.mubr.msk.f32.gmra.mrb[12].mxu1 %vm437_vm0, %v364_v23  ;;  %13981 = vmatprep.mubr.msk.f32.mxu0 %vm437_vm0, %v289_v20  ;;  %v409_v23 = vld [vmem:[%s16505_s18 + $0x410] sm:$0xff] }
  0x37   : > { %14095 = vmatprep.mubr.msk.f32.mxu1 %vm437_vm0, %v365_v24  ;;  %v291_v24 = vld [vmem:[%s16505_s18 + $0x60] sm:$0xff] }
  0x39   : > { %13982 = vmatmul.mubr.msk.f32.gmra.mrb[10].mxu0 %vm437_vm0, %v290_v21  ;;  %v317_v21 = vld [vmem:[%s16505_s18 + $0x130] sm:$0xff] }
  0x3a   : > { %14096 = vmatmul.mubr.msk.f32.gmra.mrb[14].mxu1 %vm437_vm0, %v366_v25  ;;  %13984 = vmatprep.mubr.msk.f32.mxu0 %vm437_vm0, %v291_v24  ;;  %v292_v25 = vld [vmem:[%s16505_s18 + $0x68] sm:$0xff]  ;;  %v11509_v24 = vld [vmem:[%s16505_s18 + $0x4f0] sm:$0xff] }
  0x3b   : > { %14098 = vmatprep.mubr.msk.f32.mxu1 %vm437_vm0, %v367_v26  ;;  %v410_v26 = vld [vmem:[%s16505_s18 + $0x418] sm:$0xff] }
  0x3d   : > { %13985 = vmatmul.mubr.msk.f32.gmra.mrb[12].mxu0 %vm437_vm0, %v292_v25  ;;  %v319_v25 = vld [vmem:[%s16505_s18 + $0x140] sm:$0xff] }
  0x3e   : > { %14099 = vmatmul.mubr.msk.f32.gmra.mrb[16].mxu1 %vm437_vm0, %v368_v27  ;;  %v411_v27 = vld [vmem:[%s16505_s18 + $0x420] sm:$0xff] }
  0x3f   : > { %14101 = vmatprep.mubr.msk.f32.mxu1 %vm437_vm0, %v369_v28  ;;  %v11786_v28 = vld [vmem:[%s20007_s3 + $0x70] sm:$0xff] }
  0x42   : > { %14102 = vmatmul.mubr.msk.f32.gmra.mrb[18].mxu1 %vm437_vm0, %v370_v29  ;;  %v11787_v29 = vld [vmem:[%s20007_s3 + $0x78] sm:$0xff] }
  0x43   : > { %14104 = vmatprep.mubr.msk.f32.mxu1 %vm437_vm0, %v371_v30  ;;  %v15750_v30 = vpack.c.bf16 %v11787_v29, %v11786_v28  ;;  %v11511_v28 = vld [vmem:[%s16505_s18 + $0x500] sm:$0xff]  ;;  %v321_v29 = vld [vmem:[%s16505_s18 + $0x150] sm:$0xff] }
  0x45   : > { %15751 = vmatprep.subr.bf16.mxu0 %v15750_v30 }
  0x46   : > { %14105 = vmatmul.mubr.msk.f32.gmra.mrb[20].mxu1 %vm437_vm0, %v372_v31  ;;  %v293_v31 = vld [vmem:[%s16505_s18 + $0x70] sm:$0xff]  ;;  %15753 = vmatpush3.bf16.msra.mxu0 %v15750_v30  ;;  %v322_v30 = vld [vmem:[%s16505_s18 + $0x158] sm:$0xff] }
  0x47   : > { %14107 = vmatprep.mubr.msk.f32.mxu1 %vm437_vm0, %v373_v32  ;;  %v294_v32 = vld [vmem:[%s16505_s18 + $0x78] sm:$0xff]  ;;  %13987 = vmatprep.mubr.msk.f32.mxu0 %vm437_vm0, %v293_v31  ;;  %v11512_v31 = vld [vmem:[%s16505_s18 + $0x508] sm:$0xff] }
  0x48   : > { %13988 = vmatmul.mubr.msk.f32.gmra.mrb[14].mxu0 %vm437_vm0, %v294_v32  ;;  %v11513_v32 = vld [vmem:[%s16505_s18 + $0x510] sm:$0xff] }
  0x4a   : > { %14108 = vmatmul.mubr.msk.f32.gmra.mrb[22].mxu1 %vm437_vm0, %v374_v33  ;;  %v412_v33 = vld [vmem:[%s16505_s18 + $0x428] sm:$0xff] }
  0x4b   : > { %14110 = vmatprep.mubr.msk.f32.mxu1 %vm437_vm0, %v375_v34  ;;  %v413_v34 = vld [vmem:[%s16505_s18 + $0x430] sm:$0xff] }
  0x4e   : > { %14111 = vmatmul.mubr.msk.f32.gmra.mrb[24].mxu1 %vm437_vm0, %v376_v35  ;;  %v295_v35 = vld [vmem:[%s16505_s18 + $0x80] sm:$0xff] }
  0x4f   : > { %14113 = vmatprep.mubr.msk.f32.mxu1 %vm437_vm0, %v377_v36  ;;  %13990 = vmatprep.mubr.msk.f32.mxu0 %vm437_vm0, %v295_v35  ;;  %v296_v36 = vld [vmem:[%s16505_s18 + $0x88] sm:$0xff]  ;;  %v11514_v35 = vld [vmem:[%s16505_s18 + $0x518] sm:$0xff] }
  0x50   : > { %13991 = vmatmul.mubr.msk.f32.gmra.mrb[16].mxu0 %vm437_vm0, %v296_v36  ;;  %v11515_v36 = vld [vmem:[%s16505_s18 + $0x520] sm:$0xff] }
  0x52   : > { %14114 = vmatmul.mubr.msk.f32.gmra.mrb[26].mxu1 %vm437_vm0, %v378_v37  ;;  %v414_v37 = vld [vmem:[%s16505_s18 + $0x438] sm:$0xff] }
  0x53   : > { %14116 = vmatprep.mubr.msk.f32.mxu1 %vm437_vm0, %v379_v38  ;;  %v415_v38 = vld [vmem:[%s16505_s18 + $0x440] sm:$0xff] }
  0x56   : > { %14117 = vmatmul.mubr.msk.f32.gmra.mrb[28].mxu1 %vm437_vm0, %v380_v39  ;;  %v297_v39 = vld [vmem:[%s16505_s18 + $0x90] sm:$0xff] }
  0x57   : > { %14119 = vmatprep.mubr.msk.f32.mxu1 %vm437_vm0, %v381_v40  ;;  %13993 = vmatprep.mubr.msk.f32.mxu0 %vm437_vm0, %v297_v39  ;;  %v298_v40 = vld [vmem:[%s16505_s18 + $0x98] sm:$0xff]  ;;  %v11516_v39 = vld [vmem:[%s16505_s18 + $0x528] sm:$0xff] }
  0x58   : > { %13994 = vmatmul.mubr.msk.f32.gmra.mrb[18].mxu0 %vm437_vm0, %v298_v40  ;;  %v11517_v40 = vld [vmem:[%s16505_s18 + $0x530] sm:$0xff] }
  0x5a   : > { %14120 = vmatmul.mubr.msk.f32.gmra.mrb[30].mxu1 %vm437_vm0, %v382_v41  ;;  %v416_v41 = vld [vmem:[%s16505_s18 + $0x448] sm:$0xff] }
  0x5b   : > { %14122 = vmatprep.mubr.msk.f32.mxu1 %vm437_vm0, %v383_v42  ;;  %v417_v42 = vld [vmem:[%s16505_s18 + $0x450] sm:$0xff] }
  0x5e   : > { %14123 = vmatmul.mubr.msk.f32.gmra.mrb[32].mxu1 %vm437_vm0, %v384_v43  ;;  %v299_v43 = vld [vmem:[%s16505_s18 + $0xa0] sm:$0xff] }
  0x5f   : > { %14125 = vmatprep.mubr.msk.f32.mxu1 %vm437_vm0, %v385_v44  ;;  %13996 = vmatprep.mubr.msk.f32.mxu0 %vm437_vm0, %v299_v43  ;;  %v300_v44 = vld [vmem:[%s16505_s18 + $0xa8] sm:$0xff]  ;;  %v11518_v43 = vld [vmem:[%s16505_s18 + $0x538] sm:$0xff] }
  0x60   : > { %13997 = vmatmul.mubr.msk.f32.gmra.mrb[20].mxu0 %vm437_vm0, %v300_v44  ;;  %v11519_v44 = vld [vmem:[%s16505_s18 + $0x540] sm:$0xff] }
  0x62   : > { %14126 = vmatmul.mubr.msk.f32.gmra.mrb[34].mxu1 %vm437_vm0, %v386_v45  ;;  %v418_v45 = vld [vmem:[%s16505_s18 + $0x458] sm:$0xff] }
  0x63   : > { %14128 = vmatprep.mubr.msk.f32.mxu1 %vm437_vm0, %v387_v46  ;;  %v419_v46 = vld [vmem:[%s16505_s18 + $0x460] sm:$0xff] }
  0x66   : > { %14129 = vmatmul.mubr.msk.f32.gmra.mrb[36].mxu1 %vm437_vm0, %v388_v47  ;;  %v301_v47 = vld [vmem:[%s16505_s18 + $0xb0] sm:$0xff] }
  0x67   : > { %14131 = vmatprep.mubr.msk.f32.mxu1 %vm437_vm0, %v389_v48  ;;  %13999 = vmatprep.mubr.msk.f32.mxu0 %vm437_vm0, %v301_v47  ;;  %v302_v48 = vld [vmem:[%s16505_s18 + $0xb8] sm:$0xff] }
  0x68   : > { %14000 = vmatmul.mubr.msk.f32.gmra.mrb[22].mxu0 %vm437_vm0, %v302_v48  ;;  %v329_v48 = vld [vmem:[%s16505_s18 + $0x190] sm:$0xff] }
  0x6a   : > { %14132 = vmatmul.mubr.msk.f32.gmra.mrb[38].mxu1 %vm437_vm0, %v390_v49  ;;  %v420_v49 = vld [vmem:[%s16505_s18 + $0x468] sm:$0xff] }
  0x6b   : > { %14134 = vmatprep.mubr.msk.f32.mxu1 %vm437_vm0, %v391_v50  ;;  %v421_v50 = vld [vmem:[%s16505_s18 + $0x470] sm:$0xff] }
  0x6e   : > { %14135 = vmatmul.mubr.msk.f32.gmra.mrb[40].mxu1 %vm437_vm0, %v392_v51  ;;  %v303_v51 = vld [vmem:[%s16505_s18 + $0xc0] sm:$0xff] }
  0x6f   : > { %14137 = vmatprep.mubr.msk.f32.mxu1 %vm437_vm0, %v393_v52  ;;  %14002 = vmatprep.mubr.msk.f32.mxu0 %vm437_vm0, %v303_v51  ;;  %v304_v52 = vld [vmem:[%s16505_s18 + $0xc8] sm:$0xff]  ;;  %v11521_v51 = vld [vmem:[%s16505_s18 + $0x550] sm:$0xff] }
  0x70   : > { %14003 = vmatmul.mubr.msk.f32.gmra.mrb[24].mxu0 %vm437_vm0, %v304_v52  ;;  %v331_v52 = vld [vmem:[%s16505_s18 + $0x1a0] sm:$0xff] }
  0x71   : > { %14005 = vmatprep.mubr.msk.f32.mxu0 %vm437_vm0, %v305_v58  ;;  %v11524_v58 = vld [vmem:[%s16505_s18 + $0x568] sm:$0xff] }
  0x72   : > { %14138 = vmatmul.mubr.msk.f32.gmra.mrb[42].mxu1 %vm437_vm0, %v394_v53  ;;  %v422_v53 = vld [vmem:[%s16505_s18 + $0x478] sm:$0xff] }
  0x73   : > { %14140 = vmatprep.mubr.msk.f32.mxu1 %vm437_vm0, %v395_v54  ;;  %v11495_v54 = vld [vmem:[%s16505_s18 + $0x480] sm:$0xff] }
  0x76   : > { %14141 = vmatmul.mubr.msk.f32.gmra.mrb[44].mxu1 %vm437_vm0, %v396_v55  ;;  %v11788_v55 = vld [vmem:[%s20007_s3 + $0x80] sm:$0xff] }
  0x77   : > { %14143 = vmatprep.mubr.msk.f32.mxu1 %vm437_vm0, %v397_v56  ;;  %v11789_v56 = vld [vmem:[%s20007_s3 + $0x88] sm:$0xff] }
  0x78   : > { %v15754_v57 = vpack.c.bf16 %v11789_v56, %v11788_v55  ;;  %v11523_v55 = vld [vmem:[%s16505_s18 + $0x560] sm:$0xff]  ;;  %v333_v56 = vld [vmem:[%s16505_s18 + $0x1b0] sm:$0xff] }
  0x7a   : > { %14144 = vmatmul.mubr.msk.f32.gmra.mrb[46].mxu1 %vm437_vm0, %v398_v59  ;;  %v306_v59 = vld [vmem:[%s16505_s18 + $0xd8] sm:$0xff]  ;;  %15755 = vmatprep.subr.bf16.mxu0 %v15754_v57 }
  0x7b   : > { %14146 = vmatprep.mubr.msk.f32.mxu1 %vm437_vm0, %v399_v60  ;;  %v11496_v60 = vld [vmem:[%s16505_s18 + $0x488] sm:$0xff]  ;;  %14006 = vmatmul.mubr.msk.f32.gmra.mrb[26].mxu0 %vm437_vm0, %v306_v59  ;;  %v11525_v59 = vld [vmem:[%s16505_s18 + $0x570] sm:$0xff] }
  0x7c   : > { %15757 = vmatpush3.bf16.msra.mxu0 %v15754_v57  ;;  %14008 = vmatprep.mubr.msk.f32.mxu0 %vm437_vm0, %v307_v62  ;;  %v334_v57 = vld [vmem:[%s16505_s18 + $0x1b8] sm:$0xff] }
  0x7d   : > { %v11526_v62 = vld [vmem:[%s16505_s18 + $0x578] sm:$0xff] }
  0x7e   : > { %14147 = vmatmul.mubr.msk.f32.gmra.mrb[48].mxu1 %vm437_vm0, %v400_v2  ;;  %v309_v2 = vld [vmem:[%s16505_s18 + $0xf0] sm:$0xff] }
  0x7f   : > { %14149 = vmatprep.mubr.msk.f32.mxu1 %vm437_vm0, %v401_v4  ;;  %14009 = vmatmul.mubr.msk.f32.gmra.mrb[28].mxu0 %vm437_vm0, %v308_v63  ;;  %v310_v4 = vld [vmem:[%s16505_s18 + $0xf8] sm:$0xff]  ;;  %v11527_v63 = vld [vmem:[%s16505_s18 + $0x580] sm:$0xff] }
  0x80   : > { %14011 = vmatprep.mubr.msk.f32.mxu0 %vm437_vm0, %v309_v2  ;;  %v11528_v2 = vld [vmem:[%s16505_s18 + $0x588] sm:$0xff] }
  0x82   : > { %14150 = vmatmul.mubr.msk.f32.gmra.mrb[50].mxu1 %vm437_vm0, %v402_v9  ;;  %v312_v9 = vld [vmem:[%s16505_s18 + $0x108] sm:$0xff] }
  0x83   : > { %14152 = vmatprep.mubr.msk.f32.mxu1 %vm437_vm0, %v403_v11  ;;  %14012 = vmatmul.mubr.msk.f32.gmra.mrb[30].mxu0 %vm437_vm0, %v310_v4  ;;  %v11502_v11 = vld [vmem:[%s16505_s18 + $0x4b8] sm:$0xff]  ;;  %v11529_v4 = vld [vmem:[%s16505_s18 + $0x590] sm:$0xff] }
  0x84   : > { %14014 = vmatprep.mubr.msk.f32.mxu0 %vm437_vm0, %v311_v7  ;;  %v11530_v7 = vld [vmem:[%s16505_s18 + $0x598] sm:$0xff] }
  0x86   : > { %14153 = vmatmul.mubr.msk.f32.gmra.mrb[52].mxu1 %vm437_vm0, %v404_v14  ;;  %v11504_v14 = vld [vmem:[%s16505_s18 + $0x4c8] sm:$0xff] }
  0x87   : > { %14155 = vmatprep.mubr.msk.f32.mxu1 %vm437_vm0, %v405_v15  ;;  %14015 = vmatmul.mubr.msk.f32.gmra.mrb[32].mxu0 %vm437_vm0, %v312_v9  ;;  %v315_v15 = vld [vmem:[%s16505_s18 + $0x120] sm:$0xff] }
  0x88   : > { %14017 = vmatprep.mubr.msk.f32.mxu0 %vm437_vm0, %v313_v12  ;;  %v11531_v9 = vld [vmem:[%s16505_s18 + $0x5a0] sm:$0xff]  ;;  %v11795_v12 = vld [vmem:[%s20007_s3 + $0xb8] sm:$0xff] }
  0x8a   : > { %14156 = vmatmul.mubr.msk.f32.gmra.mrb[54].mxu1 %vm437_vm0, %v406_v18  ;;  %v11507_v18 = vld [vmem:[%s16505_s18 + $0x4e0] sm:$0xff] }
  0x8b   : > { %14158 = vmatprep.mubr.msk.f32.mxu1 %vm437_vm0, %v407_v19  ;;  %14018 = vmatmul.mubr.msk.f32.gmra.mrb[34].mxu0 %vm437_vm0, %v314_v13  ;;  %v11791_v19 = vld [vmem:[%s20007_s3 + $0x98] sm:$0xff] }
  0x8c   : > { %14020 = vmatprep.mubr.msk.f32.mxu0 %vm437_vm0, %v315_v15  ;;  %v342_v15 = vld [vmem:[%s16505_s18 + $0x1f8] sm:$0xff] }
  0x8e   : > { %14159 = vmatmul.mubr.msk.f32.gmra.mrb[56].mxu1 %vm437_vm0, %v408_v22  ;;  %v318_v22 = vld [vmem:[%s16505_s18 + $0x138] sm:$0xff] }
  0x8f   : > { %14161 = vmatprep.mubr.msk.f32.mxu1 %vm437_vm0, %v409_v23  ;;  %14021 = vmatmul.mubr.msk.f32.gmra.mrb[36].mxu0 %vm437_vm0, %v316_v16  ;;  %v11508_v23 = vld [vmem:[%s16505_s18 + $0x4e8] sm:$0xff] }
  0x90   : > { %14023 = vmatprep.mubr.msk.f32.mxu0 %vm437_vm0, %v317_v21  ;;  %v11532_v16 = vld [vmem:[%s16505_s18 + $0x5a8] sm:$0xff]  ;;  %v11534_v21 = vld [vmem:[%s16505_s18 + $0x5b8] sm:$0xff] }
  0x92   : > { %14162 = vmatmul.mubr.msk.f32.gmra.mrb[58].mxu1 %vm437_vm0, %v410_v26  ;;  %v320_v26 = vld [vmem:[%s16505_s18 + $0x148] sm:$0xff] }
  0x93   : > { %14164 = vmatprep.mubr.msk.f32.mxu1 %vm437_vm0, %v411_v27  ;;  %14024 = vmatmul.mubr.msk.f32.gmra.mrb[38].mxu0 %vm437_vm0, %v318_v22  ;;  %v11510_v27 = vld [vmem:[%s16505_s18 + $0x4f8] sm:$0xff]  ;;  %v11535_v22 = vld [vmem:[%s16505_s18 + $0x5c0] sm:$0xff] }
  0x94   : > { %14026 = vmatprep.mubr.msk.f32.mxu0 %vm437_vm0, %v319_v25 }
  0x96   : > { %14165 = vmatmul.mubr.msk.f32.gmra.mrb[60].mxu1 %vm437_vm0, %v412_v33  ;;  %v323_v33 = vld [vmem:[%s16505_s18 + $0x160] sm:$0xff] }
  0x97   : > { %14167 = vmatprep.mubr.msk.f32.mxu1 %vm437_vm0, %v413_v34  ;;  %14027 = vmatmul.mubr.msk.f32.gmra.mrb[40].mxu0 %vm437_vm0, %v320_v26  ;;  %v324_v34 = vld [vmem:[%s16505_s18 + $0x168] sm:$0xff]  ;;  %v346_v26 = vld [vmem:[%s16505_s18 + $0x218] sm:$0xff] }
  0x98   : > { %14029 = vmatprep.mubr.msk.f32.mxu0 %vm437_vm0, %v321_v29 }
  0x9a   : > { %14168 = vmatmul.mubr.msk.f32.gmra.mrb[62].mxu1 %vm437_vm0, %v414_v37  ;;  %v325_v37 = vld [vmem:[%s16505_s18 + $0x170] sm:$0xff] }
  0x9b   : > { %14170 = vmatprep.mubr.msk.f32.mxu1 %vm437_vm0, %v415_v38  ;;  %14030 = vmatmul.mubr.msk.f32.gmra.mrb[42].mxu0 %vm437_vm0, %v322_v30  ;;  %v326_v38 = vld [vmem:[%s16505_s18 + $0x178] sm:$0xff]  ;;  %v347_v30 = vld [vmem:[%s16505_s18 + $0x220] sm:$0xff] }
  0x9c   : > { %14032 = vmatprep.mubr.msk.f32.mxu0 %vm437_vm0, %v323_v33  ;;  %v11538_v33 = vld [vmem:[%s16505_s18 + $0x5d8] sm:$0xff] }
  0x9e   : > { %14171 = vmatmul.mubr.msk.f32.gmra.mrb[64].mxu1 %vm437_vm0, %v416_v41  ;;  %v327_v41 = vld [vmem:[%s16505_s18 + $0x180] sm:$0xff] }
  0x9f   : > { %14173 = vmatprep.mubr.msk.f32.mxu1 %vm437_vm0, %v417_v42  ;;  %14033 = vmatmul.mubr.msk.f32.gmra.mrb[44].mxu0 %vm437_vm0, %v324_v34  ;;  %v328_v42 = vld [vmem:[%s16505_s18 + $0x188] sm:$0xff]  ;;  %v11539_v34 = vld [vmem:[%s16505_s18 + $0x5e0] sm:$0xff] }
  0xa0   : > { %14035 = vmatprep.mubr.msk.f32.mxu0 %vm437_vm0, %v325_v37 }
  0xa2   : > { %14174 = vmatmul.mubr.msk.f32.gmra.mrb[66].mxu1 %vm437_vm0, %v418_v45  ;;  %v11792_v45 = vld [vmem:[%s20007_s3 + $0xa0] sm:$0xff] }
  0xa3   : > { %14176 = vmatprep.mubr.msk.f32.mxu1 %vm437_vm0, %v419_v46  ;;  %14036 = vmatmul.mubr.msk.f32.gmra.mrb[46].mxu0 %vm437_vm0, %v326_v38  ;;  %v11793_v46 = vld [vmem:[%s20007_s3 + $0xa8] sm:$0xff]  ;;  %v350_v38 = vld [vmem:[%s16505_s18 + $0x238] sm:$0xff] }
  0xa4   : > { %14038 = vmatprep.mubr.msk.f32.mxu0 %vm437_vm0, %v327_v41  ;;  %v15762_v47 = vpack.c.bf16 %v11793_v46, %v11792_v45  ;;  %v1803_v46 = vld [vmem:[%s20007_s3] sm:$0xff] }
  0xa6   : > { %14177 = vmatmul.mubr.msk.f32.gmra.mrb[68].mxu1 %vm437_vm0, %v420_v49  ;;  %v330_v49 = vld [vmem:[%s16505_s18 + $0x198] sm:$0xff] }
  0xa7   : > { %14179 = vmatprep.mubr.msk.f32.mxu1 %vm437_vm0, %v421_v50  ;;  %14039 = vmatmul.mubr.msk.f32.gmra.mrb[48].mxu0 %vm437_vm0, %v328_v42  ;;  %v11520_v50 = vld [vmem:[%s16505_s18 + $0x548] sm:$0xff] }
  0xa8   : > { %14041 = vmatprep.mubr.msk.f32.mxu0 %vm437_vm0, %v329_v48 }
  0xaa   : > { %14180 = vmatmul.mubr.msk.f32.gmra.mrb[70].mxu1 %vm437_vm0, %v422_v53  ;;  %v332_v53 = vld [vmem:[%s16505_s18 + $0x1a8] sm:$0xff] }
  0xab   : > { %14196 = vmatprep.mubr.msk.f32.mxu1 %vm437_vm0, %v11495_v54  ;;  %14042 = vmatmul.mubr.msk.f32.gmra.mrb[50].mxu0 %vm437_vm0, %v330_v49  ;;  %v11522_v54 = vld [vmem:[%s16505_s18 + $0x558] sm:$0xff] }
  0xac   : > { %14044 = vmatprep.mubr.msk.f32.mxu0 %vm437_vm0, %v331_v52 }
  0xae   : > { %14197 = vmatmul.mubr.msk.f32.vlgmr.msra.gmra.mrb[72].mxu1 %vm437_vm0, %v11496_v60  ;;  %v335_v60 = vld [vmem:[%s16505_s18 + $0x1c0] sm:$0xff] }
  0xaf   : > { %14199 = vmatprep.mubr.msk.f32.mxu1 %vm437_vm0, %v11497_v61  ;;  %15797 = vmatpush3.bf16.msra.mxu1 %v16478_v3  ;;  %v11501_v3 = vld [vmem:[%s16505_s18 + $0x4b0] sm:$0xff]  ;;  %v336_v61 = vld [vmem:[%s16505_s18 + $0x1c8] sm:$0xff] }
  0xb0   : > { %15799 = vmatprep.subr.bf16.mxu1 %v16483_v5  ;;  %14045 = vmatmul.mubr.msk.f32.gmra.mrb[52].mxu0 %vm437_vm0, %v332_v53 }
  0xb1   : > { %14047 = vmatprep.mubr.msk.f32.mxu0 %vm437_vm0, %v333_v56 }
  0xb2   : > { %14200 = vmatmul.mubr.msk.f32.gmra.mrb[74].mxu1 %vm437_vm0, %v11498_v0  ;;  %v337_v0 = vld [vmem:[%s16505_s18 + $0x1d0] sm:$0xff] }
  0xb3   : > { %14202 = vmatprep.mubr.msk.f32.mxu1 %vm437_vm0, %v11499_v1  ;;  %15801 = vmatpush3.bf16.msra.mxu1 %v16483_v5  ;;  %v11503_v5 = vld [vmem:[%s16505_s18 + $0x4c0] sm:$0xff]  ;;  %v338_v1 = vld [vmem:[%s16505_s18 + $0x1d8] sm:$0xff] }
  0xb4   : > { %15803 = vmatprep.subr.bf16.mxu1 %v16499_v8  ;;  %14048 = vmatmul.mubr.msk.f32.gmra.mrb[54].mxu0 %vm437_vm0, %v334_v57 }
  0xb5   : > { %14050 = vmatprep.mubr.msk.f32.mxu0 %vm437_vm0, %v335_v60 }
  0xb6   : > { %14203 = vmatmul.mubr.msk.f32.gmra.mrb[76].mxu1 %vm437_vm0, %v11500_v6  ;;  %v339_v6 = vld [vmem:[%s16505_s18 + $0x1e0] sm:$0xff] }
  0xb7   : > { %14205 = vmatprep.mubr.msk.f32.mxu1 %vm437_vm0, %v11501_v3  ;;  %15805 = vmatpush3.bf16.msra.mxu1 %v16499_v8  ;;  %v11505_v8 = vld [vmem:[%s16505_s18 + $0x4d0] sm:$0xff]  ;;  %v340_v3 = vld [vmem:[%s16505_s18 + $0x1e8] sm:$0xff] }
  0xb8   : > { %14904 = vmatprep.subr.msk.mxu1 %vm870_vm1, %v16515_v10  ;;  %14051 = vmatmul.mubr.msk.f32.gmra.mrb[56].mxu0 %vm437_vm0, %v336_v61 }
  0xb9   : > { %14053 = vmatprep.mubr.msk.f32.mxu0 %vm437_vm0, %v337_v0 }
  0xba   : > { %14206 = vmatmul.mubr.msk.f32.gmra.mrb[78].mxu1 %vm437_vm0, %v11502_v11 }
  0xbb   : > { %14208 = vmatprep.mubr.msk.f32.mxu1 %vm437_vm0, %v11503_v5  ;;  %14905 = vmatpush3.msk.msra.mxu1 %vm870_vm1, %v16515_v10  ;;  %v11790_v10 = vld [vmem:[%s20007_s3 + $0x90] sm:$0xff] }
  0xbc   : > { %v15758_v20 = vpack.c.bf16 %v11791_v19, %v11790_v10  ;;  %14054 = vmatmul.mubr.msk.f32.gmra.mrb[58].mxu0 %vm437_vm0, %v338_v1  ;;  %v11794_v5 = vld [vmem:[%s20007_s3 + $0xb0] sm:$0xff]  ;;  %v343_v10 = vld [vmem:[%s16505_s18 + $0x200] sm:$0xff] }
  0xbd   : > { %14056 = vmatprep.mubr.msk.f32.mxu0 %vm437_vm0, %v339_v6 }
  0xbe   : > { %14209 = vmatmul.mubr.msk.f32.gmra.mrb[80].mxu1 %vm437_vm0, %v11504_v14  ;;  %15759 = vmatprep.subr.bf16.mxu0 %v15758_v20  ;;  %v15766_v14 = vpack.c.bf16 %v11795_v12, %v11794_v5 }
  0xbf   : > { %14211 = vmatprep.mubr.msk.f32.mxu1 %vm437_vm0, %v11505_v8  ;;  %15761 = vmatpush3.bf16.msra.mxu0 %v15758_v20  ;;  %v341_v8 = vld [vmem:[%s16505_s18 + $0x1f0] sm:$0xff]  ;;  %v344_v20 = vld [vmem:[%s16505_s18 + $0x208] sm:$0xff] }
  0xc0   : > { %15763 = vmatprep.subr.bf16.mxu0 %v15762_v47  ;;  %14057 = vmatmul.mubr.msk.f32.gmra.mrb[60].mxu0 %vm437_vm0, %v340_v3 }
  0xc1   : > { %14059 = vmatprep.mubr.msk.f32.mxu0 %vm437_vm0, %v341_v8  ;;  %v11557_v8 = vld [vmem:[%s16505_s18 + $0x670] sm:$0xff] }
  0xc2   : > { %14212 = vmatmul.mubr.msk.f32.gmra.mrb[82].mxu1 %vm437_vm0, %v11506_v17  ;;  %v11533_v17 = vld [vmem:[%s16505_s18 + $0x5b0] sm:$0xff] }
  0xc3   : > { %14214 = vmatprep.mubr.msk.f32.mxu1 %vm437_vm0, %v11507_v18  ;;  %15765 = vmatpush3.bf16.msra.mxu0 %v15762_v47  ;;  %v1804_v47 = vld [vmem:[%s20007_s3 + $0x8] sm:$0xff] }
  0xc4   : > { %15767 = vmatprep.subr.bf16.mxu0 %v15766_v14  ;;  %14060 = vmatmul.mubr.msk.f32.gmra.mrb[62].mxu0 %vm437_vm0, %v342_v15  ;;  %v17001_v49 = vpack.c.bf16 %v1804_v47, %v1803_v46  ;;  %v11568_v47 = vld [vmem:[%s16505_s18 + $0x6c8] sm:$0xff] }
  0xc5   : > { %14062 = vmatprep.mubr.msk.f32.mxu0 %vm437_vm0, %v343_v10  ;;  %v11559_v10 = vld [vmem:[%s16505_s18 + $0x680] sm:$0xff] }
  0xc6   : > { %14215 = vmatmul.mubr.msk.f32.gmra.mrb[84].mxu1 %vm437_vm0, %v11508_v23 }
  0xc7   : > { %14217 = vmatprep.mubr.msk.f32.mxu1 %vm437_vm0, %v11509_v24  ;;  %15769 = vmatpush3.bf16.msra.mxu0 %v15766_v14  ;;  %v345_v24 = vld [vmem:[%s16505_s18 + $0x210] sm:$0xff]  ;;  %v11556_v14 = vld [vmem:[%s16505_s18 + $0x668] sm:$0xff] }
  0xc8   : > { %14063 = vmatmul.mubr.msk.f32.gmra.mrb[64].mxu0 %vm437_vm0, %v344_v20  ;;  %15771 = vmatprep.subr.bf16.mxu0 %v17001_v49 }
  0xc9   : > { %14065 = vmatprep.mubr.msk.f32.mxu0 %vm437_vm0, %v345_v24  ;;  %v11561_v24 = vld [vmem:[%s16505_s18 + $0x690] sm:$0xff] }
  0xca   : > { %14218 = vmatmul.mubr.msk.f32.gmra.mrb[86].mxu1 %vm437_vm0, %v11510_v27  ;;  %v11536_v27 = vld [vmem:[%s16505_s18 + $0x5c8] sm:$0xff] }
  0xcb   : > { %14220 = vmatprep.mubr.msk.f32.mxu1 %vm437_vm0, %v11511_v28  ;;  %v11537_v28 = vld [vmem:[%s16505_s18 + $0x5d0] sm:$0xff] }
  0xcc   : > { %14066 = vmatmul.mubr.msk.f32.gmra.mrb[66].mxu0 %vm437_vm0, %v346_v26 }
  0xcd   : > { %14068 = vmatprep.mubr.msk.f32.mxu0 %vm437_vm0, %v347_v30  ;;  %v11563_v30 = vld [vmem:[%s16505_s18 + $0x6a0] sm:$0xff] }
  0xce   : > { %14221 = vmatmul.mubr.msk.f32.gmra.mrb[88].mxu1 %vm437_vm0, %v11512_v31 }
  0xcf   : > { %14223 = vmatprep.mubr.msk.f32.mxu1 %vm437_vm0, %v11513_v32  ;;  %v348_v32 = vld [vmem:[%s16505_s18 + $0x228] sm:$0xff] }
  0xd0   : > { %14069 = vmatmul.mubr.msk.f32.gmra.mrb[68].mxu0 %vm437_vm0, %v348_v32 }
  0xd2   : > { %14224 = vmatmul.mubr.msk.f32.gmra.mrb[90].mxu1 %vm437_vm0, %v11514_v35 }
  0xd3   : > { %14226 = vmatprep.mubr.msk.f32.mxu1 %vm437_vm0, %v11515_v36  ;;  %v349_v36 = vld [vmem:[%s16505_s18 + $0x230] sm:$0xff] }
  0xd4   : > { %14071 = vmatprep.mubr.msk.f32.mxu0 %vm437_vm0, %v349_v36  ;;  %v11565_v36 = vld [vmem:[%s16505_s18 + $0x6b0] sm:$0xff] }
  0xd5   : > { %14072 = vmatmul.mubr.msk.f32.gmra.mrb[70].mxu0 %vm437_vm0, %v350_v38 }
  0xd6   : > { %14227 = vmatmul.mubr.msk.f32.gmra.mrb[92].mxu1 %vm437_vm0, %v11516_v39  ;;  %v11540_v39 = vld [vmem:[%s16505_s18 + $0x5e8] sm:$0xff] }
  0xd7   : > { %14229 = vmatprep.mubr.msk.f32.mxu1 %vm437_vm0, %v11517_v40  ;;  %v11541_v40 = vld [vmem:[%s16505_s18 + $0x5f0] sm:$0xff] }
  0xda   : > { %14230 = vmatmul.mubr.msk.f32.gmra.mrb[94].mxu1 %vm437_vm0, %v11518_v43  ;;  %v11542_v43 = vld [vmem:[%s16505_s18 + $0x5f8] sm:$0xff] }
  0xdb   : > { %14232 = vmatprep.mubr.msk.f32.mxu1 %vm437_vm0, %v11519_v44  ;;  %v11543_v44 = vld [vmem:[%s16505_s18 + $0x600] sm:$0xff] }
  0xde   : > { %14233 = vmatmul.mubr.msk.f32.gmra.mrb[96].mxu1 %vm437_vm0, %v11520_v50  ;;  %v11544_v50 = vld [vmem:[%s16505_s18 + $0x608] sm:$0xff] }
  0xdf   : > { %14235 = vmatprep.mubr.msk.f32.mxu1 %vm437_vm0, %v11521_v51  ;;  %v11545_v51 = vld [vmem:[%s16505_s18 + $0x610] sm:$0xff] }
  0xe2   : > { %14236 = vmatmul.mubr.msk.f32.gmra.mrb[98].mxu1 %vm437_vm0, %v11522_v54  ;;  %v11546_v54 = vld [vmem:[%s16505_s18 + $0x618] sm:$0xff] }
  0xe3   : > { %14238 = vmatprep.mubr.msk.f32.mxu1 %vm437_vm0, %v11523_v55  ;;  %v11547_v55 = vld [vmem:[%s16505_s18 + $0x620] sm:$0xff] }
  0xe6   : > { %14239 = vmatmul.mubr.msk.f32.gmra.mrb[100].mxu1 %vm437_vm0, %v11524_v58  ;;  %v11548_v58 = vld [vmem:[%s16505_s18 + $0x628] sm:$0xff] }
  0xe7   : > { %14241 = vmatprep.mubr.msk.f32.mxu1 %vm437_vm0, %v11525_v59  ;;  %v11549_v59 = vld [vmem:[%s16505_s18 + $0x630] sm:$0xff] }
  0xea   : > { %14242 = vmatmul.mubr.msk.f32.gmra.mrb[102].mxu1 %vm437_vm0, %v11526_v62  ;;  %v11550_v62 = vld [vmem:[%s16505_s18 + $0x638] sm:$0xff] }
  0xeb   : > { %14244 = vmatprep.mubr.msk.f32.mxu1 %vm437_vm0, %v11527_v63  ;;  %v11551_v63 = vld [vmem:[%s16505_s18 + $0x640] sm:$0xff] }
  0xee   : > { %14245 = vmatmul.mubr.msk.f32.gmra.mrb[104].mxu1 %vm437_vm0, %v11528_v2  ;;  %v11552_v2 = vld [vmem:[%s16505_s18 + $0x648] sm:$0xff] }
  0xef   : > { %14247 = vmatprep.mubr.msk.f32.mxu1 %vm437_vm0, %v11529_v4  ;;  %v11553_v4 = vld [vmem:[%s16505_s18 + $0x650] sm:$0xff] }
  0xf1   : > { %v16916_v11 = vpop.f32.mrb[0].mxu1 }
  0xf2   : > { %20012 = vst [vmem:[#allocation3_spill] sm:$0xff] %v16916_v11  ;;  %v16924_v13 = vpop.f32.mrb[1].mxu1  ;;  %14248 = vmatmul.mubr.msk.f32.gmra.mrb[106].mxu1 %vm437_vm0, %v11530_v7  ;;  %v11554_v7 = vld [vmem:[%s16505_s18 + $0x658] sm:$0xff] }
  0xf3   : > { %20013 = vst [vmem:[#allocation4_spill] sm:$0xff] %v16924_v13  ;;  %14250 = vmatprep.mubr.msk.f32.mxu1 %vm437_vm0, %v11531_v9  ;;  %v11555_v9 = vld [vmem:[%s16505_s18 + $0x660] sm:$0xff] }
  0xf5   : > { %v16934_v18 = vpop.f32.mrb[2].mxu1 }
  0xf6   : > { %20014 = vst [vmem:[#allocation5_spill] sm:$0xff] %v16934_v18  ;;  %v16937_v19 = vpop.f32.mrb[3].mxu1  ;;  %14251 = vmatmul.mubr.msk.f32.gmra.mrb[108].mxu1 %vm437_vm0, %v11532_v16 }
  0xf7   : > { %20015 = vst [vmem:[#allocation6_spill] sm:$0xff] %v16937_v19  ;;  %14253 = vmatprep.mubr.msk.f32.mxu1 %vm437_vm0, %v11533_v17  ;;  %v11558_v17 = vld [vmem:[%s16505_s18 + $0x678] sm:$0xff] }
  0xf9   : > { %v16946_v23 = vpop.f32.mrb[4].mxu1 }
  0xfa   : > { %20016 = vst [vmem:[#allocation7_spill] sm:$0xff] %v16946_v23  ;;  %v16949_v25 = vpop.f32.mrb[5].mxu1  ;;  %14254 = vmatmul.mubr.msk.f32.gmra.mrb[110].mxu1 %vm437_vm0, %v11534_v21 }
  0xfb   : > { %20017 = vst [vmem:[#allocation8_spill] sm:$0xff] %v16949_v25  ;;  %14256 = vmatprep.mubr.msk.f32.mxu1 %vm437_vm0, %v11535_v22  ;;  %v11560_v22 = vld [vmem:[%s16505_s18 + $0x688] sm:$0xff] }
  0xfd   : > { %v16958_v29 = vpop.f32.mrb[6].mxu1 }
  0xfe   : > { %20018 = vst [vmem:[#allocation9_spill] sm:$0xff] %v16958_v29  ;;  %v16961_v31 = vpop.f32.mrb[7].mxu1  ;;  %14257 = vmatmul.mubr.msk.f32.gmra.mrb[112].mxu1 %vm437_vm0, %v11536_v27 }
  0xff   : > { %20019 = vst [vmem:[#allocation10_spill] sm:$0xff] %v16961_v31  ;;  %14259 = vmatprep.mubr.msk.f32.mxu1 %vm437_vm0, %v11537_v28  ;;  %v11562_v28 = vld [vmem:[%s16505_s18 + $0x698] sm:$0xff] }
 0x101   : > { %v16970_v35 = vpop.f32.mrb[8].mxu1 }
 0x102   : > { %20020 = vst [vmem:[#allocation11_spill] sm:$0xff] %v16970_v35  ;;  %v16973_v37 = vpop.f32.mrb[9].mxu1  ;;  %14260 = vmatmul.mubr.msk.f32.gmra.mrb[114].mxu1 %vm437_vm0, %v11538_v33 }
 0x103   : > { %20021 = vst [vmem:[#allocation12_spill] sm:$0xff] %v16973_v37  ;;  %14262 = vmatprep.mubr.msk.f32.mxu1 %vm437_vm0, %v11539_v34  ;;  %v11564_v34 = vld [vmem:[%s16505_s18 + $0x6a8] sm:$0xff]  ;;  %v11617_v37 = vld [vmem:[%s16505_s18 + $0x850] sm:$0xff] }
 0x105   : > { %v16982_v41 = vpop.f32.mrb[10].mxu1 }
 0x106   : > { %20022 = vst [vmem:[#allocation13_spill] sm:$0xff] %v16982_v41  ;;  %v16984_v42 = vpop.f32.mrb[11].mxu1  ;;  %14263 = vmatmul.mubr.msk.f32.gmra.mrb[116].mxu1 %vm437_vm0, %v11540_v39 }
 0x107   : > { %20023 = vst [vmem:[#allocation14_spill] sm:$0xff] %v16984_v42  ;;  %14265 = vmatprep.mubr.msk.f32.mxu1 %vm437_vm0, %v11541_v40  ;;  %v11566_v40 = vld [vmem:[%s16505_s18 + $0x6b8] sm:$0xff] }
 0x109   : > { %v16990_v45 = vpop.f32.mrb[12].mxu1 }
 0x10a   : > { %20024 = vst [vmem:[#allocation15_spill] sm:$0xff] %v16990_v45  ;;  %v16998_v48 = vpop.f32.mrb[13].mxu1  ;;  %14266 = vmatmul.mubr.msk.f32.gmra.mrb[118].mxu1 %vm437_vm0, %v11542_v43  ;;  %v11567_v43 = vld [vmem:[%s16505_s18 + $0x6c0] sm:$0xff] }
 0x10b   : > { %20025 = vst [vmem:[#allocation16_spill] sm:$0xff] %v16998_v48  ;;  %14268 = vmatprep.mubr.msk.f32.mxu1 %vm437_vm0, %v11543_v44 }
 0x10d   : > { %v17007_v52 = vpop.f32.mrb[14].mxu1 }
 0x10e   : > { %20026 = vst [vmem:[#allocation17_spill] sm:$0xff] %v17007_v52  ;;  %v17009_v53 = vpop.f32.mrb[15].mxu1  ;;  %14269 = vmatmul.mubr.msk.f32.gmra.mrb[120].mxu1 %vm437_vm0, %v11544_v50  ;;  %v11569_v50 = vld [vmem:[%s16505_s18 + $0x6d0] sm:$0xff] }
 0x10f   : > { %20027 = vst [vmem:[#allocation18_spill] sm:$0xff] %v17009_v53  ;;  %14271 = vmatprep.mubr.msk.f32.mxu1 %vm437_vm0, %v11545_v51 }
 0x111   : > { %v17015_v56 = vpop.f32.mrb[16].mxu1 }
 0x112   : > { %20028 = vst [vmem:[#allocation19_spill] sm:$0xff] %v17015_v56  ;;  %v17017_v57 = vpop.f32.mrb[17].mxu1  ;;  %14272 = vmatmul.mubr.msk.f32.gmra.mrb[122].mxu1 %vm437_vm0, %v11546_v54  ;;  %v1807_v56 = vld [vmem:[%s20007_s3 + $0x20] sm:$0xff] }
 0x113   : > { %20029 = vst [vmem:[#allocation20_spill] sm:$0xff] %v17017_v57  ;;  %14274 = vmatprep.mubr.msk.f32.mxu1 %vm437_vm0, %v11547_v55  ;;  %v11570_v55 = vld [vmem:[%s16505_s18 + $0x6d8] sm:$0xff] }
 0x115   : > { %v17023_v60 = vpop.f32.mrb[18].mxu1 }
 0x116   : > { %20030 = vst [vmem:[#allocation21_spill] sm:$0xff] %v17023_v60  ;;  %v17025_v61 = vpop.f32.mrb[19].mxu1  ;;  %14275 = vmatmul.mubr.msk.f32.gmra.mrb[124].mxu1 %vm437_vm0, %v11548_v58  ;;  %v11571_v58 = vld [vmem:[%s16505_s18 + $0x6e0] sm:$0xff] }
 0x117   : > { %20031 = vst [vmem:[#allocation22_spill] sm:$0xff] %v17025_v61  ;;  %14277 = vmatprep.mubr.msk.f32.mxu1 %vm437_vm0, %v11549_v59  ;;  %v11606_v61 = vld [vmem:[%s16505_s18 + $0x7f8] sm:$0xff] }
 0x119   : > { %v17031_v0 = vpop.f32.mrb[20].mxu1 }
 0x11a   : > { %20032 = vst [vmem:[#allocation23_spill] sm:$0xff] %v17031_v0  ;;  %v17033_v1 = vpop.f32.mrb[21].mxu1  ;;  %14278 = vmatmul.mubr.msk.f32.gmra.mrb[126].mxu1 %vm437_vm0, %v11550_v62 }
 0x11b   : > { %20033 = vst [vmem:[#allocation24_spill] sm:$0xff] %v17033_v1  ;;  %14280 = vmatprep.mubr.msk.f32.mxu1 %vm437_vm0, %v11551_v63  ;;  %v11572_v63 = vld [vmem:[%s16505_s18 + $0x6e8] sm:$0xff] }
 0x11d   : > { %v17039_v6 = vpop.f32.mrb[22].mxu1 }
 0x11e   : > { %20034 = vst [vmem:[#allocation25_spill] sm:$0xff] %v17039_v6  ;;  %v17041_v3 = vpop.f32.mrb[23].mxu1  ;;  %14281 = vmatmul.mubr.msk.f32.gmra.mrb[128].mxu1 %vm437_vm0, %v11552_v2  ;;  %v11573_v2 = vld [vmem:[%s16505_s18 + $0x6f0] sm:$0xff] }
 0x11f   : > { %20035 = vst [vmem:[#allocation26_spill] sm:$0xff] %v17041_v3  ;;  %14283 = vmatprep.mubr.msk.f32.mxu1 %vm437_vm0, %v11553_v4 }
 0x121   : > { %v17047_v5 = vpop.f32.mrb[24].mxu1 }
 0x122   : > { %20036 = vst [vmem:[#allocation27_spill] sm:$0xff] %v17047_v5  ;;  %v17049_v12 = vpop.f32.mrb[25].mxu1  ;;  %14284 = vmatmul.mubr.msk.f32.gmra.mrb[130].mxu1 %vm437_vm0, %v11554_v7  ;;  %v1806_v5 = vld [vmem:[%s20007_s3 + $0x18] sm:$0xff] }
 0x123   : > { %20037 = vst [vmem:[#allocation28_spill] sm:$0xff] %v17049_v12  ;;  %14286 = vmatprep.mubr.msk.f32.mxu1 %vm437_vm0, %v11555_v9  ;;  %v11574_v9 = vld [vmem:[%s16505_s18 + $0x6f8] sm:$0xff] }
 0x125   : > { %v17055_v15 = vpop.f32.mrb[26].mxu1 }
 0x126   : > { %20038 = vst [vmem:[#allocation29_spill] sm:$0xff] %v17055_v15  ;;  %v17057_v16 = vpop.f32.mrb[27].mxu1  ;;  %14287 = vmatmul.mubr.msk.f32.gmra.mrb[132].mxu1 %vm437_vm0, %v11556_v14  ;;  %v11575_v14 = vld [vmem:[%s16505_s18 + $0x700] sm:$0xff] }
 0x127   : > { %20039 = vst [vmem:[#allocation30_spill] sm:$0xff] %v17057_v16  ;;  %14289 = vmatprep.mubr.msk.f32.mxu1 %vm437_vm0, %v11557_v8  ;;  %v1805_v16 = vld [vmem:[%s20007_s3 + $0x10] sm:$0xff] }
 0x128   : > { %v15774_v1 = vpack.c.bf16 %v1806_v5, %v1805_v16  ;;  %v11607_v5 = vld [vmem:[%s16505_s18 + $0x800] sm:$0xff] }
 0x129   : > { %v17063_v20 = vpop.f32.mrb[28].mxu1 }
 0x12a   : > { %20040 = vst [vmem:[#allocation31_spill] sm:$0xff] %v17063_v20  ;;  %v17065_v21 = vpop.f32.mrb[29].mxu1  ;;  %14290 = vmatmul.mubr.msk.f32.gmra.mrb[134].mxu1 %vm437_vm0, %v11558_v17 }
 0x12b   : > { %20041 = vst [vmem:[#allocation32_spill] sm:$0xff] %v17065_v21  ;;  %14292 = vmatprep.mubr.msk.f32.mxu1 %vm437_vm0, %v11559_v10  ;;  %v17132_v10 = vpop.f32.mrb[0].mxu0  ;;  %v17298_v21 = vld [vmem:[%s20006_s2] ss:$0 sm:$0xff] }
 0x12d   : > { %v17071_v26 = vpop.f32.mrb[30].mxu1 }
 0x12e   : > { %20042 = vst [vmem:[#allocation33_spill] sm:$0xff] %v17071_v26  ;;  %v17073_v27 = vpop.f32.mrb[31].mxu1  ;;  %14293 = vmatmul.mubr.msk.f32.gmra.mrb[136].mxu1 %vm437_vm0, %v11560_v22  ;;  %v11576_v22 = vld [vmem:[%s16505_s18 + $0x708] sm:$0xff] }
 0x12f   : > { %20043 = vst [vmem:[#allocation34_spill] sm:$0xff] %v17073_v27  ;;  %14295 = vmatprep.mubr.msk.f32.mxu1 %vm437_vm0, %v11561_v24  ;;  %v17136_v24 = vpop.f32.mrb[1].mxu0 }
 0x131   : > { %v17079_v32 = vpop.f32.mrb[32].mxu1 }
 0x132   : > { %20044 = vst [vmem:[#allocation35_spill] sm:$0xff] %v17079_v32  ;;  %v17081_v33 = vpop.f32.mrb[33].mxu1  ;;  %14296 = vmatmul.mubr.msk.f32.gmra.mrb[138].mxu1 %vm437_vm0, %v11562_v28  ;;  %v11577_v28 = vld [vmem:[%s16505_s18 + $0x710] sm:$0xff] }
 0x133   : > { %20045 = vst [vmem:[#allocation36_spill] sm:$0xff] %v17081_v33  ;;  %14298 = vmatprep.mubr.msk.f32.mxu1 %vm437_vm0, %v11563_v30 }
 0x135   : > { %v17087_v38 = vpop.f32.mrb[34].mxu1 }
 0x136   : > { %20046 = vst [vmem:[#allocation37_spill] sm:$0xff] %v17087_v38  ;;  %v17089_v39 = vpop.f32.mrb[35].mxu1  ;;  %14299 = vmatmul.mubr.msk.f32.gmra.mrb[140].mxu1 %vm437_vm0, %v11564_v34 }
 0x137   : > { %20047 = vst [vmem:[#allocation38_spill] sm:$0xff] %v17089_v39  ;;  %14301 = vmatprep.mubr.msk.f32.mxu1 %vm437_vm0, %v11565_v36  ;;  %v11578_v36 = vld [vmem:[%s16505_s18 + $0x718] sm:$0xff] }
 0x139   : > { %v17095_v44 = vpop.f32.mrb[36].mxu1 }
 0x13a   : > { %20048 = vst [vmem:[#allocation39_spill] sm:$0xff] %v17095_v44  ;;  %v17097_v46 = vpop.f32.mrb[37].mxu1  ;;  %14302 = vmatmul.mubr.msk.f32.gmra.mrb[142].mxu1 %vm437_vm0, %v11566_v40  ;;  %v17146_v40 = vpop.f32.mrb[2].mxu0 }
 0x13b   : > { %20049 = vst [vmem:[#allocation40_spill] sm:$0xff] %v17097_v46  ;;  %14304 = vmatprep.mubr.msk.f32.mxu1 %vm437_vm0, %v11567_v43  ;;  %v11579_v43 = vld [vmem:[%s16505_s18 + $0x720] sm:$0xff] }
 0x13d   : > { %v17103_v51 = vpop.f32.mrb[38].mxu1 }
 0x13e   : > { %20050 = vst [vmem:[#allocation41_spill] sm:$0xff] %v17103_v51  ;;  %v17105_v54 = vpop.f32.mrb[39].mxu1  ;;  %14305 = vmatmul.mubr.msk.f32.gmra.mrb[144].mxu1 %vm437_vm0, %v11568_v47  ;;  %v17149_v47 = vpop.f32.mrb[3].mxu0 }
 0x13f   : > { %20051 = vst [vmem:[#allocation42_spill] sm:$0xff] %v17105_v54  ;;  %14307 = vmatprep.mubr.msk.f32.mxu1 %vm437_vm0, %v11569_v50 }
 0x141   : > { %v17111_v59 = vpop.f32.mrb[40].mxu1 }
 0x142   : > { %20052 = vst [vmem:[#allocation43_spill] sm:$0xff] %v17111_v59  ;;  %v17113_v62 = vpop.f32.mrb[41].mxu1  ;;  %14308 = vmatmul.mubr.msk.f32.gmra.mrb[146].mxu1 %vm437_vm0, %v11570_v55 }
 0x143   : > { %20053 = vst [vmem:[#allocation44_spill] sm:$0xff] %v17113_v62  ;;  %14310 = vmatprep.mubr.msk.f32.mxu1 %vm437_vm0, %v11571_v58  ;;  %v11580_v58 = vld [vmem:[%s16505_s18 + $0x728] sm:$0xff] }
 0x145   : > { %v17119_v4 = vpop.f32.mrb[42].mxu1 }
 0x146   : > { %20054 = vst [vmem:[#allocation45_spill] sm:$0xff] %v17119_v4  ;;  %v17121_v7 = vpop.f32.mrb[43].mxu1  ;;  %14311 = vmatmul.mubr.msk.f32.gmra.mrb[148].mxu1 %vm437_vm0, %v11572_v63  ;;  %v17158_v63 = vpop.f32.mrb[4].mxu0 }
 0x147   : > { %20055 = vst [vmem:[#allocation46_spill] sm:$0xff] %v17121_v7  ;;  %14313 = vmatprep.mubr.msk.f32.mxu1 %vm437_vm0, %v11573_v2  ;;  %v11581_v2 = vld [vmem:[%s16505_s18 + $0x730] sm:$0xff] }
 0x149   : > { %v17127_v8 = vpop.f32.mrb[44].mxu1 }
 0x14a   : > { %20056 = vst [vmem:[#allocation47_spill] sm:$0xff] %v17127_v8  ;;  %v17129_v17 = vpop.f32.mrb[45].mxu1  ;;  %14314 = vmatmul.mubr.msk.f32.gmra.mrb[150].mxu1 %vm437_vm0, %v11574_v9  ;;  %v17161_v9 = vpop.f32.mrb[5].mxu0 }
 0x14b   : > { %20057 = vst [vmem:[#allocation48_spill] sm:$0xff] %v17129_v17  ;;  %14316 = vmatprep.mubr.msk.f32.mxu1 %vm437_vm0, %v11575_v14 }
 0x14d   : > { %v17139_v30 = vpop.f32.mrb[46].mxu1 }
 0x14e   : > { %20058 = vst [vmem:[#allocation49_spill] sm:$0xff] %v17139_v30  ;;  %v17141_v34 = vpop.f32.mrb[47].mxu1  ;;  %14317 = vmatmul.mubr.msk.f32.gmra.mrb[152].mxu1 %vm437_vm0, %v11576_v22 }
 0x14f   : > { %20059 = vst [vmem:[#allocation50_spill] sm:$0xff] %v17141_v34  ;;  %14319 = vmatprep.mubr.msk.f32.mxu1 %vm437_vm0, %v11577_v28  ;;  %v11582_v28 = vld [vmem:[%s16505_s18 + $0x738] sm:$0xff] }
 0x151   : > { %v17151_v50 = vpop.f32.mrb[48].mxu1 }
 0x152   : > { %20060 = vst [vmem:[#allocation51_spill] sm:$0xff] %v17151_v50  ;;  %v17153_v55 = vpop.f32.mrb[49].mxu1  ;;  %14320 = vmatmul.mubr.msk.f32.gmra.mrb[154].mxu1 %vm437_vm0, %v11578_v36  ;;  %v17170_v36 = vpop.f32.mrb[6].mxu0 }
 0x153   : > { %20061 = vst [vmem:[#allocation52_spill] sm:$0xff] %v17153_v55  ;;  %14322 = vmatprep.mubr.msk.f32.mxu1 %vm437_vm0, %v11579_v43  ;;  %v11583_v43 = vld [vmem:[%s16505_s18 + $0x740] sm:$0xff]  ;;  %v17173_v50 = vpop.f32.mrb[7].mxu0 }
 0x155   : > { %v17163_v14 = vpop.f32.mrb[50].mxu1 }
 0x156   : > { %20062 = vst [vmem:[#allocation53_spill] sm:$0xff] %v17163_v14  ;;  %v17165_v22 = vpop.f32.mrb[51].mxu1  ;;  %14323 = vmatmul.mubr.msk.f32.gmra.mrb[156].mxu1 %vm437_vm0, %v11580_v58  ;;  %v11584_v14 = vld [vmem:[%s16505_s18 + $0x748] sm:$0xff]  ;;  %v17182_v58 = vpop.f32.mrb[8].mxu0 }
 0x157   : > { %20063 = vst [vmem:[#allocation54_spill] sm:$0xff] %v17165_v22  ;;  %14325 = vmatprep.mubr.msk.f32.mxu1 %vm437_vm0, %v11581_v2  ;;  %v11585_v2 = vld [vmem:[%s16505_s18 + $0x750] sm:$0xff]  ;;  %v17185_v22 = vpop.f32.mrb[9].mxu0 }
 0x159   : > { %v17175_v55 = vpop.f32.mrb[52].mxu1 }
 0x15a   : > { %20064 = vst [vmem:[#allocation55_spill] sm:$0xff] %v17175_v55  ;;  %v17177_v30 = vpop.f32.mrb[53].mxu1  ;;  %14326 = vmatmul.mubr.msk.f32.gmra.mrb[158].mxu1 %vm437_vm0, %v11582_v28  ;;  %v11586_v55 = vld [vmem:[%s16505_s18 + $0x758] sm:$0xff]  ;;  %v17194_v28 = vpop.f32.mrb[10].mxu0 }
 0x15b   : > { %20065 = vst [vmem:[#allocation56_spill] sm:$0xff] %v17177_v30  ;;  %14328 = vmatprep.mubr.msk.f32.mxu1 %vm437_vm0, %v11583_v43  ;;  %v11587_v43 = vld [vmem:[%s16505_s18 + $0x760] sm:$0xff]  ;;  %v17197_v30 = vpop.f32.mrb[11].mxu0 }
 0x15d   : > { %v17187_v34 = vpop.f32.mrb[54].mxu1 }
 0x15e   : > { %20066 = vst [vmem:[#allocation57_spill] sm:$0xff] %v17187_v34  ;;  %v17189_v8 = vpop.f32.mrb[55].mxu1  ;;  %14329 = vmatmul.mubr.msk.f32.gmra.mrb[160].mxu1 %vm437_vm0, %v11584_v14  ;;  %v11588_v34 = vld [vmem:[%s16505_s18 + $0x768] sm:$0xff]  ;;  %v17206_v14 = vpop.f32.mrb[12].mxu0 }
 0x15f   : > { %20067 = vst [vmem:[#allocation58_spill] sm:$0xff] %v17189_v8  ;;  %14331 = vmatprep.mubr.msk.f32.mxu1 %vm437_vm0, %v11585_v2  ;;  %v11589_v2 = vld [vmem:[%s16505_s18 + $0x770] sm:$0xff]  ;;  %v17209_v8 = vpop.f32.mrb[13].mxu0 }
 0x161   : > { %v17199_v17 = vpop.f32.mrb[56].mxu1 }
 0x162   : > { %20068 = vst [vmem:[#allocation59_spill] sm:$0xff] %v17199_v17  ;;  %v17201_v4 = vpop.f32.mrb[57].mxu1  ;;  %14332 = vmatmul.mubr.msk.f32.gmra.mrb[162].mxu1 %vm437_vm0, %v11586_v55  ;;  %v11590_v17 = vld [vmem:[%s16505_s18 + $0x778] sm:$0xff]  ;;  %v17218_v55 = vpop.f32.mrb[14].mxu0 }
 0x163   : > { %20069 = vst [vmem:[#allocation60_spill] sm:$0xff] %v17201_v4  ;;  %14334 = vmatprep.mubr.msk.f32.mxu1 %vm437_vm0, %v11587_v43  ;;  %v11591_v43 = vld [vmem:[%s16505_s18 + $0x780] sm:$0xff]  ;;  %v17221_v4 = vpop.f32.mrb[15].mxu0 }
 0x165   : > { %v17211_v7 = vpop.f32.mrb[58].mxu1 }
 0x166   : > { %20070 = vst [vmem:[#allocation61_spill] sm:$0xff] %v17211_v7  ;;  %v17213_v59 = vpop.f32.mrb[59].mxu1  ;;  %14335 = vmatmul.mubr.msk.f32.gmra.mrb[164].mxu1 %vm437_vm0, %v11588_v34  ;;  %v11592_v7 = vld [vmem:[%s16505_s18 + $0x788] sm:$0xff]  ;;  %v17230_v34 = vpop.f32.mrb[16].mxu0 }
 0x167   : > { %20071 = vst [vmem:[#allocation62_spill] sm:$0xff] %v17213_v59  ;;  %14337 = vmatprep.mubr.msk.f32.mxu1 %vm437_vm0, %v11589_v2  ;;  %v11593_v2 = vld [vmem:[%s16505_s18 + $0x790] sm:$0xff]  ;;  %v17233_v59 = vpop.f32.mrb[17].mxu0 }
 0x169   : > { %v17223_v62 = vpop.f32.mrb[60].mxu1 }
 0x16a   : > { %20072 = vst [vmem:[#allocation63_spill] sm:$0xff] %v17223_v62  ;;  %v17225_v51 = vpop.f32.mrb[61].mxu1  ;;  %14338 = vmatmul.mubr.msk.f32.gmra.mrb[166].mxu1 %vm437_vm0, %v11590_v17  ;;  %v11594_v62 = vld [vmem:[%s16505_s18 + $0x798] sm:$0xff]  ;;  %v17242_v17 = vpop.f32.mrb[18].mxu0 }
 0x16b   : > { %20073 = vst [vmem:[#allocation64_spill] sm:$0xff] %v17225_v51  ;;  %14340 = vmatprep.mubr.msk.f32.mxu1 %vm437_vm0, %v11591_v43  ;;  %v11595_v43 = vld [vmem:[%s16505_s18 + $0x7a0] sm:$0xff]  ;;  %v17245_v51 = vpop.f32.mrb[19].mxu0 }
 0x16d   : > { %v17235_v54 = vpop.f32.mrb[62].mxu1 }
 0x16e   : > { %20074 = vst [vmem:[#allocation65_spill] sm:$0xff] %v17235_v54  ;;  %v17237_v44 = vpop.f32.mrb[63].mxu1  ;;  %14341 = vmatmul.mubr.msk.f32.gmra.mrb[168].mxu1 %vm437_vm0, %v11592_v7  ;;  %v11596_v54 = vld [vmem:[%s16505_s18 + $0x7a8] sm:$0xff]  ;;  %v17254_v7 = vpop.f32.mrb[20].mxu0 }
 0x16f   : > { %20075 = vst [vmem:[#allocation66_spill] sm:$0xff] %v17237_v44  ;;  %14343 = vmatprep.mubr.msk.f32.mxu1 %vm437_vm0, %v11593_v2  ;;  %v11597_v2 = vld [vmem:[%s16505_s18 + $0x7b0] sm:$0xff]  ;;  %v17257_v44 = vpop.f32.mrb[21].mxu0 }
 0x171   : > { %v17247_v46 = vpop.f32.mrb[64].mxu1 }
 0x172   : > { %20076 = vst [vmem:[#allocation67_spill] sm:$0xff] %v17247_v46  ;;  %v17249_v38 = vpop.f32.mrb[65].mxu1  ;;  %14344 = vmatmul.mubr.msk.f32.gmra.mrb[170].mxu1 %vm437_vm0, %v11594_v62  ;;  %v11598_v46 = vld [vmem:[%s16505_s18 + $0x7b8] sm:$0xff]  ;;  %v17266_v62 = vpop.f32.mrb[22].mxu0 }
 0x173   : > { %20077 = vst [vmem:[#allocation68_spill] sm:$0xff] %v17249_v38  ;;  %14346 = vmatprep.mubr.msk.f32.mxu1 %vm437_vm0, %v11595_v43  ;;  %v11599_v43 = vld [vmem:[%s16505_s18 + $0x7c0] sm:$0xff]  ;;  %v17269_v38 = vpop.f32.mrb[23].mxu0 }
 0x175   : > { %v17259_v39 = vpop.f32.mrb[66].mxu1 }
 0x176   : > { %20078 = vst [vmem:[#allocation69_spill] sm:$0xff] %v17259_v39  ;;  %v17261_v32 = vpop.f32.mrb[67].mxu1  ;;  %14347 = vmatmul.mubr.msk.f32.gmra.mrb[172].mxu1 %vm437_vm0, %v11596_v54  ;;  %v11600_v39 = vld [vmem:[%s16505_s18 + $0x7c8] sm:$0xff]  ;;  %v17278_v54 = vpop.f32.mrb[24].mxu0 }
 0x177   : > { %20079 = vst [vmem:[#allocation70_spill] sm:$0xff] %v17261_v32  ;;  %14349 = vmatprep.mubr.msk.f32.mxu1 %vm437_vm0, %v11597_v2  ;;  %v11601_v2 = vld [vmem:[%s16505_s18 + $0x7d0] sm:$0xff]  ;;  %v17281_v32 = vpop.f32.mrb[25].mxu0 }
 0x179   : > { %v17271_v33 = vpop.f32.mrb[68].mxu1 }
 0x17a   : > { %20080 = vst [vmem:[#allocation71_spill] sm:$0xff] %v17271_v33  ;;  %v17273_v26 = vpop.f32.mrb[69].mxu1  ;;  %14350 = vmatmul.mubr.msk.f32.gmra.mrb[174].mxu1 %vm437_vm0, %v11598_v46  ;;  %v11602_v33 = vld [vmem:[%s16505_s18 + $0x7d8] sm:$0xff]  ;;  %v17290_v46 = vpop.f32.mrb[26].mxu0 }
 0x17b   : > { %20081 = vst [vmem:[#allocation72_spill] sm:$0xff] %v17273_v26  ;;  %14352 = vmatprep.mubr.msk.f32.mxu1 %vm437_vm0, %v11599_v43  ;;  %v11603_v43 = vld [vmem:[%s16505_s18 + $0x7e0] sm:$0xff]  ;;  %v17293_v26 = vpop.f32.mrb[27].mxu0 }
 0x17c   : > { %v17311_v12 = vpop.f32.mrb[28].mxu0 }
 0x17d   : > { %v17283_v27 = vpop.f32.mrb[70].mxu1  ;;  %v17314_v6 = vpop.f32.mrb[29].mxu0 }
 0x17e   : > { %20082 = vst [vmem:[#allocation73_spill] sm:$0xff] %v17283_v27  ;;  %v17285_v20 = vpop.f32.mrb[71].mxu1  ;;  %14353 = vmatmul.mubr.msk.f32.gmra.mrb[176].mxu1 %vm437_vm0, %v11600_v39 }
 0x17f   : > { %20083 = vst [vmem:[#allocation74_spill] sm:$0xff] %v17285_v20  ;;  %14355 = vmatprep.mubr.msk.f32.mxu1 %vm437_vm0, %v11601_v2  ;;  %v11604_v2 = vld [vmem:[%s16505_s18 + $0x7e8] sm:$0xff] }
 0x181   : > { %v14198_v15 = vpop.f32.mrb[72].mxu1 }
 0x182   : > { %v2464_v27 = vadd.f32 %v14198_v15, %v17298_v21  ;;  %v2458_v20 = vpop.f32.mrb[73].mxu1  ;;  %14356 = vmatmul.mubr.msk.f32.gmra.mrb[178].mxu1 %vm437_vm0, %v11602_v33  ;;  %v11605_v15 = vld [vmem:[%s16505_s18 + $0x7f0] sm:$0xff] }
 0x183   : > { %v2459_v39 = vadd.f32 %v17298_v21, %v2458_v20  ;;  %14358 = vmatprep.mubr.msk.f32.mxu1 %vm437_vm0, %v11603_v43 }
 0x184   : > { %v3178_v43 = vmax.f32 %v2464_v27, 0.0  ;;  %v1808_v27 = vld [vmem:[%s20007_s3 + $0x28] sm:$0xff] }
 0x185   : > { %v3177_v20 = vmax.f32 %v2459_v39, 0.0  ;;  %v14201_v33 = vpop.f32.mrb[74].mxu1  ;;  %v17328_v39 = vpop.f32.mrb[30].mxu0  ;;  %v15778_v57 = vpack.c.bf16 %v1808_v27, %v1807_v56 }
 0x186   : > { %v2474_v3 = vadd.f32 %v14201_v33, %v17298_v21  ;;  %v2468_v0 = vpop.f32.mrb[75].mxu1  ;;  %14359 = vmatmul.mubr.msk.f32.gmra.mrb[180].mxu1 %vm437_vm0, %v11604_v2 }
 0x187   : > { %v2469_v60 = vadd.f32 %v17298_v21, %v2468_v0  ;;  %14436 = vmatprep.mubr.msk.f32.mxu0 %vm3334_vm2, %v3177_v20  ;;  %14361 = vmatprep.mubr.msk.f32.mxu1 %vm437_vm0, %v11605_v15  ;;  %v17332_v0 = vpop.f32.mrb[31].mxu0 }
 0x188   : > { %14437 = vmatmul.mubr.msk.f32.vlgmr.msra.gmra.mrb[72].mxu0 %vm3334_vm2, %v3178_v43  ;;  %v3180_v15 = vmax.f32 %v2474_v3, 0.0  ;;  %v11608_v43 = vld [vmem:[%s16505_s18 + $0x808] sm:$0xff] }
 0x189   : > { %v3179_v16 = vmax.f32 %v2469_v60, 0.0  ;;  %v14204_v2 = vpop.f32.mrb[76].mxu1  ;;  %15773 = vmatpush3.bf16.msra.mxu0 %v17001_v49  ;;  %v17341_v60 = vpop.f32.mrb[32].mxu0  ;;  %v11609_v49 = vld [vmem:[%s16505_s18 + $0x810] sm:$0xff] }
 0x18a   : > { %v2484_v20 = vadd.f32 %v14204_v2, %v17298_v21  ;;  %v2478_v33 = vpop.f32.mrb[77].mxu1  ;;  %14362 = vmatmul.mubr.msk.f32.gmra.mrb[182].mxu1 %vm437_vm0, %v11606_v61  ;;  %15775 = vmatprep.subr.bf16.mxu0 %v15774_v1  ;;  %v17345_v3 = vpop.f32.mrb[33].mxu0 }
 0x18b   : > { %v2479_v52 = vadd.f32 %v17298_v21, %v2478_v33  ;;  %14439 = vmatprep.mubr.msk.f32.mxu0 %vm3334_vm2, %v3179_v16  ;;  %14364 = vmatprep.mubr.msk.f32.mxu1 %vm437_vm0, %v11607_v5  ;;  %v11610_v16 = vld [vmem:[%s16505_s18 + $0x818] sm:$0xff] }
 0x18c   : > { %14440 = vmatmul.mubr.msk.f32.gmra.mrb[74].mxu0 %vm3334_vm2, %v3180_v15  ;;  %v3182_v56 = vmax.f32 %v2484_v20, 0.0  ;;  %v17353_v15 = vpop.f32.mrb[34].mxu0 }
 0x18d   : > { %v3181_v2 = vmax.f32 %v2479_v52, 0.0  ;;  %v14207_v61 = vpop.f32.mrb[78].mxu1  ;;  %15777 = vmatpush3.bf16.msra.mxu0 %v15774_v1  ;;  %v11611_v52 = vld [vmem:[%s16505_s18 + $0x820] sm:$0xff]  ;;  %v17357_v1 = vpop.f32.mrb[35].mxu0 }
 0x18e   : > { %v2494_v27 = vadd.f32 %v14207_v61, %v17298_v21  ;;  %v2488_v33 = vpop.f32.mrb[79].mxu1  ;;  %14365 = vmatmul.mubr.msk.f32.gmra.mrb[184].mxu1 %vm437_vm0, %v11608_v43  ;;  %15779 = vmatprep.subr.bf16.mxu0 %v15778_v57 }
 0x18f   : > { %v2489_v5 = vadd.f32 %v17298_v21, %v2488_v33  ;;  %14442 = vmatprep.mubr.msk.f32.mxu0 %vm3334_vm2, %v3181_v2  ;;  %14367 = vmatprep.mubr.msk.f32.mxu1 %vm437_vm0, %v11609_v49  ;;  %v11612_v2 = vld [vmem:[%s16505_s18 + $0x828] sm:$0xff] }
 0x190   : > { %14443 = vmatmul.mubr.msk.f32.gmra.mrb[76].mxu0 %vm3334_vm2, %v3182_v56  ;;  %v3184_v43 = vmax.f32 %v2494_v27, 0.0  ;;  %v17365_v56 = vpop.f32.mrb[36].mxu0 }
 0x191   : > { %v3183_v20 = vmax.f32 %v2489_v5, 0.0  ;;  %v14210_v61 = vpop.f32.mrb[80].mxu1  ;;  %15781 = vmatpush3.bf16.msra.mxu0 %v15778_v57  ;;  %v11613_v57 = vld [vmem:[%s16505_s18 + $0x830] sm:$0xff]  ;;  %v17369_v27 = vpop.f32.mrb[37].mxu0 }
 0x192   : > { %v2504_v33 = vadd.f32 %v14210_v61, %v17298_v21  ;;  %v2498_v53 = vpop.f32.mrb[81].mxu1  ;;  %14368 = vmatmul.mubr.msk.f32.gmra.mrb[186].mxu1 %vm437_vm0, %v11610_v16  ;;  %v17377_v48 = vpop.f32.mrb[38].mxu0 }
 0x193   : > { %v2499_v49 = vadd.f32 %v17298_v21, %v2498_v53  ;;  %14445 = vmatprep.mubr.msk.f32.mxu0 %vm3334_vm2, %v3183_v20  ;;  %14370 = vmatprep.mubr.msk.f32.mxu1 %vm437_vm0, %v11611_v52  ;;  %v11614_v52 = vld [vmem:[%s16505_s18 + $0x838] sm:$0xff] }
 0x194   : > { %14446 = vmatmul.mubr.msk.f32.gmra.mrb[78].mxu0 %vm3334_vm2, %v3184_v43  ;;  %v3186_v45 = vmax.f32 %v2504_v33, 0.0  ;;  %v11615_v43 = vld [vmem:[%s16505_s18 + $0x840] sm:$0xff] }
 0x195   : > { %v3185_v5 = vmax.f32 %v2499_v49, 0.0  ;;  %v14213_v61 = vpop.f32.mrb[82].mxu1  ;;  %v17381_v49 = vpop.f32.mrb[39].mxu0 }
 0x196   : > { %v2514_v16 = vadd.f32 %v14213_v61, %v17298_v21  ;;  %v2508_v53 = vpop.f32.mrb[83].mxu1  ;;  %14371 = vmatmul.mubr.msk.f32.gmra.mrb[188].mxu1 %vm437_vm0, %v11612_v2  ;;  %v1809_v2 = vld [vmem:[%s20007_s3 + $0x30] sm:$0xff]  ;;  %v17395_v35 = vpop.f32.mrb[40].mxu0 }
 0x197   : > { %v2509_v20 = vadd.f32 %v17298_v21, %v2508_v53  ;;  %14448 = vmatprep.mubr.msk.f32.mxu0 %vm3334_vm2, %v3185_v5  ;;  %14373 = vmatprep.mubr.msk.f32.mxu1 %vm437_vm0, %v11613_v57  ;;  %v1810_v57 = vld [vmem:[%s20007_s3 + $0x38] sm:$0xff] }
 0x198   : > { %14449 = vmatmul.mubr.msk.f32.gmra.mrb[80].mxu0 %vm3334_vm2, %v3186_v45  ;;  %v3188_v5 = vmax.f32 %v2514_v16, 0.0  ;;  %v15782_v45 = vpack.c.bf16 %v1810_v57, %v1809_v2  ;;  %v17399_v16 = vpop.f32.mrb[41].mxu0  ;;  %v11618_v57 = vld [vmem:[%s16505_s18 + $0x858] sm:$0xff] }
 0x199   : > { %v3187_v33 = vmax.f32 %v2509_v20, 0.0  ;;  %v14216_v61 = vpop.f32.mrb[84].mxu1  ;;  %v11616_v20 = vld [vmem:[%s16505_s18 + $0x848] sm:$0xff] }
 0x19a   : > { %v2524_v53 = vadd.f32 %v14216_v61, %v17298_v21  ;;  %v2518_v41 = vpop.f32.mrb[85].mxu1  ;;  %14374 = vmatmul.mubr.msk.f32.gmra.mrb[190].mxu1 %vm437_vm0, %v11614_v52  ;;  %15783 = vmatprep.subr.bf16.mxu0 %v15782_v45 }
 0x19b   : > { %v2519_v42 = vadd.f32 %v17298_v21, %v2518_v41  ;;  %14451 = vmatprep.mubr.msk.f32.mxu0 %vm3334_vm2, %v3187_v33  ;;  %14376 = vmatprep.mubr.msk.f32.mxu1 %vm437_vm0, %v11615_v43 }
 0x19c   : > { %14452 = vmatmul.mubr.msk.f32.gmra.mrb[82].mxu0 %vm3334_vm2, %v3188_v5  ;;  %v3190_v2 = vmax.f32 %v2524_v53, 0.0  ;;  %v17407_v5 = vpop.f32.mrb[42].mxu0 }
 0x19d   : > { %v3189_v61 = vmax.f32 %v2519_v42, 0.0  ;;  %v14219_v52 = vpop.f32.mrb[86].mxu1  ;;  %15785 = vmatpush3.bf16.msra.mxu0 %v15782_v45  ;;  %v11619_v42 = vld [vmem:[%s16505_s18 + $0x860] sm:$0xff]  ;;  %v17411_v53 = vpop.f32.mrb[43].mxu0 }
 0x19e   : > { %v2534_v41 = vadd.f32 %v14219_v52, %v17298_v21  ;;  %v2528_v33 = vpop.f32.mrb[87].mxu1  ;;  %14377 = vmatmul.mubr.msk.f32.gmra.mrb[192].mxu1 %vm437_vm0, %v11616_v20 }
 0x19f   : > { %v2529_v43 = vadd.f32 %v17298_v21, %v2528_v33  ;;  %14454 = vmatprep.mubr.msk.f32.mxu0 %vm3334_vm2, %v3189_v61  ;;  %14379 = vmatprep.mubr.msk.f32.mxu1 %vm437_vm0, %v11617_v37  ;;  %v11620_v37 = vld [vmem:[%s16505_s18 + $0x868] sm:$0xff] }
 0x1a0   : > { %14455 = vmatmul.mubr.msk.f32.gmra.mrb[84].mxu0 %vm3334_vm2, %v3190_v2  ;;  %v3192_v29 = vmax.f32 %v2534_v41, 0.0  ;;  %v17419_v2 = vpop.f32.mrb[44].mxu0 }
 0x1a1   : > { %v3191_v45 = vmax.f32 %v2529_v43, 0.0  ;;  %v14222_v52 = vpop.f32.mrb[88].mxu1  ;;  %v11621_v43 = vld [vmem:[%s16505_s18 + $0x870] sm:$0xff]  ;;  %v17423_v41 = vpop.f32.mrb[45].mxu0 }
 0x1a2   : > { %v2544_v20 = vadd.f32 %v14222_v52, %v17298_v21  ;;  %v2538_v33 = vpop.f32.mrb[89].mxu1  ;;  %14380 = vmatmul.mubr.msk.f32.gmra.mrb[194].mxu1 %vm437_vm0, %v11618_v57 }
 0x1a3   : > { %v2539_v61 = vadd.f32 %v17298_v21, %v2538_v33  ;;  %14457 = vmatprep.mubr.msk.f32.mxu0 %vm3334_vm2, %v3191_v45  ;;  %14382 = vmatprep.mubr.msk.f32.mxu1 %vm437_vm0, %v11619_v42  ;;  %v11622_v42 = vld [vmem:[%s16505_s18 + $0x878] sm:$0xff] }
 0x1a4   : > { %14458 = vmatmul.mubr.msk.f32.gmra.mrb[86].mxu0 %vm3334_vm2, %v3192_v29  ;;  %v3194_v23 = vmax.f32 %v2544_v20, 0.0  ;;  %v17431_v29 = vpop.f32.mrb[46].mxu0 }
 0x1a5   : > { %v3193_v52 = vmax.f32 %v2539_v61, 0.0  ;;  %v14225_v31 = vpop.f32.mrb[90].mxu1  ;;  %20084 = vst [vmem:[#allocation75_spill] sm:$0xff] %v17431_v29  ;;  %v11623_v61 = vld [vmem:[%s16505_s18 + $0x880] sm:$0xff]  ;;  %v17435_v20 = vpop.f32.mrb[47].mxu0 }
 0x1a6   : > { %v2554_v57 = vadd.f32 %v14225_v31, %v17298_v21  ;;  %v2548_v33 = vpop.f32.mrb[91].mxu1  ;;  %14383 = vmatmul.mubr.msk.f32.gmra.mrb[196].mxu1 %vm437_vm0, %v11620_v37 }
 0x1a7   : > { %v2549_v45 = vadd.f32 %v17298_v21, %v2548_v33  ;;  %14460 = vmatprep.mubr.msk.f32.mxu0 %vm3334_vm2, %v3193_v52  ;;  %14385 = vmatprep.mubr.msk.f32.mxu1 %vm437_vm0, %v11621_v43  ;;  %v11624_v43 = vld [vmem:[%s16505_s18 + $0x888] sm:$0xff] }
 0x1a8   : > { %14461 = vmatmul.mubr.msk.f32.gmra.mrb[88].mxu0 %vm3334_vm2, %v3194_v23  ;;  %v3196_v18 = vmax.f32 %v2554_v57, 0.0  ;;  %v17443_v23 = vpop.f32.mrb[48].mxu0 }
 0x1a9   : > { %v3195_v31 = vmax.f32 %v2549_v45, 0.0  ;;  %v14228_v25 = vpop.f32.mrb[92].mxu1  ;;  %20085 = vst [vmem:[#allocation76_spill] sm:$0xff] %v17443_v23  ;;  %v11625_v45 = vld [vmem:[%s16505_s18 + $0x890] sm:$0xff]  ;;  %v17447_v57 = vpop.f32.mrb[49].mxu0 }
 0x1aa   : > { %v2564_v37 = vadd.f32 %v14228_v25, %v17298_v21  ;;  %v2558_v33 = vpop.f32.mrb[93].mxu1  ;;  %14386 = vmatmul.mubr.msk.f32.gmra.mrb[198].mxu1 %vm437_vm0, %v11622_v42  ;;  %20086 = vst [vmem:[#allocation77_spill] sm:$0xff] %v17447_v57 }
 0x1ab   : > { %v2559_v52 = vadd.f32 %v17298_v21, %v2558_v33  ;;  %14463 = vmatprep.mubr.msk.f32.mxu0 %vm3334_vm2, %v3195_v31  ;;  %14388 = vmatprep.mubr.msk.f32.mxu1 %vm437_vm0, %v11623_v61  ;;  %v11626_v61 = vld [vmem:[%s16505_s18 + $0x898] sm:$0xff] }
 0x1ac   : > { %14464 = vmatmul.mubr.msk.f32.gmra.mrb[90].mxu0 %vm3334_vm2, %v3196_v18  ;;  %v3198_v11 = vmax.f32 %v2564_v37, 0.0  ;;  %v17455_v18 = vpop.f32.mrb[50].mxu0 }
 0x1ad   : > { %v3197_v25 = vmax.f32 %v2559_v52, 0.0  ;;  %v14231_v19 = vpop.f32.mrb[94].mxu1  ;;  %20087 = vst [vmem:[#allocation78_spill] sm:$0xff] %v17455_v18  ;;  %v11627_v52 = vld [vmem:[%s16505_s18 + $0x8a0] sm:$0xff]  ;;  %v17459_v37 = vpop.f32.mrb[51].mxu0 }
 0x1ae   : > { %v2574_v42 = vadd.f32 %v14231_v19, %v17298_v21  ;;  %v2568_v33 = vpop.f32.mrb[95].mxu1  ;;  %14389 = vmatmul.mubr.msk.f32.gmra.mrb[200].mxu1 %vm437_vm0, %v11624_v43  ;;  %20088 = vst [vmem:[#allocation79_spill] sm:$0xff] %v17459_v37 }
 0x1af   : > { %v2569_v31 = vadd.f32 %v17298_v21, %v2568_v33  ;;  %14466 = vmatprep.mubr.msk.f32.mxu0 %vm3334_vm2, %v3197_v25  ;;  %14391 = vmatprep.mubr.msk.f32.mxu1 %vm437_vm0, %v11625_v45  ;;  %v11628_v45 = vld [vmem:[%s16505_s18 + $0x8a8] sm:$0xff] }
 0x1b0   : > { %14467 = vmatmul.mubr.msk.f32.gmra.mrb[92].mxu0 %vm3334_vm2, %v3198_v11  ;;  %v3200_v23 = vmax.f32 %v2574_v42, 0.0  ;;  %v17467_v11 = vpop.f32.mrb[52].mxu0 }
 0x1b1   : > { %v3199_v19 = vmax.f32 %v2569_v31, 0.0  ;;  %v14234_v13 = vpop.f32.mrb[96].mxu1  ;;  %20089 = vst [vmem:[#allocation80_spill] sm:$0xff] %v17467_v11  ;;  %v11629_v31 = vld [vmem:[%s16505_s18 + $0x8b0] sm:$0xff]  ;;  %v17471_v42 = vpop.f32.mrb[53].mxu0 }
 0x1b2   : > { %v2584_v43 = vadd.f32 %v14234_v13, %v17298_v21  ;;  %v2578_v33 = vpop.f32.mrb[97].mxu1  ;;  %14392 = vmatmul.mubr.msk.f32.gmra.mrb[202].mxu1 %vm437_vm0, %v11626_v61  ;;  %20090 = vst [vmem:[#allocation81_spill] sm:$0xff] %v17471_v42 }
 0x1b3   : > { %v2579_v25 = vadd.f32 %v17298_v21, %v2578_v33  ;;  %14469 = vmatprep.mubr.msk.f32.mxu0 %vm3334_vm2, %v3199_v19  ;;  %14394 = vmatprep.mubr.msk.f32.mxu1 %vm437_vm0, %v11627_v52  ;;  %v11630_v52 = vld [vmem:[%s16505_s18 + $0x8b8] sm:$0xff] }
 0x1b4   : > { %14470 = vmatmul.mubr.msk.f32.gmra.mrb[94].mxu0 %vm3334_vm2, %v3200_v23  ;;  %v3202_v37 = vmax.f32 %v2584_v43, 0.0  ;;  %v17479_v23 = vpop.f32.mrb[54].mxu0 }
 0x1b5   : > { %v3201_v13 = vmax.f32 %v2579_v25, 0.0  ;;  %v14237_v18 = vpop.f32.mrb[98].mxu1  ;;  %20091 = vst [vmem:[#allocation82_spill] sm:$0xff] %v17479_v23  ;;  %v11631_v25 = vld [vmem:[%s16505_s18 + $0x8c0] sm:$0xff]  ;;  %v17483_v43 = vpop.f32.mrb[55].mxu0 }
 0x1b6   : > { %v2594_v61 = vadd.f32 %v14237_v18, %v17298_v21  ;;  %v2588_v33 = vpop.f32.mrb[99].mxu1  ;;  %14395 = vmatmul.mubr.msk.f32.gmra.mrb[204].mxu1 %vm437_vm0, %v11628_v45  ;;  %20092 = vst [vmem:[#allocation83_spill] sm:$0xff] %v17483_v43 }
 0x1b7   : > { %v2589_v19 = vadd.f32 %v17298_v21, %v2588_v33  ;;  %14472 = vmatprep.mubr.msk.f32.mxu0 %vm3334_vm2, %v3201_v13  ;;  %14397 = vmatprep.mubr.msk.f32.mxu1 %vm437_vm0, %v11629_v31  ;;  %v11632_v31 = vld [vmem:[%s16505_s18 + $0x8c8] sm:$0xff] }
 0x1b8   : > { %14473 = vmatmul.mubr.msk.f32.gmra.mrb[96].mxu0 %vm3334_vm2, %v3202_v37  ;;  %v3204_v42 = vmax.f32 %v2594_v61, 0.0  ;;  %v17491_v37 = vpop.f32.mrb[56].mxu0 }
 0x1b9   : > { %v3203_v18 = vmax.f32 %v2589_v19, 0.0  ;;  %v14240_v11 = vpop.f32.mrb[100].mxu1  ;;  %20093 = vst [vmem:[#allocation84_spill] sm:$0xff] %v17491_v37  ;;  %v11633_v19 = vld [vmem:[%s16505_s18 + $0x8d0] sm:$0xff]  ;;  %v17495_v61 = vpop.f32.mrb[57].mxu0 }
 0x1ba   : > { %v2604_v45 = vadd.f32 %v14240_v11, %v17298_v21  ;;  %v2598_v33 = vpop.f32.mrb[101].mxu1  ;;  %14398 = vmatmul.mubr.msk.f32.gmra.mrb[206].mxu1 %vm437_vm0, %v11630_v52  ;;  %20094 = vst [vmem:[#allocation85_spill] sm:$0xff] %v17495_v61 }
 0x1bb   : > { %v2599_v13 = vadd.f32 %v17298_v21, %v2598_v33  ;;  %14475 = vmatprep.mubr.msk.f32.mxu0 %vm3334_vm2, %v3203_v18  ;;  %14400 = vmatprep.mubr.msk.f32.mxu1 %vm437_vm0, %v11631_v25  ;;  %v11634_v25 = vld [vmem:[%s16505_s18 + $0x8d8] sm:$0xff] }
 0x1bc   : > { %14476 = vmatmul.mubr.msk.f32.gmra.mrb[98].mxu0 %vm3334_vm2, %v3204_v42  ;;  %v3206_v43 = vmax.f32 %v2604_v45, 0.0  ;;  %v17503_v42 = vpop.f32.mrb[58].mxu0 }
 0x1bd   : > { %v3205_v11 = vmax.f32 %v2599_v13, 0.0  ;;  %v14243_v23 = vpop.f32.mrb[102].mxu1  ;;  %20095 = vst [vmem:[#allocation86_spill] sm:$0xff] %v17503_v42  ;;  %v11635_v13 = vld [vmem:[%s16505_s18 + $0x8e0] sm:$0xff]  ;;  %v17507_v45 = vpop.f32.mrb[59].mxu0 }
 0x1be   : > { %v2614_v52 = vadd.f32 %v14243_v23, %v17298_v21  ;;  %v2608_v33 = vpop.f32.mrb[103].mxu1  ;;  %14401 = vmatmul.mubr.msk.f32.gmra.mrb[208].mxu1 %vm437_vm0, %v11632_v31  ;;  %20096 = vst [vmem:[#allocation87_spill] sm:$0xff] %v17507_v45 }
 0x1bf   : > { %v2609_v18 = vadd.f32 %v17298_v21, %v2608_v33  ;;  %14478 = vmatprep.mubr.msk.f32.mxu0 %vm3334_vm2, %v3205_v11  ;;  %14403 = vmatprep.mubr.msk.f32.mxu1 %vm437_vm0, %v11633_v19  ;;  %v11636_v19 = vld [vmem:[%s16505_s18 + $0x8e8] sm:$0xff] }
 0x1c0   : > { %14479 = vmatmul.mubr.msk.f32.gmra.mrb[100].mxu0 %vm3334_vm2, %v3206_v43  ;;  %v3208_v61 = vmax.f32 %v2614_v52, 0.0  ;;  %v17515_v43 = vpop.f32.mrb[60].mxu0 }
 0x1c1   : > { %v3207_v23 = vmax.f32 %v2609_v18, 0.0  ;;  %v14246_v37 = vpop.f32.mrb[104].mxu1  ;;  %20097 = vst [vmem:[#allocation88_spill] sm:$0xff] %v17515_v43  ;;  %v11637_v18 = vld [vmem:[%s16505_s18 + $0x8f0] sm:$0xff]  ;;  %v17519_v42 = vpop.f32.mrb[61].mxu0 }
 0x1c2   : > { %v2618_v31 = vpop.f32.mrb[105].mxu1  ;;  %14404 = vmatmul.mubr.msk.f32.gmra.mrb[210].mxu1 %vm437_vm0, %v11634_v25  ;;  %v2624_v33 = vadd.f32 %v14246_v37, %v17298_v21  ;;  %20098 = vst [vmem:[#allocation89_spill] sm:$0xff] %v17519_v42  ;;  %v17527_v43 = vpop.f32.mrb[62].mxu0 }
 0x1c3   : > { %14481 = vmatprep.mubr.msk.f32.mxu0 %vm3334_vm2, %v3207_v23  ;;  %14406 = vmatprep.mubr.msk.f32.mxu1 %vm437_vm0, %v11635_v13  ;;  %v2619_v11 = vadd.f32 %v17298_v21, %v2618_v31  ;;  %v11638_v13 = vld [vmem:[%s16505_s18 + $0x8f8] sm:$0xff]  ;;  %20099 = vst [vmem:[#allocation90_spill] sm:$0xff] %v17527_v43 }
 0x1c4   : > { %14482 = vmatmul.mubr.msk.f32.gmra.mrb[102].mxu0 %vm3334_vm2, %v3208_v61  ;;  %v3210_v37 = vmax.f32 %v2624_v33, 0.0  ;;  %v17530_v61 = vpop.f32.mrb[63].mxu0  ;;  %v1811_v33 = vld [vmem:[%s20007_s3 + $0x40] sm:$0xff] }
 0x1c5   : > { %v14249_v52 = vpop.f32.mrb[106].mxu1  ;;  %v3209_v45 = vmax.f32 %v2619_v11, 0.0  ;;  %20100 = vst [vmem:[#allocation91_spill] sm:$0xff] %v17530_v61 }
 0x1c6   : > { %v2628_v25 = vpop.f32.mrb[107].mxu1  ;;  %14407 = vmatmul.mubr.msk.f32.gmra.mrb[212].mxu1 %vm437_vm0, %v11636_v19  ;;  %v2634_v23 = vadd.f32 %v14249_v52, %v17298_v21 }
 0x1c7   : > { %14484 = vmatprep.mubr.msk.f32.mxu0 %vm3334_vm2, %v3209_v45  ;;  %14409 = vmatprep.mubr.msk.f32.mxu1 %vm437_vm0, %v11637_v18  ;;  %v2629_v31 = vadd.f32 %v17298_v21, %v2628_v25  ;;  %v1812_v45 = vld [vmem:[%s20007_s3 + $0x48] sm:$0xff] }
 0x1c8   : > { %14485 = vmatmul.mubr.msk.f32.gmra.mrb[104].mxu0 %vm3334_vm2, %v3210_v37  ;;  %v3212_v18 = vmax.f32 %v2634_v23, 0.0  ;;  %v15786_v25 = vpack.c.bf16 %v1812_v45, %v1811_v33 }
 0x1c9   : > { %v14252_v11 = vpop.f32.mrb[108].mxu1  ;;  %v3211_v42 = vmax.f32 %v2629_v31, 0.0  ;;  %v17542_v31 = vpop.f32.mrb[64].mxu0 }
 0x1ca   : > { %v2638_v19 = vpop.f32.mrb[109].mxu1  ;;  %14410 = vmatmul.mubr.msk.f32.gmra.mrb[214].mxu1 %vm437_vm0, %v11638_v13  ;;  %v2644_v52 = vadd.f32 %v14252_v11, %v17298_v21  ;;  %20101 = vst [vmem:[#allocation92_spill] sm:$0xff] %v17542_v31  ;;  %15787 = vmatprep.subr.bf16.mxu0 %v15786_v25  ;;  %v17545_v43 = vpop.f32.mrb[65].mxu0 }
 0x1cb   : > { %14487 = vmatprep.mubr.msk.f32.mxu0 %vm3334_vm2, %v3211_v42  ;;  %v2639_v37 = vadd.f32 %v17298_v21, %v2638_v19  ;;  %15789 = vmatpush3.bf16.msra.mxu0 %v15786_v25  ;;  %v17550_v11 = vpop.f32.mrb[66].mxu0 }
 0x1cc   : > { %14488 = vmatmul.mubr.msk.f32.gmra.mrb[106].mxu0 %vm3334_vm2, %v3212_v18  ;;  %v3214_v13 = vmax.f32 %v2644_v52, 0.0  ;;  %20102 = vst [vmem:[#allocation93_spill] sm:$0xff] %v17550_v11  ;;  %v17553_v33 = vpop.f32.mrb[67].mxu0 }
 0x1cd   : > { %v14255_v61 = vpop.f32.mrb[110].mxu1  ;;  %v3213_v57 = vmax.f32 %v2639_v37, 0.0  ;;  %20103 = vst [vmem:[#allocation94_spill] sm:$0xff] %v17553_v33  ;;  %v17558_v52 = vpop.f32.mrb[68].mxu0 }
 0x1ce   : > { %v2648_v29 = vpop.f32.mrb[111].mxu1  ;;  %v2654_v23 = vadd.f32 %v14255_v61, %v17298_v21  ;;  %20104 = vst [vmem:[#allocation95_spill] sm:$0xff] %v17558_v52 }
 0x1cf   : > { %14490 = vmatprep.mubr.msk.f32.mxu0 %vm3334_vm2, %v3213_v57  ;;  %v2649_v42 = vadd.f32 %v17298_v21, %v2648_v29  ;;  %v17561_v29 = vpop.f32.mrb[69].mxu0 }
 0x1d0   : > { %14491 = vmatmul.mubr.msk.f32.gmra.mrb[108].mxu0 %vm3334_vm2, %v3214_v13  ;;  %v3216_v31 = vmax.f32 %v2654_v23, 0.0  ;;  %20105 = vst [vmem:[#allocation96_spill] sm:$0xff] %v17561_v29 }
 0x1d1   : > { %v14258_v45 = vpop.f32.mrb[112].mxu1  ;;  %v3215_v19 = vmax.f32 %v2649_v42, 0.0 }
 0x1d2   : > { %v2658_v18 = vpop.f32.mrb[113].mxu1  ;;  %v2664_v25 = vadd.f32 %v14258_v45, %v17298_v21  ;;  %v17566_v45 = vpop.f32.mrb[70].mxu0 }
 0x1d3   : > { %14493 = vmatprep.mubr.msk.f32.mxu0 %vm3334_vm2, %v3215_v19  ;;  %v2659_v61 = vadd.f32 %v17298_v21, %v2658_v18  ;;  %20106 = vst [vmem:[#allocation97_spill] sm:$0xff] %v17566_v45  ;;  %v17569_v19 = vpop.f32.mrb[71].mxu0 }
 0x1d4   : > { %14494 = vmatmul.mubr.msk.f32.gmra.mrb[110].mxu0 %vm3334_vm2, %v3216_v31  ;;  %v3218_v11 = vmax.f32 %v2664_v25, 0.0  ;;  %20107 = vst [vmem:[#allocation98_spill] sm:$0xff] %v17569_v19 }
 0x1d5   : > { %v14261_v57 = vpop.f32.mrb[114].mxu1  ;;  %v3217_v37 = vmax.f32 %v2659_v61, 0.0 }
 0x1d6   : > { %v2668_v13 = vpop.f32.mrb[115].mxu1  ;;  %v2674_v42 = vadd.f32 %v14261_v57, %v17298_v21 }
 0x1d7   : > { %14496 = vmatprep.mubr.msk.f32.mxu0 %vm3334_vm2, %v3217_v37  ;;  %v2669_v23 = vadd.f32 %v17298_v21, %v2668_v13 }
 0x1d8   : > { %14497 = vmatmul.mubr.msk.f32.gmra.mrb[112].mxu0 %vm3334_vm2, %v3218_v11  ;;  %v3220_v29 = vmax.f32 %v2674_v42, 0.0 }
 0x1d9   : > { %v14264_v18 = vpop.f32.mrb[116].mxu1  ;;  %v3219_v31 = vmax.f32 %v2669_v23, 0.0 }
 0x1da   : > { %v2678_v52 = vpop.f32.mrb[117].mxu1  ;;  %v2684_v61 = vadd.f32 %v14264_v18, %v17298_v21 }
 0x1db   : > { %14499 = vmatprep.mubr.msk.f32.mxu0 %vm3334_vm2, %v3219_v31  ;;  %v2679_v25 = vadd.f32 %v17298_v21, %v2678_v52 }
 0x1dc   : > { %14500 = vmatmul.mubr.msk.f32.gmra.mrb[114].mxu0 %vm3334_vm2, %v3220_v29  ;;  %v3222_v45 = vmax.f32 %v2684_v61, 0.0 }
 0x1dd   : > { %v14267_v57 = vpop.f32.mrb[118].mxu1  ;;  %v3221_v37 = vmax.f32 %v2679_v25, 0.0 }
 0x1de   : > { %v2688_v13 = vpop.f32.mrb[119].mxu1  ;;  %v2694_v11 = vadd.f32 %v14267_v57, %v17298_v21 }
 0x1df   : > { %14502 = vmatprep.mubr.msk.f32.mxu0 %vm3334_vm2, %v3221_v37  ;;  %v2689_v23 = vadd.f32 %v17298_v21, %v2688_v13 }
 0x1e0   : > { %14503 = vmatmul.mubr.msk.f32.gmra.mrb[116].mxu0 %vm3334_vm2, %v3222_v45  ;;  %v3224_v52 = vmax.f32 %v2694_v11, 0.0 }
 0x1e1   : > { %v14270_v42 = vpop.f32.mrb[120].mxu1  ;;  %v3223_v18 = vmax.f32 %v2689_v23, 0.0 }
 0x1e2   : > { %v2704_v31 = vadd.f32 %v14270_v42, %v17298_v21  ;;  %v2698_v19 = vpop.f32.mrb[121].mxu1 }
 0x1e3   : > { %v2699_v29 = vadd.f32 %v17298_v21, %v2698_v19  ;;  %14505 = vmatprep.mubr.msk.f32.mxu0 %vm3334_vm2, %v3223_v18 }
 0x1e4   : > { %14506 = vmatmul.mubr.msk.f32.gmra.mrb[118].mxu0 %vm3334_vm2, %v3224_v52  ;;  %v3226_v57 = vmax.f32 %v2704_v31, 0.0 }
 0x1e5   : > { %v3225_v61 = vmax.f32 %v2699_v29, 0.0  ;;  %v14273_v25 = vpop.f32.mrb[122].mxu1 }
 0x1e6   : > { %v2714_v37 = vadd.f32 %v14273_v25, %v17298_v21  ;;  %v2708_v13 = vpop.f32.mrb[123].mxu1 }
 0x1e7   : > { %v2709_v45 = vadd.f32 %v17298_v21, %v2708_v13  ;;  %14508 = vmatprep.mubr.msk.f32.mxu0 %vm3334_vm2, %v3225_v61 }
 0x1e8   : > { %14509 = vmatmul.mubr.msk.f32.gmra.mrb[120].mxu0 %vm3334_vm2, %v3226_v57  ;;  %v3228_v42 = vmax.f32 %v2714_v37, 0.0 }
 0x1e9   : > { %v3227_v23 = vmax.f32 %v2709_v45, 0.0  ;;  %v14276_v11 = vpop.f32.mrb[124].mxu1 }
 0x1ea   : > { %v2724_v19 = vadd.f32 %v14276_v11, %v17298_v21  ;;  %v2718_v18 = vpop.f32.mrb[125].mxu1 }
 0x1eb   : > { %v2719_v52 = vadd.f32 %v17298_v21, %v2718_v18  ;;  %14511 = vmatprep.mubr.msk.f32.mxu0 %vm3334_vm2, %v3227_v23 }
 0x1ec   : > { %14512 = vmatmul.mubr.msk.f32.gmra.mrb[122].mxu0 %vm3334_vm2, %v3228_v42  ;;  %v3230_v25 = vmax.f32 %v2724_v19, 0.0 }
 0x1ed   : > { %v3229_v31 = vmax.f32 %v2719_v52, 0.0  ;;  %v14279_v29 = vpop.f32.mrb[126].mxu1 }
 0x1ee   : > { %v2734_v13 = vadd.f32 %v14279_v29, %v17298_v21  ;;  %v2728_v61 = vpop.f32.mrb[127].mxu1 }
 0x1ef   : > { %v2729_v57 = vadd.f32 %v17298_v21, %v2728_v61  ;;  %14514 = vmatprep.mubr.msk.f32.mxu0 %vm3334_vm2, %v3229_v31 }
 0x1f0   : > { %14515 = vmatmul.mubr.msk.f32.gmra.mrb[124].mxu0 %vm3334_vm2, %v3230_v25  ;;  %v3232_v11 = vmax.f32 %v2734_v13, 0.0 }
 0x1f1   : > { %v3231_v37 = vmax.f32 %v2729_v57, 0.0  ;;  %v14282_v45 = vpop.f32.mrb[128].mxu1 }
 0x1f2   : > { %v2744_v18 = vadd.f32 %v14282_v45, %v17298_v21  ;;  %v2738_v23 = vpop.f32.mrb[129].mxu1  ;;  %v1814_v45 = vld [vmem:[%s20007_s3 + $0x58] sm:$0xff] }
 0x1f3   : > { %v2739_v42 = vadd.f32 %v17298_v21, %v2738_v23  ;;  %14517 = vmatprep.mubr.msk.f32.mxu0 %vm3334_vm2, %v3231_v37  ;;  %v1813_v37 = vld [vmem:[%s20007_s3 + $0x50] sm:$0xff] }
 0x1f4   : > { %14518 = vmatmul.mubr.msk.f32.gmra.mrb[126].mxu0 %vm3334_vm2, %v3232_v11  ;;  %v3234_v29 = vmax.f32 %v2744_v18, 0.0 }
 0x1f5   : > { %v3233_v19 = vmax.f32 %v2739_v42, 0.0  ;;  %v14285_v52 = vpop.f32.mrb[130].mxu1  ;;  %v15790_v42 = vpack.c.bf16 %v1814_v45, %v1813_v37 }
 0x1f6   : > { %v2754_v61 = vadd.f32 %v14285_v52, %v17298_v21  ;;  %v2748_v31 = vpop.f32.mrb[131].mxu1 }
 0x1f7   : > { %v2749_v25 = vadd.f32 %v17298_v21, %v2748_v31  ;;  %14520 = vmatprep.mubr.msk.f32.mxu0 %vm3334_vm2, %v3233_v19  ;;  %15791 = vmatprep.subr.bf16.mxu0 %v15790_v42 }
 0x1f8   : > { %14521 = vmatmul.mubr.msk.f32.gmra.mrb[128].mxu0 %vm3334_vm2, %v3234_v29  ;;  %v3236_v11 = vmax.f32 %v2754_v61, 0.0 }
 0x1f9   : > { %v3235_v13 = vmax.f32 %v2749_v25, 0.0  ;;  %v14288_v57 = vpop.f32.mrb[132].mxu1  ;;  %15793 = vmatpush3.bf16.msra.mxu0 %v15790_v42 }
 0x1fa   : > { %v2764_v18 = vadd.f32 %v14288_v57, %v17298_v21  ;;  %v2758_v23 = vpop.f32.mrb[133].mxu1 }
 0x1fb   : > { %v2759_v52 = vadd.f32 %v17298_v21, %v2758_v23  ;;  %14523 = vmatprep.mubr.msk.f32.mxu0 %vm3334_vm2, %v3235_v13 }
 0x1fc   : > { %14524 = vmatmul.mubr.msk.f32.gmra.mrb[130].mxu0 %vm3334_vm2, %v3236_v11  ;;  %v3238_v31 = vmax.f32 %v2764_v18, 0.0 }
 0x1fd   : > { %v3237_v19 = vmax.f32 %v2759_v52, 0.0  ;;  %v14291_v29 = vpop.f32.mrb[134].mxu1 }
 0x1fe   : > { %v2774_v25 = vadd.f32 %v14291_v29, %v17298_v21  ;;  %v2768_v33 = vpop.f32.mrb[135].mxu1 }
 0x1ff   : > { %v2769_v61 = vadd.f32 %v17298_v21, %v2768_v33  ;;  %14526 = vmatprep.mubr.msk.f32.mxu0 %vm3334_vm2, %v3237_v19 }
 0x200   : > { %14527 = vmatmul.mubr.msk.f32.gmra.mrb[132].mxu0 %vm3334_vm2, %v3238_v31  ;;  %v3240_v45 = vmax.f32 %v2774_v25, 0.0 }
 0x201   : > { %v3239_v57 = vmax.f32 %v2769_v61, 0.0  ;;  %v14294_v37 = vpop.f32.mrb[136].mxu1 }
 0x202   : > { %v2784_v13 = vadd.f32 %v14294_v37, %v17298_v21  ;;  %v2778_v11 = vpop.f32.mrb[137].mxu1 }
 0x203   : > { %v2779_v23 = vadd.f32 %v17298_v21, %v2778_v11  ;;  %14529 = vmatprep.mubr.msk.f32.mxu0 %vm3334_vm2, %v3239_v57 }
 0x204   : > { %14530 = vmatmul.mubr.msk.f32.gmra.mrb[134].mxu0 %vm3334_vm2, %v3240_v45  ;;  %v3242_v52 = vmax.f32 %v2784_v13, 0.0 }
 0x205   : > { %v3241_v18 = vmax.f32 %v2779_v23, 0.0  ;;  %v14297_v42 = vpop.f32.mrb[138].mxu1 }
 0x206   : > { %v2794_v33 = vadd.f32 %v14297_v42, %v17298_v21  ;;  %v2788_v19 = vpop.f32.mrb[139].mxu1 }
 0x207   : > { %v2789_v29 = vadd.f32 %v17298_v21, %v2788_v19  ;;  %14532 = vmatprep.mubr.msk.f32.mxu0 %vm3334_vm2, %v3241_v18 }
 0x208   : > { %14533 = vmatmul.mubr.msk.f32.gmra.mrb[136].mxu0 %vm3334_vm2, %v3242_v52  ;;  %v3244_v61 = vmax.f32 %v2794_v33, 0.0 }
 0x209   : > { %v3243_v31 = vmax.f32 %v2789_v29, 0.0  ;;  %v14300_v25 = vpop.f32.mrb[140].mxu1 }
 0x20a   : > { %v2804_v37 = vadd.f32 %v14300_v25, %v17298_v21  ;;  %v2798_v57 = vpop.f32.mrb[141].mxu1 }
 0x20b   : > { %v2799_v45 = vadd.f32 %v17298_v21, %v2798_v57  ;;  %14535 = vmatprep.mubr.msk.f32.mxu0 %vm3334_vm2, %v3243_v31 }
 0x20c   : > { %14536 = vmatmul.mubr.msk.f32.gmra.mrb[138].mxu0 %vm3334_vm2, %v3244_v61  ;;  %v3246_v23 = vmax.f32 %v2804_v37, 0.0 }
 0x20d   : > { %v3245_v13 = vmax.f32 %v2799_v45, 0.0  ;;  %v14303_v11 = vpop.f32.mrb[142].mxu1 }
 0x20e   : > { %v2814_v42 = vadd.f32 %v14303_v11, %v17298_v21  ;;  %v2808_v18 = vpop.f32.mrb[143].mxu1 }
 0x20f   : > { %v2809_v52 = vadd.f32 %v17298_v21, %v2808_v18  ;;  %14538 = vmatprep.mubr.msk.f32.mxu0 %vm3334_vm2, %v3245_v13 }
 0x210   : > { %14539 = vmatmul.mubr.msk.f32.gmra.mrb[140].mxu0 %vm3334_vm2, %v3246_v23  ;;  %v3248_v29 = vmax.f32 %v2814_v42, 0.0 }
 0x211   : > { %v3247_v33 = vmax.f32 %v2809_v52, 0.0  ;;  %v14306_v19 = vpop.f32.mrb[144].mxu1 }
 0x212   : > { %v2824_v25 = vadd.f32 %v14306_v19, %v17298_v21  ;;  %v2818_v31 = vpop.f32.mrb[145].mxu1 }
 0x213   : > { %v2819_v61 = vadd.f32 %v17298_v21, %v2818_v31  ;;  %14541 = vmatprep.mubr.msk.f32.mxu0 %vm3334_vm2, %v3247_v33 }
 0x214   : > { %14542 = vmatmul.mubr.msk.f32.gmra.mrb[142].mxu0 %vm3334_vm2, %v3248_v29  ;;  %v3250_v45 = vmax.f32 %v2824_v25, 0.0 }
 0x215   : > { %v3249_v37 = vmax.f32 %v2819_v61, 0.0  ;;  %v14309_v57 = vpop.f32.mrb[146].mxu1 }
 0x216   : > { %v2834_v11 = vadd.f32 %v14309_v57, %v17298_v21  ;;  %v2828_v13 = vpop.f32.mrb[147].mxu1 }
 0x217   : > { %v2829_v23 = vadd.f32 %v17298_v21, %v2828_v13  ;;  %14544 = vmatprep.mubr.msk.f32.mxu0 %vm3334_vm2, %v3249_v37 }
 0x218   : > { %14545 = vmatmul.mubr.msk.f32.gmra.mrb[144].mxu0 %vm3334_vm2, %v3250_v45  ;;  %v3252_v52 = vmax.f32 %v2834_v11, 0.0 }
 0x219   : > { %v3251_v42 = vmax.f32 %v2829_v23, 0.0  ;;  %v14312_v18 = vpop.f32.mrb[148].mxu1 }
 0x21a   : > { %v2844_v19 = vadd.f32 %v14312_v18, %v17298_v21  ;;  %v2838_v33 = vpop.f32.mrb[149].mxu1 }
 0x21b   : > { %v2839_v29 = vadd.f32 %v17298_v21, %v2838_v33  ;;  %14547 = vmatprep.mubr.msk.f32.mxu0 %vm3334_vm2, %v3251_v42 }
 0x21c   : > { %14548 = vmatmul.mubr.msk.f32.gmra.mrb[146].mxu0 %vm3334_vm2, %v3252_v52  ;;  %v3254_v61 = vmax.f32 %v2844_v19, 0.0 }
 0x21d   : > { %v3253_v25 = vmax.f32 %v2839_v29, 0.0  ;;  %v14315_v31 = vpop.f32.mrb[150].mxu1 }
 0x21e   : > { %v2854_v57 = vadd.f32 %v14315_v31, %v17298_v21  ;;  %v2848_v37 = vpop.f32.mrb[151].mxu1 }
 0x21f   : > { %v2849_v45 = vadd.f32 %v17298_v21, %v2848_v37  ;;  %14550 = vmatprep.mubr.msk.f32.mxu0 %vm3334_vm2, %v3253_v25  ;;  %v12374_v37 = vld [vmem:[%s20007_s3 + $0xc8] sm:$0xff] }
 0x220   : > { %14551 = vmatmul.mubr.msk.f32.gmra.mrb[148].mxu0 %vm3334_vm2, %v3254_v61  ;;  %v3256_v23 = vmax.f32 %v2854_v57, 0.0  ;;  %v12373_v57 = vld [vmem:[%s20007_s3 + $0xc0] sm:$0xff] }
 0x221   : > { %v3255_v11 = vmax.f32 %v2849_v45, 0.0  ;;  %v14318_v13 = vpop.f32.mrb[152].mxu1 }
 0x222   : > { %v2864_v18 = vadd.f32 %v14318_v13, %v17298_v21  ;;  %v2858_v42 = vpop.f32.mrb[153].mxu1  ;;  %v17663_v13 = vpack.c.bf16 %v12374_v37, %v12373_v57 }
 0x223   : > { %v2859_v52 = vadd.f32 %v17298_v21, %v2858_v42  ;;  %14553 = vmatprep.mubr.msk.f32.mxu0 %vm3334_vm2, %v3255_v11 }
 0x224   : > { %14554 = vmatmul.mubr.msk.f32.gmra.mrb[150].mxu0 %vm3334_vm2, %v3256_v23  ;;  %v3258_v29 = vmax.f32 %v2864_v18, 0.0  ;;  %15807 = vmatprep.subr.bf16.mxu0 %v17663_v13 }
 0x225   : > { %v3257_v19 = vmax.f32 %v2859_v52, 0.0  ;;  %v14321_v33 = vpop.f32.mrb[154].mxu1 }
 0x226   : > { %v2874_v31 = vadd.f32 %v14321_v33, %v17298_v21  ;;  %v2868_v25 = vpop.f32.mrb[155].mxu1 }
 0x227   : > { %v2869_v61 = vadd.f32 %v17298_v21, %v2868_v25  ;;  %14556 = vmatprep.mubr.msk.f32.mxu0 %vm3334_vm2, %v3257_v19 }
 0x228   : > { %14557 = vmatmul.mubr.msk.f32.gmra.mrb[152].mxu0 %vm3334_vm2, %v3258_v29  ;;  %v3260_v23 = vmax.f32 %v2874_v31, 0.0 }
 0x229   : > { %v3259_v45 = vmax.f32 %v2869_v61, 0.0  ;;  %v14324_v11 = vpop.f32.mrb[156].mxu1 }
 0x22a   : > { %v2884_v18 = vadd.f32 %v14324_v11, %v17298_v21  ;;  %v2878_v42 = vpop.f32.mrb[157].mxu1 }
 0x22b   : > { %v2879_v52 = vadd.f32 %v17298_v21, %v2878_v42  ;;  %14559 = vmatprep.mubr.msk.f32.mxu0 %vm3334_vm2, %v3259_v45 }
 0x22c   : > { %14560 = vmatmul.mubr.msk.f32.gmra.mrb[154].mxu0 %vm3334_vm2, %v3260_v23  ;;  %v3262_v29 = vmax.f32 %v2884_v18, 0.0 }
 0x22d   : > { %v3261_v19 = vmax.f32 %v2879_v52, 0.0  ;;  %v14327_v33 = vpop.f32.mrb[158].mxu1 }
 0x22e   : > { %v2894_v25 = vadd.f32 %v14327_v33, %v17298_v21  ;;  %v2888_v61 = vpop.f32.mrb[159].mxu1 }
 0x22f   : > { %v2889_v57 = vadd.f32 %v17298_v21, %v2888_v61  ;;  %14562 = vmatprep.mubr.msk.f32.mxu0 %vm3334_vm2, %v3261_v19 }
 0x230   : > { %14563 = vmatmul.mubr.msk.f32.gmra.mrb[156].mxu0 %vm3334_vm2, %v3262_v29  ;;  %v3264_v11 = vmax.f32 %v2894_v25, 0.0 }
 0x231   : > { %v3263_v31 = vmax.f32 %v2889_v57, 0.0  ;;  %v14330_v37 = vpop.f32.mrb[160].mxu1 }
 0x232   : > { %v2904_v45 = vadd.f32 %v14330_v37, %v17298_v21  ;;  %v2898_v42 = vpop.f32.mrb[161].mxu1 }
 0x233   : > { %v2899_v23 = vadd.f32 %v17298_v21, %v2898_v42  ;;  %14565 = vmatprep.mubr.msk.f32.mxu0 %vm3334_vm2, %v3263_v31  ;;  %v17685_v31 = vld [vmem:[%s20006_s2] ss:$0 sm:$0xff] }
 0x234   : > { %14566 = vmatmul.mubr.msk.f32.gmra.mrb[158].mxu0 %vm3334_vm2, %v3264_v11  ;;  %v3266_v33 = vmax.f32 %v2904_v45, 0.0 }
 0x235   : > { %v3265_v18 = vmax.f32 %v2899_v23, 0.0  ;;  %v14333_v52 = vpop.f32.mrb[162].mxu1 }
 0x236   : > { %v2914_v61 = vadd.f32 %v14333_v52, %v17298_v21  ;;  %v2908_v19 = vpop.f32.mrb[163].mxu1 }
 0x237   : > { %v2909_v29 = vadd.f32 %v17298_v21, %v2908_v19  ;;  %14568 = vmatprep.mubr.msk.f32.mxu0 %vm3334_vm2, %v3265_v18 }
 0x238   : > { %14569 = vmatmul.mubr.msk.f32.gmra.mrb[160].mxu0 %vm3334_vm2, %v3266_v33  ;;  %v3268_v37 = vmax.f32 %v2914_v61, 0.0 }
 0x239   : > { %v3267_v25 = vmax.f32 %v2909_v29, 0.0  ;;  %v14336_v57 = vpop.f32.mrb[164].mxu1 }
 0x23a   : > { %v2924_v11 = vadd.f32 %v17685_v31, %v14336_v57  ;;  %v2918_v45 = vpop.f32.mrb[165].mxu1 }
 0x23b   : > { %v2919_v42 = vadd.f32 %v17685_v31, %v2918_v45  ;;  %14571 = vmatprep.mubr.msk.f32.mxu0 %vm3334_vm2, %v3267_v25 }
 0x23c   : > { %14572 = vmatmul.mubr.msk.f32.gmra.mrb[162].mxu0 %vm3334_vm2, %v3268_v37  ;;  %v3270_v18 = vmax.f32 %v2924_v11, 0.0 }
 0x23d   : > { %v3269_v21 = vmax.f32 %v2919_v42, 0.0  ;;  %v14339_v23 = vpop.f32.mrb[166].mxu1 }
 0x23e   : > { %v2934_v52 = vadd.f32 %v17685_v31, %v14339_v23  ;;  %v2928_v33 = vpop.f32.mrb[167].mxu1 }
 0x23f   : > { %v2929_v61 = vadd.f32 %v17685_v31, %v2928_v33  ;;  %14574 = vmatprep.mubr.msk.f32.mxu0 %vm3334_vm2, %v3269_v21 }
 0x240   : > { %14575 = vmatmul.mubr.msk.f32.gmra.mrb[164].mxu0 %vm3334_vm2, %v3270_v18  ;;  %v3272_v57 = vmax.f32 %v2934_v52, 0.0 }
 0x241   : > { %v3271_v19 = vmax.f32 %v2929_v61, 0.0  ;;  %v14342_v29 = vpop.f32.mrb[168].mxu1 }
 0x242   : > { %v2944_v45 = vadd.f32 %v17685_v31, %v14342_v29  ;;  %v2938_v25 = vpop.f32.mrb[169].mxu1 }
 0x243   : > { %v2939_v37 = vadd.f32 %v17685_v31, %v2938_v25  ;;  %14577 = vmatprep.mubr.msk.f32.mxu0 %vm3334_vm2, %v3271_v19 }
 0x244   : > { %14578 = vmatmul.mubr.msk.f32.gmra.mrb[166].mxu0 %vm3334_vm2, %v3272_v57  ;;  %v3274_v23 = vmax.f32 %v2944_v45, 0.0 }
 0x245   : > { %v3273_v11 = vmax.f32 %v2939_v37, 0.0  ;;  %v14345_v42 = vpop.f32.mrb[170].mxu1 }
 0x246   : > { %v2954_v33 = vadd.f32 %v17685_v31, %v14345_v42  ;;  %v2948_v21 = vpop.f32.mrb[171].mxu1 }
 0x247   : > { %v2949_v18 = vadd.f32 %v17685_v31, %v2948_v21  ;;  %14580 = vmatprep.mubr.msk.f32.mxu0 %vm3334_vm2, %v3273_v11 }
 0x248   : > { %14581 = vmatmul.mubr.msk.f32.gmra.mrb[168].mxu0 %vm3334_vm2, %v3274_v23  ;;  %v3276_v29 = vmax.f32 %v2954_v33, 0.0 }
 0x249   : > { %v3275_v52 = vmax.f32 %v2949_v18, 0.0  ;;  %v14348_v61 = vpop.f32.mrb[172].mxu1 }
 0x24a   : > { %v2964_v25 = vadd.f32 %v17685_v31, %v14348_v61  ;;  %v2958_v19 = vpop.f32.mrb[173].mxu1 }
 0x24b   : > { %v2959_v57 = vadd.f32 %v17685_v31, %v2958_v19  ;;  %14583 = vmatprep.mubr.msk.f32.mxu0 %vm3334_vm2, %v3275_v52 }
 0x24c   : > { %14584 = vmatmul.mubr.msk.f32.gmra.mrb[170].mxu0 %vm3334_vm2, %v3276_v29  ;;  %v3278_v42 = vmax.f32 %v2964_v25, 0.0 }
 0x24d   : > { %v3277_v45 = vmax.f32 %v2959_v57, 0.0  ;;  %v14351_v37 = vpop.f32.mrb[174].mxu1 }
 0x24e   : > { %v2974_v21 = vadd.f32 %v17685_v31, %v14351_v37  ;;  %v2968_v11 = vpop.f32.mrb[175].mxu1 }
 0x24f   : > { %v2969_v23 = vadd.f32 %v17685_v31, %v2968_v11  ;;  %14586 = vmatprep.mubr.msk.f32.mxu0 %vm3334_vm2, %v3277_v45 }
 0x250   : > { %14587 = vmatmul.mubr.msk.f32.gmra.mrb[172].mxu0 %vm3334_vm2, %v3278_v42  ;;  %v3280_v61 = vmax.f32 %v2974_v21, 0.0 }
 0x251   : > { %v3279_v33 = vmax.f32 %v2969_v23, 0.0  ;;  %v14354_v18 = vpop.f32.mrb[176].mxu1 }
 0x252   : > { %v2984_v19 = vadd.f32 %v17685_v31, %v14354_v18  ;;  %v2978_v52 = vpop.f32.mrb[177].mxu1 }
 0x253   : > { %v2979_v29 = vadd.f32 %v17685_v31, %v2978_v52  ;;  %14589 = vmatprep.mubr.msk.f32.mxu0 %vm3334_vm2, %v3279_v33 }
 0x254   : > { %14590 = vmatmul.mubr.msk.f32.gmra.mrb[174].mxu0 %vm3334_vm2, %v3280_v61  ;;  %v3282_v37 = vmax.f32 %v2984_v19, 0.0 }
 0x255   : > { %v3281_v25 = vmax.f32 %v2979_v29, 0.0  ;;  %v14357_v57 = vpop.f32.mrb[178].mxu1 }
 0x256   : > { %v2994_v11 = vadd.f32 %v17685_v31, %v14357_v57  ;;  %v2988_v45 = vpop.f32.mrb[179].mxu1 }
 0x257   : > { %v2989_v42 = vadd.f32 %v17685_v31, %v2988_v45  ;;  %14592 = vmatprep.mubr.msk.f32.mxu0 %vm3334_vm2, %v3281_v25 }
 0x258   : > { %14593 = vmatmul.mubr.msk.f32.gmra.mrb[176].mxu0 %vm3334_vm2, %v3282_v37  ;;  %v3284_v18 = vmax.f32 %v2994_v11, 0.0 }
 0x259   : > { %v3283_v21 = vmax.f32 %v2989_v42, 0.0  ;;  %v14360_v23 = vpop.f32.mrb[180].mxu1 }
 0x25a   : > { %v3004_v52 = vadd.f32 %v17685_v31, %v14360_v23  ;;  %v2998_v33 = vpop.f32.mrb[181].mxu1 }
 0x25b   : > { %v2999_v61 = vadd.f32 %v17685_v31, %v2998_v33  ;;  %14595 = vmatprep.mubr.msk.f32.mxu0 %vm3334_vm2, %v3283_v21 }
 0x25c   : > { %14596 = vmatmul.mubr.msk.f32.gmra.mrb[178].mxu0 %vm3334_vm2, %v3284_v18  ;;  %v3286_v57 = vmax.f32 %v3004_v52, 0.0 }
 0x25d   : > { %v3285_v19 = vmax.f32 %v2999_v61, 0.0  ;;  %v14363_v29 = vpop.f32.mrb[182].mxu1 }
 0x25e   : > { %v3014_v45 = vadd.f32 %v17685_v31, %v14363_v29  ;;  %v3008_v25 = vpop.f32.mrb[183].mxu1 }
 0x25f   : > { %v3009_v37 = vadd.f32 %v17685_v31, %v3008_v25  ;;  %14598 = vmatprep.mubr.msk.f32.mxu0 %vm3334_vm2, %v3285_v19 }
 0x260   : > { %14599 = vmatmul.mubr.msk.f32.gmra.mrb[180].mxu0 %vm3334_vm2, %v3286_v57  ;;  %v3288_v23 = vmax.f32 %v3014_v45, 0.0 }
 0x261   : > { %v3287_v11 = vmax.f32 %v3009_v37, 0.0  ;;  %v14366_v42 = vpop.f32.mrb[184].mxu1 }
 0x262   : > { %v3024_v33 = vadd.f32 %v17685_v31, %v14366_v42  ;;  %v3018_v21 = vpop.f32.mrb[185].mxu1 }
 0x263   : > { %v3019_v18 = vadd.f32 %v17685_v31, %v3018_v21  ;;  %14601 = vmatprep.mubr.msk.f32.mxu0 %vm3334_vm2, %v3287_v11 }
 0x264   : > { %14602 = vmatmul.mubr.msk.f32.gmra.mrb[182].mxu0 %vm3334_vm2, %v3288_v23  ;;  %v3290_v29 = vmax.f32 %v3024_v33, 0.0  ;;  %v12084_v33 = vld [vmem:[%s16505_s18 + $0x900] sm:$0xff] }
 0x265   : > { %v3289_v52 = vmax.f32 %v3019_v18, 0.0  ;;  %v14369_v61 = vpop.f32.mrb[186].mxu1  ;;  %14906 = vmatprep.mubr.msk.f32.mxu1 %vm437_vm0, %v12084_v33  ;;  %v12085_v18 = vld [vmem:[%s16505_s18 + $0x908] sm:$0xff] }
 0x266   : > { %v3034_v19 = vadd.f32 %v17685_v31, %v14369_v61  ;;  %v3028_v57 = vpop.f32.mrb[187].mxu1  ;;  %14907 = vmatmul.mubr.msk.f32.vlgmr.msra.gmra.mrb[216].mxu1 %vm437_vm0, %v12085_v18 }
 0x267   : > { %v3029_v25 = vadd.f32 %v17685_v31, %v3028_v57  ;;  %14604 = vmatprep.mubr.msk.f32.mxu0 %vm3334_vm2, %v3289_v52 }
 0x268   : > { %14605 = vmatmul.mubr.msk.f32.gmra.mrb[184].mxu0 %vm3334_vm2, %v3290_v29  ;;  %v3292_v42 = vmax.f32 %v3034_v19, 0.0 }
 0x269   : > { %v3291_v45 = vmax.f32 %v3029_v25, 0.0  ;;  %v14372_v37 = vpop.f32.mrb[188].mxu1 }
 0x26a   : > { %v3044_v11 = vadd.f32 %v17685_v31, %v14372_v37  ;;  %v3038_v23 = vpop.f32.mrb[189].mxu1  ;;  %v12087_v37 = vld [vmem:[%s16505_s18 + $0x918] sm:$0xff] }
 0x26b   : > { %v3039_v21 = vadd.f32 %v17685_v31, %v3038_v23  ;;  %14607 = vmatprep.mubr.msk.f32.mxu0 %vm3334_vm2, %v3291_v45  ;;  %v12086_v45 = vld [vmem:[%s16505_s18 + $0x910] sm:$0xff] }
 0x26c   : > { %14608 = vmatmul.mubr.msk.f32.gmra.mrb[186].mxu0 %vm3334_vm2, %v3292_v42  ;;  %v3294_v29 = vmax.f32 %v3044_v11, 0.0  ;;  %14909 = vmatprep.mubr.msk.f32.mxu1 %vm437_vm0, %v12086_v45 }
 0x26d   : > { %v3293_v52 = vmax.f32 %v3039_v21, 0.0  ;;  %v14375_v61 = vpop.f32.mrb[190].mxu1  ;;  %14910 = vmatmul.mubr.msk.f32.gmra.mrb[218].mxu1 %vm437_vm0, %v12087_v37 }
 0x26e   : > { %v3054_v19 = vadd.f32 %v17685_v31, %v14375_v61  ;;  %v3048_v57 = vpop.f32.mrb[191].mxu1  ;;  %v12089_v61 = vld [vmem:[%s16505_s18 + $0x928] sm:$0xff] }
 0x26f   : > { %v3049_v25 = vadd.f32 %v17685_v31, %v3048_v57  ;;  %14610 = vmatprep.mubr.msk.f32.mxu0 %vm3334_vm2, %v3293_v52  ;;  %v12088_v52 = vld [vmem:[%s16505_s18 + $0x920] sm:$0xff] }
 0x270   : > { %14611 = vmatmul.mubr.msk.f32.gmra.mrb[188].mxu0 %vm3334_vm2, %v3294_v29  ;;  %v3296_v11 = vmax.f32 %v3054_v19, 0.0  ;;  %14912 = vmatprep.mubr.msk.f32.mxu1 %vm437_vm0, %v12088_v52 }
 0x271   : > { %v3295_v42 = vmax.f32 %v3049_v25, 0.0  ;;  %v14378_v23 = vpop.f32.mrb[192].mxu1  ;;  %14913 = vmatmul.mubr.msk.f32.gmra.mrb[220].mxu1 %vm437_vm0, %v12089_v61 }
 0x272   : > { %v3064_v21 = vadd.f32 %v17685_v31, %v14378_v23  ;;  %v3058_v33 = vpop.f32.mrb[193].mxu1  ;;  %v12091_v23 = vld [vmem:[%s16505_s18 + $0x938] sm:$0xff] }
 0x273   : > { %v3059_v18 = vadd.f32 %v17685_v31, %v3058_v33  ;;  %14613 = vmatprep.mubr.msk.f32.mxu0 %vm3334_vm2, %v3295_v42  ;;  %v12090_v42 = vld [vmem:[%s16505_s18 + $0x930] sm:$0xff] }
 0x274   : > { %14614 = vmatmul.mubr.msk.f32.gmra.mrb[190].mxu0 %vm3334_vm2, %v3296_v11  ;;  %v3298_v19 = vmax.f32 %v3064_v21, 0.0  ;;  %14915 = vmatprep.mubr.msk.f32.mxu1 %vm437_vm0, %v12090_v42 }
 0x275   : > { %v3297_v29 = vmax.f32 %v3059_v18, 0.0  ;;  %v14381_v57 = vpop.f32.mrb[194].mxu1  ;;  %14916 = vmatmul.mubr.msk.f32.gmra.mrb[222].mxu1 %vm437_vm0, %v12091_v23 }
 0x276   : > { %v3074_v25 = vadd.f32 %v17685_v31, %v14381_v57  ;;  %v3068_v45 = vpop.f32.mrb[195].mxu1  ;;  %v12093_v57 = vld [vmem:[%s16505_s18 + $0x948] sm:$0xff] }
 0x277   : > { %v3069_v37 = vadd.f32 %v17685_v31, %v3068_v45  ;;  %14616 = vmatprep.mubr.msk.f32.mxu0 %vm3334_vm2, %v3297_v29  ;;  %v12092_v29 = vld [vmem:[%s16505_s18 + $0x940] sm:$0xff] }
 0x278   : > { %14617 = vmatmul.mubr.msk.f32.gmra.mrb[192].mxu0 %vm3334_vm2, %v3298_v19  ;;  %v3300_v21 = vmax.f32 %v3074_v25, 0.0  ;;  %14918 = vmatprep.mubr.msk.f32.mxu1 %vm437_vm0, %v12092_v29 }
 0x279   : > { %v3299_v11 = vmax.f32 %v3069_v37, 0.0  ;;  %v14384_v33 = vpop.f32.mrb[196].mxu1  ;;  %14919 = vmatmul.mubr.msk.f32.gmra.mrb[224].mxu1 %vm437_vm0, %v12093_v57 }
 0x27a   : > { %v3084_v18 = vadd.f32 %v17685_v31, %v14384_v33  ;;  %v3078_v52 = vpop.f32.mrb[197].mxu1  ;;  %v12095_v33 = vld [vmem:[%s16505_s18 + $0x958] sm:$0xff] }
 0x27b   : > { %v3079_v61 = vadd.f32 %v17685_v31, %v3078_v52  ;;  %14619 = vmatprep.mubr.msk.f32.mxu0 %vm3334_vm2, %v3299_v11  ;;  %v12094_v11 = vld [vmem:[%s16505_s18 + $0x950] sm:$0xff] }
 0x27c   : > { %14620 = vmatmul.mubr.msk.f32.gmra.mrb[194].mxu0 %vm3334_vm2, %v3300_v21  ;;  %v3302_v25 = vmax.f32 %v3084_v18, 0.0  ;;  %14921 = vmatprep.mubr.msk.f32.mxu1 %vm437_vm0, %v12094_v11 }
 0x27d   : > { %v3301_v19 = vmax.f32 %v3079_v61, 0.0  ;;  %v14387_v45 = vpop.f32.mrb[198].mxu1  ;;  %14922 = vmatmul.mubr.msk.f32.gmra.mrb[226].mxu1 %vm437_vm0, %v12095_v33 }
 0x27e   : > { %v3094_v37 = vadd.f32 %v17685_v31, %v14387_v45  ;;  %v3088_v42 = vpop.f32.mrb[199].mxu1  ;;  %v12097_v45 = vld [vmem:[%s16505_s18 + $0x968] sm:$0xff] }
 0x27f   : > { %v3089_v23 = vadd.f32 %v17685_v31, %v3088_v42  ;;  %14622 = vmatprep.mubr.msk.f32.mxu0 %vm3334_vm2, %v3301_v19  ;;  %v12096_v19 = vld [vmem:[%s16505_s18 + $0x960] sm:$0xff] }
 0x280   : > { %14623 = vmatmul.mubr.msk.f32.gmra.mrb[196].mxu0 %vm3334_vm2, %v3302_v25  ;;  %v3304_v18 = vmax.f32 %v3094_v37, 0.0  ;;  %14924 = vmatprep.mubr.msk.f32.mxu1 %vm437_vm0, %v12096_v19 }
 0x281   : > { %v3303_v21 = vmax.f32 %v3089_v23, 0.0  ;;  %v14390_v52 = vpop.f32.mrb[200].mxu1  ;;  %14925 = vmatmul.mubr.msk.f32.gmra.mrb[228].mxu1 %vm437_vm0, %v12097_v45 }
 0x282   : > { %v3104_v61 = vadd.f32 %v17685_v31, %v14390_v52  ;;  %v3098_v29 = vpop.f32.mrb[201].mxu1  ;;  %v12099_v52 = vld [vmem:[%s16505_s18 + $0x978] sm:$0xff] }
 0x283   : > { %v3099_v57 = vadd.f32 %v17685_v31, %v3098_v29  ;;  %14625 = vmatprep.mubr.msk.f32.mxu0 %vm3334_vm2, %v3303_v21  ;;  %v12098_v21 = vld [vmem:[%s16505_s18 + $0x970] sm:$0xff] }
 0x284   : > { %14626 = vmatmul.mubr.msk.f32.gmra.mrb[198].mxu0 %vm3334_vm2, %v3304_v18  ;;  %v3306_v37 = vmax.f32 %v3104_v61, 0.0  ;;  %14927 = vmatprep.mubr.msk.f32.mxu1 %vm437_vm0, %v12098_v21 }
 0x285   : > { %v3305_v25 = vmax.f32 %v3099_v57, 0.0  ;;  %v14393_v42 = vpop.f32.mrb[202].mxu1  ;;  %14928 = vmatmul.mubr.msk.f32.gmra.mrb[230].mxu1 %vm437_vm0, %v12099_v52 }
 0x286   : > { %v3114_v23 = vadd.f32 %v17685_v31, %v14393_v42  ;;  %v3108_v11 = vpop.f32.mrb[203].mxu1  ;;  %v12101_v42 = vld [vmem:[%s16505_s18 + $0x988] sm:$0xff] }
 0x287   : > { %v3109_v33 = vadd.f32 %v17685_v31, %v3108_v11  ;;  %14628 = vmatprep.mubr.msk.f32.mxu0 %vm3334_vm2, %v3305_v25  ;;  %v12100_v25 = vld [vmem:[%s16505_s18 + $0x980] sm:$0xff] }
 0x288   : > { %14629 = vmatmul.mubr.msk.f32.gmra.mrb[200].mxu0 %vm3334_vm2, %v3306_v37  ;;  %v3308_v61 = vmax.f32 %v3114_v23, 0.0  ;;  %14930 = vmatprep.mubr.msk.f32.mxu1 %vm437_vm0, %v12100_v25 }
 0x289   : > { %v3307_v18 = vmax.f32 %v3109_v33, 0.0  ;;  %v14396_v29 = vpop.f32.mrb[204].mxu1  ;;  %14931 = vmatmul.mubr.msk.f32.gmra.mrb[232].mxu1 %vm437_vm0, %v12101_v42 }
 0x28a   : > { %v3124_v57 = vadd.f32 %v17685_v31, %v14396_v29  ;;  %v3118_v19 = vpop.f32.mrb[205].mxu1  ;;  %v12103_v29 = vld [vmem:[%s16505_s18 + $0x998] sm:$0xff] }
 0x28b   : > { %v3119_v45 = vadd.f32 %v17685_v31, %v3118_v19  ;;  %14631 = vmatprep.mubr.msk.f32.mxu0 %vm3334_vm2, %v3307_v18  ;;  %v12102_v18 = vld [vmem:[%s16505_s18 + $0x990] sm:$0xff] }
 0x28c   : > { %14632 = vmatmul.mubr.msk.f32.gmra.mrb[202].mxu0 %vm3334_vm2, %v3308_v61  ;;  %v3310_v23 = vmax.f32 %v3124_v57, 0.0  ;;  %14933 = vmatprep.mubr.msk.f32.mxu1 %vm437_vm0, %v12102_v18 }
 0x28d   : > { %v3309_v37 = vmax.f32 %v3119_v45, 0.0  ;;  %v14399_v11 = vpop.f32.mrb[206].mxu1  ;;  %14934 = vmatmul.mubr.msk.f32.gmra.mrb[234].mxu1 %vm437_vm0, %v12103_v29 }
 0x28e   : > { %v3134_v33 = vadd.f32 %v17685_v31, %v14399_v11  ;;  %v3128_v21 = vpop.f32.mrb[207].mxu1  ;;  %v12105_v11 = vld [vmem:[%s16505_s18 + $0x9a8] sm:$0xff] }
 0x28f   : > { %v3129_v52 = vadd.f32 %v17685_v31, %v3128_v21  ;;  %14634 = vmatprep.mubr.msk.f32.mxu0 %vm3334_vm2, %v3309_v37  ;;  %v12104_v37 = vld [vmem:[%s16505_s18 + $0x9a0] sm:$0xff] }
 0x290   : > { %14635 = vmatmul.mubr.msk.f32.gmra.mrb[204].mxu0 %vm3334_vm2, %v3310_v23  ;;  %v3312_v57 = vmax.f32 %v3134_v33, 0.0  ;;  %14936 = vmatprep.mubr.msk.f32.mxu1 %vm437_vm0, %v12104_v37 }
 0x291   : > { %v3311_v61 = vmax.f32 %v3129_v52, 0.0  ;;  %v14402_v19 = vpop.f32.mrb[208].mxu1  ;;  %14937 = vmatmul.mubr.msk.f32.gmra.mrb[236].mxu1 %vm437_vm0, %v12105_v11 }
 0x292   : > { %v3144_v45 = vadd.f32 %v17685_v31, %v14402_v19  ;;  %v3138_v25 = vpop.f32.mrb[209].mxu1  ;;  %v12107_v19 = vld [vmem:[%s16505_s18 + $0x9b8] sm:$0xff] }
 0x293   : > { %v3139_v42 = vadd.f32 %v17685_v31, %v3138_v25  ;;  %14637 = vmatprep.mubr.msk.f32.mxu0 %vm3334_vm2, %v3311_v61  ;;  %v12106_v61 = vld [vmem:[%s16505_s18 + $0x9b0] sm:$0xff] }
 0x294   : > { %14638 = vmatmul.mubr.msk.f32.gmra.mrb[206].mxu0 %vm3334_vm2, %v3312_v57  ;;  %v3314_v33 = vmax.f32 %v3144_v45, 0.0  ;;  %14939 = vmatprep.mubr.msk.f32.mxu1 %vm437_vm0, %v12106_v61 }
 0x295   : > { %v3313_v23 = vmax.f32 %v3139_v42, 0.0  ;;  %v14405_v21 = vpop.f32.mrb[210].mxu1  ;;  %14940 = vmatmul.mubr.msk.f32.gmra.mrb[238].mxu1 %vm437_vm0, %v12107_v19  ;;  %v941_v19 = vadd.f32 %v17685_v31, %v17136_v24 }
 0x296   : > { %v3154_v52 = vadd.f32 %v17685_v31, %v14405_v21  ;;  %v3148_v18 = vpop.f32.mrb[211].mxu1  ;;  %v12109_v21 = vld [vmem:[%s16505_s18 + $0x9c8] sm:$0xff] }
 0x297   : > { %v3149_v29 = vadd.f32 %v17685_v31, %v3148_v18  ;;  %14640 = vmatprep.mubr.msk.f32.mxu0 %vm3334_vm2, %v3313_v23  ;;  %v12108_v23 = vld [vmem:[%s16505_s18 + $0x9c0] sm:$0xff]  ;;  %v1659_v24 = vmax.f32 %v941_v19, 0.0  ;;  %v961_v19 = vadd.f32 %v17685_v31, %v17161_v9 }
 0x298   : > { %14641 = vmatmul.mubr.msk.f32.gmra.mrb[208].mxu0 %vm3334_vm2, %v3314_v33  ;;  %v3316_v45 = vmax.f32 %v3154_v52, 0.0  ;;  %14942 = vmatprep.mubr.msk.f32.mxu1 %vm437_vm0, %v12108_v23  ;;  %v951_v23 = vadd.f32 %v17685_v31, %v17149_v47 }
 0x299   : > { %v3315_v57 = vmax.f32 %v3149_v29, 0.0  ;;  %v14408_v25 = vpop.f32.mrb[212].mxu1  ;;  %14943 = vmatmul.mubr.msk.f32.gmra.mrb[240].mxu1 %vm437_vm0, %v12109_v21  ;;  %v12375_v21 = vld [vmem:[%s20007_s3 + $0xd0] sm:$0xff] }
 0x29a   : > { %v3164_v42 = vadd.f32 %v17685_v31, %v14408_v25  ;;  %v3158_v37 = vpop.f32.mrb[213].mxu1  ;;  %v12110_v25 = vld [vmem:[%s16505_s18 + $0x9d0] sm:$0xff] }
 0x29b   : > { %v3159_v11 = vadd.f32 %v17685_v31, %v3158_v37  ;;  %14643 = vmatprep.mubr.msk.f32.mxu0 %vm3334_vm2, %v3315_v57  ;;  %14945 = vmatprep.mubr.msk.f32.mxu1 %vm437_vm0, %v12110_v25  ;;  %v12378_v25 = vld [vmem:[%s20007_s3 + $0xe8] sm:$0xff] }
 0x29c   : > { %14644 = vmatmul.mubr.msk.f32.gmra.mrb[210].mxu0 %vm3334_vm2, %v3316_v45  ;;  %v3318_v52 = vmax.f32 %v3164_v42, 0.0  ;;  %v12111_v45 = vld [vmem:[%s16505_s18 + $0x9d8] sm:$0xff]  ;;  %v946_v42 = vadd.f32 %v17685_v31, %v17132_v10  ;;  %v12113_v10 = vld [vmem:[%s16505_s18 + $0x9e8] sm:$0xff] }
 0x29d   : > { %v3317_v33 = vmax.f32 %v3159_v11, 0.0  ;;  %v14411_v18 = vpop.f32.mrb[214].mxu1  ;;  %14946 = vmatmul.mubr.msk.f32.gmra.mrb[242].mxu1 %vm437_vm0, %v12111_v45  ;;  %v12114_v45 = vld [vmem:[%s16505_s18 + $0x9f0] sm:$0xff] }
 0x29e   : > { %v3174_v29 = vadd.f32 %v17685_v31, %v14411_v18  ;;  %v3168_v61 = vpop.f32.mrb[215].mxu1  ;;  %v12112_v18 = vld [vmem:[%s16505_s18 + $0x9e0] sm:$0xff]  ;;  %v1660_v47 = vmax.f32 %v946_v42, 0.0 }
 0x29f   : > { %v3169_v57 = vadd.f32 %v17685_v31, %v3168_v61  ;;  %14646 = vmatprep.mubr.msk.f32.mxu0 %vm3334_vm2, %v3317_v33  ;;  %v12376_v33 = vld [vmem:[%s20007_s3 + $0xd8] sm:$0xff]  ;;  %14948 = vmatprep.mubr.msk.f32.mxu1 %vm437_vm0, %v12112_v18  ;;  %v1661_v61 = vmax.f32 %v951_v23, 0.0  ;;  %v12116_v23 = vld [vmem:[%s16505_s18 + $0xa00] sm:$0xff]  ;;  %v12118_v18 = vld [vmem:[%s16505_s18 + $0xa10] sm:$0xff] }
 0x2a0   : > { %14647 = vmatmul.mubr.msk.f32.gmra.mrb[212].mxu0 %vm3334_vm2, %v3318_v52  ;;  %v3320_v11 = vmax.f32 %v3174_v29, 0.0  ;;  %v956_v52 = vadd.f32 %v17685_v31, %v17146_v40  ;;  %v15810_v29 = vpack.c.bf16 %v12376_v33, %v12375_v21  ;;  %v12115_v40 = vld [vmem:[%s16505_s18 + $0x9f8] sm:$0xff] }
 0x2a1   : > { %v3319_v37 = vmax.f32 %v3169_v57, 0.0  ;;  %14949 = vmatmul.mubr.msk.f32.gmra.mrb[244].mxu1 %vm437_vm0, %v12113_v10  ;;  %v12377_v57 = vld [vmem:[%s20007_s3 + $0xe0] sm:$0xff]  ;;  %v12119_v10 = vld [vmem:[%s16505_s18 + $0xa18] sm:$0xff] }
 0x2a2   : > { %14951 = vmatprep.mubr.msk.f32.mxu1 %vm437_vm0, %v12114_v45  ;;  %v1662_v9 = vmax.f32 %v956_v52, 0.0  ;;  %v15814_v42 = vpack.c.bf16 %v12378_v25, %v12377_v57  ;;  %v1001_v25 = vadd.f32 %v17685_v31, %v17209_v8  ;;  %v12380_v45 = vld [vmem:[%s20007_s3 + $0xf8] sm:$0xff] }
 0x2a3   : > { %14649 = vmatprep.mubr.msk.f32.mxu0 %vm3334_vm2, %v3319_v37  ;;  %v966_v37 = vadd.f32 %v17685_v31, %v17158_v63  ;;  %v976_v63 = vadd.f32 %v17685_v31, %v17170_v36  ;;  %v986_v36 = vadd.f32 %v17685_v31, %v17182_v58  ;;  %v996_v58 = vadd.f32 %v17685_v31, %v17194_v28  ;;  %v12123_v8 = vld [vmem:[%s16505_s18 + $0xa38] sm:$0xff] }
 0x2a4   : > { %14650 = vmatmul.mubr.msk.f32.gmra.mrb[214].mxu0 %vm3334_vm2, %v3320_v11  ;;  %v1663_v11 = vmax.f32 %v961_v19, 0.0 }
 0x2a5   : > { %14676 = vmatprep.mubr.msk.f32.mxu0 %vm3334_vm2, %v1659_v24  ;;  %14952 = vmatmul.mubr.msk.f32.gmra.mrb[246].mxu1 %vm437_vm0, %v12115_v40  ;;  %v971_v24 = vadd.f32 %v17685_v31, %v17173_v50  ;;  %v1664_v21 = vmax.f32 %v966_v37, 0.0  ;;  %v981_v50 = vadd.f32 %v17685_v31, %v17185_v22  ;;  %v991_v22 = vadd.f32 %v17685_v31, %v17197_v30  ;;  %v12379_v30 = vld [vmem:[%s20007_s3 + $0xf0] sm:$0xff] }
 0x2a6   : > { %14954 = vmatprep.mubr.msk.f32.mxu1 %vm437_vm0, %v12116_v23  ;;  %v1668_v19 = vmax.f32 %v986_v36, 0.0  ;;  %v12122_v40 = vld [vmem:[%s16505_s18 + $0xa30] sm:$0xff]  ;;  %v15818_v28 = vpack.c.bf16 %v12380_v45, %v12379_v30  ;;  %v1006_v37 = vadd.f32 %v17685_v31, %v17206_v14  ;;  %v12125_v23 = vld [vmem:[%s16505_s18 + $0xa48] sm:$0xff]  ;;  %v1016_v14 = vadd.f32 %v17685_v31, %v17218_v55 }
 0x2a7   : > { %v1665_v33 = vmax.f32 %v971_v24, 0.0  ;;  %v1667_v52 = vmax.f32 %v981_v50, 0.0  ;;  %v1669_v57 = vmax.f32 %v991_v22, 0.0  ;;  %v12124_v24 = vld [vmem:[%s16505_s18 + $0xa40] sm:$0xff]  ;;  %v1026_v55 = vadd.f32 %v17685_v31, %v17230_v34  ;;  %v12130_v22 = vld [vmem:[%s16505_s18 + $0xa70] sm:$0xff] }
 0x2a8   : > { %14677 = vmatmul.mubr.msk.f32.vlgmr.msra.gmra.mrb[72].mxu0 %vm3334_vm2, %v1660_v47  ;;  %v1666_v47 = vmax.f32 %v976_v63, 0.0  ;;  %v12126_v63 = vld [vmem:[%s16505_s18 + $0xa50] sm:$0xff]  ;;  %v1674_v50 = vmax.f32 %v1016_v14, 0.0  ;;  %v1036_v34 = vadd.f32 %v17685_v31, %v17242_v17  ;;  %v1046_v17 = vadd.f32 %v17685_v31, %v17254_v7 }
 0x2a9   : > { %14679 = vmatprep.mubr.msk.f32.mxu0 %vm3334_vm2, %v1661_v61  ;;  %15809 = vmatpush3.bf16.msra.mxu0 %v17663_v13  ;;  %v12117_v13 = vld [vmem:[%s16505_s18 + $0xa08] sm:$0xff]  ;;  %v1676_v36 = vmax.f32 %v1026_v55, 0.0  ;;  %v1056_v7 = vadd.f32 %v17685_v31, %v17266_v62  ;;  %v12134_v45 = vld [vmem:[%s16505_s18 + $0xa90] sm:$0xff]  ;;  %v1066_v62 = vadd.f32 %v17685_v31, %v17278_v54  ;;  %v1076_v54 = vadd.f32 %v17685_v31, %v17290_v46  ;;  %v12143_v55 = vld [vmem:[%s16505_s18 + $0xad8] sm:$0xff] }
 0x2aa   : > { %15811 = vmatprep.subr.bf16.mxu0 %v15810_v29  ;;  %14955 = vmatmul.mubr.msk.f32.gmra.mrb[248].mxu1 %vm437_vm0, %v12117_v13  ;;  %v12121_v61 = vld [vmem:[%s16505_s18 + $0xa28] sm:$0xff]  ;;  %v1672_v13 = vmax.f32 %v1006_v37, 0.0  ;;  %v1086_v46 = vadd.f32 %v17685_v31, %v17311_v12  ;;  %v1096_v12 = vadd.f32 %v17685_v31, %v17328_v39 }
 0x2ab   : > { %14957 = vmatprep.mubr.msk.f32.mxu1 %vm437_vm0, %v12118_v18  ;;  %v12137_v37 = vld [vmem:[%s16505_s18 + $0xaa8] sm:$0xff] }
 0x2ac   : > { %14680 = vmatmul.mubr.msk.f32.gmra.mrb[74].mxu0 %vm3334_vm2, %v1662_v9  ;;  %v1670_v9 = vmax.f32 %v996_v58, 0.0  ;;  %v12132_v58 = vld [vmem:[%s16505_s18 + $0xa80] sm:$0xff] }
 0x2ad   : > { %14682 = vmatprep.mubr.msk.f32.mxu0 %vm3334_vm2, %v1663_v11  ;;  %15813 = vmatpush3.bf16.msra.mxu0 %v15810_v29  ;;  %v12120_v29 = vld [vmem:[%s16505_s18 + $0xa20] sm:$0xff]  ;;  %v1011_v11 = vadd.f32 %v17685_v31, %v17221_v4  ;;  %v1021_v4 = vadd.f32 %v17685_v31, %v17233_v59  ;;  %v1031_v59 = vadd.f32 %v17685_v31, %v17245_v51 }
 0x2ae   : > { %15815 = vmatprep.subr.bf16.mxu0 %v15814_v42  ;;  %14958 = vmatmul.mubr.msk.f32.gmra.mrb[250].mxu1 %vm437_vm0, %v12119_v10  ;;  %v12128_v10 = vld [vmem:[%s16505_s18 + $0xa60] sm:$0xff]  ;;  %v1041_v51 = vadd.f32 %v17685_v31, %v17257_v44  ;;  %v1051_v44 = vadd.f32 %v17685_v31, %v17269_v38  ;;  %v1061_v38 = vadd.f32 %v17685_v31, %v17281_v32 }
 0x2af   : > { %14960 = vmatprep.mubr.msk.f32.mxu1 %vm437_vm0, %v12120_v29  ;;  %v1675_v18 = vmax.f32 %v1021_v4, 0.0  ;;  %v12131_v29 = vld [vmem:[%s16505_s18 + $0xa78] sm:$0xff]  ;;  %v1071_v32 = vadd.f32 %v17685_v31, %v17293_v26  ;;  %v1081_v26 = vadd.f32 %v17685_v31, %v17314_v6  ;;  %v1091_v6 = vadd.f32 %v17685_v31, %v17332_v0  ;;  %v12141_v4 = vld [vmem:[%s16505_s18 + $0xac8] sm:$0xff] }
 0x2b0   : > { %14683 = vmatmul.mubr.msk.f32.gmra.mrb[76].mxu0 %vm3334_vm2, %v1664_v21  ;;  %v1673_v21 = vmax.f32 %v1011_v11, 0.0  ;;  %v1681_v30 = vmax.f32 %v1051_v44, 0.0  ;;  %v1101_v0 = vadd.f32 %v17685_v31, %v17345_v3  ;;  %v1111_v3 = vadd.f32 %v17685_v31, %v17357_v1  ;;  %v12381_v1 = vld [vmem:[%s20007_s3 + $0x100] sm:$0xff] }
 0x2b1   : > { %14685 = vmatprep.mubr.msk.f32.mxu0 %vm3334_vm2, %v1665_v33  ;;  %15817 = vmatpush3.bf16.msra.mxu0 %v15814_v42  ;;  %v1671_v42 = vmax.f32 %v1001_v25, 0.0  ;;  %v12127_v33 = vld [vmem:[%s16505_s18 + $0xa58] sm:$0xff]  ;;  %v1680_v25 = vmax.f32 %v1046_v17, 0.0  ;;  %v1685_v11 = vmax.f32 %v1071_v32, 0.0  ;;  %v1687_v14 = vmax.f32 %v1081_v26, 0.0  ;;  %v12148_v44 = vld [vmem:[%s16505_s18 + $0xb00] sm:$0xff] }
 0x2b2   : > { %14961 = vmatmul.mubr.msk.f32.gmra.mrb[252].mxu1 %vm437_vm0, %v12121_v61  ;;  %15819 = vmatprep.subr.bf16.mxu0 %v15818_v28  ;;  %v1678_v61 = vmax.f32 %v1036_v34, 0.0  ;;  %v1691_v39 = vmax.f32 %v1101_v0, 0.0  ;;  %v1693_v34 = vmax.f32 %v1111_v3, 0.0  ;;  %v12154_v32 = vld [vmem:[%s16505_s18 + $0xb30] sm:$0xff]  ;;  %v12160_v0 = vld [vmem:[%s16505_s18 + $0xb60] sm:$0xff] }
 0x2b3   : > { %14963 = vmatprep.mubr.msk.f32.mxu1 %vm437_vm0, %v12122_v40  ;;  %v12135_v40 = vld [vmem:[%s16505_s18 + $0xa98] sm:$0xff]  ;;  %v20113_v3 = vld [vmem:[#allocation81_spill] sm:$0xff] }
 0x2b4   : > { %14686 = vmatmul.mubr.msk.f32.gmra.mrb[78].mxu0 %vm3334_vm2, %v1666_v47  ;;  %v12129_v47 = vld [vmem:[%s16505_s18 + $0xa68] sm:$0xff] }
 0x2b5   : > { %14688 = vmatprep.mubr.msk.f32.mxu0 %vm3334_vm2, %v1667_v52  ;;  %15821 = vmatpush3.bf16.msra.mxu0 %v15818_v28  ;;  %v1677_v52 = vmax.f32 %v1031_v59, 0.0  ;;  %v1682_v28 = vmax.f32 %v1056_v7, 0.0  ;;  %v1106_v59 = vadd.f32 %v17685_v31, %v17341_v60  ;;  %v1116_v60 = vadd.f32 %v17685_v31, %v17353_v15  ;;  %v12150_v7 = vld [vmem:[%s16505_s18 + $0xb10] sm:$0xff] }
 0x2b6   : > { %14964 = vmatmul.mubr.msk.f32.gmra.mrb[254].mxu1 %vm437_vm0, %v12123_v8  ;;  %v1683_v8 = vmax.f32 %v1061_v38, 0.0 }
 0x2b7   : > { %14966 = vmatprep.mubr.msk.f32.mxu1 %vm437_vm0, %v12124_v24  ;;  %v12138_v24 = vld [vmem:[%s16505_s18 + $0xab0] sm:$0xff] }
 0x2b8   : > { %14689 = vmatmul.mubr.msk.f32.gmra.mrb[80].mxu0 %vm3334_vm2, %v1668_v19  ;;  %v1679_v19 = vmax.f32 %v1041_v51, 0.0  ;;  %v12382_v51 = vld [vmem:[%s20007_s3 + $0x108] sm:$0xff] }
 0x2b9   : > { %14691 = vmatprep.mubr.msk.f32.mxu0 %vm3334_vm2, %v1669_v57  ;;  %v12133_v57 = vld [vmem:[%s16505_s18 + $0xa88] sm:$0xff]  ;;  %v15822_v15 = vpack.c.bf16 %v12382_v51, %v12381_v1  ;;  %v20115_v51 = vld [vmem:[#allocation83_spill] sm:$0xff] }
 0x2ba   : > { %14967 = vmatmul.mubr.msk.f32.gmra.mrb[0].mxu1 %vm437_vm0, %v12125_v23  ;;  %v12139_v23 = vld [vmem:[%s16505_s18 + $0xab8] sm:$0xff] }
 0x2bb   : > { %14969 = vmatprep.mubr.msk.f32.mxu1 %vm437_vm0, %v12126_v63  ;;  %v1688_v63 = vmax.f32 %v1086_v46, 0.0  ;;  %15823 = vmatprep.subr.bf16.mxu0 %v15822_v15  ;;  %v12158_v46 = vld [vmem:[%s16505_s18 + $0xb50] sm:$0xff] }
 0x2bc   : > { %14692 = vmatmul.mubr.msk.f32.gmra.mrb[82].mxu0 %vm3334_vm2, %v1670_v9  ;;  %v12136_v9 = vld [vmem:[%s16505_s18 + $0xaa0] sm:$0xff] }
 0x2bd   : > { %14694 = vmatprep.mubr.msk.f32.mxu0 %vm3334_vm2, %v1671_v42  ;;  %v1684_v42 = vmax.f32 %v1066_v62, 0.0  ;;  %15825 = vmatpush3.bf16.msra.mxu0 %v15822_v15  ;;  %v12164_v15 = vld [vmem:[%s16505_s18 + $0xb80] sm:$0xff] }
 0x2be   : > { %14970 = vmatmul.mubr.msk.f32.gmra.mrb[2].mxu1 %vm437_vm0, %v12127_v33  ;;  %v1689_v33 = vmax.f32 %v1091_v6, 0.0 }
 0x2bf   : > { %14972 = vmatprep.mubr.msk.f32.mxu1 %vm437_vm0, %v12128_v10  ;;  %v12144_v10 = vld [vmem:[%s16505_s18 + $0xae0] sm:$0xff] }
 0x2c0   : > { %14695 = vmatmul.mubr.msk.f32.gmra.mrb[84].mxu0 %vm3334_vm2, %v1672_v13  ;;  %v1686_v13 = vmax.f32 %v1076_v54, 0.0  ;;  %v12156_v54 = vld [vmem:[%s16505_s18 + $0xb40] sm:$0xff] }
 0x2c1   : > { %14697 = vmatprep.mubr.msk.f32.mxu0 %vm3334_vm2, %v1673_v21  ;;  %v12140_v21 = vld [vmem:[%s16505_s18 + $0xac0] sm:$0xff] }
 0x2c2   : > { %14973 = vmatmul.mubr.msk.f32.gmra.mrb[4].mxu1 %vm437_vm0, %v12129_v47  ;;  %v12145_v47 = vld [vmem:[%s16505_s18 + $0xae8] sm:$0xff] }
 0x2c3   : > { %14975 = vmatprep.mubr.msk.f32.mxu1 %vm437_vm0, %v12130_v22  ;;  %v12146_v22 = vld [vmem:[%s16505_s18 + $0xaf0] sm:$0xff] }
 0x2c4   : > { %14698 = vmatmul.mubr.msk.f32.gmra.mrb[86].mxu0 %vm3334_vm2, %v1674_v50  ;;  %v12142_v50 = vld [vmem:[%s16505_s18 + $0xad0] sm:$0xff] }
 0x2c5   : > { %14700 = vmatprep.mubr.msk.f32.mxu0 %vm3334_vm2, %v1675_v18  ;;  %v1690_v18 = vmax.f32 %v1096_v12, 0.0  ;;  %v20111_v12 = vld [vmem:[#allocation79_spill] sm:$0xff] }
 0x2c6   : > { %14976 = vmatmul.mubr.msk.f32.gmra.mrb[6].mxu1 %vm437_vm0, %v12131_v29  ;;  %v1694_v29 = vmax.f32 %v1116_v60, 0.0 }
 0x2c7   : > { %14978 = vmatprep.mubr.msk.f32.mxu1 %vm437_vm0, %v12132_v58  ;;  %v12149_v58 = vld [vmem:[%s16505_s18 + $0xb08] sm:$0xff] }
 0x2c8   : > { %14701 = vmatmul.mubr.msk.f32.gmra.mrb[88].mxu0 %vm3334_vm2, %v1676_v36  ;;  %v1692_v36 = vmax.f32 %v1106_v59, 0.0 }
 0x2c9   : > { %14703 = vmatprep.mubr.msk.f32.mxu0 %vm3334_vm2, %v1677_v52  ;;  %v1121_v52 = vadd.f32 %v17685_v31, %v17369_v27  ;;  %v12147_v27 = vld [vmem:[%s16505_s18 + $0xaf8] sm:$0xff] }
 0x2ca   : > { %14979 = vmatmul.mubr.msk.f32.gmra.mrb[8].mxu1 %vm437_vm0, %v12133_v57 }
 0x2cb   : > { %14981 = vmatprep.mubr.msk.f32.mxu1 %vm437_vm0, %v12134_v45  ;;  %v1695_v17 = vmax.f32 %v1121_v52, 0.0 }
 0x2cc   : > { %14704 = vmatmul.mubr.msk.f32.gmra.mrb[90].mxu0 %vm3334_vm2, %v1678_v61  ;;  %v1126_v61 = vadd.f32 %v17685_v31, %v17365_v56  ;;  %v1136_v56 = vadd.f32 %v17685_v31, %v17377_v48  ;;  %v1146_v48 = vadd.f32 %v17685_v31, %v17395_v35  ;;  %v1156_v35 = vadd.f32 %v17685_v31, %v17407_v5 }
 0x2cd   : > { %14706 = vmatprep.mubr.msk.f32.mxu0 %vm3334_vm2, %v1679_v19  ;;  %v1131_v19 = vadd.f32 %v17685_v31, %v17381_v49  ;;  %v1141_v49 = vadd.f32 %v17685_v31, %v17399_v16  ;;  %v1151_v16 = vadd.f32 %v17685_v31, %v17411_v53  ;;  %v1161_v53 = vadd.f32 %v17685_v31, %v17423_v41 }
 0x2ce   : > { %14982 = vmatmul.mubr.msk.f32.gmra.mrb[10].mxu1 %vm437_vm0, %v12135_v40  ;;  %v1696_v57 = vmax.f32 %v1126_v61, 0.0  ;;  %v1698_v38 = vmax.f32 %v1136_v56, 0.0  ;;  %v12152_v40 = vld [vmem:[%s16505_s18 + $0xb20] sm:$0xff]  ;;  %v1700_v62 = vmax.f32 %v1146_v48, 0.0  ;;  %v1171_v41 = vadd.f32 %v17685_v31, %v17435_v20  ;;  %v20116_v61 = vld [vmem:[#allocation82_spill] sm:$0xff] }
 0x2cf   : > { %14984 = vmatprep.mubr.msk.f32.mxu1 %vm437_vm0, %v12136_v9  ;;  %v1699_v45 = vmax.f32 %v1141_v49, 0.0  ;;  %v12155_v9 = vld [vmem:[%s16505_s18 + $0xb38] sm:$0xff]  ;;  %v1703_v5 = vmax.f32 %v1161_v53, 0.0  ;;  %v20118_v49 = vld [vmem:[#allocation84_spill] sm:$0xff] }
 0x2d0   : > { %14707 = vmatmul.mubr.msk.f32.gmra.mrb[92].mxu0 %vm3334_vm2, %v1680_v25  ;;  %v1697_v25 = vmax.f32 %v1131_v19, 0.0  ;;  %v12167_v56 = vld [vmem:[%s16505_s18 + $0xb98] sm:$0xff] }
 0x2d1   : > { %14709 = vmatprep.mubr.msk.f32.mxu0 %vm3334_vm2, %v1681_v30  ;;  %v12151_v30 = vld [vmem:[%s16505_s18 + $0xb18] sm:$0xff] }
 0x2d2   : > { %14985 = vmatmul.mubr.msk.f32.gmra.mrb[12].mxu1 %vm437_vm0, %v12137_v37  ;;  %v1702_v37 = vmax.f32 %v1156_v35, 0.0 }
 0x2d3   : > { %14987 = vmatprep.mubr.msk.f32.mxu1 %vm437_vm0, %v12138_v24  ;;  %v20108_v24 = vld [vmem:[#allocation75_spill] sm:$0xff] }
 0x2d4   : > { %14710 = vmatmul.mubr.msk.f32.gmra.mrb[94].mxu0 %vm3334_vm2, %v1682_v28  ;;  %v12153_v28 = vld [vmem:[%s16505_s18 + $0xb28] sm:$0xff] }
 0x2d5   : > { %14712 = vmatprep.mubr.msk.f32.mxu0 %vm3334_vm2, %v1683_v8  ;;  %v1701_v8 = vmax.f32 %v1151_v16, 0.0  ;;  %v12169_v16 = vld [vmem:[%s16505_s18 + $0xba8] sm:$0xff] }
 0x2d6   : > { %14988 = vmatmul.mubr.msk.f32.gmra.mrb[14].mxu1 %vm437_vm0, %v12139_v23  ;;  %v20109_v23 = vld [vmem:[#allocation77_spill] sm:$0xff] }
 0x2d7   : > { %14990 = vmatprep.mubr.msk.f32.mxu1 %vm437_vm0, %v12140_v21  ;;  %v20110_v21 = vld [vmem:[#allocation76_spill] sm:$0xff] }
 0x2d8   : > { %14713 = vmatmul.mubr.msk.f32.gmra.mrb[96].mxu0 %vm3334_vm2, %v1684_v42  ;;  %v1166_v42 = vadd.f32 %v17685_v31, %v17419_v2  ;;  %v18107_v2 = vld [vmem:[%s20006_s2] ss:$0 sm:$0xff]  ;;  %v1705_v31 = vmax.f32 %v1171_v41, 0.0 }
 0x2d9   : > { %14715 = vmatprep.mubr.msk.f32.mxu0 %vm3334_vm2, %v1685_v11  ;;  %v12157_v11 = vld [vmem:[%s16505_s18 + $0xb48] sm:$0xff]  ;;  %v1176_v20 = vadd.f32 %v18107_v2, %v20108_v24  ;;  %v20123_v24 = vld [vmem:[#allocation91_spill] sm:$0xff] }
 0x2da   : > { %14991 = vmatmul.mubr.msk.f32.gmra.mrb[16].mxu1 %vm437_vm0, %v12141_v4  ;;  %v1704_v26 = vmax.f32 %v1166_v42, 0.0  ;;  %v1186_v4 = vadd.f32 %v18107_v2, %v20110_v21  ;;  %v1261_v21 = vadd.f32 %v18107_v2, %v17545_v43 }
 0x2db   : > { %14993 = vmatprep.mubr.msk.f32.mxu1 %vm437_vm0, %v12142_v50  ;;  %v1706_v6 = vmax.f32 %v1176_v20, 0.0  ;;  %v12161_v50 = vld [vmem:[%s16505_s18 + $0xb68] sm:$0xff]  ;;  %v1251_v20 = vadd.f32 %v18107_v2, %v20123_v24  ;;  %v20137_v24 = vld [vmem:[#allocation7_spill] sm:$0xff] }
 0x2dc   : > { %14716 = vmatmul.mubr.msk.f32.gmra.mrb[98].mxu0 %vm3334_vm2, %v1686_v13  ;;  %v1181_v13 = vadd.f32 %v18107_v2, %v20109_v23  ;;  %v12173_v23 = vld [vmem:[%s16505_s18 + $0xbc8] sm:$0xff] }
 0x2dd   : > { %14718 = vmatprep.mubr.msk.f32.mxu0 %vm3334_vm2, %v1687_v14  ;;  %v12159_v14 = vld [vmem:[%s16505_s18 + $0xb58] sm:$0xff] }
 0x2de   : > { %14994 = vmatmul.mubr.msk.f32.gmra.mrb[18].mxu1 %vm437_vm0, %v12143_v55  ;;  %v1708_v55 = vmax.f32 %v1186_v4, 0.0  ;;  %v12174_v4 = vld [vmem:[%s16505_s18 + $0xbd0] sm:$0xff] }
 0x2df   : > { %14996 = vmatprep.mubr.msk.f32.mxu1 %vm437_vm0, %v12144_v10  ;;  %v1201_v10 = vadd.f32 %v18107_v2, %v20113_v3  ;;  %v20127_v3 = vld [vmem:[#allocation93_spill] sm:$0xff] }
 0x2e0   : > { %14719 = vmatmul.mubr.msk.f32.gmra.mrb[100].mxu0 %vm3334_vm2, %v1688_v63  ;;  %v1707_v63 = vmax.f32 %v1181_v13, 0.0 }
 0x2e1   : > { %14721 = vmatprep.mubr.msk.f32.mxu0 %vm3334_vm2, %v1689_v33  ;;  %v1191_v33 = vadd.f32 %v18107_v2, %v20111_v12  ;;  %v1711_v1 = vmax.f32 %v1201_v10, 0.0  ;;  %v1276_v10 = vadd.f32 %v18107_v2, %v20127_v3 }
 0x2e2   : > { %14997 = vmatmul.mubr.msk.f32.gmra.mrb[20].mxu1 %vm437_vm0, %v12145_v47  ;;  %v12162_v47 = vld [vmem:[%s16505_s18 + $0xb70] sm:$0xff] }
 0x2e3   : > { %14999 = vmatprep.mubr.msk.f32.mxu1 %vm437_vm0, %v12146_v22  ;;  %v1211_v22 = vadd.f32 %v18107_v2, %v20115_v51  ;;  %v12531_v51 = vld [vmem:[%s20009_s5 + $0x48] sm:$0xff] }
 0x2e4   : > { %14722 = vmatmul.mubr.msk.f32.gmra.mrb[102].mxu0 %vm3334_vm2, %v1690_v18  ;;  %v20112_v18 = vld [vmem:[#allocation78_spill] sm:$0xff] }
 0x2e5   : > { %14724 = vmatprep.mubr.msk.f32.mxu0 %vm3334_vm2, %v1691_v39  ;;  %v1196_v59 = vadd.f32 %v18107_v2, %v20112_v18  ;;  %v1709_v39 = vmax.f32 %v1191_v33, 0.0  ;;  %v1713_v19 = vmax.f32 %v1211_v22, 0.0  ;;  %v20125_v33 = vld [vmem:[#allocation92_spill] sm:$0xff]  ;;  %v12176_v18 = vld [vmem:[%s16505_s18 + $0xbe0] sm:$0xff]  ;;  %v1726_v22 = vmax.f32 %v1276_v10, 0.0  ;;  %v20142_v10 = vld [vmem:[#allocation14_spill] sm:$0xff] }
 0x2e6   : > { %15000 = vmatmul.mubr.msk.f32.gmra.mrb[22].mxu1 %vm437_vm0, %v12147_v27  ;;  %v12165_v27 = vld [vmem:[%s16505_s18 + $0xb88] sm:$0xff] }
 0x2e7   : > { %15002 = vmatprep.mubr.msk.f32.mxu1 %vm437_vm0, %v12148_v44  ;;  %v1710_v60 = vmax.f32 %v1196_v59, 0.0  ;;  %v20117_v44 = vld [vmem:[#allocation85_spill] sm:$0xff]  ;;  %v12177_v59 = vld [vmem:[%s16505_s18 + $0xbe8] sm:$0xff] }
 0x2e8   : > { %14725 = vmatmul.mubr.msk.f32.gmra.mrb[104].mxu0 %vm3334_vm2, %v1692_v36  ;;  %v12163_v36 = vld [vmem:[%s16505_s18 + $0xb78] sm:$0xff] }
 0x2e9   : > { %14727 = vmatprep.mubr.msk.f32.mxu0 %vm3334_vm2, %v1693_v34  ;;  %v20114_v34 = vld [vmem:[#allocation80_spill] sm:$0xff] }
 0x2ea   : > { %15003 = vmatmul.mubr.msk.f32.gmra.mrb[24].mxu1 %vm437_vm0, %v12149_v58  ;;  %v1206_v52 = vadd.f32 %v18107_v2, %v20114_v34  ;;  %v1221_v58 = vadd.f32 %v18107_v2, %v20117_v44  ;;  %v12178_v34 = vld [vmem:[%s16505_s18 + $0xbf0] sm:$0xff]  ;;  %v12180_v44 = vld [vmem:[%s16505_s18 + $0xc00] sm:$0xff] }
 0x2eb   : > { %15005 = vmatprep.mubr.msk.f32.mxu1 %vm437_vm0, %v12150_v7  ;;  %v1226_v7 = vadd.f32 %v18107_v2, %v20118_v49  ;;  %v20132_v49 = vld [vmem:[#allocation4_spill] sm:$0xff] }
 0x2ec   : > { %14728 = vmatmul.mubr.msk.f32.gmra.mrb[106].mxu0 %vm3334_vm2, %v1694_v29  ;;  %v1712_v29 = vmax.f32 %v1206_v52, 0.0  ;;  %v12179_v52 = vld [vmem:[%s16505_s18 + $0xbf8] sm:$0xff] }
 0x2ed   : > { %14730 = vmatprep.mubr.msk.f32.mxu0 %vm3334_vm2, %v1695_v17  ;;  %v1216_v17 = vadd.f32 %v18107_v2, %v20116_v61 }
 0x2ee   : > { %15006 = vmatmul.mubr.msk.f32.gmra.mrb[26].mxu1 %vm437_vm0, %v12151_v30  ;;  %v1715_v30 = vmax.f32 %v1221_v58, 0.0  ;;  %v12181_v58 = vld [vmem:[%s16505_s18 + $0xc08] sm:$0xff] }
 0x2ef   : > { %15008 = vmatprep.mubr.msk.f32.mxu1 %vm437_vm0, %v12152_v40  ;;  %v1716_v40 = vmax.f32 %v1226_v7, 0.0  ;;  %v1301_v7 = vadd.f32 %v18107_v2, %v20132_v49  ;;  %v20146_v49 = vld [vmem:[#allocation18_spill] sm:$0xff] }
 0x2f0   : > { %14731 = vmatmul.mubr.msk.f32.gmra.mrb[108].mxu0 %vm3334_vm2, %v1696_v57  ;;  %v12166_v57 = vld [vmem:[%s16505_s18 + $0xb90] sm:$0xff] }
 0x2f1   : > { %14733 = vmatprep.mubr.msk.f32.mxu0 %vm3334_vm2, %v1697_v25  ;;  %v1714_v25 = vmax.f32 %v1216_v17, 0.0  ;;  %v20130_v17 = vld [vmem:[#allocation98_spill] sm:$0xff] }
 0x2f2   : > { %15009 = vmatmul.mubr.msk.f32.gmra.mrb[28].mxu1 %vm437_vm0, %v12153_v28  ;;  %v20120_v28 = vld [vmem:[#allocation86_spill] sm:$0xff] }
 0x2f3   : > { %15011 = vmatprep.mubr.msk.f32.mxu1 %vm437_vm0, %v12154_v32  ;;  %v12383_v32 = vld [vmem:[%s20007_s3 + $0x110] sm:$0xff] }
 0x2f4   : > { %14734 = vmatmul.mubr.msk.f32.gmra.mrb[110].mxu0 %vm3334_vm2, %v1698_v38  ;;  %v20119_v38 = vld [vmem:[#allocation87_spill] sm:$0xff] }
 0x2f5   : > { %14736 = vmatprep.mubr.msk.f32.mxu0 %vm3334_vm2, %v1699_v45  ;;  %v1231_v48 = vadd.f32 %v18107_v2, %v20119_v38  ;;  %v12168_v45 = vld [vmem:[%s16505_s18 + $0xba0] sm:$0xff]  ;;  %v12182_v38 = vld [vmem:[%s16505_s18 + $0xc10] sm:$0xff] }
 0x2f6   : > { %15012 = vmatmul.mubr.msk.f32.gmra.mrb[30].mxu1 %vm437_vm0, %v12155_v9  ;;  %v12384_v9 = vld [vmem:[%s20007_s3 + $0x118] sm:$0xff] }
 0x2f7   : > { %15014 = vmatprep.mubr.msk.f32.mxu1 %vm437_vm0, %v12156_v54  ;;  %v1717_v35 = vmax.f32 %v1231_v48, 0.0  ;;  %v15826_v42 = vpack.c.bf16 %v12384_v9, %v12383_v32  ;;  %v20122_v54 = vld [vmem:[#allocation88_spill] sm:$0xff]  ;;  %v12183_v48 = vld [vmem:[%s16505_s18 + $0xc18] sm:$0xff]  ;;  %v20135_v9 = vld [vmem:[#allocation5_spill] sm:$0xff] }
 0x2f8   : > { %14737 = vmatmul.mubr.msk.f32.gmra.mrb[112].mxu0 %vm3334_vm2, %v1700_v62  ;;  %v1236_v62 = vadd.f32 %v18107_v2, %v20120_v28  ;;  %v1731_v28 = vmax.f32 %v1301_v7, 0.0  ;;  %v1371_v7 = vadd.f32 %v18107_v2, %v20146_v49  ;;  %v20157_v49 = vld [vmem:[#allocation27_spill] sm:$0xff] }
 0x2f9   : > { %14739 = vmatprep.mubr.msk.f32.mxu0 %vm3334_vm2, %v1701_v8  ;;  %v20121_v8 = vld [vmem:[#allocation89_spill] sm:$0xff]  ;;  %15827 = vmatprep.subr.bf16.mxu0 %v15826_v42 }
 0x2fa   : > { %15015 = vmatmul.mubr.msk.f32.gmra.mrb[32].mxu1 %vm437_vm0, %v12157_v11  ;;  %v1241_v53 = vadd.f32 %v18107_v2, %v20121_v8  ;;  %v1718_v41 = vmax.f32 %v1236_v62, 0.0  ;;  %v1246_v11 = vadd.f32 %v18107_v2, %v20122_v54  ;;  %15829 = vmatpush3.bf16.msra.mxu0 %v15826_v42  ;;  %v20134_v62 = vld [vmem:[#allocation6_spill] sm:$0xff]  ;;  %v12184_v8 = vld [vmem:[%s16505_s18 + $0xc20] sm:$0xff]  ;;  %v12186_v54 = vld [vmem:[%s16505_s18 + $0xc30] sm:$0xff] }
 0x2fb   : > { %15017 = vmatprep.mubr.msk.f32.mxu1 %vm437_vm0, %v12158_v46  ;;  %v20124_v46 = vld [vmem:[#allocation90_spill] sm:$0xff] }
 0x2fc   : > { %14740 = vmatmul.mubr.msk.f32.gmra.mrb[114].mxu0 %vm3334_vm2, %v1702_v37  ;;  %v12170_v37 = vld [vmem:[%s16505_s18 + $0xbb0] sm:$0xff]  ;;  %v1720_v13 = vmax.f32 %v1246_v11, 0.0  ;;  %v12187_v11 = vld [vmem:[%s16505_s18 + $0xc38] sm:$0xff] }
 0x2fd   : > { %14742 = vmatprep.mubr.msk.f32.mxu0 %vm3334_vm2, %v1703_v5  ;;  %v12171_v5 = vld [vmem:[%s16505_s18 + $0xbb8] sm:$0xff] }
 0x2fe   : > { %15018 = vmatmul.mubr.msk.f32.gmra.mrb[34].mxu1 %vm437_vm0, %v12159_v14  ;;  %v1256_v14 = vadd.f32 %v18107_v2, %v20124_v46  ;;  %v12188_v46 = vld [vmem:[%s16505_s18 + $0xc40] sm:$0xff] }
 0x2ff   : > { %15020 = vmatprep.mubr.msk.f32.mxu1 %vm437_vm0, %v12160_v0  ;;  %v1266_v0 = vadd.f32 %v18107_v2, %v20125_v33 }
 0x300   : > { %14743 = vmatmul.mubr.msk.f32.gmra.mrb[116].mxu0 %vm3334_vm2, %v1704_v26  ;;  %v1719_v26 = vmax.f32 %v1241_v53, 0.0  ;;  %v1722_v12 = vmax.f32 %v1256_v14, 0.0  ;;  %v12185_v53 = vld [vmem:[%s16505_s18 + $0xc28] sm:$0xff] }
 0x301   : > { %14745 = vmatprep.mubr.msk.f32.mxu0 %vm3334_vm2, %v1705_v31  ;;  %v12172_v31 = vld [vmem:[%s16505_s18 + $0xbc0] sm:$0xff]  ;;  %v12189_v14 = vld [vmem:[%s16505_s18 + $0xc48] sm:$0xff] }
 0x302   : > { %15021 = vmatmul.mubr.msk.f32.gmra.mrb[36].mxu1 %vm437_vm0, %v12161_v50  ;;  %v1723_v50 = vmax.f32 %v1261_v21, 0.0  ;;  %v20139_v21 = vld [vmem:[#allocation9_spill] sm:$0xff] }
 0x303   : > { %15023 = vmatprep.mubr.msk.f32.mxu1 %vm437_vm0, %v12162_v47 }
 0x304   : > { %14746 = vmatmul.mubr.msk.f32.gmra.mrb[118].mxu0 %vm3334_vm2, %v1706_v6  ;;  %v1721_v6 = vmax.f32 %v1251_v20, 0.0  ;;  %v1326_v20 = vadd.f32 %v18107_v2, %v20137_v24 }
 0x305   : > { %14748 = vmatprep.mubr.msk.f32.mxu0 %vm3334_vm2, %v1707_v63  ;;  %v12175_v63 = vld [vmem:[%s16505_s18 + $0xbd8] sm:$0xff] }
 0x306   : > { %15024 = vmatmul.mubr.msk.f32.gmra.mrb[38].mxu1 %vm437_vm0, %v12163_v36  ;;  %v20128_v36 = vld [vmem:[#allocation96_spill] sm:$0xff] }
 0x307   : > { %15026 = vmatprep.mubr.msk.f32.mxu1 %vm437_vm0, %v12164_v15  ;;  %v20129_v15 = vld [vmem:[#allocation95_spill] sm:$0xff] }
 0x308   : > { %14749 = vmatmul.mubr.msk.f32.gmra.mrb[120].mxu0 %vm3334_vm2, %v1708_v55  ;;  %v20126_v55 = vld [vmem:[#allocation94_spill] sm:$0xff] }
 0x309   : > { %14751 = vmatprep.mubr.msk.f32.mxu0 %vm3334_vm2, %v1709_v39  ;;  %v1271_v43 = vadd.f32 %v18107_v2, %v20126_v55  ;;  %v1724_v39 = vmax.f32 %v1266_v0, 0.0 }
 0x30a   : > { %15027 = vmatmul.mubr.msk.f32.gmra.mrb[40].mxu1 %vm437_vm0, %v12165_v27  ;;  %v1286_v27 = vadd.f32 %v18107_v2, %v20129_v15 }
 0x30b   : > { %15029 = vmatprep.mubr.msk.f32.mxu1 %vm437_vm0, %v12166_v57  ;;  %v1725_v47 = vmax.f32 %v1271_v43, 0.0  ;;  %v12191_v43 = vld [vmem:[%s16505_s18 + $0xc58] sm:$0xff] }
 0x30c   : > { %14752 = vmatmul.mubr.msk.f32.gmra.mrb[122].mxu0 %vm3334_vm2, %v1710_v60  ;;  %v1281_v60 = vadd.f32 %v18107_v2, %v20128_v36  ;;  %v1728_v57 = vmax.f32 %v1286_v27, 0.0  ;;  %v20144_v27 = vld [vmem:[#allocation16_spill] sm:$0xff] }
 0x30d   : > { %14754 = vmatprep.mubr.msk.f32.mxu0 %vm3334_vm2, %v1711_v1  ;;  %v12530_v1 = vld [vmem:[%s20009_s5 + $0x40] sm:$0xff] }
 0x30e   : > { %15030 = vmatmul.mubr.msk.f32.gmra.mrb[42].mxu1 %vm437_vm0, %v12167_v56  ;;  %v1727_v61 = vmax.f32 %v1281_v60, 0.0  ;;  %v20131_v56 = vld [vmem:[#allocation97_spill] sm:$0xff]  ;;  %v12192_v60 = vld [vmem:[%s16505_s18 + $0xc60] sm:$0xff] }
 0x30f   : > { %15032 = vmatprep.mubr.msk.f32.mxu1 %vm437_vm0, %v12168_v45  ;;  %v20133_v45 = vld [vmem:[#allocation3_spill] sm:$0xff] }
 0x310   : > { %14755 = vmatmul.mubr.msk.f32.gmra.mrb[124].mxu0 %vm3334_vm2, %v1712_v29  ;;  %v15830_v29 = vpack.c.bf16 %v12531_v51, %v12530_v1  ;;  %v20143_v51 = vld [vmem:[#allocation13_spill] sm:$0xff] }
 0x311   : > { %14757 = vmatprep.mubr.msk.f32.mxu0 %vm3334_vm2, %v1713_v19  ;;  %v1291_v19 = vadd.f32 %v18107_v2, %v20130_v17  ;;  %v12194_v17 = vld [vmem:[%s16505_s18 + $0xc70] sm:$0xff] }
 0x312   : > { %15033 = vmatmul.mubr.msk.f32.gmra.mrb[44].mxu1 %vm437_vm0, %v12169_v16  ;;  %15831 = vmatprep.subr.bf16.mxu1 %v15830_v29  ;;  %v1306_v16 = vadd.f32 %v18107_v2, %v20133_v45 }
 0x313   : > { %15035 = vmatprep.mubr.msk.f32.mxu1 %vm437_vm0, %v12170_v37  ;;  %15833 = vmatpush3.bf16.msra.mxu1 %v15830_v29  ;;  %v1316_v37 = vadd.f32 %v18107_v2, %v20135_v9  ;;  %v1361_v29 = vadd.f32 %v18107_v2, %v20144_v27  ;;  %v12199_v9 = vld [vmem:[%s16505_s18 + $0xc98] sm:$0xff] }
 0x314   : > { %14758 = vmatmul.mubr.msk.f32.gmra.mrb[126].mxu0 %vm3334_vm2, %v1714_v25  ;;  %v1296_v25 = vadd.f32 %v18107_v2, %v20131_v56  ;;  %v1732_v32 = vmax.f32 %v1306_v16, 0.0 }
 0x315   : > { %14760 = vmatprep.mubr.msk.f32.mxu0 %vm3334_vm2, %v1715_v30  ;;  %v1729_v30 = vmax.f32 %v1291_v19, 0.0  ;;  %v12195_v19 = vld [vmem:[%s16505_s18 + $0xc78] sm:$0xff] }
 0x316   : > { %15036 = vmatmul.mubr.msk.f32.gmra.mrb[46].mxu1 %vm437_vm0, %v12171_v5  ;;  %v20136_v5 = vld [vmem:[#allocation8_spill] sm:$0xff] }
 0x317   : > { %15038 = vmatprep.mubr.msk.f32.mxu1 %vm437_vm0, %v12172_v31 }
 0x318   : > { %14761 = vmatmul.mubr.msk.f32.gmra.mrb[128].mxu0 %vm3334_vm2, %v1716_v40  ;;  %v1730_v40 = vmax.f32 %v1296_v25, 0.0  ;;  %v1743_v25 = vmax.f32 %v1361_v29, 0.0  ;;  %v20156_v29 = vld [vmem:[#allocation28_spill] sm:$0xff] }
 0x319   : > { %14763 = vmatprep.mubr.msk.f32.mxu0 %vm3334_vm2, %v1717_v35  ;;  %v1311_v35 = vadd.f32 %v18107_v2, %v20134_v62  ;;  %v1745_v62 = vmax.f32 %v1371_v7, 0.0  ;;  %v1426_v7 = vadd.f32 %v18107_v2, %v20157_v49 }
 0x31a   : > { %15039 = vmatmul.mubr.msk.f32.gmra.mrb[48].mxu1 %vm437_vm0, %v12173_v23  ;;  %v20138_v23 = vld [vmem:[#allocation10_spill] sm:$0xff] }
 0x31b   : > { %15041 = vmatprep.mubr.msk.f32.mxu1 %vm437_vm0, %v12174_v4  ;;  %v1733_v42 = vmax.f32 %v1311_v35, 0.0  ;;  %v1336_v4 = vadd.f32 %v18107_v2, %v20139_v21  ;;  %v20148_v35 = vld [vmem:[#allocation20_spill] sm:$0xff] }
 0x31c   : > { %14764 = vmatmul.mubr.msk.f32.gmra.mrb[130].mxu0 %vm3334_vm2, %v1718_v41  ;;  %v1321_v41 = vadd.f32 %v18107_v2, %v20136_v5  ;;  %v20149_v5 = vld [vmem:[#allocation19_spill] sm:$0xff]  ;;  %v20152_v21 = vld [vmem:[#allocation24_spill] sm:$0xff] }
 0x31d   : > { %14766 = vmatprep.mubr.msk.f32.mxu0 %vm3334_vm2, %v1719_v26  ;;  %v1734_v26 = vmax.f32 %v1316_v37, 0.0 }
 0x31e   : > { %15042 = vmatmul.mubr.msk.f32.gmra.mrb[50].mxu1 %vm437_vm0, %v12175_v63  ;;  %v1735_v31 = vmax.f32 %v1321_v41, 0.0  ;;  %v1386_v41 = vadd.f32 %v18107_v2, %v20149_v5  ;;  %v20160_v5 = vld [vmem:[#allocation32_spill] sm:$0xff] }
 0x31f   : > { %15044 = vmatprep.mubr.msk.f32.mxu1 %vm437_vm0, %v12176_v18  ;;  %v1738_v18 = vmax.f32 %v1336_v4, 0.0  ;;  %v1401_v4 = vadd.f32 %v18107_v2, %v20152_v21 }
 0x320   : > { %14767 = vmatmul.mubr.msk.f32.gmra.mrb[132].mxu0 %vm3334_vm2, %v1720_v13  ;;  %v1331_v13 = vadd.f32 %v18107_v2, %v20138_v23 }
 0x321   : > { %14769 = vmatprep.mubr.msk.f32.mxu0 %vm3334_vm2, %v1721_v6  ;;  %v1736_v6 = vmax.f32 %v1326_v20, 0.0  ;;  %v12200_v20 = vld [vmem:[%s16505_s18 + $0xca0] sm:$0xff] }
 0x322   : > { %15045 = vmatmul.mubr.msk.f32.gmra.mrb[52].mxu1 %vm437_vm0, %v12177_v59  ;;  %v1737_v63 = vmax.f32 %v1331_v13, 0.0  ;;  %v20141_v59 = vld [vmem:[#allocation11_spill] sm:$0xff]  ;;  %v1748_v13 = vmax.f32 %v1386_v41, 0.0  ;;  %v1441_v41 = vadd.f32 %v18107_v2, %v20160_v5  ;;  %v20168_v5 = vld [vmem:[#allocation40_spill] sm:$0xff] }
 0x323   : > { %15047 = vmatprep.mubr.msk.f32.mxu1 %vm437_vm0, %v12178_v34  ;;  %v12193_v34 = vld [vmem:[%s16505_s18 + $0xc68] sm:$0xff] }
 0x324   : > { %14770 = vmatmul.mubr.msk.f32.gmra.mrb[134].mxu0 %vm3334_vm2, %v1722_v12  ;;  %v20140_v12 = vld [vmem:[#allocation12_spill] sm:$0xff] }
 0x325   : > { %14772 = vmatprep.mubr.msk.f32.mxu0 %vm3334_vm2, %v1723_v50  ;;  %v1341_v33 = vadd.f32 %v18107_v2, %v20140_v12  ;;  %v12190_v50 = vld [vmem:[%s16505_s18 + $0xc50] sm:$0xff] }
 0x326   : > { %15048 = vmatmul.mubr.msk.f32.gmra.mrb[54].mxu1 %vm437_vm0, %v12179_v52  ;;  %v12202_v12 = vld [vmem:[%s16505_s18 + $0xcb0] sm:$0xff] }
 0x327   : > { %15050 = vmatprep.mubr.msk.f32.mxu1 %vm437_vm0, %v12180_v44  ;;  %v1739_v3 = vmax.f32 %v1341_v33, 0.0  ;;  %v12203_v33 = vld [vmem:[%s16505_s18 + $0xcb8] sm:$0xff] }
 0x328   : > { %14773 = vmatmul.mubr.msk.f32.gmra.mrb[136].mxu0 %vm3334_vm2, %v1724_v39  ;;  %v1346_v39 = vadd.f32 %v18107_v2, %v20141_v59 }
 0x329   : > { %14775 = vmatprep.mubr.msk.f32.mxu0 %vm3334_vm2, %v1725_v47  ;;  %v1351_v47 = vadd.f32 %v18107_v2, %v20142_v10 }
 0x32a   : > { %15051 = vmatmul.mubr.msk.f32.gmra.mrb[56].mxu1 %vm437_vm0, %v12181_v58  ;;  %v1740_v1 = vmax.f32 %v1346_v39, 0.0  ;;  %v1751_v39 = vmax.f32 %v1401_v4, 0.0 }
 0x32b   : > { %15053 = vmatprep.mubr.msk.f32.mxu1 %vm437_vm0, %v12182_v38  ;;  %v1741_v15 = vmax.f32 %v1351_v47, 0.0  ;;  %v12196_v38 = vld [vmem:[%s16505_s18 + $0xc80] sm:$0xff] }
 0x32c   : > { %14776 = vmatmul.mubr.msk.f32.gmra.mrb[138].mxu0 %vm3334_vm2, %v1726_v22  ;;  %v1356_v22 = vadd.f32 %v18107_v2, %v20143_v51 }
 0x32d   : > { %14778 = vmatprep.mubr.msk.f32.mxu0 %vm3334_vm2, %v1727_v61 }
 0x32e   : > { %15054 = vmatmul.mubr.msk.f32.gmra.mrb[58].mxu1 %vm437_vm0, %v12183_v48  ;;  %v1742_v58 = vmax.f32 %v1356_v22, 0.0  ;;  %v12197_v48 = vld [vmem:[%s16505_s18 + $0xc88] sm:$0xff]  ;;  %v20155_v22 = vld [vmem:[#allocation25_spill] sm:$0xff] }
 0x32f   : > { %15056 = vmatprep.mubr.msk.f32.mxu1 %vm437_vm0, %v12184_v8  ;;  %v1381_v8 = vadd.f32 %v18107_v2, %v20148_v35 }
 0x330   : > { %14779 = vmatmul.mubr.msk.f32.gmra.mrb[140].mxu0 %vm3334_vm2, %v1728_v57  ;;  %v20145_v57 = vld [vmem:[#allocation15_spill] sm:$0xff] }
 0x331   : > { %14781 = vmatprep.mubr.msk.f32.mxu0 %vm3334_vm2, %v1729_v30  ;;  %v1366_v56 = vadd.f32 %v18107_v2, %v20145_v57  ;;  %v12207_v57 = vld [vmem:[%s16505_s18 + $0xcd8] sm:$0xff] }
 0x332   : > { %15057 = vmatmul.mubr.msk.f32.gmra.mrb[60].mxu1 %vm437_vm0, %v12185_v53 }
 0x333   : > { %15059 = vmatprep.mubr.msk.f32.mxu1 %vm437_vm0, %v12186_v54  ;;  %v1744_v16 = vmax.f32 %v1366_v56, 0.0  ;;  %v1747_v54 = vmax.f32 %v1381_v8, 0.0  ;;  %v1756_v8 = vmax.f32 %v1426_v7, 0.0  ;;  %v20166_v7 = vld [vmem:[#allocation38_spill] sm:$0xff] }
 0x334   : > { %14782 = vmatmul.mubr.msk.f32.gmra.mrb[142].mxu0 %vm3334_vm2, %v1730_v40  ;;  %v20147_v40 = vld [vmem:[#allocation17_spill] sm:$0xff] }
 0x335   : > { %14784 = vmatprep.mubr.msk.f32.mxu0 %vm3334_vm2, %v1731_v28  ;;  %v1376_v28 = vadd.f32 %v18107_v2, %v20147_v40 }
 0x336   : > { %15060 = vmatmul.mubr.msk.f32.gmra.mrb[62].mxu1 %vm437_vm0, %v12187_v11  ;;  %v20150_v11 = vld [vmem:[#allocation22_spill] sm:$0xff] }
 0x337   : > { %15062 = vmatprep.mubr.msk.f32.mxu1 %vm437_vm0, %v12188_v46  ;;  %v20151_v46 = vld [vmem:[#allocation21_spill] sm:$0xff] }
 0x338   : > { %14785 = vmatmul.mubr.msk.f32.gmra.mrb[144].mxu0 %vm3334_vm2, %v1732_v32  ;;  %v12198_v32 = vld [vmem:[%s16505_s18 + $0xc90] sm:$0xff] }
 0x339   : > { %14787 = vmatprep.mubr.msk.f32.mxu0 %vm3334_vm2, %v1733_v42  ;;  %v18287_v0 = vpop.f32.mrb[216].mxu1  ;;  %v1746_v42 = vmax.f32 %v1376_v28, 0.0  ;;  %v12208_v28 = vld [vmem:[%s16505_s18 + $0xce0] sm:$0xff] }
 0x33a   : > { %15063 = vmatmul.mubr.msk.f32.gmra.mrb[64].mxu1 %vm437_vm0, %v12189_v14  ;;  %v18292_v55 = vpop.f32.mrb[217].mxu1  ;;  %v1396_v14 = vadd.f32 %v18107_v2, %v20151_v46 }
 0x33b   : > { %15065 = vmatprep.mubr.msk.f32.mxu1 %vm437_vm0, %v12190_v50 }
 0x33c   : > { %14788 = vmatmul.mubr.msk.f32.gmra.mrb[146].mxu0 %vm3334_vm2, %v1734_v26  ;;  %v1391_v26 = vadd.f32 %v18107_v2, %v20150_v11  ;;  %v12210_v11 = vld [vmem:[%s16505_s18 + $0xcf0] sm:$0xff] }
 0x33d   : > { %14790 = vmatprep.mubr.msk.f32.mxu0 %vm3334_vm2, %v1735_v31  ;;  %v12201_v31 = vld [vmem:[%s16505_s18 + $0xca8] sm:$0xff] }
 0x33e   : > { %15066 = vmatmul.mubr.msk.f32.gmra.mrb[66].mxu1 %vm437_vm0, %v12191_v43  ;;  %v1750_v43 = vmax.f32 %v1396_v14, 0.0  ;;  %v1759_v14 = vmax.f32 %v1441_v41, 0.0  ;;  %v1481_v41 = vadd.f32 %v18107_v2, %v20168_v5  ;;  %v20175_v5 = vld [vmem:[#allocation45_spill] sm:$0xff] }
 0x33f   : > { %15068 = vmatprep.mubr.msk.f32.mxu1 %vm437_vm0, %v12192_v60  ;;  %v12204_v60 = vld [vmem:[%s16505_s18 + $0xcc0] sm:$0xff] }
 0x340   : > { %14791 = vmatmul.mubr.msk.f32.gmra.mrb[148].mxu0 %vm3334_vm2, %v1736_v6  ;;  %v18301_v36 = vpop.f32.mrb[218].mxu1  ;;  %v1749_v6 = vmax.f32 %v1391_v26, 0.0  ;;  %v12211_v26 = vld [vmem:[%s16505_s18 + $0xcf8] sm:$0xff] }
 0x341   : > { %14793 = vmatprep.mubr.msk.f32.mxu0 %vm3334_vm2, %v1737_v63  ;;  %v18307_v52 = vpop.f32.mrb[219].mxu1 }
 0x342   : > { %15069 = vmatmul.mubr.msk.f32.gmra.mrb[68].mxu1 %vm437_vm0, %v12193_v34  ;;  %v12205_v34 = vld [vmem:[%s16505_s18 + $0xcc8] sm:$0xff] }
 0x343   : > { %15071 = vmatprep.mubr.msk.f32.mxu1 %vm437_vm0, %v12194_v17  ;;  %v1421_v17 = vadd.f32 %v18107_v2, %v20156_v29  ;;  %v12533_v29 = vld [vmem:[%s20009_s5 + $0x58] sm:$0xff] }
 0x344   : > { %14794 = vmatmul.mubr.msk.f32.gmra.mrb[150].mxu0 %vm3334_vm2, %v1738_v18  ;;  %v18315_v61 = vpop.f32.mrb[220].mxu1  ;;  %v20153_v18 = vld [vmem:[#allocation23_spill] sm:$0xff] }
 0x345   : > { %14796 = vmatprep.mubr.msk.f32.mxu0 %vm3334_vm2, %v1739_v3  ;;  %v18321_v44 = vpop.f32.mrb[221].mxu1  ;;  %v1406_v59 = vadd.f32 %v18107_v2, %v20153_v18  ;;  %v20154_v3 = vld [vmem:[#allocation26_spill] sm:$0xff] }
 0x346   : > { %15072 = vmatmul.mubr.msk.f32.gmra.mrb[70].mxu1 %vm437_vm0, %v12195_v19  ;;  %v1411_v10 = vadd.f32 %v18107_v2, %v20154_v3 }
 0x347   : > { %15074 = vmatprep.mubr.msk.f32.mxu1 %vm437_vm0, %v12196_v38  ;;  %v1752_v51 = vmax.f32 %v1406_v59, 0.0  ;;  %v1755_v38 = vmax.f32 %v1421_v17, 0.0  ;;  %v20163_v59 = vld [vmem:[#allocation33_spill] sm:$0xff] }
 0x348   : > { %14797 = vmatmul.mubr.msk.f32.gmra.mrb[152].mxu0 %vm3334_vm2, %v1740_v1  ;;  %v18329_v30 = vpop.f32.mrb[222].mxu1  ;;  %v1753_v27 = vmax.f32 %v1411_v10, 0.0  ;;  %v20164_v10 = vld [vmem:[#allocation36_spill] sm:$0xff] }
 0x349   : > { %14799 = vmatprep.mubr.msk.f32.mxu0 %vm3334_vm2, %v1741_v15  ;;  %v18335_v45 = vpop.f32.mrb[223].mxu1  ;;  %v1416_v15 = vadd.f32 %v18107_v2, %v20155_v22  ;;  %v12215_v22 = vld [vmem:[%s16505_s18 + $0xd18] sm:$0xff] }
 0x34a   : > { %15075 = vmatmul.mubr.msk.f32.gmra.mrb[72].mxu1 %vm437_vm0, %v12197_v48  ;;  %v20158_v48 = vld [vmem:[#allocation30_spill] sm:$0xff] }
 0x34b   : > { %15077 = vmatprep.mubr.msk.f32.mxu1 %vm437_vm0, %v12198_v32  ;;  %v20159_v32 = vld [vmem:[#allocation29_spill] sm:$0xff] }
 0x34c   : > { %14800 = vmatmul.mubr.msk.f32.gmra.mrb[154].mxu0 %vm3334_vm2, %v1742_v58  ;;  %v18343_v53 = vpop.f32.mrb[224].mxu1  ;;  %v12206_v58 = vld [vmem:[%s16505_s18 + $0xcd0] sm:$0xff] }
 0x34d   : > { %14802 = vmatprep.mubr.msk.f32.mxu0 %vm3334_vm2, %v1743_v25  ;;  %v18349_v37 = vpop.f32.mrb[225].mxu1  ;;  %v1754_v25 = vmax.f32 %v1416_v15, 0.0  ;;  %v12532_v15 = vld [vmem:[%s20009_s5 + $0x50] sm:$0xff] }
 0x34e   : > { %15078 = vmatmul.mubr.msk.f32.gmra.mrb[74].mxu1 %vm437_vm0, %v12199_v9  ;;  %v1436_v9 = vadd.f32 %v18107_v2, %v20159_v32  ;;  %v20167_v32 = vld [vmem:[#allocation37_spill] sm:$0xff] }
 0x34f   : > { %15080 = vmatprep.mubr.msk.f32.mxu1 %vm437_vm0, %v12200_v20 }
 0x350   : > { %14803 = vmatmul.mubr.msk.f32.gmra.mrb[156].mxu0 %vm3334_vm2, %v1744_v16  ;;  %v18357_v24 = vpop.f32.mrb[226].mxu1  ;;  %v1431_v16 = vadd.f32 %v18107_v2, %v20158_v48 }
 0x351   : > { %14805 = vmatprep.mubr.msk.f32.mxu0 %vm3334_vm2, %v1745_v62  ;;  %v18363_v23 = vpop.f32.mrb[227].mxu1  ;;  %v12209_v62 = vld [vmem:[%s16505_s18 + $0xce8] sm:$0xff] }
 0x352   : > { %15081 = vmatmul.mubr.msk.f32.gmra.mrb[76].mxu1 %vm437_vm0, %v12201_v31  ;;  %v1758_v31 = vmax.f32 %v1436_v9, 0.0  ;;  %v1476_v9 = vadd.f32 %v18107_v2, %v20167_v32  ;;  %v12224_v32 = vld [vmem:[%s16505_s18 + $0xd60] sm:$0xff] }
 0x353   : > { %15083 = vmatprep.mubr.msk.f32.mxu1 %vm437_vm0, %v12202_v12  ;;  %v12212_v12 = vld [vmem:[%s16505_s18 + $0xd00] sm:$0xff] }
 0x354   : > { %14806 = vmatmul.mubr.msk.f32.gmra.mrb[158].mxu0 %vm3334_vm2, %v1746_v42  ;;  %v18371_v63 = vpop.f32.mrb[228].mxu1  ;;  %v1757_v42 = vmax.f32 %v1431_v16, 0.0  ;;  %v12216_v16 = vld [vmem:[%s16505_s18 + $0xd20] sm:$0xff] }
 0x355   : > { %14808 = vmatprep.mubr.msk.f32.mxu0 %vm3334_vm2, %v1747_v54  ;;  %v18377_v50 = vpop.f32.mrb[229].mxu1 }
 0x356   : > { %15084 = vmatmul.mubr.msk.f32.gmra.mrb[78].mxu1 %vm437_vm0, %v12203_v33  ;;  %v12213_v33 = vld [vmem:[%s16505_s18 + $0xd08] sm:$0xff] }
 0x357   : > { %15086 = vmatprep.mubr.msk.f32.mxu1 %vm437_vm0, %v12204_v60  ;;  %v1461_v60 = vadd.f32 %v18107_v2, %v20164_v10  ;;  %v20171_v10 = vld [vmem:[#allocation41_spill] sm:$0xff] }
 0x358   : > { %14809 = vmatmul.mubr.msk.f32.gmra.mrb[160].mxu0 %vm3334_vm2, %v1748_v13  ;;  %v18385_v47 = vpop.f32.mrb[230].mxu1  ;;  %v20161_v13 = vld [vmem:[#allocation31_spill] sm:$0xff] }
 0x359   : > { %14811 = vmatprep.mubr.msk.f32.mxu0 %vm3334_vm2, %v1749_v6  ;;  %v18391_v1 = vpop.f32.mrb[231].mxu1  ;;  %v1446_v46 = vadd.f32 %v18107_v2, %v20161_v13  ;;  %v20162_v6 = vld [vmem:[#allocation34_spill] sm:$0xff]  ;;  %v1763_v49 = vmax.f32 %v1461_v60, 0.0  ;;  %v1496_v60 = vadd.f32 %v18107_v2, %v20171_v10 }
 0x35a   : > { %15087 = vmatmul.mubr.msk.f32.gmra.mrb[80].mxu1 %vm437_vm0, %v12205_v34  ;;  %v1451_v21 = vadd.f32 %v18107_v2, %v20162_v6 }
 0x35b   : > { %15089 = vmatprep.mubr.msk.f32.mxu1 %vm437_vm0, %v12206_v58  ;;  %v1760_v18 = vmax.f32 %v1446_v46, 0.0  ;;  %v20165_v58 = vld [vmem:[#allocation35_spill] sm:$0xff]  ;;  %v1766_v46 = vmax.f32 %v1476_v9, 0.0  ;;  %v12225_v9 = vld [vmem:[%s16505_s18 + $0xd68] sm:$0xff] }
 0x35c   : > { %14812 = vmatmul.mubr.msk.f32.gmra.mrb[162].mxu0 %vm3334_vm2, %v1750_v43  ;;  %v18399_v19 = vpop.f32.mrb[232].mxu1  ;;  %v1761_v3 = vmax.f32 %v1451_v21, 0.0  ;;  %v1767_v21 = vmax.f32 %v1481_v41, 0.0  ;;  %v1516_v41 = vadd.f32 %v18107_v2, %v20175_v5 }
 0x35d   : > { %14814 = vmatprep.mubr.msk.f32.mxu0 %vm3334_vm2, %v1751_v39  ;;  %v18405_v56 = vpop.f32.mrb[233].mxu1  ;;  %v1456_v39 = vadd.f32 %v18107_v2, %v20163_v59  ;;  %v12221_v59 = vld [vmem:[%s16505_s18 + $0xd48] sm:$0xff] }
 0x35e   : > { %15090 = vmatmul.mubr.msk.f32.gmra.mrb[82].mxu1 %vm437_vm0, %v12207_v57  ;;  %v1466_v57 = vadd.f32 %v18107_v2, %v20165_v58  ;;  %v12223_v58 = vld [vmem:[%s16505_s18 + $0xd58] sm:$0xff] }
 0x35f   : > { %15092 = vmatprep.mubr.msk.f32.mxu1 %vm437_vm0, %v12208_v28  ;;  %v1762_v17 = vmax.f32 %v1456_v39, 0.0  ;;  %v12217_v28 = vld [vmem:[%s16505_s18 + $0xd28] sm:$0xff] }
 0x360   : > { %14815 = vmatmul.mubr.msk.f32.gmra.mrb[164].mxu0 %vm3334_vm2, %v1752_v51  ;;  %v18413_v40 = vpop.f32.mrb[234].mxu1  ;;  %v12214_v51 = vld [vmem:[%s16505_s18 + $0xd10] sm:$0xff] }
 0x361   : > { %14817 = vmatprep.mubr.msk.f32.mxu0 %vm3334_vm2, %v1753_v27  ;;  %v18419_v35 = vpop.f32.mrb[235].mxu1 }
 0x362   : > { %15093 = vmatmul.mubr.msk.f32.gmra.mrb[84].mxu1 %vm437_vm0, %v12209_v62 }
 0x363   : > { %15095 = vmatprep.mubr.msk.f32.mxu1 %vm437_vm0, %v12210_v11 }
 0x364   : > { %14818 = vmatmul.mubr.msk.f32.gmra.mrb[166].mxu0 %vm3334_vm2, %v1754_v25  ;;  %v18427_v54 = vpop.f32.mrb[236].mxu1  ;;  %v15834_v25 = vpack.c.bf16 %v12533_v29, %v12532_v15  ;;  %v20172_v15 = vld [vmem:[#allocation44_spill] sm:$0xff] }
 0x365   : > { %14820 = vmatprep.mubr.msk.f32.mxu0 %vm3334_vm2, %v1755_v38  ;;  %v18433_v20 = vpop.f32.mrb[237].mxu1  ;;  %v1471_v38 = vadd.f32 %v18107_v2, %v20166_v7  ;;  %v1501_v29 = vadd.f32 %v18107_v2, %v20172_v15 }
 0x366   : > { %15096 = vmatmul.mubr.msk.f32.gmra.mrb[86].mxu1 %vm437_vm0, %v12211_v26  ;;  %15835 = vmatprep.subr.bf16.mxu1 %v15834_v25  ;;  %v12218_v26 = vld [vmem:[%s16505_s18 + $0xd30] sm:$0xff] }
 0x367   : > { %15098 = vmatprep.mubr.msk.f32.mxu1 %vm437_vm0, %v12212_v12  ;;  %15837 = vmatpush3.bf16.msra.mxu1 %v15834_v25  ;;  %v20170_v12 = vld [vmem:[#allocation42_spill] sm:$0xff]  ;;  %v20173_v25 = vld [vmem:[#allocation43_spill] sm:$0xff] }
 0x368   : > { %14821 = vmatmul.mubr.msk.f32.gmra.mrb[168].mxu0 %vm3334_vm2, %v1756_v8  ;;  %v18441_v4 = vpop.f32.mrb[238].mxu1  ;;  %v1764_v8 = vmax.f32 %v1466_v57, 0.0  ;;  %v1770_v57 = vmax.f32 %v1496_v60, 0.0  ;;  %v20178_v60 = vld [vmem:[#allocation50_spill] sm:$0xff] }
 0x369   : > { %14823 = vmatprep.mubr.msk.f32.mxu0 %vm3334_vm2, %v1757_v42  ;;  %v18447_v43 = vpop.f32.mrb[239].mxu1  ;;  %v1765_v42 = vmax.f32 %v1471_v38, 0.0  ;;  %v1771_v38 = vmax.f32 %v1501_v29, 0.0 }
 0x36a   : > { %15099 = vmatmul.mubr.msk.f32.gmra.mrb[88].mxu1 %vm437_vm0, %v12213_v33  ;;  %v1491_v33 = vadd.f32 %v18107_v2, %v20170_v12  ;;  %v12227_v12 = vld [vmem:[%s16505_s18 + $0xd78] sm:$0xff] }
 0x36b   : > { %15101 = vmatprep.mubr.msk.f32.mxu1 %vm437_vm0, %v12214_v51 }
 0x36c   : > { %14824 = vmatmul.mubr.msk.f32.gmra.mrb[170].mxu0 %vm3334_vm2, %v1758_v31  ;;  %v18455_v34 = vpop.f32.mrb[240].mxu1  ;;  %v12219_v31 = vld [vmem:[%s16505_s18 + $0xd38] sm:$0xff] }
 0x36d   : > { %14826 = vmatprep.mubr.msk.f32.mxu0 %vm3334_vm2, %v1759_v14  ;;  %v18464_v27 = vpop.f32.mrb[241].mxu1  ;;  %v20169_v14 = vld [vmem:[#allocation39_spill] sm:$0xff] }
 0x36e   : > { %15102 = vmatmul.mubr.msk.f32.gmra.mrb[90].mxu1 %vm437_vm0, %v12215_v22  ;;  %v1486_v6 = vadd.f32 %v18107_v2, %v20169_v14  ;;  %v1769_v22 = vmax.f32 %v1491_v33, 0.0  ;;  %v1774_v33 = vmax.f32 %v1516_v41, 0.0  ;;  %v20182_v41 = vld [vmem:[#allocation54_spill] sm:$0xff] }
 0x36f   : > { %15104 = vmatprep.mubr.msk.f32.mxu1 %vm437_vm0, %v12216_v16  ;;  %v20174_v16 = vld [vmem:[#allocation46_spill] sm:$0xff] }
 0x370   : > { %14827 = vmatmul.mubr.msk.f32.gmra.mrb[172].mxu0 %vm3334_vm2, %v1760_v18  ;;  %v18475_v48 = vpop.f32.mrb[242].mxu1  ;;  %v12220_v18 = vld [vmem:[%s16505_s18 + $0xd40] sm:$0xff] }
 0x371   : > { %14829 = vmatprep.mubr.msk.f32.mxu0 %vm3334_vm2, %v1761_v3  ;;  %v18480_v62 = vpop.f32.mrb[243].mxu1  ;;  %v1768_v3 = vmax.f32 %v1486_v6, 0.0 }
 0x372   : > { %15105 = vmatmul.mubr.msk.f32.gmra.mrb[92].mxu1 %vm437_vm0, %v12217_v28  ;;  %v1511_v28 = vadd.f32 %v18107_v2, %v20174_v16 }
 0x373   : > { %15107 = vmatprep.mubr.msk.f32.mxu1 %vm437_vm0, %v12218_v26 }
 0x374   : > { %14830 = vmatmul.mubr.msk.f32.gmra.mrb[174].mxu0 %vm3334_vm2, %v1762_v17  ;;  %v18489_v11 = vpop.f32.mrb[244].mxu1  ;;  %v12222_v17 = vld [vmem:[%s16505_s18 + $0xd50] sm:$0xff] }
 0x375   : > { %14832 = vmatprep.mubr.msk.f32.mxu0 %vm3334_vm2, %v1763_v49  ;;  %v18495_v13 = vpop.f32.mrb[245].mxu1  ;;  %v1506_v49 = vadd.f32 %v18107_v2, %v20173_v25 }
 0x376   : > { %15108 = vmatmul.mubr.msk.f32.gmra.mrb[94].mxu1 %vm437_vm0, %v12219_v31  ;;  %v1773_v31 = vmax.f32 %v1511_v28, 0.0 }
 0x377   : > { %15110 = vmatprep.mubr.msk.f32.mxu1 %vm437_vm0, %v12220_v18  ;;  %v20177_v18 = vld [vmem:[#allocation47_spill] sm:$0xff] }
 0x378   : > { %14833 = vmatmul.mubr.msk.f32.gmra.mrb[176].mxu0 %vm3334_vm2, %v1764_v8  ;;  %v18506_v39 = vpop.f32.mrb[246].mxu1 }
 0x379   : > { %14835 = vmatprep.mubr.msk.f32.mxu0 %vm3334_vm2, %v1765_v42  ;;  %v18511_v51 = vpop.f32.mrb[247].mxu1  ;;  %v1772_v42 = vmax.f32 %v1506_v49, 0.0  ;;  %v20180_v49 = vld [vmem:[#allocation52_spill] sm:$0xff] }
 0x37a   : > { %15111 = vmatmul.mubr.msk.f32.gmra.mrb[96].mxu1 %vm437_vm0, %v12221_v59  ;;  %v1526_v59 = vadd.f32 %v18107_v2, %v20177_v18 }
 0x37b   : > { %15113 = vmatprep.mubr.msk.f32.mxu1 %vm437_vm0, %v12222_v17  ;;  %v20179_v17 = vld [vmem:[#allocation49_spill] sm:$0xff] }
 0x37c   : > { %14836 = vmatmul.mubr.msk.f32.gmra.mrb[178].mxu0 %vm3334_vm2, %v1766_v46  ;;  %v20176_v46 = vld [vmem:[#allocation48_spill] sm:$0xff]  ;;  %v1776_v29 = vmax.f32 %v1526_v59, 0.0 }
 0x37d   : > { %14838 = vmatprep.mubr.msk.f32.mxu0 %vm3334_vm2, %v1767_v21  ;;  %v18523_v7 = vpop.f32.mrb[248].mxu1  ;;  %v1521_v14 = vadd.f32 %v18107_v2, %v20176_v46  ;;  %v12226_v21 = vld [vmem:[%s16505_s18 + $0xd70] sm:$0xff]  ;;  %v20184_v59 = vld [vmem:[#allocation56_spill] sm:$0xff] }
 0x37e   : > { %v18527_v8 = vpop.f32.mrb[249].mxu1  ;;  %15114 = vmatmul.mubr.msk.f32.gmra.mrb[98].mxu1 %vm437_vm0, %v12223_v58  ;;  %v1536_v58 = vadd.f32 %v18107_v2, %v20179_v17 }
 0x37f   : > { %15116 = vmatprep.mubr.msk.f32.mxu1 %vm437_vm0, %v12224_v32  ;;  %v1775_v10 = vmax.f32 %v1521_v14, 0.0  ;;  %v20181_v32 = vld [vmem:[#allocation51_spill] sm:$0xff] }
 0x380   : > { %14839 = vmatmul.mubr.msk.f32.gmra.mrb[180].mxu0 %vm3334_vm2, %v1768_v3  ;;  %v1778_v28 = vmax.f32 %v1536_v58, 0.0 }
 0x381   : > { %14841 = vmatprep.mubr.msk.f32.mxu0 %vm3334_vm2, %v1769_v22  ;;  %v18537_v26 = vpop.f32.mrb[250].mxu1  ;;  %v1531_v22 = vadd.f32 %v18107_v2, %v20178_v60 }
 0x382   : > { %v18541_v6 = vpop.f32.mrb[251].mxu1  ;;  %15117 = vmatmul.mubr.msk.f32.gmra.mrb[100].mxu1 %vm437_vm0, %v12225_v9  ;;  %v1546_v9 = vadd.f32 %v18107_v2, %v20181_v32 }
 0x383   : > { %15119 = vmatprep.mubr.msk.f32.mxu1 %vm437_vm0, %v12226_v21  ;;  %v1777_v25 = vmax.f32 %v1531_v22, 0.0  ;;  %v20183_v21 = vld [vmem:[#allocation53_spill] sm:$0xff] }
 0x384   : > { %14842 = vmatmul.mubr.msk.f32.gmra.mrb[182].mxu0 %vm3334_vm2, %v1770_v57  ;;  %v1780_v14 = vmax.f32 %v1546_v9, 0.0  ;;  %v20187_v9 = vld [vmem:[#allocation57_spill] sm:$0xff] }
 0x385   : > { %14844 = vmatprep.mubr.msk.f32.mxu0 %vm3334_vm2, %v1771_v38  ;;  %v18551_v3 = vpop.f32.mrb[252].mxu1  ;;  %v1541_v38 = vadd.f32 %v18107_v2, %v20180_v49  ;;  %v20186_v49 = vld [vmem:[#allocation58_spill] sm:$0xff] }
 0x386   : > { %v18555_v15 = vpop.f32.mrb[253].mxu1  ;;  %15120 = vmatmul.mubr.msk.f32.gmra.mrb[102].mxu1 %vm437_vm0, %v12227_v12  ;;  %v1556_v12 = vadd.f32 %v18107_v2, %v20183_v21 }
 0x387   : > { %v1779_v5 = vmax.f32 %v1541_v38, 0.0  ;;  %v1571_v38 = vadd.f32 %v18107_v2, %v20186_v49 }
 0x388   : > { %14845 = vmatmul.mubr.msk.f32.gmra.mrb[184].mxu0 %vm3334_vm2, %v1772_v42  ;;  %v1782_v22 = vmax.f32 %v1556_v12, 0.0 }
 0x389   : > { %14847 = vmatprep.mubr.msk.f32.mxu0 %vm3334_vm2, %v1773_v31  ;;  %v18562_v57 = vpop.f32.mrb[254].mxu1  ;;  %v1551_v31 = vadd.f32 %v18107_v2, %v20182_v41 }
 0x38a   : > { %v18566_v16 = vpop.f32.mrb[255].mxu1 }
 0x38b   : > { %v1781_v18 = vmax.f32 %v1551_v31, 0.0  ;;  %v1785_v31 = vmax.f32 %v1571_v38, 0.0 }
 0x38c   : > { %14848 = vmatmul.mubr.msk.f32.gmra.mrb[186].mxu0 %vm3334_vm2, %v1774_v33 }
 0x38d   : > { %14850 = vmatprep.mubr.msk.f32.mxu0 %vm3334_vm2, %v1775_v10  ;;  %v18572_v42 = vpop.f32.mrb[0].mxu1  ;;  %v1561_v10 = vadd.f32 %v18107_v2, %v20184_v59  ;;  %v20189_v59 = vld [vmem:[#allocation59_spill] sm:$0xff] }
 0x38e   : > { %v18576_v46 = vpop.f32.mrb[1].mxu1 }
 0x390   : > { %14851 = vmatmul.mubr.msk.f32.gmra.mrb[188].mxu0 %vm3334_vm2, %v1776_v29  ;;  %v20185_v29 = vld [vmem:[#allocation55_spill] sm:$0xff] }
 0x391   : > { %14853 = vmatprep.mubr.msk.f32.mxu0 %vm3334_vm2, %v1777_v25  ;;  %v18582_v33 = vpop.f32.mrb[2].mxu1  ;;  %v1566_v17 = vadd.f32 %v18107_v2, %v20185_v29  ;;  %v1783_v25 = vmax.f32 %v1561_v10, 0.0  ;;  %v1586_v10 = vadd.f32 %v18107_v2, %v20189_v59 }
 0x392   : > { %v18586_v60 = vpop.f32.mrb[3].mxu1 }
 0x393   : > { %v1784_v32 = vmax.f32 %v1566_v17, 0.0  ;;  %v20191_v17 = vld [vmem:[#allocation62_spill] sm:$0xff]  ;;  %v1788_v38 = vmax.f32 %v1586_v10, 0.0 }
 0x394   : > { %14854 = vmatmul.mubr.msk.f32.gmra.mrb[190].mxu0 %vm3334_vm2, %v1778_v28 }
 0x395   : > { %14856 = vmatprep.mubr.msk.f32.mxu0 %vm3334_vm2, %v1779_v5  ;;  %v18592_v58 = vpop.f32.mrb[4].mxu1  ;;  %v1576_v5 = vadd.f32 %v18107_v2, %v20187_v9 }
 0x396   : > { %v18596_v28 = vpop.f32.mrb[5].mxu1 }
 0x398   : > { %14857 = vmatmul.mubr.msk.f32.gmra.mrb[192].mxu0 %vm3334_vm2, %v1780_v14  ;;  %v20188_v14 = vld [vmem:[#allocation60_spill] sm:$0xff] }
 0x399   : > { %14859 = vmatprep.mubr.msk.f32.mxu0 %vm3334_vm2, %v1781_v18  ;;  %v18602_v41 = vpop.f32.mrb[6].mxu1  ;;  %v1581_v21 = vadd.f32 %v18107_v2, %v20188_v14  ;;  %v1786_v18 = vmax.f32 %v1576_v5, 0.0  ;;  %v20194_v14 = vld [vmem:[#allocation64_spill] sm:$0xff] }
 0x39a   : > { %v18606_v12 = vpop.f32.mrb[7].mxu1  ;;  %v1601_v59 = vadd.f32 %v18107_v2, %v20194_v14 }
 0x39b   : > { %v1787_v29 = vmax.f32 %v1581_v21, 0.0 }
 0x39c   : > { %14860 = vmatmul.mubr.msk.f32.gmra.mrb[194].mxu0 %vm3334_vm2, %v1782_v22 }
 0x39d   : > { %14862 = vmatprep.mubr.msk.f32.mxu0 %vm3334_vm2, %v1783_v25  ;;  %v18612_v22 = vpop.f32.mrb[8].mxu1  ;;  %v1591_v25 = vadd.f32 %v18107_v2, %v20191_v17 }
 0x39e   : > { %20190 = vst [vmem:[#allocation75_spill] sm:$0xff] %v18612_v22  ;;  %v18616_v49 = vpop.f32.mrb[9].mxu1  ;;  %v1791_v22 = vmax.f32 %v1601_v59, 0.0 }
 0x3a0   : > { %14863 = vmatmul.mubr.msk.f32.gmra.mrb[196].mxu0 %vm3334_vm2, %v1784_v32  ;;  %v20192_v32 = vld [vmem:[#allocation61_spill] sm:$0xff] }
 0x3a1   : > { %14865 = vmatprep.mubr.msk.f32.mxu0 %vm3334_vm2, %v1785_v31  ;;  %v1596_v9 = vadd.f32 %v18107_v2, %v20192_v32  ;;  %v18622_v5 = vpop.f32.mrb[10].mxu1  ;;  %v1789_v31 = vmax.f32 %v1591_v25, 0.0  ;;  %v20198_v32 = vld [vmem:[#allocation66_spill] sm:$0xff] }
 0x3a2   : > { %20193 = vst [vmem:[#allocation77_spill] sm:$0xff] %v18622_v5  ;;  %v18626_v21 = vpop.f32.mrb[11].mxu1  ;;  %v1611_v5 = vadd.f32 %v18107_v2, %v20198_v32 }
 0x3a3   : > { %20195 = vst [vmem:[#allocation76_spill] sm:$0xff] %v18626_v21  ;;  %v1790_v17 = vmax.f32 %v1596_v9, 0.0 }
 0x3a4   : > { %14866 = vmatmul.mubr.msk.f32.gmra.mrb[198].mxu0 %vm3334_vm2, %v1786_v18  ;;  %v20196_v18 = vld [vmem:[#allocation63_spill] sm:$0xff]  ;;  %v1793_v21 = vmax.f32 %v1611_v5, 0.0 }
 0x3a5   : > { %14868 = vmatprep.mubr.msk.f32.mxu0 %vm3334_vm2, %v1787_v29  ;;  %v1606_v29 = vadd.f32 %v18107_v2, %v20196_v18  ;;  %v18632_v10 = vpop.f32.mrb[12].mxu1  ;;  %v20202_v18 = vld [vmem:[#allocation68_spill] sm:$0xff] }
 0x3a6   : > { %20197 = vst [vmem:[#allocation79_spill] sm:$0xff] %v18632_v10  ;;  %v18636_v25 = vpop.f32.mrb[13].mxu1  ;;  %v1621_v10 = vadd.f32 %v18107_v2, %v20202_v18 }
 0x3a7   : > { %20199 = vst [vmem:[#allocation78_spill] sm:$0xff] %v18636_v25  ;;  %v1792_v14 = vmax.f32 %v1606_v29, 0.0 }
 0x3a8   : > { %14869 = vmatmul.mubr.msk.f32.gmra.mrb[200].mxu0 %vm3334_vm2, %v1788_v38  ;;  %v20200_v38 = vld [vmem:[#allocation65_spill] sm:$0xff]  ;;  %v1795_v25 = vmax.f32 %v1621_v10, 0.0 }
 0x3a9   : > { %14871 = vmatprep.mubr.msk.f32.mxu0 %vm3334_vm2, %v1789_v31  ;;  %v1616_v31 = vadd.f32 %v18107_v2, %v20200_v38  ;;  %v18642_v9 = vpop.f32.mrb[14].mxu1  ;;  %v20206_v38 = vld [vmem:[#allocation70_spill] sm:$0xff] }
 0x3aa   : > { %20201 = vst [vmem:[#allocation81_spill] sm:$0xff] %v18642_v9  ;;  %v18646_v59 = vpop.f32.mrb[15].mxu1  ;;  %v1631_v9 = vadd.f32 %v18107_v2, %v20206_v38 }
 0x3ab   : > { %20203 = vst [vmem:[#allocation80_spill] sm:$0xff] %v18646_v59  ;;  %v1794_v32 = vmax.f32 %v1616_v31, 0.0 }
 0x3ac   : > { %14872 = vmatmul.mubr.msk.f32.gmra.mrb[202].mxu0 %vm3334_vm2, %v1790_v17  ;;  %v20204_v17 = vld [vmem:[#allocation67_spill] sm:$0xff]  ;;  %v1797_v59 = vmax.f32 %v1631_v9, 0.0 }
 0x3ad   : > { %14874 = vmatprep.mubr.msk.f32.mxu0 %vm3334_vm2, %v1791_v22  ;;  %v1626_v22 = vadd.f32 %v18107_v2, %v20204_v17  ;;  %v18652_v29 = vpop.f32.mrb[16].mxu1  ;;  %v20210_v17 = vld [vmem:[#allocation72_spill] sm:$0xff]  ;;  %v20212_v9 = vld [vmem:[#allocation71_spill] sm:$0xff] }
 0x3ae   : > { %20205 = vst [vmem:[#allocation83_spill] sm:$0xff] %v18652_v29  ;;  %v18656_v5 = vpop.f32.mrb[17].mxu1  ;;  %v1641_v29 = vadd.f32 %v18107_v2, %v20210_v17 }
 0x3af   : > { %20207 = vst [vmem:[#allocation82_spill] sm:$0xff] %v18656_v5  ;;  %v1796_v18 = vmax.f32 %v1626_v22, 0.0 }
 0x3b0   : > { %14875 = vmatmul.mubr.msk.f32.gmra.mrb[204].mxu0 %vm3334_vm2, %v1792_v14  ;;  %v20208_v14 = vld [vmem:[#allocation69_spill] sm:$0xff] }
 0x3b1   : > { %14877 = vmatprep.mubr.msk.f32.mxu0 %vm3334_vm2, %v1793_v21  ;;  %v1636_v21 = vadd.f32 %v18107_v2, %v20208_v14  ;;  %v18662_v31 = vpop.f32.mrb[18].mxu1  ;;  %v1646_v14 = vadd.f32 %v18107_v2, %v20212_v9 }
 0x3b2   : > { %20209 = vst [vmem:[#allocation85_spill] sm:$0xff] %v18662_v31  ;;  %v18666_v10 = vpop.f32.mrb[19].mxu1  ;;  %v1799_v31 = vmax.f32 %v1641_v29, 0.0  ;;  %v20215_v29 = vld [vmem:[#allocation73_spill] sm:$0xff] }
 0x3b3   : > { %20211 = vst [vmem:[#allocation84_spill] sm:$0xff] %v18666_v10  ;;  %v1798_v38 = vmax.f32 %v1636_v21, 0.0  ;;  %v20214_v10 = vld [vmem:[#allocation74_spill] sm:$0xff]  ;;  %v1800_v21 = vmax.f32 %v1646_v14, 0.0 }
 0x3b4   : > { %14878 = vmatmul.mubr.msk.f32.gmra.mrb[206].mxu0 %vm3334_vm2, %v1794_v32  ;;  %v12534_v32 = vld [vmem:[%s20009_s5 + $0x60] sm:$0xff] }
 0x3b5   : > { %14880 = vmatprep.mubr.msk.f32.mxu0 %vm3334_vm2, %v1795_v25  ;;  %v12535_v25 = vld [vmem:[%s20009_s5 + $0x68] sm:$0xff]  ;;  %v18678_v17 = vpop.f32.mrb[20].mxu1 }
 0x3b6   : > { %v15838_v22 = vpack.c.bf16 %v12535_v25, %v12534_v32  ;;  %20213 = vst [vmem:[#allocation87_spill] sm:$0xff] %v18678_v17  ;;  %v18682_v5 = vpop.f32.mrb[21].mxu1  ;;  %v18691_v32 = vld [vmem:[%s20006_s2] ss:$0 sm:$0xff] }
 0x3b8   : > { %14881 = vmatmul.mubr.msk.f32.gmra.mrb[208].mxu0 %vm3334_vm2, %v1796_v18  ;;  %v1651_v18 = vadd.f32 %v18107_v2, %v20214_v10  ;;  %15839 = vmatprep.subr.bf16.mxu1 %v15838_v22  ;;  %v1656_v10 = vadd.f32 %v18691_v32, %v20215_v29 }
 0x3b9   : > { %14883 = vmatprep.mubr.msk.f32.mxu0 %vm3334_vm2, %v1797_v59  ;;  %15841 = vmatpush3.bf16.msra.mxu1 %v15838_v22  ;;  %v6413_v59 = vadd.f32 %v18107_v2, %v18292_v55  ;;  %v18695_v25 = vpop.f32.mrb[22].mxu1  ;;  %v6423_v2 = vadd.f32 %v18691_v32, %v18307_v52  ;;  %v6418_v22 = vadd.f32 %v18691_v32, %v18287_v0 }
 0x3ba   : > { %v1801_v9 = vmax.f32 %v1651_v18, 0.0  ;;  %v18697_v17 = vpop.f32.mrb[23].mxu1  ;;  %v1802_v55 = vmax.f32 %v1656_v10, 0.0  ;;  %v6428_v52 = vadd.f32 %v18691_v32, %v18301_v36 }
 0x3bb   : > { %v7133_v18 = vmax.f32 %v6423_v2, 0.0 }
 0x3bc   : > { %14884 = vmatmul.mubr.msk.f32.gmra.mrb[210].mxu0 %vm3334_vm2, %v1798_v38 }
 0x3bd   : > { %14886 = vmatprep.mubr.msk.f32.mxu0 %vm3334_vm2, %v1799_v31  ;;  %v7131_v31 = vmax.f32 %v6413_v59, 0.0  ;;  %v18705_v38 = vpop.f32.mrb[24].mxu1  ;;  %v7132_v59 = vmax.f32 %v6418_v22, 0.0  ;;  %v6453_v22 = vadd.f32 %v18691_v32, %v18349_v37  ;;  %v6458_v37 = vadd.f32 %v18691_v32, %v18343_v53 }
 0x3be   : > { %v18707_v14 = vpop.f32.mrb[25].mxu1 }
 0x3c0   : > { %14887 = vmatmul.mubr.msk.f32.gmra.mrb[212].mxu0 %vm3334_vm2, %v1800_v21  ;;  %v6433_v21 = vadd.f32 %v18691_v32, %v18321_v44  ;;  %v6438_v44 = vadd.f32 %v18691_v32, %v18315_v61  ;;  %v7139_v61 = vmax.f32 %v6453_v22, 0.0 }
 0x3c1   : > { %14889 = vmatprep.mubr.msk.f32.mxu0 %vm3334_vm2, %v1801_v9  ;;  %v18715_v29 = vpop.f32.mrb[26].mxu1  ;;  %v6443_v9 = vadd.f32 %v18691_v32, %v18335_v45  ;;  %v6448_v45 = vadd.f32 %v18691_v32, %v18329_v30 }
 0x3c2   : > { %v18717_v10 = vpop.f32.mrb[27].mxu1  ;;  %v7135_v0 = vmax.f32 %v6433_v21, 0.0 }
 0x3c3   : > { %v7137_v36 = vmax.f32 %v6443_v9, 0.0 }
 0x3c4   : > { %14890 = vmatmul.mubr.msk.f32.gmra.mrb[214].mxu0 %vm3334_vm2, %v1802_v55 }
 0x3c5   : > { %15146 = vmatprep.mubr.msk.f32.mxu0 %vm3334_vm2, %v7131_v31  ;;  %v7134_v31 = vmax.f32 %v6428_v52, 0.0  ;;  %v18725_v2 = vpop.f32.mrb[28].mxu1  ;;  %v6463_v52 = vadd.f32 %v18691_v32, %v18363_v23  ;;  %v6468_v23 = vadd.f32 %v18691_v32, %v18357_v24 }
 0x3c6   : > { %v18727_v55 = vpop.f32.mrb[29].mxu1 }
 0x3c7   : > { %v7141_v30 = vmax.f32 %v6463_v52, 0.0 }
 0x3c8   : > { %15147 = vmatmul.mubr.msk.f32.vlgmr.msra.gmra.mrb[72].mxu0 %vm3334_vm2, %v7132_v59 }
 0x3c9   : > { %15149 = vmatprep.mubr.msk.f32.mxu0 %vm3334_vm2, %v7133_v18  ;;  %v7136_v18 = vmax.f32 %v6438_v44, 0.0  ;;  %v18735_v21 = vpop.f32.mrb[30].mxu1  ;;  %v6473_v44 = vadd.f32 %v18691_v32, %v18377_v50  ;;  %v6478_v50 = vadd.f32 %v18691_v32, %v18371_v63 }
 0x3ca   : > { %v18737_v59 = vpop.f32.mrb[31].mxu1 }
 0x3cb   : > { %v7143_v53 = vmax.f32 %v6473_v44, 0.0 }
 0x3cc   : > { %15150 = vmatmul.mubr.msk.f32.gmra.mrb[74].mxu0 %vm3334_vm2, %v7134_v31 }
 0x3cd   : > { %15152 = vmatprep.mubr.msk.f32.mxu0 %vm3334_vm2, %v7135_v0  ;;  %v7138_v0 = vmax.f32 %v6448_v45, 0.0  ;;  %v18745_v9 = vpop.f32.mrb[32].mxu1  ;;  %v6483_v45 = vadd.f32 %v18691_v32, %v18391_v1  ;;  %v6488_v1 = vadd.f32 %v18691_v32, %v18385_v47 }
 0x3ce   : > { %v18747_v31 = vpop.f32.mrb[33].mxu1 }
 0x3cf   : > { %v7145_v24 = vmax.f32 %v6483_v45, 0.0 }
 0x3d0   : > { %15153 = vmatmul.mubr.msk.f32.gmra.mrb[76].mxu0 %vm3334_vm2, %v7136_v18 }
 0x3d1   : > { %15155 = vmatprep.mubr.msk.f32.mxu0 %vm3334_vm2, %v7137_v36  ;;  %v7140_v36 = vmax.f32 %v6458_v37, 0.0  ;;  %v18755_v22 = vpop.f32.mrb[34].mxu1  ;;  %v6493_v37 = vadd.f32 %v18691_v32, %v18405_v56  ;;  %v6498_v56 = vadd.f32 %v18691_v32, %v18399_v19 }
 0x3d2   : > { %v18757_v18 = vpop.f32.mrb[35].mxu1 }
 0x3d3   : > { %v7147_v63 = vmax.f32 %v6493_v37, 0.0 }
 0x3d4   : > { %15156 = vmatmul.mubr.msk.f32.gmra.mrb[78].mxu0 %vm3334_vm2, %v7138_v0 }
 0x3d5   : > { %15158 = vmatprep.mubr.msk.f32.mxu0 %vm3334_vm2, %v7139_v61  ;;  %v7142_v61 = vmax.f32 %v6468_v23, 0.0  ;;  %v18765_v52 = vpop.f32.mrb[36].mxu1  ;;  %v6503_v23 = vadd.f32 %v18691_v32, %v18419_v35  ;;  %v6508_v35 = vadd.f32 %v18691_v32, %v18413_v40 }
 0x3d6   : > { %v18767_v0 = vpop.f32.mrb[37].mxu1 }
 0x3d7   : > { %v7149_v47 = vmax.f32 %v6503_v23, 0.0 }
 0x3d8   : > { %15159 = vmatmul.mubr.msk.f32.gmra.mrb[80].mxu0 %vm3334_vm2, %v7140_v36 }
 0x3d9   : > { %15161 = vmatprep.mubr.msk.f32.mxu0 %vm3334_vm2, %v7141_v30  ;;  %v7144_v30 = vmax.f32 %v6478_v50, 0.0  ;;  %v18775_v44 = vpop.f32.mrb[38].mxu1  ;;  %v6513_v50 = vadd.f32 %v18691_v32, %v18433_v20  ;;  %v6518_v20 = vadd.f32 %v18691_v32, %v18427_v54 }
 0x3da   : > { %v18777_v36 = vpop.f32.mrb[39].mxu1 }
 0x3db   : > { %v7151_v19 = vmax.f32 %v6513_v50, 0.0 }
 0x3dc   : > { %15162 = vmatmul.mubr.msk.f32.gmra.mrb[82].mxu0 %vm3334_vm2, %v7142_v61 }
 0x3dd   : > { %15164 = vmatprep.mubr.msk.f32.mxu0 %vm3334_vm2, %v7143_v53  ;;  %v7146_v53 = vmax.f32 %v6488_v1, 0.0  ;;  %v18785_v45 = vpop.f32.mrb[40].mxu1  ;;  %v6523_v1 = vadd.f32 %v18691_v32, %v18447_v43  ;;  %v6528_v43 = vadd.f32 %v18691_v32, %v18441_v4 }
 0x3de   : > { %v18787_v61 = vpop.f32.mrb[41].mxu1 }
 0x3df   : > { %v7153_v40 = vmax.f32 %v6523_v1, 0.0 }
 0x3e0   : > { %15165 = vmatmul.mubr.msk.f32.gmra.mrb[84].mxu0 %vm3334_vm2, %v7144_v30 }
 0x3e1   : > { %15167 = vmatprep.mubr.msk.f32.mxu0 %vm3334_vm2, %v7145_v24  ;;  %v7148_v24 = vmax.f32 %v6498_v56, 0.0  ;;  %v18795_v37 = vpop.f32.mrb[42].mxu1  ;;  %v6533_v56 = vadd.f32 %v18691_v32, %v18464_v27  ;;  %v6538_v27 = vadd.f32 %v18691_v32, %v18455_v34 }
 0x3e2   : > { %v18797_v30 = vpop.f32.mrb[43].mxu1 }
 0x3e3   : > { %v7155_v54 = vmax.f32 %v6533_v56, 0.0 }
 0x3e4   : > { %15168 = vmatmul.mubr.msk.f32.gmra.mrb[86].mxu0 %vm3334_vm2, %v7146_v53 }
 0x3e5   : > { %15170 = vmatprep.mubr.msk.f32.mxu0 %vm3334_vm2, %v7147_v63  ;;  %v7150_v63 = vmax.f32 %v6508_v35, 0.0  ;;  %v18805_v23 = vpop.f32.mrb[44].mxu1  ;;  %v6543_v35 = vadd.f32 %v18691_v32, %v18480_v62  ;;  %v6548_v62 = vadd.f32 %v18691_v32, %v18475_v48 }
 0x3e6   : > { %v18807_v53 = vpop.f32.mrb[45].mxu1 }
 0x3e7   : > { %v7157_v4 = vmax.f32 %v6543_v35, 0.0 }
 0x3e8   : > { %15171 = vmatmul.mubr.msk.f32.gmra.mrb[88].mxu0 %vm3334_vm2, %v7148_v24 }
 0x3e9   : > { %15173 = vmatprep.mubr.msk.f32.mxu0 %vm3334_vm2, %v7149_v47  ;;  %v7152_v47 = vmax.f32 %v6518_v20, 0.0  ;;  %v18815_v50 = vpop.f32.mrb[46].mxu1  ;;  %v6553_v20 = vadd.f32 %v18691_v32, %v18495_v13  ;;  %v6558_v13 = vadd.f32 %v18691_v32, %v18489_v11  ;;  %v6578_v11 = vadd.f32 %v18691_v32, %v18523_v7 }
 0x3ea   : > { %v18817_v24 = vpop.f32.mrb[47].mxu1 }
 0x3eb   : > { %v7159_v34 = vmax.f32 %v6553_v20, 0.0  ;;  %v7164_v7 = vmax.f32 %v6578_v11, 0.0  ;;  %v6598_v11 = vadd.f32 %v18691_v32, %v18551_v3  ;;  %v6613_v3 = vadd.f32 %v18691_v32, %v18576_v46 }
 0x3ec   : > { %15174 = vmatmul.mubr.msk.f32.gmra.mrb[90].mxu0 %vm3334_vm2, %v7150_v63 }
 0x3ed   : > { %15176 = vmatprep.mubr.msk.f32.mxu0 %vm3334_vm2, %v7151_v19  ;;  %v7154_v19 = vmax.f32 %v6528_v43, 0.0  ;;  %v18825_v1 = vpop.f32.mrb[48].mxu1  ;;  %v6563_v43 = vadd.f32 %v18691_v32, %v18511_v51  ;;  %v6568_v51 = vadd.f32 %v18691_v32, %v18506_v39  ;;  %v6583_v39 = vadd.f32 %v18691_v32, %v18541_v6 }
 0x3ee   : > { %v18827_v63 = vpop.f32.mrb[49].mxu1  ;;  %v6593_v6 = vadd.f32 %v18691_v32, %v18555_v15  ;;  %v7168_v15 = vmax.f32 %v6598_v11, 0.0 }
 0x3ef   : > { %v7161_v48 = vmax.f32 %v6563_v43, 0.0 }
 0x3f0   : > { %15177 = vmatmul.mubr.msk.f32.gmra.mrb[92].mxu0 %vm3334_vm2, %v7152_v47 }
 0x3f1   : > { %15179 = vmatprep.mubr.msk.f32.mxu0 %vm3334_vm2, %v7153_v40  ;;  %v7156_v40 = vmax.f32 %v6538_v27, 0.0  ;;  %v18835_v56 = vpop.f32.mrb[50].mxu1  ;;  %v6573_v27 = vadd.f32 %v18691_v32, %v18527_v8  ;;  %v12537_v8 = vld [vmem:[%s20009_s5 + $0x78] sm:$0xff] }
 0x3f2   : > { %v18837_v47 = vpop.f32.mrb[51].mxu1 }
 0x3f4   : > { %15180 = vmatmul.mubr.msk.f32.gmra.mrb[94].mxu0 %vm3334_vm2, %v7154_v19 }
 0x3f5   : > { %15182 = vmatprep.mubr.msk.f32.mxu0 %vm3334_vm2, %v7155_v54  ;;  %v7158_v54 = vmax.f32 %v6548_v62, 0.0  ;;  %v18845_v35 = vpop.f32.mrb[52].mxu1  ;;  %v12536_v62 = vld [vmem:[%s20009_s5 + $0x70] sm:$0xff] }
 0x3f6   : > { %v18847_v19 = vpop.f32.mrb[53].mxu1  ;;  %v15842_v43 = vpack.c.bf16 %v12537_v8, %v12536_v62  ;;  %v7167_v8 = vmax.f32 %v6593_v6, 0.0  ;;  %v7171_v6 = vmax.f32 %v6613_v3, 0.0 }
 0x3f8   : > { %15183 = vmatmul.mubr.msk.f32.gmra.mrb[96].mxu0 %vm3334_vm2, %v7156_v40  ;;  %15843 = vmatprep.subr.bf16.mxu1 %v15842_v43 }
 0x3f9   : > { %15185 = vmatprep.mubr.msk.f32.mxu0 %vm3334_vm2, %v7157_v4  ;;  %v7160_v4 = vmax.f32 %v6558_v13, 0.0  ;;  %v18855_v20 = vpop.f32.mrb[54].mxu1  ;;  %15845 = vmatpush3.bf16.msra.mxu1 %v15842_v43 }
 0x3fa   : > { %20216 = vst [vmem:[#allocation86_spill] sm:$0xff] %v18855_v20  ;;  %v18857_v40 = vpop.f32.mrb[55].mxu1  ;;  %v6588_v20 = vadd.f32 %v18691_v32, %v18537_v26  ;;  %v6603_v26 = vadd.f32 %v18691_v32, %v18566_v16 }
 0x3fc   : > { %15186 = vmatmul.mubr.msk.f32.gmra.mrb[98].mxu0 %vm3334_vm2, %v7158_v54  ;;  %v7162_v54 = vmax.f32 %v6568_v51, 0.0  ;;  %v7166_v62 = vmax.f32 %v6588_v20, 0.0  ;;  %v6608_v20 = vadd.f32 %v18691_v32, %v18562_v57  ;;  %v7169_v43 = vmax.f32 %v6603_v26, 0.0 }
 0x3fd   : > { %15188 = vmatprep.mubr.msk.f32.mxu0 %vm3334_vm2, %v7159_v34  ;;  %v7163_v34 = vmax.f32 %v6573_v27, 0.0  ;;  %v18871_v13 = vpop.f32.mrb[56].mxu1  ;;  %v7165_v27 = vmax.f32 %v6583_v39, 0.0  ;;  %v6623_v57 = vadd.f32 %v18691_v32, %v18586_v60 }
 0x3fe   : > { %v7170_v16 = vmax.f32 %v6608_v20, 0.0 }
 0x3ff   : > { %v7173_v26 = vmax.f32 %v6623_v57, 0.0 }
 0x400   : > { %15189 = vmatmul.mubr.msk.f32.gmra.mrb[100].mxu0 %vm3334_vm2, %v7160_v4  ;;  %v18873_v4 = vpop.f32.mrb[57].mxu1 }
 0x401   : > { %15191 = vmatprep.mubr.msk.f32.mxu0 %vm3334_vm2, %v7161_v48  ;;  %v18881_v48 = vpop.f32.mrb[58].mxu1 }
 0x402   : > { %v18883_v51 = vpop.f32.mrb[59].mxu1 }
 0x404   : > { %15192 = vmatmul.mubr.msk.f32.gmra.mrb[102].mxu0 %vm3334_vm2, %v7162_v54 }
 0x405   : > { %15194 = vmatprep.mubr.msk.f32.mxu0 %vm3334_vm2, %v7163_v34  ;;  %v18891_v34 = vpop.f32.mrb[60].mxu1 }
 0x406   : > { %v18893_v39 = vpop.f32.mrb[61].mxu1 }
 0x408   : > { %15195 = vmatmul.mubr.msk.f32.gmra.mrb[104].mxu0 %vm3334_vm2, %v7164_v7 }
 0x409   : > { %15197 = vmatprep.mubr.msk.f32.mxu0 %vm3334_vm2, %v7165_v27  ;;  %v18901_v54 = vpop.f32.mrb[62].mxu1  ;;  %v6618_v27 = vadd.f32 %v18691_v32, %v18572_v42  ;;  %v6633_v42 = vadd.f32 %v18691_v32, %v18596_v28 }
 0x40a   : > { %v18903_v7 = vpop.f32.mrb[63].mxu1 }
 0x40b   : > { %v7172_v46 = vmax.f32 %v6618_v27, 0.0  ;;  %v7175_v3 = vmax.f32 %v6633_v42, 0.0 }
 0x40c   : > { %15198 = vmatmul.mubr.msk.f32.gmra.mrb[106].mxu0 %vm3334_vm2, %v7166_v62 }
 0x40d   : > { %15200 = vmatprep.mubr.msk.f32.mxu0 %vm3334_vm2, %v7167_v8  ;;  %v18911_v62 = vpop.f32.mrb[64].mxu1  ;;  %v6628_v8 = vadd.f32 %v18691_v32, %v18582_v33  ;;  %v6643_v33 = vadd.f32 %v18691_v32, %v18606_v12 }
 0x40e   : > { %v18913_v11 = vpop.f32.mrb[65].mxu1 }
 0x40f   : > { %v7174_v60 = vmax.f32 %v6628_v8, 0.0  ;;  %v7177_v57 = vmax.f32 %v6643_v33, 0.0 }
 0x410   : > { %15201 = vmatmul.mubr.msk.f32.gmra.mrb[108].mxu0 %vm3334_vm2, %v7168_v15 }
 0x411   : > { %15203 = vmatprep.mubr.msk.f32.mxu0 %vm3334_vm2, %v7169_v43  ;;  %v18921_v15 = vpop.f32.mrb[66].mxu1  ;;  %v6638_v43 = vadd.f32 %v18691_v32, %v18592_v58  ;;  %v6653_v58 = vadd.f32 %v18691_v32, %v18616_v49 }
 0x412   : > { %v18923_v20 = vpop.f32.mrb[67].mxu1 }
 0x413   : > { %v7176_v28 = vmax.f32 %v6638_v43, 0.0 }
 0x414   : > { %15204 = vmatmul.mubr.msk.f32.gmra.mrb[110].mxu0 %vm3334_vm2, %v7170_v16 }
 0x415   : > { %15206 = vmatprep.mubr.msk.f32.mxu0 %vm3334_vm2, %v7171_v6  ;;  %v18931_v16 = vpop.f32.mrb[68].mxu1  ;;  %v6648_v6 = vadd.f32 %v18691_v32, %v18602_v41  ;;  %v20220_v41 = vld [vmem:[#allocation76_spill] sm:$0xff] }
 0x416   : > { %v18933_v27 = vpop.f32.mrb[69].mxu1  ;;  %v6663_v43 = vadd.f32 %v18691_v32, %v20220_v41 }
 0x417   : > { %v7178_v12 = vmax.f32 %v6648_v6, 0.0 }
 0x418   : > { %15207 = vmatmul.mubr.msk.f32.gmra.mrb[112].mxu0 %vm3334_vm2, %v7172_v46 }
 0x419   : > { %15209 = vmatprep.mubr.msk.f32.mxu0 %vm3334_vm2, %v7173_v26  ;;  %v18941_v46 = vpop.f32.mrb[70].mxu1  ;;  %v20219_v26 = vld [vmem:[#allocation75_spill] sm:$0xff] }
 0x41a   : > { %20217 = vst [vmem:[#allocation89_spill] sm:$0xff] %v18941_v46  ;;  %v18943_v8 = vpop.f32.mrb[71].mxu1  ;;  %v6658_v42 = vadd.f32 %v18691_v32, %v20219_v26  ;;  %v20223_v46 = vld [vmem:[#allocation77_spill] sm:$0xff]  ;;  %v20224_v26 = vld [vmem:[#allocation78_spill] sm:$0xff] }
 0x41b   : > { %20218 = vst [vmem:[#allocation88_spill] sm:$0xff] %v18943_v8  ;;  %v6668_v6 = vadd.f32 %v18691_v32, %v20223_v46  ;;  %v20228_v46 = vld [vmem:[#allocation80_spill] sm:$0xff] }
 0x41c   : > { %15210 = vmatmul.mubr.msk.f32.gmra.mrb[114].mxu0 %vm3334_vm2, %v7174_v60  ;;  %v7179_v60 = vmax.f32 %v6653_v58, 0.0  ;;  %v7180_v49 = vmax.f32 %v6658_v42, 0.0  ;;  %v6673_v58 = vadd.f32 %v18691_v32, %v20224_v26 }
 0x41d   : > { %15212 = vmatprep.mubr.msk.f32.mxu0 %vm3334_vm2, %v7175_v3  ;;  %v18951_v3 = vpop.f32.mrb[72].mxu1  ;;  %v7182_v41 = vmax.f32 %v6668_v6, 0.0 }
 0x41e   : > { %20221 = vst [vmem:[#allocation91_spill] sm:$0xff] %v18951_v3  ;;  %v18953_v33 = vpop.f32.mrb[73].mxu1  ;;  %v20227_v3 = vld [vmem:[#allocation79_spill] sm:$0xff] }
 0x41f   : > { %20222 = vst [vmem:[#allocation90_spill] sm:$0xff] %v18953_v33  ;;  %v6678_v42 = vadd.f32 %v18691_v32, %v20227_v3  ;;  %v20232_v3 = vld [vmem:[#allocation82_spill] sm:$0xff] }
 0x420   : > { %15213 = vmatmul.mubr.msk.f32.gmra.mrb[116].mxu0 %vm3334_vm2, %v7176_v28  ;;  %v7181_v28 = vmax.f32 %v6663_v43, 0.0  ;;  %v6683_v43 = vadd.f32 %v18691_v32, %v20228_v46 }
 0x421   : > { %15215 = vmatprep.mubr.msk.f32.mxu0 %vm3334_vm2, %v7177_v57  ;;  %v18961_v57 = vpop.f32.mrb[74].mxu1  ;;  %v7184_v26 = vmax.f32 %v6678_v42, 0.0 }
 0x422   : > { %20225 = vst [vmem:[#allocation92_spill] sm:$0xff] %v18961_v57  ;;  %v18963_v8 = vpop.f32.mrb[75].mxu1  ;;  %v20231_v57 = vld [vmem:[#allocation81_spill] sm:$0xff] }
 0x423   : > { %20226 = vst [vmem:[#allocation94_spill] sm:$0xff] %v18963_v8  ;;  %v6688_v6 = vadd.f32 %v18691_v32, %v20231_v57  ;;  %v20235_v57 = vld [vmem:[#allocation84_spill] sm:$0xff] }
 0x424   : > { %15216 = vmatmul.mubr.msk.f32.gmra.mrb[118].mxu0 %vm3334_vm2, %v7178_v12  ;;  %v7183_v12 = vmax.f32 %v6673_v58, 0.0  ;;  %v6693_v58 = vadd.f32 %v18691_v32, %v20232_v3 }
 0x425   : > { %15218 = vmatprep.mubr.msk.f32.mxu0 %vm3334_vm2, %v7179_v60  ;;  %v18971_v60 = vpop.f32.mrb[76].mxu1  ;;  %v7186_v46 = vmax.f32 %v6688_v6, 0.0 }
 0x426   : > { %20229 = vst [vmem:[#allocation93_spill] sm:$0xff] %v18971_v60  ;;  %v18973_v33 = vpop.f32.mrb[77].mxu1  ;;  %v20234_v60 = vld [vmem:[#allocation83_spill] sm:$0xff] }
 0x427   : > { %20230 = vst [vmem:[#allocation96_spill] sm:$0xff] %v18973_v33  ;;  %v6698_v42 = vadd.f32 %v18691_v32, %v20234_v60  ;;  %v6713_v60 = vadd.f32 %v18691_v32, %v18682_v5 }
 0x428   : > { %15219 = vmatmul.mubr.msk.f32.gmra.mrb[120].mxu0 %vm3334_vm2, %v7180_v49  ;;  %v7185_v49 = vmax.f32 %v6683_v43, 0.0  ;;  %v6703_v43 = vadd.f32 %v18691_v32, %v20235_v57 }
 0x429   : > { %15221 = vmatprep.mubr.msk.f32.mxu0 %vm3334_vm2, %v7181_v28  ;;  %v18981_v28 = vpop.f32.mrb[78].mxu1  ;;  %v7188_v3 = vmax.f32 %v6698_v42, 0.0 }
 0x42a   : > { %20233 = vst [vmem:[#allocation95_spill] sm:$0xff] %v18981_v28  ;;  %v18983_v8 = vpop.f32.mrb[79].mxu1  ;;  %v20237_v28 = vld [vmem:[#allocation85_spill] sm:$0xff] }
 0x42b   : > { %v6708_v6 = vadd.f32 %v18691_v32, %v20237_v28  ;;  %v6723_v28 = vadd.f32 %v18691_v32, %v18697_v17 }
 0x42c   : > { %15222 = vmatmul.mubr.msk.f32.gmra.mrb[122].mxu0 %vm3334_vm2, %v7182_v41  ;;  %v7187_v41 = vmax.f32 %v6693_v58, 0.0 }
 0x42d   : > { %15224 = vmatprep.mubr.msk.f32.mxu0 %vm3334_vm2, %v7183_v12  ;;  %v18991_v12 = vpop.f32.mrb[80].mxu1  ;;  %v7190_v57 = vmax.f32 %v6708_v6, 0.0  ;;  %v6728_v6 = vadd.f32 %v18691_v32, %v18695_v25  ;;  %v6743_v25 = vadd.f32 %v18691_v32, %v18717_v10 }
 0x42e   : > { %20236 = vst [vmem:[#allocation98_spill] sm:$0xff] %v18991_v12  ;;  %v18993_v33 = vpop.f32.mrb[81].mxu1  ;;  %v20238_v12 = vld [vmem:[#allocation87_spill] sm:$0xff] }
 0x42f   : > { %v6718_v42 = vadd.f32 %v18691_v32, %v20238_v12  ;;  %v6733_v12 = vadd.f32 %v18691_v32, %v18707_v14  ;;  %v7194_v17 = vmax.f32 %v6728_v6, 0.0  ;;  %v6748_v6 = vadd.f32 %v18691_v32, %v18715_v29 }
 0x430   : > { %15225 = vmatmul.mubr.msk.f32.gmra.mrb[124].mxu0 %vm3334_vm2, %v7184_v26  ;;  %v7189_v26 = vmax.f32 %v6703_v43, 0.0  ;;  %v6763_v29 = vadd.f32 %v18691_v32, %v18737_v59  ;;  %v9105_v59 = vld [vmem:[%s20009_s5] sm:$0xff] }
 0x431   : > { %15227 = vmatprep.mubr.msk.f32.mxu0 %vm3334_vm2, %v7185_v49  ;;  %v19001_v49 = vpop.f32.mrb[82].mxu1  ;;  %v7192_v5 = vmax.f32 %v6718_v42, 0.0  ;;  %v6738_v42 = vadd.f32 %v18691_v32, %v18705_v38  ;;  %v6753_v38 = vadd.f32 %v18691_v32, %v18727_v55  ;;  %v7198_v10 = vmax.f32 %v6748_v6, 0.0 }
 0x432   : > { %v19003_v58 = vpop.f32.mrb[83].mxu1  ;;  %v6768_v6 = vadd.f32 %v18691_v32, %v18735_v21 }
 0x433   : > { %v7196_v14 = vmax.f32 %v6738_v42, 0.0  ;;  %v6758_v42 = vadd.f32 %v18691_v32, %v18725_v2  ;;  %v6773_v2 = vadd.f32 %v18691_v32, %v18747_v31  ;;  %v6778_v31 = vadd.f32 %v18691_v32, %v18745_v9 }
 0x434   : > { %15228 = vmatmul.mubr.msk.f32.gmra.mrb[126].mxu0 %vm3334_vm2, %v7186_v46  ;;  %v7191_v46 = vmax.f32 %v6713_v60, 0.0  ;;  %v7202_v21 = vmax.f32 %v6768_v6, 0.0  ;;  %v6793_v9 = vadd.f32 %v18691_v32, %v18767_v0 }
 0x435   : > { %15230 = vmatprep.mubr.msk.f32.mxu0 %vm3334_vm2, %v7187_v41  ;;  %v19011_v41 = vpop.f32.mrb[84].mxu1  ;;  %v7200_v55 = vmax.f32 %v6758_v42, 0.0 }
 0x436   : > { %v19013_v43 = vpop.f32.mrb[85].mxu1 }
 0x438   : > { %15231 = vmatmul.mubr.msk.f32.gmra.mrb[128].mxu0 %vm3334_vm2, %v7188_v3  ;;  %v7193_v3 = vmax.f32 %v6723_v28, 0.0 }
 0x439   : > { %15233 = vmatprep.mubr.msk.f32.mxu0 %vm3334_vm2, %v7189_v26  ;;  %v19021_v26 = vpop.f32.mrb[86].mxu1 }
 0x43a   : > { %v19023_v60 = vpop.f32.mrb[87].mxu1 }
 0x43c   : > { %15234 = vmatmul.mubr.msk.f32.gmra.mrb[130].mxu0 %vm3334_vm2, %v7190_v57  ;;  %v7195_v57 = vmax.f32 %v6733_v12, 0.0 }
 0x43d   : > { %15236 = vmatprep.mubr.msk.f32.mxu0 %vm3334_vm2, %v7191_v46  ;;  %v19031_v46 = vpop.f32.mrb[88].mxu1 }
 0x43e   : > { %v19033_v28 = vpop.f32.mrb[89].mxu1 }
 0x440   : > { %15237 = vmatmul.mubr.msk.f32.gmra.mrb[132].mxu0 %vm3334_vm2, %v7192_v5  ;;  %v7197_v5 = vmax.f32 %v6743_v25, 0.0 }
 0x441   : > { %15239 = vmatprep.mubr.msk.f32.mxu0 %vm3334_vm2, %v7193_v3  ;;  %v19041_v3 = vpop.f32.mrb[90].mxu1 }
 0x442   : > { %v19043_v12 = vpop.f32.mrb[91].mxu1 }
 0x444   : > { %15240 = vmatmul.mubr.msk.f32.gmra.mrb[134].mxu0 %vm3334_vm2, %v7194_v17  ;;  %v7199_v17 = vmax.f32 %v6753_v38, 0.0 }
 0x445   : > { %15242 = vmatprep.mubr.msk.f32.mxu0 %vm3334_vm2, %v7195_v57  ;;  %v19051_v57 = vpop.f32.mrb[92].mxu1 }
 0x446   : > { %v19053_v25 = vpop.f32.mrb[93].mxu1 }
 0x448   : > { %15243 = vmatmul.mubr.msk.f32.gmra.mrb[136].mxu0 %vm3334_vm2, %v7196_v14  ;;  %v7201_v14 = vmax.f32 %v6763_v29, 0.0  ;;  %v6783_v29 = vadd.f32 %v18691_v32, %v18757_v18 }
 0x449   : > { %15245 = vmatprep.mubr.msk.f32.mxu0 %vm3334_vm2, %v7197_v5  ;;  %v9106_v5 = vld [vmem:[%s20009_s5 + $0x8] sm:$0xff] }
 0x44a   : > { %v19067_v38 = vpack.c.bf16 %v9106_v5, %v9105_v59  ;;  %v7205_v6 = vmax.f32 %v6783_v29, 0.0 }
 0x44c   : > { %15246 = vmatmul.mubr.msk.f32.gmra.mrb[138].mxu0 %vm3334_vm2, %v7198_v10  ;;  %v19069_v10 = vpop.f32.mrb[94].mxu1  ;;  %15847 = vmatprep.subr.bf16.mxu1 %v19067_v38 }
 0x44d   : > { %15248 = vmatprep.mubr.msk.f32.mxu0 %vm3334_vm2, %v7199_v17  ;;  %20239 = vst [vmem:[#allocation97_spill] sm:$0xff] %v19069_v10  ;;  %v19071_v42 = vpop.f32.mrb[95].mxu1  ;;  %v7203_v17 = vmax.f32 %v6773_v2, 0.0  ;;  %v7204_v10 = vmax.f32 %v6778_v31, 0.0  ;;  %v6798_v31 = vadd.f32 %v18691_v32, %v18765_v52  ;;  %v6813_v52 = vadd.f32 %v18691_v32, %v18787_v61 }
 0x44e   : > { %v19080_v59 = vpop.f32.mrb[96].mxu1  ;;  %v6828_v61 = vadd.f32 %v18691_v32, %v18795_v37  ;;  %v6848_v37 = vadd.f32 %v18691_v32, %v18815_v50  ;;  %v6868_v50 = vadd.f32 %v18691_v32, %v18835_v56  ;;  %v20240_v56 = vld [vmem:[#allocation86_spill] sm:$0xff] }
 0x44f   : > { %v19082_v5 = vpop.f32.mrb[97].mxu1  ;;  %v7208_v0 = vmax.f32 %v6798_v31, 0.0  ;;  %v6818_v31 = vadd.f32 %v18691_v32, %v18785_v45  ;;  %v6838_v45 = vadd.f32 %v18691_v32, %v18805_v23  ;;  %v6858_v23 = vadd.f32 %v18691_v32, %v18825_v1 }
 0x450   : > { %15249 = vmatmul.mubr.msk.f32.gmra.mrb[140].mxu0 %vm3334_vm2, %v7200_v55  ;;  %v6788_v55 = vadd.f32 %v18691_v32, %v18755_v22  ;;  %v6803_v22 = vadd.f32 %v18691_v32, %v18777_v36  ;;  %v6878_v1 = vadd.f32 %v18691_v32, %v18845_v35  ;;  %v6898_v35 = vadd.f32 %v18691_v32, %v18871_v13 }
 0x451   : > { %15251 = vmatprep.mubr.msk.f32.mxu0 %vm3334_vm2, %v7201_v14  ;;  %v19090_v14 = vpop.f32.mrb[98].mxu1  ;;  %v6918_v13 = vadd.f32 %v18691_v32, %v18891_v34  ;;  %v6938_v34 = vadd.f32 %v18691_v32, %v18911_v62  ;;  %v6958_v62 = vadd.f32 %v18691_v32, %v18931_v16 }
 0x452   : > { %v19092_v2 = vpop.f32.mrb[99].mxu1  ;;  %v7206_v18 = vmax.f32 %v6788_v55, 0.0  ;;  %v6808_v55 = vadd.f32 %v18691_v32, %v18775_v44  ;;  %v6823_v44 = vadd.f32 %v18691_v32, %v18797_v30  ;;  %v6843_v30 = vadd.f32 %v18691_v32, %v18817_v24 }
 0x453   : > { %v6863_v24 = vadd.f32 %v18691_v32, %v18837_v47  ;;  %v6883_v47 = vadd.f32 %v18691_v32, %v18857_v40  ;;  %v6903_v40 = vadd.f32 %v18691_v32, %v18883_v51  ;;  %v6923_v51 = vadd.f32 %v18691_v32, %v18903_v7 }
 0x454   : > { %15252 = vmatmul.mubr.msk.f32.gmra.mrb[142].mxu0 %vm3334_vm2, %v7202_v21  ;;  %v7207_v21 = vmax.f32 %v6793_v9, 0.0  ;;  %v7210_v36 = vmax.f32 %v6808_v55, 0.0  ;;  %v7214_v55 = vmax.f32 %v6828_v61, 0.0  ;;  %v7222_v61 = vmax.f32 %v6868_v50, 0.0 }
 0x455   : > { %15254 = vmatprep.mubr.msk.f32.mxu0 %vm3334_vm2, %v7203_v17  ;;  %v19100_v17 = vpop.f32.mrb[100].mxu1  ;;  %v6943_v7 = vadd.f32 %v18691_v32, %v18923_v20  ;;  %v7236_v50 = vmax.f32 %v6938_v34, 0.0  ;;  %v19204_v20 = vld [vmem:[%s20008_s4] ss:$0 sm:$0xff] }
 0x456   : > { %v19102_v29 = vpop.f32.mrb[101].mxu1 }
 0x458   : > { %15255 = vmatmul.mubr.msk.f32.gmra.mrb[144].mxu0 %vm3334_vm2, %v7204_v10  ;;  %v7209_v10 = vmax.f32 %v6803_v22, 0.0  ;;  %v7213_v22 = vmax.f32 %v6823_v44, 0.0  ;;  %v7220_v44 = vmax.f32 %v6858_v23, 0.0  ;;  %v7232_v23 = vmax.f32 %v6918_v13, 0.0 }
 0x459   : > { %15257 = vmatprep.mubr.msk.f32.mxu0 %vm3334_vm2, %v7205_v6  ;;  %v19110_v6 = vpop.f32.mrb[102].mxu1 }
 0x45a   : > { %v19112_v9 = vpop.f32.mrb[103].mxu1 }
 0x45c   : > { %15258 = vmatmul.mubr.msk.f32.gmra.mrb[146].mxu0 %vm3334_vm2, %v7206_v18  ;;  %v7211_v18 = vmax.f32 %v6813_v52, 0.0  ;;  %v7216_v52 = vmax.f32 %v6838_v45, 0.0  ;;  %v7225_v45 = vmax.f32 %v6883_v47, 0.0  ;;  %v7240_v47 = vmax.f32 %v6958_v62, 0.0 }
 0x45d   : > { %15260 = vmatprep.mubr.msk.f32.mxu0 %vm3334_vm2, %v7207_v21  ;;  %v7212_v21 = vmax.f32 %v6818_v31, 0.0  ;;  %v7218_v31 = vmax.f32 %v6848_v37, 0.0  ;;  %v6908_v37 = vadd.f32 %v18691_v32, %v18881_v48  ;;  %v6928_v48 = vadd.f32 %v18691_v32, %v18901_v54 }
 0x45e   : > { %v6948_v54 = vadd.f32 %v18691_v32, %v18921_v15  ;;  %v20241_v15 = vld [vmem:[#allocation88_spill] sm:$0xff] }
 0x460   : > { %15261 = vmatmul.mubr.msk.f32.gmra.mrb[148].mxu0 %vm3334_vm2, %v7208_v0  ;;  %v6833_v0 = vadd.f32 %v18691_v32, %v18807_v53  ;;  %v6853_v53 = vadd.f32 %v18691_v32, %v18827_v63  ;;  %v6873_v63 = vadd.f32 %v18691_v32, %v18847_v19  ;;  %v6893_v19 = vadd.f32 %v18691_v32, %v18873_v4 }
 0x461   : > { %15263 = vmatprep.mubr.msk.f32.mxu0 %vm3334_vm2, %v7209_v10  ;;  %v6913_v4 = vadd.f32 %v18691_v32, %v18893_v39  ;;  %v6933_v39 = vadd.f32 %v18691_v32, %v18913_v11  ;;  %v6953_v11 = vadd.f32 %v18691_v32, %v18933_v27 }
 0x462   : > { %v7215_v10 = vmax.f32 %v6833_v0, 0.0  ;;  %v7224_v0 = vmax.f32 %v6878_v1, 0.0  ;;  %v6963_v1 = vadd.f32 %v18691_v32, %v20241_v15 }
 0x464   : > { %15264 = vmatmul.mubr.msk.f32.gmra.mrb[150].mxu0 %vm3334_vm2, %v7210_v36  ;;  %v7217_v36 = vmax.f32 %v6843_v30, 0.0  ;;  %v7227_v30 = vmax.f32 %v6893_v19, 0.0  ;;  %v20243_v19 = vld [vmem:[#allocation90_spill] sm:$0xff] }
 0x465   : > { %15266 = vmatprep.mubr.msk.f32.mxu0 %vm3334_vm2, %v7211_v18  ;;  %v7219_v18 = vmax.f32 %v6853_v53, 0.0  ;;  %v7230_v53 = vmax.f32 %v6908_v37, 0.0 }
 0x468   : > { %15267 = vmatmul.mubr.msk.f32.gmra.mrb[152].mxu0 %vm3334_vm2, %v7212_v21  ;;  %v7221_v21 = vmax.f32 %v6863_v24, 0.0  ;;  %v7234_v24 = vmax.f32 %v6928_v48, 0.0 }
 0x469   : > { %15269 = vmatprep.mubr.msk.f32.mxu0 %vm3334_vm2, %v7213_v22  ;;  %v7223_v22 = vmax.f32 %v6873_v63, 0.0  ;;  %v7238_v63 = vmax.f32 %v6948_v54, 0.0 }
 0x46c   : > { %15270 = vmatmul.mubr.msk.f32.gmra.mrb[154].mxu0 %vm3334_vm2, %v7214_v55  ;;  %v6888_v55 = vadd.f32 %v18691_v32, %v20240_v56  ;;  %v20242_v56 = vld [vmem:[#allocation89_spill] sm:$0xff] }
 0x46d   : > { %15272 = vmatprep.mubr.msk.f32.mxu0 %vm3334_vm2, %v7215_v10  ;;  %v6968_v16 = vadd.f32 %v18691_v32, %v20242_v56 }
 0x46e   : > { %v7226_v10 = vmax.f32 %v6888_v55, 0.0 }
 0x470   : > { %15273 = vmatmul.mubr.msk.f32.gmra.mrb[156].mxu0 %vm3334_vm2, %v7216_v52  ;;  %v7228_v52 = vmax.f32 %v6898_v35, 0.0 }
 0x471   : > { %15275 = vmatprep.mubr.msk.f32.mxu0 %vm3334_vm2, %v7217_v36  ;;  %v7229_v36 = vmax.f32 %v6903_v40, 0.0 }
 0x474   : > { %15276 = vmatmul.mubr.msk.f32.gmra.mrb[158].mxu0 %vm3334_vm2, %v7218_v31  ;;  %v7231_v31 = vmax.f32 %v6913_v4, 0.0  ;;  %v20244_v4 = vld [vmem:[#allocation91_spill] sm:$0xff] }
 0x475   : > { %15278 = vmatprep.mubr.msk.f32.mxu0 %vm3334_vm2, %v7219_v18  ;;  %v7233_v18 = vmax.f32 %v6923_v51, 0.0  ;;  %v20245_v51 = vld [vmem:[#allocation94_spill] sm:$0xff] }
 0x478   : > { %15279 = vmatmul.mubr.msk.f32.gmra.mrb[160].mxu0 %vm3334_vm2, %v7220_v44  ;;  %v7235_v44 = vmax.f32 %v6933_v39, 0.0 }
 0x479   : > { %15281 = vmatprep.mubr.msk.f32.mxu0 %vm3334_vm2, %v7221_v21  ;;  %v7237_v21 = vmax.f32 %v6943_v7, 0.0  ;;  %v20246_v7 = vld [vmem:[#allocation92_spill] sm:$0xff] }
 0x47c   : > { %15282 = vmatmul.mubr.msk.f32.gmra.mrb[162].mxu0 %vm3334_vm2, %v7222_v61  ;;  %v7239_v61 = vmax.f32 %v6953_v11, 0.0  ;;  %v20247_v11 = vld [vmem:[#allocation96_spill] sm:$0xff] }
 0x47d   : > { %15284 = vmatprep.mubr.msk.f32.mxu0 %vm3334_vm2, %v7223_v22 }
 0x480   : > { %15285 = vmatmul.mubr.msk.f32.gmra.mrb[164].mxu0 %vm3334_vm2, %v7224_v0 }
 0x481   : > { %15287 = vmatprep.mubr.msk.f32.mxu0 %vm3334_vm2, %v7225_v45  ;;  %v7241_v45 = vmax.f32 %v6963_v1, 0.0 }
 0x484   : > { %15288 = vmatmul.mubr.msk.f32.gmra.mrb[166].mxu0 %vm3334_vm2, %v7226_v10  ;;  %v6973_v10 = vadd.f32 %v18691_v32, %v20243_v19 }
 0x485   : > { %15290 = vmatprep.mubr.msk.f32.mxu0 %vm3334_vm2, %v7227_v30 }
 0x488   : > { %15291 = vmatmul.mubr.msk.f32.gmra.mrb[168].mxu0 %vm3334_vm2, %v7228_v52  ;;  %v7242_v52 = vmax.f32 %v6968_v16, 0.0 }
 0x489   : > { %15293 = vmatprep.mubr.msk.f32.mxu0 %vm3334_vm2, %v7229_v36 }
 0x48c   : > { %15294 = vmatmul.mubr.msk.f32.gmra.mrb[170].mxu0 %vm3334_vm2, %v7230_v53  ;;  %v6978_v53 = vadd.f32 %v18691_v32, %v20244_v4 }
 0x48d   : > { %15296 = vmatprep.mubr.msk.f32.mxu0 %vm3334_vm2, %v7231_v31  ;;  %v7243_v31 = vmax.f32 %v6973_v10, 0.0 }
 0x490   : > { %15297 = vmatmul.mubr.msk.f32.gmra.mrb[172].mxu0 %vm3334_vm2, %v7232_v23  ;;  %v6983_v23 = vadd.f32 %v18691_v32, %v20245_v51 }
 0x491   : > { %15299 = vmatprep.mubr.msk.f32.mxu0 %vm3334_vm2, %v7233_v18 }
 0x494   : > { %15300 = vmatmul.mubr.msk.f32.gmra.mrb[174].mxu0 %vm3334_vm2, %v7234_v24  ;;  %v7244_v24 = vmax.f32 %v6978_v53, 0.0 }
 0x495   : > { %15302 = vmatprep.mubr.msk.f32.mxu0 %vm3334_vm2, %v7235_v44 }
 0x498   : > { %15303 = vmatmul.mubr.msk.f32.gmra.mrb[176].mxu0 %vm3334_vm2, %v7236_v50  ;;  %v6988_v50 = vadd.f32 %v18691_v32, %v20246_v7 }
 0x499   : > { %15305 = vmatprep.mubr.msk.f32.mxu0 %vm3334_vm2, %v7237_v21  ;;  %v7245_v21 = vmax.f32 %v6983_v23, 0.0 }
 0x49a   : > { %v7246_v1 = vmax.f32 %v6988_v50, 0.0 }
 0x49b   : > { %v15148_v22 = vpop.f32.mrb[72].mxu0 }
 0x49c   : > { %v8657_v27 = vadd.f32 %v15148_v22, %v19204_v20  ;;  %v7786_v0 = vpop.f32.mrb[73].mxu0  ;;  %15306 = vmatmul.mubr.msk.f32.gmra.mrb[178].mxu0 %vm3334_vm2, %v7238_v63  ;;  %v6993_v63 = vadd.f32 %v18691_v32, %v20247_v11 }
 0x49d   : > { %v8656_v55 = vadd.f32 %v19204_v20, %v7786_v0  ;;  %15308 = vmatprep.mubr.msk.f32.mxu0 %vm3334_vm2, %v7239_v61 }
 0x49e   : > { %v8801_v35 = vmax.f32 %v8657_v27, 0.0  ;;  %v20248_v27 = vld [vmem:[#allocation93_spill] sm:$0xff]  ;;  %v7247_v16 = vmax.f32 %v6993_v63, 0.0  ;;  %v19273_v63 = vld [vmem:[%s20006_s2] ss:$0 sm:$0xff] }
 0x49f   : > { %v8800_v30 = vmax.f32 %v8656_v55, 0.0  ;;  %v15151_v40 = vpop.f32.mrb[74].mxu0  ;;  %v6998_v0 = vadd.f32 %v18691_v32, %v20248_v27  ;;  %v7003_v55 = vadd.f32 %v18691_v32, %v18983_v8  ;;  %v7013_v8 = vadd.f32 %v18691_v32, %v18993_v33 }
 0x4a0   : > { %8946 = vst.msk [vmem:[#allocation2 + $0x8] sm:$0xff] %vm8944_vm3, %v8801_v35  ;;  %v8659_v37 = vadd.f32 %v15151_v40, %v19204_v20  ;;  %v7796_v36 = vpop.f32.mrb[75].mxu0  ;;  %15309 = vmatmul.mubr.msk.f32.gmra.mrb[180].mxu0 %vm3334_vm2, %v7240_v47  ;;  %v7023_v33 = vadd.f32 %v18691_v32, %v19003_v58 }
 0x4a1   : > { %8945 = vst.msk [vmem:[#allocation2] sm:$0xff] %vm8944_vm3, %v8800_v30  ;;  %v8658_v13 = vadd.f32 %v19204_v20, %v7796_v36  ;;  %15311 = vmatprep.mubr.msk.f32.mxu0 %vm3334_vm2, %v7241_v45  ;;  %v7248_v35 = vmax.f32 %v6998_v0, 0.0  ;;  %v7249_v4 = vmax.f32 %v7003_v55, 0.0 }
 0x4a2   : > { %v8803_v48 = vmax.f32 %v8659_v37, 0.0  ;;  %v7253_v58 = vmax.f32 %v7023_v33, 0.0 }
 0x4a3   : > { %v8802_v18 = vmax.f32 %v8658_v13, 0.0  ;;  %v15154_v39 = vpop.f32.mrb[76].mxu0 }
 0x4a4   : > { %8948 = vst.msk [vmem:[#allocation2 + $0x18] sm:$0xff] %vm8944_vm3, %v8803_v48  ;;  %v8661_v34 = vadd.f32 %v15154_v39, %v19204_v20  ;;  %v7806_v44 = vpop.f32.mrb[77].mxu0  ;;  %15312 = vmatmul.mubr.msk.f32.gmra.mrb[182].mxu0 %vm3334_vm2, %v7242_v52  ;;  %v20249_v52 = vld [vmem:[#allocation95_spill] sm:$0xff] }
 0x4a5   : > { %8947 = vst.msk [vmem:[#allocation2 + $0x10] sm:$0xff] %vm8944_vm3, %v8802_v18  ;;  %v8660_v54 = vadd.f32 %v19204_v20, %v7806_v44  ;;  %15314 = vmatprep.mubr.msk.f32.mxu0 %vm3334_vm2, %v7243_v31  ;;  %v7008_v37 = vadd.f32 %v18691_v32, %v20249_v52  ;;  %v20250_v18 = vld [vmem:[#allocation98_spill] sm:$0xff] }
 0x4a6   : > { %v8805_v62 = vmax.f32 %v8661_v34, 0.0  ;;  %v7018_v39 = vadd.f32 %v18691_v32, %v20250_v18  ;;  %v7251_v34 = vmax.f32 %v7013_v8, 0.0 }
 0x4a7   : > { %v8804_v61 = vmax.f32 %v8660_v54, 0.0  ;;  %v15157_v15 = vpop.f32.mrb[78].mxu0  ;;  %v7250_v51 = vmax.f32 %v7008_v37, 0.0 }
 0x4a8   : > { %8950 = vst.msk [vmem:[#allocation2 + $0x28] sm:$0xff] %vm8944_vm3, %v8805_v62  ;;  %v8663_v22 = vadd.f32 %v15157_v15, %v19204_v20  ;;  %v7816_v47 = vpop.f32.mrb[79].mxu0  ;;  %15315 = vmatmul.mubr.msk.f32.gmra.mrb[184].mxu0 %vm3334_vm2, %v7244_v24  ;;  %v7252_v54 = vmax.f32 %v7018_v39, 0.0  ;;  %v7028_v62 = vadd.f32 %v19273_v63, %v19001_v49  ;;  %v7038_v49 = vadd.f32 %v19273_v63, %v19011_v41 }
 0x4a9   : > { %8949 = vst.msk [vmem:[#allocation2 + $0x20] sm:$0xff] %vm8944_vm3, %v8804_v61  ;;  %v8662_v56 = vadd.f32 %v19204_v20, %v7816_v47  ;;  %15317 = vmatprep.mubr.msk.f32.mxu0 %vm3334_vm2, %v7245_v21  ;;  %v7033_v61 = vadd.f32 %v19273_v63, %v19013_v43  ;;  %v7043_v43 = vadd.f32 %v19273_v63, %v19023_v60 }
 0x4aa   : > { %v8807_v45 = vmax.f32 %v8663_v22, 0.0  ;;  %v7254_v47 = vmax.f32 %v7028_v62, 0.0  ;;  %v7048_v41 = vadd.f32 %v19273_v63, %v19021_v26  ;;  %v7053_v60 = vadd.f32 %v19273_v63, %v19033_v28 }
 0x4ab   : > { %v8806_v19 = vmax.f32 %v8662_v56, 0.0  ;;  %v15160_v10 = vpop.f32.mrb[80].mxu0  ;;  %v7257_v52 = vmax.f32 %v7043_v43, 0.0  ;;  %v7058_v26 = vadd.f32 %v19273_v63, %v19031_v46  ;;  %v7063_v28 = vadd.f32 %v19273_v63, %v19043_v12 }
 0x4ac   : > { %8952 = vst.msk [vmem:[#allocation2 + $0x38] sm:$0xff] %vm8944_vm3, %v8807_v45  ;;  %v8665_v30 = vadd.f32 %v15160_v10, %v19204_v20  ;;  %v7826_v40 = vpop.f32.mrb[81].mxu0  ;;  %15318 = vmatmul.mubr.msk.f32.gmra.mrb[186].mxu0 %vm3334_vm2, %v7246_v1  ;;  %v7256_v10 = vmax.f32 %v7038_v49, 0.0  ;;  %v7258_v8 = vmax.f32 %v7048_v41, 0.0  ;;  %v7068_v46 = vadd.f32 %v19273_v63, %v19041_v3 }
 0x4ad   : > { %8951 = vst.msk [vmem:[#allocation2 + $0x30] sm:$0xff] %vm8944_vm3, %v8806_v19  ;;  %v8664_v36 = vadd.f32 %v19204_v20, %v7826_v40  ;;  %15320 = vmatprep.mubr.msk.f32.mxu0 %vm3334_vm2, %v7247_v16  ;;  %v7255_v16 = vmax.f32 %v7033_v61, 0.0  ;;  %v7260_v39 = vmax.f32 %v7058_v26, 0.0  ;;  %v7073_v12 = vadd.f32 %v19273_v63, %v19053_v25 }
 0x4ae   : > { %v8809_v53 = vmax.f32 %v8665_v30, 0.0  ;;  %v7078_v25 = vadd.f32 %v19273_v63, %v19051_v57  ;;  %v9110_v57 = vld [vmem:[%s20009_s5 + $0x28] sm:$0xff]  ;;  %v7093_v41 = vadd.f32 %v19273_v63, %v19082_v5 }
 0x4af   : > { %v8808_v13 = vmax.f32 %v8664_v36, 0.0  ;;  %v15163_v31 = vpop.f32.mrb[82].mxu0 }
 0x4b0   : > { %8954 = vst.msk [vmem:[#allocation2 + $0x48] sm:$0xff] %vm8944_vm3, %v8809_v53  ;;  %v8667_v23 = vadd.f32 %v15163_v31, %v19204_v20  ;;  %v7836_v48 = vpop.f32.mrb[83].mxu0  ;;  %15321 = vmatmul.mubr.msk.f32.gmra.mrb[188].mxu0 %vm3334_vm2, %v7248_v35 }
 0x4b1   : > { %8953 = vst.msk [vmem:[#allocation2 + $0x40] sm:$0xff] %vm8944_vm3, %v8808_v13  ;;  %v8666_v24 = vadd.f32 %v19204_v20, %v7836_v48  ;;  %15323 = vmatprep.mubr.msk.f32.mxu0 %vm3334_vm2, %v7249_v4 }
 0x4b2   : > { %v8811_v44 = vmax.f32 %v8667_v23, 0.0 }
 0x4b3   : > { %v8810_v7 = vmax.f32 %v8666_v24, 0.0  ;;  %v15166_v50 = vpop.f32.mrb[84].mxu0 }
 0x4b4   : > { %8956 = vst.msk [vmem:[#allocation2 + $0x58] sm:$0xff] %vm8944_vm3, %v8811_v44  ;;  %v8669_v21 = vadd.f32 %v15166_v50, %v19204_v20  ;;  %v7846_v11 = vpop.f32.mrb[85].mxu0  ;;  %15324 = vmatmul.mubr.msk.f32.gmra.mrb[190].mxu0 %vm3334_vm2, %v7250_v51  ;;  %v7259_v51 = vmax.f32 %v7053_v60, 0.0  ;;  %v7261_v44 = vmax.f32 %v7063_v28, 0.0  ;;  %v9108_v50 = vld [vmem:[%s20009_s5 + $0x18] sm:$0xff] }
 0x4b5   : > { %8955 = vst.msk [vmem:[#allocation2 + $0x50] sm:$0xff] %vm8944_vm3, %v8810_v7  ;;  %v8668_v32 = vadd.f32 %v19204_v20, %v7846_v11  ;;  %15326 = vmatprep.mubr.msk.f32.mxu0 %vm3334_vm2, %v7251_v34  ;;  %v9107_v7 = vld [vmem:[%s20009_s5 + $0x10] sm:$0xff]  ;;  %v7262_v11 = vmax.f32 %v7068_v46, 0.0 }
 0x4b6   : > { %v8813_v15 = vmax.f32 %v8669_v21, 0.0  ;;  %v15850_v61 = vpack.c.bf16 %v9108_v50, %v9107_v7 }
 0x4b7   : > { %v8812_v1 = vmax.f32 %v8668_v32, 0.0  ;;  %v15169_v22 = vpop.f32.mrb[86].mxu0 }
 0x4b8   : > { %8958 = vst.msk [vmem:[#allocation2 + $0x68] sm:$0xff] %vm8944_vm3, %v8813_v15  ;;  %v8671_v27 = vadd.f32 %v15169_v22, %v19204_v20  ;;  %v7856_v0 = vpop.f32.mrb[87].mxu0  ;;  %15327 = vmatmul.mubr.msk.f32.gmra.mrb[192].mxu0 %vm3334_vm2, %v7252_v54 }
 0x4b9   : > { %8957 = vst.msk [vmem:[#allocation2 + $0x60] sm:$0xff] %vm8944_vm3, %v8812_v1  ;;  %v8670_v56 = vadd.f32 %v19204_v20, %v7856_v0  ;;  %15329 = vmatprep.mubr.msk.f32.mxu0 %vm3334_vm2, %v7253_v58  ;;  %v7263_v1 = vmax.f32 %v7073_v12, 0.0 }
 0x4ba   : > { %v8815_v55 = vmax.f32 %v8671_v27, 0.0  ;;  %v9109_v27 = vld [vmem:[%s20009_s5 + $0x20] sm:$0xff] }
 0x4bb   : > { %v8814_v45 = vmax.f32 %v8670_v56, 0.0  ;;  %v15172_v19 = vpop.f32.mrb[88].mxu0 }
 0x4bc   : > { %8960 = vst.msk [vmem:[#allocation2 + $0x78] sm:$0xff] %vm8944_vm3, %v8815_v55  ;;  %v8673_v35 = vadd.f32 %v15172_v19, %v19204_v20  ;;  %v7866_v30 = vpop.f32.mrb[89].mxu0  ;;  %15330 = vmatmul.mubr.msk.f32.gmra.mrb[194].mxu0 %vm3334_vm2, %v7254_v47  ;;  %v7083_v47 = vadd.f32 %v19273_v63, %v19071_v42  ;;  %v20251_v55 = vld [vmem:[#allocation97_spill] sm:$0xff] }
 0x4bd   : > { %8959 = vst.msk [vmem:[#allocation2 + $0x70] sm:$0xff] %vm8944_vm3, %v8814_v45  ;;  %v8672_v40 = vadd.f32 %v19204_v20, %v7866_v30  ;;  %15332 = vmatprep.mubr.msk.f32.mxu0 %vm3334_vm2, %v7255_v16  ;;  %v7264_v16 = vmax.f32 %v7078_v25, 0.0  ;;  %v7088_v45 = vadd.f32 %v19273_v63, %v20251_v55 }
 0x4be   : > { %v8817_v37 = vmax.f32 %v8673_v35, 0.0 }
 0x4bf   : > { %v8816_v36 = vmax.f32 %v8672_v40, 0.0  ;;  %v15175_v4 = vpop.f32.mrb[90].mxu0  ;;  %v9111_v40 = vld [vmem:[%s20009_s5 + $0x30] sm:$0xff] }
 0x4c0   : > { %8962 = vst.msk [vmem:[#allocation2 + $0x88] sm:$0xff] %vm8944_vm3, %v8817_v37  ;;  %v8675_v53 = vadd.f32 %v15175_v4, %v19204_v20  ;;  %v7876_v13 = vpop.f32.mrb[91].mxu0  ;;  %15333 = vmatmul.mubr.msk.f32.gmra.mrb[196].mxu0 %vm3334_vm2, %v7256_v10  ;;  %v15854_v10 = vpack.c.bf16 %v9110_v57, %v9109_v27  ;;  %v7266_v4 = vmax.f32 %v7088_v45, 0.0 }
 0x4c1   : > { %8961 = vst.msk [vmem:[#allocation2 + $0x80] sm:$0xff] %vm8944_vm3, %v8816_v36  ;;  %v8674_v31 = vadd.f32 %v19204_v20, %v7876_v13  ;;  %15335 = vmatprep.mubr.msk.f32.mxu0 %vm3334_vm2, %v7257_v52  ;;  %v9112_v52 = vld [vmem:[%s20009_s5 + $0x38] sm:$0xff] }
 0x4c2   : > { %v8819_v23 = vmax.f32 %v8675_v53, 0.0  ;;  %v7098_v53 = vadd.f32 %v19273_v63, %v19080_v59  ;;  %v15858_v26 = vpack.c.bf16 %v9112_v52, %v9111_v40  ;;  %v12570_v59 = vld [vmem:[%s20009_s5 + $0x80] sm:$0xff] }
 0x4c3   : > { %v8818_v48 = vmax.f32 %v8674_v31, 0.0  ;;  %v15178_v18 = vpop.f32.mrb[92].mxu0 }
 0x4c4   : > { %8964 = vst.msk [vmem:[#allocation2 + $0x98] sm:$0xff] %vm8944_vm3, %v8819_v23  ;;  %v8677_v24 = vadd.f32 %v15178_v18, %v19204_v20  ;;  %v7886_v34 = vpop.f32.mrb[93].mxu0  ;;  %15336 = vmatmul.mubr.msk.f32.gmra.mrb[198].mxu0 %vm3334_vm2, %v7258_v8  ;;  %v7103_v23 = vadd.f32 %v19273_v63, %v19092_v2 }
 0x4c5   : > { %8963 = vst.msk [vmem:[#allocation2 + $0x90] sm:$0xff] %vm8944_vm3, %v8818_v48  ;;  %v8676_v33 = vadd.f32 %v19204_v20, %v7886_v34  ;;  %15338 = vmatprep.mubr.msk.f32.mxu0 %vm3334_vm2, %v7259_v51  ;;  %v7267_v51 = vmax.f32 %v7093_v41, 0.0  ;;  %v12571_v48 = vld [vmem:[%s20009_s5 + $0x88] sm:$0xff]  ;;  %v7268_v34 = vmax.f32 %v7098_v53, 0.0  ;;  %v12573_v53 = vld [vmem:[%s20009_s5 + $0x98] sm:$0xff] }
 0x4c6   : > { %v8821_v54 = vmax.f32 %v8677_v24, 0.0  ;;  %v19388_v12 = vpack.c.bf16 %v12571_v48, %v12570_v59  ;;  %v7269_v50 = vmax.f32 %v7103_v23, 0.0 }
 0x4c7   : > { %v8820_v3 = vmax.f32 %v8676_v33, 0.0  ;;  %v15181_v21 = vpop.f32.mrb[94].mxu0  ;;  %v9114_v22 = vld [vmem:[#allocation2 + $0x88] sm:$0xff]  ;;  %v7108_v33 = vadd.f32 %v19273_v63, %v19090_v14 }
 0x4c8   : > { %8966 = vst.msk [vmem:[#allocation2 + $0xa8] sm:$0xff] %vm8944_vm3, %v8821_v54  ;;  %v8679_v62 = vadd.f32 %v15181_v21, %v19204_v20  ;;  %v7896_v32 = vpop.f32.mrb[95].mxu0  ;;  %15339 = vmatmul.mubr.msk.f32.gmra.mrb[200].mxu0 %vm3334_vm2, %v7260_v39  ;;  %v9113_v58 = vld [vmem:[#allocation2 + $0x80] sm:$0xff] }
 0x4c9   : > { %8965 = vst.msk [vmem:[#allocation2 + $0xa0] sm:$0xff] %vm8944_vm3, %v8820_v3  ;;  %v8678_v15 = vadd.f32 %v19204_v20, %v7896_v32  ;;  %15378 = vmatprep.mubr.msk.f32.mxu1 %vm8944_vm3, %v9113_v58  ;;  %15341 = vmatprep.mubr.msk.f32.mxu0 %vm3334_vm2, %v7261_v44  ;;  %v7113_v3 = vadd.f32 %v19273_v63, %v19102_v29 }
 0x4ca   : > { %v8823_v0 = vmax.f32 %v8679_v62, 0.0  ;;  %15379 = vmatmul.mubr.msk.f32.vlgmr.msra.gmra.mrb[104].mxu1 %vm8944_vm3, %v9114_v22  ;;  %v7270_v62 = vmax.f32 %v7108_v33, 0.0  ;;  %v7118_v58 = vadd.f32 %v19273_v63, %v19100_v17  ;;  %v7123_v22 = vadd.f32 %v19273_v63, %v19112_v9 }
 0x4cb   : > { %v8822_v49 = vmax.f32 %v8678_v15, 0.0  ;;  %v15184_v56 = vpop.f32.mrb[96].mxu0  ;;  %15849 = vmatpush3.bf16.msra.mxu1 %v19067_v38  ;;  %v7265_v38 = vmax.f32 %v7083_v47, 0.0  ;;  %v9116_v30 = vld [vmem:[#allocation2 + $0x98] sm:$0xff]  ;;  %v7271_v15 = vmax.f32 %v7113_v3, 0.0 }
 0x4cc   : > { %8968 = vst.msk [vmem:[#allocation2 + $0xb8] sm:$0xff] %vm8944_vm3, %v8823_v0  ;;  %v8681_v42 = vadd.f32 %v15184_v56, %v19204_v20  ;;  %v7906_v43 = vpop.f32.mrb[97].mxu0  ;;  %15342 = vmatmul.mubr.msk.f32.gmra.mrb[202].mxu0 %vm3334_vm2, %v7262_v11  ;;  %v9115_v19 = vld [vmem:[#allocation2 + $0x90] sm:$0xff]  ;;  %15851 = vmatprep.subr.bf16.mxu1 %v15850_v61  ;;  %v7272_v57 = vmax.f32 %v7118_v58, 0.0  ;;  %v7128_v56 = vadd.f32 %v19273_v63, %v19110_v6  ;;  %v9092_v3 = vld [vmem:[#allocation2 + $0x18] sm:$0xff] }
 0x4cd   : > { %8967 = vst.msk [vmem:[#allocation2 + $0xb0] sm:$0xff] %vm8944_vm3, %v8822_v49  ;;  %v8680_v35 = vadd.f32 %v19204_v20, %v7906_v43  ;;  %15381 = vmatprep.mubr.msk.f32.mxu1 %vm8944_vm3, %v9115_v19  ;;  %15344 = vmatprep.mubr.msk.f32.mxu0 %vm3334_vm2, %v7263_v1 }
 0x4ce   : > { %v8825_v60 = vmax.f32 %v8681_v42, 0.0  ;;  %15382 = vmatmul.mubr.msk.f32.gmra.mrb[106].mxu1 %vm8944_vm3, %v9116_v30  ;;  %v7273_v42 = vmax.f32 %v7123_v22, 0.0  ;;  %v12595_v22 = vld [vmem:[%s20009_s5 + $0xc8] sm:$0xff] }
 0x4cf   : > { %v8824_v37 = vmax.f32 %v8680_v35, 0.0  ;;  %v15187_v36 = vpop.f32.mrb[98].mxu0  ;;  %15853 = vmatpush3.bf16.msra.mxu1 %v15850_v61  ;;  %v9118_v28 = vld [vmem:[#allocation2 + $0xa8] sm:$0xff] }
 0x4d0   : > { %8970 = vst.msk [vmem:[#allocation2 + $0xc8] sm:$0xff] %vm8944_vm3, %v8825_v60  ;;  %v8683_v8 = vadd.f32 %v15187_v36, %v19204_v20  ;;  %v7916_v5 = vpop.f32.mrb[99].mxu0  ;;  %15345 = vmatmul.mubr.msk.f32.gmra.mrb[204].mxu0 %vm3334_vm2, %v7264_v16  ;;  %v9117_v13 = vld [vmem:[#allocation2 + $0xa0] sm:$0xff]  ;;  %15855 = vmatprep.subr.bf16.mxu1 %v15854_v10 }
 0x4d1   : > { %8969 = vst.msk [vmem:[#allocation2 + $0xc0] sm:$0xff] %vm8944_vm3, %v8824_v37  ;;  %v8682_v31 = vadd.f32 %v19204_v20, %v7916_v5  ;;  %15384 = vmatprep.mubr.msk.f32.mxu1 %vm8944_vm3, %v9117_v13  ;;  %15347 = vmatprep.mubr.msk.f32.mxu0 %vm3334_vm2, %v7265_v38  ;;  %v12572_v5 = vld [vmem:[%s20009_s5 + $0x90] sm:$0xff] }
 0x4d2   : > { %v8827_v18 = vmax.f32 %v8683_v8, 0.0  ;;  %15385 = vmatmul.mubr.msk.f32.gmra.mrb[108].mxu1 %vm8944_vm3, %v9118_v28  ;;  %v15866_v59 = vpack.c.bf16 %v12573_v53, %v12572_v5 }
 0x4d3   : > { %v8826_v39 = vmax.f32 %v8682_v31, 0.0  ;;  %v15190_v24 = vpop.f32.mrb[100].mxu0  ;;  %15857 = vmatpush3.bf16.msra.mxu1 %v15854_v10  ;;  %v9120_v54 = vld [vmem:[#allocation2 + $0xb8] sm:$0xff]  ;;  %v7274_v10 = vmax.f32 %v7128_v56, 0.0 }
 0x4d4   : > { %8972 = vst.msk [vmem:[#allocation2 + $0xd8] sm:$0xff] %vm8944_vm3, %v8827_v18  ;;  %v8685_v46 = vadd.f32 %v15190_v24, %v19204_v20  ;;  %v7926_v2 = vpop.f32.mrb[101].mxu0  ;;  %15348 = vmatmul.mubr.msk.f32.gmra.mrb[206].mxu0 %vm3334_vm2, %v7266_v4  ;;  %v9119_v44 = vld [vmem:[#allocation2 + $0xb0] sm:$0xff]  ;;  %15859 = vmatprep.subr.bf16.mxu1 %v15858_v26  ;;  %v9090_v18 = vld [vmem:[#allocation2 + $0x8] sm:$0xff] }
 0x4d5   : > { %8971 = vst.msk [vmem:[#allocation2 + $0xd0] sm:$0xff] %vm8944_vm3, %v8826_v39  ;;  %v8684_v7 = vadd.f32 %v19204_v20, %v7926_v2  ;;  %15387 = vmatprep.mubr.msk.f32.mxu1 %vm8944_vm3, %v9119_v44  ;;  %15350 = vmatprep.mubr.msk.f32.mxu0 %vm3334_vm2, %v7267_v51  ;;  %v12574_v39 = vld [vmem:[%s20009_s5 + $0xa0] sm:$0xff]  ;;  %v12575_v24 = vld [vmem:[%s20009_s5 + $0xa8] sm:$0xff] }
 0x4d6   : > { %v8829_v21 = vmax.f32 %v8685_v46, 0.0  ;;  %15388 = vmatmul.mubr.msk.f32.gmra.mrb[110].mxu1 %vm8944_vm3, %v9120_v54  ;;  %v9091_v46 = vld [vmem:[#allocation2 + $0x10] sm:$0xff] }
 0x4d7   : > { %v8828_v14 = vmax.f32 %v8684_v7, 0.0  ;;  %v15193_v11 = vpop.f32.mrb[102].mxu0  ;;  %15861 = vmatpush3.bf16.msra.mxu1 %v15858_v26  ;;  %v9122_v1 = vld [vmem:[#allocation2 + $0xc8] sm:$0xff]  ;;  %v9089_v26 = vld [vmem:[#allocation2] sm:$0xff] }
 0x4d8   : > { %8974 = vst.msk [vmem:[#allocation2 + $0xe8] sm:$0xff] %vm8944_vm3, %v8829_v21  ;;  %v8687_v32 = vadd.f32 %v15193_v11, %v19204_v20  ;;  %v7936_v25 = vpop.f32.mrb[103].mxu0  ;;  %15351 = vmatmul.mubr.msk.f32.gmra.mrb[208].mxu0 %vm3334_vm2, %v7268_v34  ;;  %v9121_v61 = vld [vmem:[#allocation2 + $0xc0] sm:$0xff]  ;;  %15863 = vmatprep.subr.bf16.mxu1 %v19388_v12  ;;  %v12576_v21 = vld [vmem:[%s20009_s5 + $0xb0] sm:$0xff] }
 0x4d9   : > { %8973 = vst.msk [vmem:[#allocation2 + $0xe0] sm:$0xff] %vm8944_vm3, %v8828_v14  ;;  %v8686_v29 = vadd.f32 %v19204_v20, %v7936_v25  ;;  %15390 = vmatprep.mubr.msk.f32.mxu1 %vm8944_vm3, %v9121_v61  ;;  %15353 = vmatprep.mubr.msk.f32.mxu0 %vm3334_vm2, %v7269_v50  ;;  %v15870_v50 = vpack.c.bf16 %v12575_v24, %v12574_v39  ;;  %v9093_v11 = vld [vmem:[#allocation2 + $0x20] sm:$0xff]  ;;  %v9104_v24 = vld [vmem:[#allocation2 + $0x78] sm:$0x1] }
 0x4da   : > { %v8831_v47 = vmax.f32 %v8687_v32, 0.0  ;;  %15391 = vmatmul.mubr.msk.f32.gmra.mrb[112].mxu1 %vm8944_vm3, %v9122_v1  ;;  %v12594_v1 = vld [vmem:[%s20009_s5 + $0xc0] sm:$0xff] }
 0x4db   : > { %v8830_v17 = vmax.f32 %v8686_v29, 0.0  ;;  %v15196_v27 = vpop.f32.mrb[104].mxu0  ;;  %v9124_v43 = vld [vmem:[#allocation2 + $0xd8] sm:$0xff]  ;;  %v19481_v56 = vpack.c.bf16 %v12595_v22, %v12594_v1 }
 0x4dc   : > { %8976 = vst.msk [vmem:[#allocation2 + $0xf8] sm:$0xff] %vm8944_vm3, %v8831_v47  ;;  %v8689_v0 = vadd.f32 %v15196_v27, %v19204_v20  ;;  %v7946_v49 = vpop.f32.mrb[105].mxu0  ;;  %15354 = vmatmul.mubr.msk.f32.gmra.mrb[210].mxu0 %vm3334_vm2, %v7270_v62  ;;  %v9123_v16 = vld [vmem:[#allocation2 + $0xd0] sm:$0xff] }
 0x4dd   : > { %8975 = vst.msk [vmem:[#allocation2 + $0xf0] sm:$0xff] %vm8944_vm3, %v8830_v17  ;;  %v8688_v9 = vadd.f32 %v19204_v20, %v7946_v49  ;;  %15393 = vmatprep.mubr.msk.f32.mxu1 %vm8944_vm3, %v9123_v16  ;;  %15356 = vmatprep.mubr.msk.f32.mxu0 %vm3334_vm2, %v7271_v15  ;;  %v9094_v15 = vld [vmem:[#allocation2 + $0x28] sm:$0xff]  ;;  %v9095_v17 = vld [vmem:[#allocation2 + $0x30] sm:$0xff] }
 0x4de   : > { %v8833_v55 = vmax.f32 %v8689_v0, 0.0  ;;  %15394 = vmatmul.mubr.msk.f32.gmra.mrb[114].mxu1 %vm8944_vm3, %v9124_v43  ;;  %v9097_v43 = vld [vmem:[#allocation2 + $0x40] sm:$0xff] }
 0x4df   : > { %v8832_v45 = vmax.f32 %v8688_v9, 0.0  ;;  %v15199_v19 = vpop.f32.mrb[106].mxu0  ;;  %v9126_v30 = vld [vmem:[#allocation2 + $0xe8] sm:$0xff]  ;;  %v9096_v9 = vld [vmem:[#allocation2 + $0x38] sm:$0xff] }
 0x4e0   : > { %8978 = vst.msk [vmem:[#allocation2 + $0x108] sm:$0xff] %vm8944_vm3, %v8833_v55  ;;  %v8691_v6 = vadd.f32 %v15199_v19, %v19204_v20  ;;  %v7956_v63 = vpop.f32.mrb[107].mxu0  ;;  %15357 = vmatmul.mubr.msk.f32.gmra.mrb[212].mxu0 %vm3334_vm2, %v7272_v57  ;;  %v9125_v35 = vld [vmem:[#allocation2 + $0xe0] sm:$0xff] }
 0x4e1   : > { %8977 = vst.msk [vmem:[#allocation2 + $0x100] sm:$0xff] %vm8944_vm3, %v8832_v45  ;;  %v8690_v38 = vadd.f32 %v19204_v20, %v7956_v63  ;;  %15396 = vmatprep.mubr.msk.f32.mxu1 %vm8944_vm3, %v9125_v35  ;;  %15359 = vmatprep.mubr.msk.f32.mxu0 %vm3334_vm2, %v7273_v42  ;;  %v9098_v63 = vld [vmem:[#allocation2 + $0x48] sm:$0xff] }
 0x4e2   : > { %v8835_v41 = vmax.f32 %v8691_v6, 0.0  ;;  %15397 = vmatmul.mubr.msk.f32.gmra.mrb[116].mxu1 %vm8944_vm3, %v9126_v30 }
 0x4e3   : > { %v8834_v40 = vmax.f32 %v8690_v38, 0.0  ;;  %v15202_v52 = vpop.f32.mrb[108].mxu0  ;;  %v9128_v8 = vld [vmem:[#allocation2 + $0xf8] sm:$0x1]  ;;  %v9099_v38 = vld [vmem:[#allocation2 + $0x50] sm:$0xff] }
 0x4e4   : > { %8980 = vst.msk [vmem:[#allocation2 + $0x118] sm:$0xff] %vm8944_vm3, %v8835_v41  ;;  %v8693_v60 = vadd.f32 %v15202_v52, %v19204_v20  ;;  %v7966_v37 = vpop.f32.mrb[109].mxu0  ;;  %15360 = vmatmul.mubr.msk.f32.gmra.mrb[214].mxu0 %vm3334_vm2, %v7274_v10  ;;  %v9127_v36 = vld [vmem:[#allocation2 + $0xf0] sm:$0xff] }
 0x4e5   : > { %8979 = vst.msk [vmem:[#allocation2 + $0x110] sm:$0xff] %vm8944_vm3, %v8834_v40  ;;  %v8692_v4 = vadd.f32 %v19204_v20, %v7966_v37  ;;  %15399 = vmatprep.mubr.msk.f32.mxu1 %vm8944_vm3, %v9127_v36  ;;  %v9100_v37 = vld [vmem:[#allocation2 + $0x58] sm:$0xff] }
 0x4e6   : > { %v8837_v13 = vmax.f32 %v8693_v60, 0.0  ;;  %15400 = vmatmul.mubr.msk.f32.gmra.mrb[118].mxu1 %vm8944_vm3, %v9128_v8 }
 0x4e7   : > { %v8836_v31 = vmax.f32 %v8692_v4, 0.0  ;;  %v15205_v51 = vpop.f32.mrb[110].mxu0  ;;  %15418 = vmatprep.mubr.msk.f32.mxu1 %vm8944_vm3, %v9089_v26  ;;  %v9101_v4 = vld [vmem:[#allocation2 + $0x60] sm:$0xff] }
 0x4e8   : > { %8982 = vst.msk [vmem:[#allocation2 + $0x128] sm:$0xff] %vm8944_vm3, %v8837_v13  ;;  %v8695_v28 = vadd.f32 %v15205_v51, %v19204_v20  ;;  %v7976_v23 = vpop.f32.mrb[111].mxu0 }
 0x4e9   : > { %8981 = vst.msk [vmem:[#allocation2 + $0x120] sm:$0xff] %vm8944_vm3, %v8836_v31  ;;  %v8694_v48 = vadd.f32 %v19204_v20, %v7976_v23  ;;  %v9102_v31 = vld [vmem:[#allocation2 + $0x68] sm:$0xff] }
 0x4ea   : > { %v8839_v34 = vmax.f32 %v8695_v28, 0.0  ;;  %15419 = vmatmul.mubr.msk.f32.vlgmr.msra.gmra.mrb[104].mxu1 %vm8944_vm3, %v9090_v18  ;;  %v9103_v28 = vld [vmem:[#allocation2 + $0x70] sm:$0xff] }
 0x4eb   : > { %v8838_v2 = vmax.f32 %v8694_v48, 0.0  ;;  %v15208_v33 = vpop.f32.mrb[112].mxu0  ;;  %15421 = vmatprep.mubr.msk.f32.mxu1 %vm8944_vm3, %v9091_v46  ;;  %15865 = vmatpush3.bf16.msra.mxu1 %v19388_v12  ;;  %v12577_v12 = vld [vmem:[%s20009_s5 + $0xb8] sm:$0xff] }
 0x4ec   : > { %8984 = vst.msk [vmem:[#allocation2 + $0x138] sm:$0xff] %vm8944_vm3, %v8839_v34  ;;  %v8697_v44 = vadd.f32 %v15208_v33, %v19204_v20  ;;  %v7986_v7 = vpop.f32.mrb[113].mxu0  ;;  %15867 = vmatprep.subr.bf16.mxu1 %v15866_v59  ;;  %v15874_v61 = vpack.c.bf16 %v12577_v12, %v12576_v21  ;;  %v12596_v34 = vld [vmem:[%s20009_s5 + $0xd0] sm:$0xff]  ;;  %v12597_v46 = vld [vmem:[%s20009_s5 + $0xd8] sm:$0xff]  ;;  %v9524_v33 = vld [vmem:[#allocation2 + $0x100] sm:$0xff] }
 0x4ed   : > { %8983 = vst.msk [vmem:[#allocation2 + $0x130] sm:$0xff] %vm8944_vm3, %v8838_v2  ;;  %v8696_v54 = vadd.f32 %v19204_v20, %v7986_v7  ;;  %v9525_v12 = vld [vmem:[#allocation2 + $0x108] sm:$0xff]  ;;  %v9527_v22 = vld [vmem:[#allocation2 + $0x118] sm:$0xff] }
 0x4ee   : > { %v8841_v14 = vmax.f32 %v8697_v44, 0.0  ;;  %15422 = vmatmul.mubr.msk.f32.gmra.mrb[106].mxu1 %vm8944_vm3, %v9092_v3  ;;  %v15882_v3 = vpack.c.bf16 %v12597_v46, %v12596_v34 }
 0x4ef   : > { %v8840_v62 = vmax.f32 %v8696_v54, 0.0  ;;  %v15211_v32 = vpop.f32.mrb[114].mxu0  ;;  %15424 = vmatprep.mubr.msk.f32.mxu1 %vm8944_vm3, %v9093_v11  ;;  %15869 = vmatpush3.bf16.msra.mxu1 %v15866_v59  ;;  %v12599_v11 = vld [vmem:[%s20009_s5 + $0xe8] sm:$0xff] }
 0x4f0   : > { %8986 = vst.msk [vmem:[#allocation2 + $0x148] sm:$0xff] %vm8944_vm3, %v8841_v14  ;;  %v8699_v25 = vadd.f32 %v15211_v32, %v19204_v20  ;;  %v7996_v58 = vpop.f32.mrb[115].mxu0  ;;  %15871 = vmatprep.subr.bf16.mxu1 %v15870_v50  ;;  %v12598_v14 = vld [vmem:[%s20009_s5 + $0xe0] sm:$0xff]  ;;  %v9526_v32 = vld [vmem:[#allocation2 + $0x110] sm:$0xff] }
 0x4f1   : > { %8985 = vst.msk [vmem:[#allocation2 + $0x140] sm:$0xff] %vm8944_vm3, %v8840_v62  ;;  %v8698_v29 = vadd.f32 %v19204_v20, %v7996_v58 }
 0x4f2   : > { %v8843_v47 = vmax.f32 %v8699_v25, 0.0  ;;  %15425 = vmatmul.mubr.msk.f32.gmra.mrb[108].mxu1 %vm8944_vm3, %v9094_v15  ;;  %v15886_v15 = vpack.c.bf16 %v12599_v11, %v12598_v14 }
 0x4f3   : > { %v8842_v27 = vmax.f32 %v8698_v29, 0.0  ;;  %v15214_v57 = vpop.f32.mrb[116].mxu0  ;;  %15427 = vmatprep.mubr.msk.f32.mxu1 %vm8944_vm3, %v9095_v17  ;;  %15873 = vmatpush3.bf16.msra.mxu1 %v15870_v50  ;;  %v12601_v17 = vld [vmem:[%s20009_s5 + $0xf8] sm:$0xff] }
 0x4f4   : > { %8988 = vst.msk [vmem:[#allocation2 + $0x158] sm:$0xff] %vm8944_vm3, %v8843_v47  ;;  %v8701_v0 = vadd.f32 %v15214_v57, %v19204_v20  ;;  %v8006_v49 = vpop.f32.mrb[117].mxu0  ;;  %15875 = vmatprep.subr.bf16.mxu1 %v15874_v61  ;;  %v12600_v47 = vld [vmem:[%s20009_s5 + $0xf0] sm:$0xff]  ;;  %v9528_v57 = vld [vmem:[#allocation2 + $0x120] sm:$0xff] }
 0x4f5   : > { %8987 = vst.msk [vmem:[#allocation2 + $0x150] sm:$0xff] %vm8944_vm3, %v8842_v27  ;;  %v8700_v16 = vadd.f32 %v19204_v20, %v8006_v49 }
 0x4f6   : > { %v8845_v42 = vmax.f32 %v8701_v0, 0.0  ;;  %15428 = vmatmul.mubr.msk.f32.gmra.mrb[110].mxu1 %vm8944_vm3, %v9096_v9  ;;  %v15890_v9 = vpack.c.bf16 %v12601_v17, %v12600_v47 }
 0x4f7   : > { %v8844_v55 = vmax.f32 %v8700_v16, 0.0  ;;  %v15217_v45 = vpop.f32.mrb[118].mxu0  ;;  %15430 = vmatprep.mubr.msk.f32.mxu1 %vm8944_vm3, %v9097_v43  ;;  %15877 = vmatpush3.bf16.msra.mxu1 %v15874_v61  ;;  %v9529_v43 = vld [vmem:[#allocation2 + $0x128] sm:$0xff] }
 0x4f8   : > { %8990 = vst.msk [vmem:[#allocation2 + $0x168] sm:$0xff] %vm8944_vm3, %v8845_v42  ;;  %v8703_v19 = vadd.f32 %v15217_v45, %v19204_v20  ;;  %v8016_v10 = vpop.f32.mrb[119].mxu0  ;;  %15879 = vmatprep.subr.bf16.mxu1 %v19481_v56  ;;  %v12619_v45 = vld [vmem:[%s20009_s5 + $0x108] sm:$0xff] }
 0x4f9   : > { %8989 = vst.msk [vmem:[#allocation2 + $0x160] sm:$0xff] %vm8944_vm3, %v8844_v55  ;;  %v8702_v6 = vadd.f32 %v19204_v20, %v8016_v10  ;;  %v12618_v55 = vld [vmem:[%s20009_s5 + $0x100] sm:$0xff]  ;;  %v9530_v10 = vld [vmem:[#allocation2 + $0x130] sm:$0xff] }
 0x4fa   : > { %v8847_v35 = vmax.f32 %v8703_v19, 0.0  ;;  %15431 = vmatmul.mubr.msk.f32.gmra.mrb[112].mxu1 %vm8944_vm3, %v9098_v63 }
 0x4fb   : > { %v8846_v30 = vmax.f32 %v8702_v6, 0.0  ;;  %v15220_v41 = vpop.f32.mrb[120].mxu0  ;;  %15433 = vmatprep.mubr.msk.f32.mxu1 %vm8944_vm3, %v9099_v38 }
 0x4fc   : > { %8992 = vst.msk [vmem:[#allocation2 + $0x178] sm:$0xff] %vm8944_vm3, %v8847_v35  ;;  %v8705_v40 = vadd.f32 %v15220_v41, %v19204_v20  ;;  %v8026_v52 = vpop.f32.mrb[121].mxu0 }
 0x4fd   : > { %8991 = vst.msk [vmem:[#allocation2 + $0x170] sm:$0xff] %vm8944_vm3, %v8846_v30  ;;  %v8704_v60 = vadd.f32 %v19204_v20, %v8026_v52  ;;  %v19557_v30 = vpack.c.bf16 %v12619_v45, %v12618_v55 }
 0x4fe   : > { %v8849_v36 = vmax.f32 %v8705_v40, 0.0  ;;  %15434 = vmatmul.mubr.msk.f32.gmra.mrb[114].mxu1 %vm8944_vm3, %v9100_v37  ;;  %v9531_v40 = vld [vmem:[#allocation2 + $0x138] sm:$0xff] }
 0x4ff   : > { %v8848_v8 = vmax.f32 %v8704_v60, 0.0  ;;  %v15223_v5 = vpop.f32.mrb[122].mxu0  ;;  %15436 = vmatprep.mubr.msk.f32.mxu1 %vm8944_vm3, %v9101_v4  ;;  %v9532_v60 = vld [vmem:[#allocation2 + $0x140] sm:$0xff] }
 0x500   : > { %8994 = vst.msk [vmem:[#allocation2 + $0x188] sm:$0xff] %vm8944_vm3, %v8849_v36  ;;  %v8707_v53 = vadd.f32 %v15223_v5, %v19204_v20  ;;  %v8036_v13 = vpop.f32.mrb[123].mxu0 }
 0x501   : > { %8993 = vst.msk [vmem:[#allocation2 + $0x180] sm:$0xff] %vm8944_vm3, %v8848_v8  ;;  %v8706_v26 = vadd.f32 %v19204_v20, %v8036_v13 }
 0x502   : > { %v8851_v51 = vmax.f32 %v8707_v53, 0.0  ;;  %15437 = vmatmul.mubr.msk.f32.gmra.mrb[116].mxu1 %vm8944_vm3, %v9102_v31  ;;  %v9533_v53 = vld [vmem:[#allocation2 + $0x148] sm:$0xff] }
 0x503   : > { %v8850_v23 = vmax.f32 %v8706_v26, 0.0  ;;  %v15226_v59 = vpop.f32.mrb[124].mxu0  ;;  %15439 = vmatprep.mubr.msk.f32.mxu1 %vm8944_vm3, %v9103_v28  ;;  %v9534_v26 = vld [vmem:[#allocation2 + $0x150] sm:$0xff]  ;;  %v9539_v11 = vld [vmem:[#allocation2 + $0x178] sm:$0x1] }
 0x504   : > { %8996 = vst.msk [vmem:[#allocation2 + $0x198] sm:$0xff] %vm8944_vm3, %v8851_v51  ;;  %v8709_v48 = vadd.f32 %v15226_v59, %v19204_v20  ;;  %v8046_v18 = vpop.f32.mrb[125].mxu0  ;;  %v19576_v59 = vld [vmem:[%s20008_s4] ss:$0 sm:$0xff] }
 0x505   : > { %8995 = vst.msk [vmem:[#allocation2 + $0x190] sm:$0xff] %vm8944_vm3, %v8850_v23  ;;  %v8708_v39 = vadd.f32 %v19204_v20, %v8046_v18  ;;  %v9535_v18 = vld [vmem:[#allocation2 + $0x158] sm:$0xff] }
 0x506   : > { %v8853_v2 = vmax.f32 %v8709_v48, 0.0  ;;  %15440 = vmatmul.mubr.msk.f32.gmra.mrb[118].mxu1 %vm8944_vm3, %v9104_v24  ;;  %v9536_v24 = vld [vmem:[#allocation2 + $0x160] sm:$0xff] }
 0x507   : > { %v8852_v44 = vmax.f32 %v8708_v39, 0.0  ;;  %v15229_v7 = vpop.f32.mrb[126].mxu0  ;;  %15458 = vmatprep.mubr.msk.f32.mxu1 %vm8944_vm3, %v9524_v33  ;;  %v9759_v17 = vld [vmem:[#allocation2 + $0x188] sm:$0xff] }
 0x508   : > { %8998 = vst.msk [vmem:[#allocation2 + $0x1a8] sm:$0xff] %vm8944_vm3, %v8853_v2  ;;  %v8711_v50 = vadd.f32 %v15229_v7, %v19204_v20  ;;  %v8056_v54 = vpop.f32.mrb[127].mxu0 }
 0x509   : > { %8997 = vst.msk [vmem:[#allocation2 + $0x1a0] sm:$0xff] %vm8944_vm3, %v8852_v44  ;;  %v8710_v21 = vadd.f32 %v19204_v20, %v8056_v54  ;;  %v9537_v44 = vld [vmem:[#allocation2 + $0x168] sm:$0xff] }
 0x50a   : > { %v8855_v62 = vmax.f32 %v8711_v50, 0.0  ;;  %15459 = vmatmul.mubr.msk.f32.vlgmr.msra.gmra.mrb[104].mxu1 %vm8944_vm3, %v9525_v12  ;;  %v9538_v50 = vld [vmem:[#allocation2 + $0x170] sm:$0xff] }
 0x50b   : > { %v8854_v25 = vmax.f32 %v8710_v21, 0.0  ;;  %v15232_v58 = vpop.f32.mrb[128].mxu0  ;;  %15461 = vmatprep.mubr.msk.f32.mxu1 %vm8944_vm3, %v9526_v32  ;;  %15881 = vmatpush3.bf16.msra.mxu1 %v19481_v56  ;;  %v12621_v32 = vld [vmem:[%s20009_s5 + $0x118] sm:$0xff] }
 0x50c   : > { %9000 = vst.msk [vmem:[#allocation2 + $0x1b8] sm:$0xff] %vm8944_vm3, %v8855_v62  ;;  %v8713_v61 = vadd.f32 %v15232_v58, %v19204_v20  ;;  %v8066_v29 = vpop.f32.mrb[129].mxu0  ;;  %15883 = vmatprep.subr.bf16.mxu1 %v15882_v3  ;;  %v12620_v62 = vld [vmem:[%s20009_s5 + $0x110] sm:$0xff]  ;;  %v9758_v58 = vld [vmem:[#allocation2 + $0x180] sm:$0xff]  ;;  %v9761_v45 = vld [vmem:[#allocation2 + $0x198] sm:$0xff] }
 0x50d   : > { %8999 = vst.msk [vmem:[#allocation2 + $0x1b0] sm:$0xff] %vm8944_vm3, %v8854_v25  ;;  %v8712_v1 = vadd.f32 %v19204_v20, %v8066_v29 }
 0x50e   : > { %v8857_v27 = vmax.f32 %v8713_v61, 0.0  ;;  %15462 = vmatmul.mubr.msk.f32.gmra.mrb[106].mxu1 %vm8944_vm3, %v9527_v22  ;;  %v15898_v22 = vpack.c.bf16 %v12621_v32, %v12620_v62 }
 0x50f   : > { %v8856_v0 = vmax.f32 %v8712_v1, 0.0  ;;  %v15235_v49 = vpop.f32.mrb[130].mxu0  ;;  %15464 = vmatprep.mubr.msk.f32.mxu1 %vm8944_vm3, %v9528_v57  ;;  %15885 = vmatpush3.bf16.msra.mxu1 %v15882_v3  ;;  %v12623_v57 = vld [vmem:[%s20009_s5 + $0x128] sm:$0xff] }
 0x510   : > { %9002 = vst.msk [vmem:[#allocation2 + $0x1c8] sm:$0xff] %vm8944_vm3, %v8857_v27  ;;  %v8715_v56 = vadd.f32 %v15235_v49, %v19204_v20  ;;  %v8076_v16 = vpop.f32.mrb[131].mxu0  ;;  %15887 = vmatprep.subr.bf16.mxu1 %v15886_v15  ;;  %v12622_v27 = vld [vmem:[%s20009_s5 + $0x120] sm:$0xff]  ;;  %v9760_v49 = vld [vmem:[#allocation2 + $0x190] sm:$0xff] }
 0x511   : > { %9001 = vst.msk [vmem:[#allocation2 + $0x1c0] sm:$0xff] %vm8944_vm3, %v8856_v0  ;;  %v8714_v42 = vadd.f32 %v19204_v20, %v8076_v16 }
 0x512   : > { %v8859_v19 = vmax.f32 %v8715_v56, 0.0  ;;  %15465 = vmatmul.mubr.msk.f32.gmra.mrb[108].mxu1 %vm8944_vm3, %v9529_v43  ;;  %v15902_v43 = vpack.c.bf16 %v12623_v57, %v12622_v27 }
 0x513   : > { %v8858_v6 = vmax.f32 %v8714_v42, 0.0  ;;  %v15238_v63 = vpop.f32.mrb[132].mxu0  ;;  %15467 = vmatprep.mubr.msk.f32.mxu1 %vm8944_vm3, %v9530_v10  ;;  %15889 = vmatpush3.bf16.msra.mxu1 %v15886_v15  ;;  %v12625_v10 = vld [vmem:[%s20009_s5 + $0x138] sm:$0xff] }
 0x514   : > { %9004 = vst.msk [vmem:[#allocation2 + $0x1d8] sm:$0xff] %vm8944_vm3, %v8859_v19  ;;  %v8717_v35 = vadd.f32 %v15238_v63, %v19204_v20  ;;  %v8086_v38 = vpop.f32.mrb[133].mxu0  ;;  %15891 = vmatprep.subr.bf16.mxu1 %v15890_v9  ;;  %v12624_v19 = vld [vmem:[%s20009_s5 + $0x130] sm:$0xff]  ;;  %v9762_v63 = vld [vmem:[#allocation2 + $0x1a0] sm:$0xff] }
 0x515   : > { %9003 = vst.msk [vmem:[#allocation2 + $0x1d0] sm:$0xff] %vm8944_vm3, %v8858_v6  ;;  %v8716_v41 = vadd.f32 %v19204_v20, %v8086_v38 }
 0x516   : > { %v8861_v52 = vmax.f32 %v8717_v35, 0.0  ;;  %15468 = vmatmul.mubr.msk.f32.gmra.mrb[110].mxu1 %vm8944_vm3, %v9531_v40  ;;  %v15906_v40 = vpack.c.bf16 %v12625_v10, %v12624_v19 }
 0x517   : > { %v8860_v37 = vmax.f32 %v8716_v41, 0.0  ;;  %v15241_v36 = vpop.f32.mrb[134].mxu0  ;;  %15470 = vmatprep.mubr.msk.f32.mxu1 %vm8944_vm3, %v9532_v60  ;;  %15893 = vmatpush3.bf16.msra.mxu1 %v15890_v9  ;;  %v9763_v60 = vld [vmem:[#allocation2 + $0x1a8] sm:$0xff] }
 0x518   : > { %9006 = vst.msk [vmem:[#allocation2 + $0x1e8] sm:$0xff] %vm8944_vm3, %v8861_v52  ;;  %v8719_v4 = vadd.f32 %v15241_v36, %v19204_v20  ;;  %v8096_v8 = vpop.f32.mrb[135].mxu0  ;;  %15895 = vmatprep.subr.bf16.mxu1 %v19557_v30  ;;  %v12643_v36 = vld [vmem:[%s20009_s5 + $0x148] sm:$0xff] }
 0x519   : > { %9005 = vst.msk [vmem:[#allocation2 + $0x1e0] sm:$0xff] %vm8944_vm3, %v8860_v37  ;;  %v8718_v5 = vadd.f32 %v19204_v20, %v8096_v8  ;;  %v12642_v37 = vld [vmem:[%s20009_s5 + $0x140] sm:$0xff]  ;;  %v9764_v8 = vld [vmem:[#allocation2 + $0x1b0] sm:$0xff] }
 0x51a   : > { %v8863_v13 = vmax.f32 %v8719_v4, 0.0  ;;  %15471 = vmatmul.mubr.msk.f32.gmra.mrb[112].mxu1 %vm8944_vm3, %v9533_v53 }
 0x51b   : > { %v8862_v31 = vmax.f32 %v8718_v5, 0.0  ;;  %v15244_v51 = vpop.f32.mrb[136].mxu0  ;;  %15473 = vmatprep.mubr.msk.f32.mxu1 %vm8944_vm3, %v9534_v26 }
 0x51c   : > { %9008 = vst.msk [vmem:[#allocation2 + $0x1f8] sm:$0xff] %vm8944_vm3, %v8863_v13  ;;  %v8721_v28 = vadd.f32 %v15244_v51, %v19204_v20  ;;  %v8106_v23 = vpop.f32.mrb[137].mxu0 }
 0x51d   : > { %9007 = vst.msk [vmem:[#allocation2 + $0x1f0] sm:$0xff] %vm8944_vm3, %v8862_v31  ;;  %v8720_v48 = vadd.f32 %v19576_v59, %v8106_v23  ;;  %v19638_v31 = vpack.c.bf16 %v12643_v36, %v12642_v37 }
 0x51e   : > { %v8865_v39 = vmax.f32 %v8721_v28, 0.0  ;;  %15474 = vmatmul.mubr.msk.f32.gmra.mrb[114].mxu1 %vm8944_vm3, %v9535_v18  ;;  %v9765_v28 = vld [vmem:[#allocation2 + $0x1b8] sm:$0xff] }
 0x51f   : > { %v8864_v34 = vmax.f32 %v8720_v48, 0.0  ;;  %v15247_v46 = vpop.f32.mrb[138].mxu0  ;;  %15476 = vmatprep.mubr.msk.f32.mxu1 %vm8944_vm3, %v9536_v24  ;;  %v9766_v48 = vld [vmem:[#allocation2 + $0x1c0] sm:$0xff] }
 0x520   : > { %9010 = vst.msk [vmem:[#allocation2 + $0x208] sm:$0xff] %vm8944_vm3, %v8865_v39  ;;  %v8723_v20 = vadd.f32 %v19576_v59, %v15247_v46  ;;  %v8116_v2 = vpop.f32.mrb[139].mxu0 }
 0x521   : > { %9009 = vst.msk [vmem:[#allocation2 + $0x200] sm:$0xff] %vm8944_vm3, %v8864_v34  ;;  %v8722_v33 = vadd.f32 %v19576_v59, %v8116_v2 }
 0x522   : > { %v8867_v7 = vmax.f32 %v8723_v20, 0.0  ;;  %15477 = vmatmul.mubr.msk.f32.gmra.mrb[116].mxu1 %vm8944_vm3, %v9537_v44  ;;  %v9767_v20 = vld [vmem:[#allocation2 + $0x1c8] sm:$0xff] }
 0x523   : > { %v8866_v54 = vmax.f32 %v8722_v33, 0.0  ;;  %v15250_v3 = vpop.f32.mrb[140].mxu0  ;;  %15479 = vmatprep.mubr.msk.f32.mxu1 %vm8944_vm3, %v9538_v50  ;;  %v9768_v33 = vld [vmem:[#allocation2 + $0x1d0] sm:$0xff]  ;;  %v9773_v57 = vld [vmem:[#allocation2 + $0x1f8] sm:$0x1] }
 0x524   : > { %9012 = vst.msk [vmem:[#allocation2 + $0x218] sm:$0xff] %vm8944_vm3, %v8867_v7  ;;  %v8725_v21 = vadd.f32 %v19576_v59, %v15250_v3  ;;  %v8126_v12 = vpop.f32.mrb[141].mxu0 }
 0x525   : > { %9011 = vst.msk [vmem:[#allocation2 + $0x210] sm:$0xff] %vm8944_vm3, %v8866_v54  ;;  %v8724_v14 = vadd.f32 %v19576_v59, %v8126_v12 }
 0x526   : > { %v8869_v25 = vmax.f32 %v8725_v21, 0.0  ;;  %15480 = vmatmul.mubr.msk.f32.gmra.mrb[118].mxu1 %vm8944_vm3, %v9539_v11  ;;  %v9769_v21 = vld [vmem:[#allocation2 + $0x1d8] sm:$0xff] }
 0x527   : > { %v8868_v61 = vmax.f32 %v8724_v14, 0.0  ;;  %v15253_v29 = vpop.f32.mrb[142].mxu0  ;;  %15498 = vmatprep.mubr.msk.f32.mxu1 %vm8944_vm3, %v9758_v58  ;;  %v9770_v14 = vld [vmem:[#allocation2 + $0x1e0] sm:$0xff]  ;;  %v9993_v10 = vld [vmem:[#allocation2 + $0x208] sm:$0xff] }
 0x528   : > { %9014 = vst.msk [vmem:[#allocation2 + $0x228] sm:$0xff] %vm8944_vm3, %v8869_v25  ;;  %v8727_v15 = vadd.f32 %v19576_v59, %v15253_v29  ;;  %v8136_v1 = vpop.f32.mrb[143].mxu0 }
 0x529   : > { %9013 = vst.msk [vmem:[#allocation2 + $0x220] sm:$0xff] %vm8944_vm3, %v8868_v61  ;;  %v8726_v47 = vadd.f32 %v19576_v59, %v8136_v1  ;;  %v9771_v61 = vld [vmem:[#allocation2 + $0x1e8] sm:$0xff] }
 0x52a   : > { %v8871_v0 = vmax.f32 %v8727_v15, 0.0  ;;  %15499 = vmatmul.mubr.msk.f32.vlgmr.msra.gmra.mrb[104].mxu1 %vm8944_vm3, %v9759_v17  ;;  %v9772_v15 = vld [vmem:[#allocation2 + $0x1f0] sm:$0xff] }
 0x52b   : > { %v8870_v56 = vmax.f32 %v8726_v47, 0.0  ;;  %v15256_v16 = vpop.f32.mrb[144].mxu0  ;;  %15501 = vmatprep.mubr.msk.f32.mxu1 %vm8944_vm3, %v9760_v49  ;;  %15897 = vmatpush3.bf16.msra.mxu1 %v19557_v30  ;;  %v12645_v49 = vld [vmem:[%s20009_s5 + $0x158] sm:$0xff] }
 0x52c   : > { %9016 = vst.msk [vmem:[#allocation2 + $0x238] sm:$0xff] %vm8944_vm3, %v8871_v0  ;;  %v8729_v9 = vadd.f32 %v19576_v59, %v15256_v16  ;;  %v8146_v42 = vpop.f32.mrb[145].mxu0  ;;  %15899 = vmatprep.subr.bf16.mxu1 %v15898_v22  ;;  %v12644_v0 = vld [vmem:[%s20009_s5 + $0x150] sm:$0xff]  ;;  %v9992_v16 = vld [vmem:[#allocation2 + $0x200] sm:$0xff]  ;;  %v9995_v36 = vld [vmem:[#allocation2 + $0x218] sm:$0xff] }
 0x52d   : > { %9015 = vst.msk [vmem:[#allocation2 + $0x230] sm:$0xff] %vm8944_vm3, %v8870_v56  ;;  %v8728_v55 = vadd.f32 %v19576_v59, %v8146_v42 }
 0x52e   : > { %v8873_v6 = vmax.f32 %v8729_v9, 0.0  ;;  %15502 = vmatmul.mubr.msk.f32.gmra.mrb[106].mxu1 %vm8944_vm3, %v9761_v45  ;;  %v15914_v45 = vpack.c.bf16 %v12645_v49, %v12644_v0 }
 0x52f   : > { %v8872_v35 = vmax.f32 %v8728_v55, 0.0  ;;  %v15259_v38 = vpop.f32.mrb[146].mxu0  ;;  %15504 = vmatprep.mubr.msk.f32.mxu1 %vm8944_vm3, %v9762_v63  ;;  %15901 = vmatpush3.bf16.msra.mxu1 %v15898_v22  ;;  %v12647_v63 = vld [vmem:[%s20009_s5 + $0x168] sm:$0xff] }
 0x530   : > { %9018 = vst.msk [vmem:[#allocation2 + $0x248] sm:$0xff] %vm8944_vm3, %v8873_v6  ;;  %v8731_v30 = vadd.f32 %v19576_v59, %v15259_v38  ;;  %v8156_v41 = vpop.f32.mrb[147].mxu0  ;;  %15903 = vmatprep.subr.bf16.mxu1 %v15902_v43  ;;  %v12646_v6 = vld [vmem:[%s20009_s5 + $0x160] sm:$0xff]  ;;  %v9994_v38 = vld [vmem:[#allocation2 + $0x210] sm:$0xff] }
 0x531   : > { %9017 = vst.msk [vmem:[#allocation2 + $0x240] sm:$0xff] %vm8944_vm3, %v8872_v35  ;;  %v8730_v52 = vadd.f32 %v19576_v59, %v8156_v41 }
 0x532   : > { %v8875_v4 = vmax.f32 %v8731_v30, 0.0  ;;  %15505 = vmatmul.mubr.msk.f32.gmra.mrb[108].mxu1 %vm8944_vm3, %v9763_v60  ;;  %v15918_v60 = vpack.c.bf16 %v12647_v63, %v12646_v6 }
 0x533   : > { %v8874_v5 = vmax.f32 %v8730_v52, 0.0  ;;  %v15262_v53 = vpop.f32.mrb[148].mxu0  ;;  %15507 = vmatprep.mubr.msk.f32.mxu1 %vm8944_vm3, %v9764_v8  ;;  %15905 = vmatpush3.bf16.msra.mxu1 %v15902_v43  ;;  %v12649_v8 = vld [vmem:[%s20009_s5 + $0x178] sm:$0xff] }
 0x534   : > { %9020 = vst.msk [vmem:[#allocation2 + $0x258] sm:$0xff] %vm8944_vm3, %v8875_v4  ;;  %v8733_v13 = vadd.f32 %v19576_v59, %v15262_v53  ;;  %v8166_v26 = vpop.f32.mrb[149].mxu0  ;;  %15907 = vmatprep.subr.bf16.mxu1 %v15906_v40  ;;  %v12648_v4 = vld [vmem:[%s20009_s5 + $0x170] sm:$0xff]  ;;  %v9996_v53 = vld [vmem:[#allocation2 + $0x220] sm:$0xff] }
 0x535   : > { %9019 = vst.msk [vmem:[#allocation2 + $0x250] sm:$0xff] %vm8944_vm3, %v8874_v5  ;;  %v8732_v51 = vadd.f32 %v19576_v59, %v8166_v26 }
 0x536   : > { %v8877_v23 = vmax.f32 %v8733_v13, 0.0  ;;  %15508 = vmatmul.mubr.msk.f32.gmra.mrb[110].mxu1 %vm8944_vm3, %v9765_v28  ;;  %v15922_v28 = vpack.c.bf16 %v12649_v8, %v12648_v4 }
 0x537   : > { %v8876_v18 = vmax.f32 %v8732_v51, 0.0  ;;  %v15265_v39 = vpop.f32.mrb[150].mxu0  ;;  %15510 = vmatprep.mubr.msk.f32.mxu1 %vm8944_vm3, %v9766_v48  ;;  %15909 = vmatpush3.bf16.msra.mxu1 %v15906_v40  ;;  %v9997_v48 = vld [vmem:[#allocation2 + $0x228] sm:$0xff] }
 0x538   : > { %9022 = vst.msk [vmem:[#allocation2 + $0x268] sm:$0xff] %vm8944_vm3, %v8877_v23  ;;  %v8735_v24 = vadd.f32 %v19576_v59, %v15265_v39  ;;  %v8176_v34 = vpop.f32.mrb[151].mxu0  ;;  %15911 = vmatprep.subr.bf16.mxu1 %v19638_v31  ;;  %v12667_v39 = vld [vmem:[%s20009_s5 + $0x188] sm:$0xff] }
 0x539   : > { %9021 = vst.msk [vmem:[#allocation2 + $0x260] sm:$0xff] %vm8944_vm3, %v8876_v18  ;;  %v8734_v46 = vadd.f32 %v19576_v59, %v8176_v34  ;;  %v12666_v18 = vld [vmem:[%s20009_s5 + $0x180] sm:$0xff]  ;;  %v9998_v34 = vld [vmem:[#allocation2 + $0x230] sm:$0xff] }
 0x53a   : > { %v8879_v2 = vmax.f32 %v8735_v24, 0.0  ;;  %15511 = vmatmul.mubr.msk.f32.gmra.mrb[112].mxu1 %vm8944_vm3, %v9767_v20 }
 0x53b   : > { %v8878_v44 = vmax.f32 %v8734_v46, 0.0  ;;  %v15268_v7 = vpop.f32.mrb[152].mxu0  ;;  %15513 = vmatprep.mubr.msk.f32.mxu1 %vm8944_vm3, %v9768_v33 }
 0x53c   : > { %9024 = vst.msk [vmem:[#allocation2 + $0x278] sm:$0xff] %vm8944_vm3, %v8879_v2  ;;  %v8737_v50 = vadd.f32 %v19576_v59, %v15268_v7  ;;  %v8186_v54 = vpop.f32.mrb[153].mxu0 }
 0x53d   : > { %9023 = vst.msk [vmem:[#allocation2 + $0x270] sm:$0xff] %vm8944_vm3, %v8878_v44  ;;  %v8736_v3 = vadd.f32 %v19576_v59, %v8186_v54  ;;  %v19714_v44 = vpack.c.bf16 %v12667_v39, %v12666_v18 }
 0x53e   : > { %v8881_v12 = vmax.f32 %v8737_v50, 0.0  ;;  %15514 = vmatmul.mubr.msk.f32.gmra.mrb[114].mxu1 %vm8944_vm3, %v9769_v21  ;;  %v9999_v50 = vld [vmem:[#allocation2 + $0x238] sm:$0xff] }
 0x53f   : > { %v8880_v11 = vmax.f32 %v8736_v3, 0.0  ;;  %v15271_v62 = vpop.f32.mrb[154].mxu0  ;;  %15516 = vmatprep.mubr.msk.f32.mxu1 %vm8944_vm3, %v9770_v14  ;;  %v10000_v3 = vld [vmem:[#allocation2 + $0x240] sm:$0xff] }
 0x540   : > { %9026 = vst.msk [vmem:[#allocation2 + $0x288] sm:$0xff] %vm8944_vm3, %v8881_v12  ;;  %v8739_v32 = vadd.f32 %v19576_v59, %v15271_v62  ;;  %v8196_v25 = vpop.f32.mrb[155].mxu0 }
 0x541   : > { %9025 = vst.msk [vmem:[#allocation2 + $0x280] sm:$0xff] %vm8944_vm3, %v8880_v11  ;;  %v8738_v58 = vadd.f32 %v19576_v59, %v8196_v25 }
 0x542   : > { %v8883_v29 = vmax.f32 %v8739_v32, 0.0  ;;  %15517 = vmatmul.mubr.msk.f32.gmra.mrb[116].mxu1 %vm8944_vm3, %v9771_v61  ;;  %v10001_v32 = vld [vmem:[#allocation2 + $0x248] sm:$0xff] }
 0x543   : > { %v8882_v1 = vmax.f32 %v8738_v58, 0.0  ;;  %v15274_v22 = vpop.f32.mrb[156].mxu0  ;;  %15519 = vmatprep.mubr.msk.f32.mxu1 %vm8944_vm3, %v9772_v15  ;;  %v10002_v58 = vld [vmem:[#allocation2 + $0x250] sm:$0xff]  ;;  %v10007_v63 = vld [vmem:[#allocation2 + $0x278] sm:$0x1] }
 0x544   : > { %9028 = vst.msk [vmem:[#allocation2 + $0x298] sm:$0xff] %vm8944_vm3, %v8883_v29  ;;  %v8741_v47 = vadd.f32 %v19576_v59, %v15274_v22  ;;  %v8206_v17 = vpop.f32.mrb[157].mxu0 }
 0x545   : > { %9027 = vst.msk [vmem:[#allocation2 + $0x290] sm:$0xff] %vm8944_vm3, %v8882_v1  ;;  %v8740_v27 = vadd.f32 %v19576_v59, %v8206_v17 }
 0x546   : > { %v8885_v56 = vmax.f32 %v8741_v47, 0.0  ;;  %15520 = vmatmul.mubr.msk.f32.gmra.mrb[118].mxu1 %vm8944_vm3, %v9773_v57  ;;  %v10003_v47 = vld [vmem:[#allocation2 + $0x258] sm:$0xff] }
 0x547   : > { %v8884_v9 = vmax.f32 %v8740_v27, 0.0  ;;  %v15277_v42 = vpop.f32.mrb[158].mxu0  ;;  %15538 = vmatprep.mubr.msk.f32.mxu1 %vm8944_vm3, %v9992_v16  ;;  %v10004_v27 = vld [vmem:[#allocation2 + $0x260] sm:$0xff]  ;;  %v10227_v8 = vld [vmem:[#allocation2 + $0x288] sm:$0xff] }
 0x548   : > { %9030 = vst.msk [vmem:[#allocation2 + $0x2a8] sm:$0xff] %vm8944_vm3, %v8885_v56  ;;  %v8743_v43 = vadd.f32 %v19576_v59, %v15277_v42  ;;  %v8216_v55 = vpop.f32.mrb[159].mxu0 }
 0x549   : > { %9029 = vst.msk [vmem:[#allocation2 + $0x2a0] sm:$0xff] %vm8944_vm3, %v8884_v9  ;;  %v8742_v19 = vadd.f32 %v19576_v59, %v8216_v55  ;;  %v10005_v9 = vld [vmem:[#allocation2 + $0x268] sm:$0xff] }
 0x54a   : > { %v8887_v35 = vmax.f32 %v8743_v43, 0.0  ;;  %15539 = vmatmul.mubr.msk.f32.vlgmr.msra.gmra.mrb[104].mxu1 %vm8944_vm3, %v9993_v10  ;;  %v10006_v43 = vld [vmem:[#allocation2 + $0x270] sm:$0xff] }
 0x54b   : > { %v8886_v30 = vmax.f32 %v8742_v19, 0.0  ;;  %v15280_v41 = vpop.f32.mrb[160].mxu0  ;;  %15541 = vmatprep.mubr.msk.f32.mxu1 %vm8944_vm3, %v9994_v38  ;;  %15913 = vmatpush3.bf16.msra.mxu1 %v19638_v31  ;;  %v12669_v38 = vld [vmem:[%s20009_s5 + $0x198] sm:$0xff] }
 0x54c   : > { %9032 = vst.msk [vmem:[#allocation2 + $0x2b8] sm:$0xff] %vm8944_vm3, %v8887_v35  ;;  %v8745_v40 = vadd.f32 %v19576_v59, %v15280_v41  ;;  %v8226_v52 = vpop.f32.mrb[161].mxu0  ;;  %15915 = vmatprep.subr.bf16.mxu1 %v15914_v45  ;;  %v12668_v35 = vld [vmem:[%s20009_s5 + $0x190] sm:$0xff]  ;;  %v10226_v41 = vld [vmem:[#allocation2 + $0x280] sm:$0xff]  ;;  %v10229_v39 = vld [vmem:[#allocation2 + $0x298] sm:$0xff] }
 0x54d   : > { %9031 = vst.msk [vmem:[#allocation2 + $0x2b0] sm:$0xff] %vm8944_vm3, %v8886_v30  ;;  %v8744_v37 = vadd.f32 %v19576_v59, %v8226_v52 }
 0x54e   : > { %v8889_v5 = vmax.f32 %v8745_v40, 0.0  ;;  %15542 = vmatmul.mubr.msk.f32.gmra.mrb[106].mxu1 %vm8944_vm3, %v9995_v36  ;;  %v15930_v36 = vpack.c.bf16 %v12669_v38, %v12668_v35 }
 0x54f   : > { %v8888_v13 = vmax.f32 %v8744_v37, 0.0  ;;  %v15283_v26 = vpop.f32.mrb[162].mxu0  ;;  %15544 = vmatprep.mubr.msk.f32.mxu1 %vm8944_vm3, %v9996_v53  ;;  %15917 = vmatpush3.bf16.msra.mxu1 %v15914_v45  ;;  %v12671_v53 = vld [vmem:[%s20009_s5 + $0x1a8] sm:$0xff] }
 0x550   : > { %9034 = vst.msk [vmem:[#allocation2 + $0x2c8] sm:$0xff] %vm8944_vm3, %v8889_v5  ;;  %v8747_v31 = vadd.f32 %v19576_v59, %v15283_v26  ;;  %v8236_v51 = vpop.f32.mrb[163].mxu0  ;;  %15919 = vmatprep.subr.bf16.mxu1 %v15918_v60  ;;  %v12670_v5 = vld [vmem:[%s20009_s5 + $0x1a0] sm:$0xff]  ;;  %v10228_v26 = vld [vmem:[#allocation2 + $0x290] sm:$0xff] }
 0x551   : > { %9033 = vst.msk [vmem:[#allocation2 + $0x2c0] sm:$0xff] %vm8944_vm3, %v8888_v13  ;;  %v8746_v23 = vadd.f32 %v19576_v59, %v8236_v51 }
 0x552   : > { %v8891_v24 = vmax.f32 %v8747_v31, 0.0  ;;  %15545 = vmatmul.mubr.msk.f32.gmra.mrb[108].mxu1 %vm8944_vm3, %v9997_v48  ;;  %v15934_v48 = vpack.c.bf16 %v12671_v53, %v12670_v5 }
 0x553   : > { %v8890_v46 = vmax.f32 %v8746_v23, 0.0  ;;  %v15286_v20 = vpop.f32.mrb[164].mxu0  ;;  %15547 = vmatprep.mubr.msk.f32.mxu1 %vm8944_vm3, %v9998_v34  ;;  %15921 = vmatpush3.bf16.msra.mxu1 %v15918_v60  ;;  %v12673_v34 = vld [vmem:[%s20009_s5 + $0x1b8] sm:$0xff] }
 0x554   : > { %9036 = vst.msk [vmem:[#allocation2 + $0x2d8] sm:$0xff] %vm8944_vm3, %v8891_v24  ;;  %v8749_v2 = vadd.f32 %v19576_v59, %v15286_v20  ;;  %v8246_v33 = vpop.f32.mrb[165].mxu0  ;;  %15923 = vmatprep.subr.bf16.mxu1 %v15922_v28  ;;  %v12672_v24 = vld [vmem:[%s20009_s5 + $0x1b0] sm:$0xff]  ;;  %v10230_v20 = vld [vmem:[#allocation2 + $0x2a0] sm:$0xff] }
 0x555   : > { %9035 = vst.msk [vmem:[#allocation2 + $0x2d0] sm:$0xff] %vm8944_vm3, %v8890_v46  ;;  %v8748_v7 = vadd.f32 %v19576_v59, %v8246_v33 }
 0x556   : > { %v8893_v54 = vmax.f32 %v8749_v2, 0.0  ;;  %15548 = vmatmul.mubr.msk.f32.gmra.mrb[110].mxu1 %vm8944_vm3, %v9999_v50  ;;  %v15938_v50 = vpack.c.bf16 %v12673_v34, %v12672_v24 }
 0x557   : > { %v8892_v21 = vmax.f32 %v8748_v7, 0.0  ;;  %v15289_v12 = vpop.f32.mrb[166].mxu0  ;;  %15550 = vmatprep.mubr.msk.f32.mxu1 %vm8944_vm3, %v10000_v3  ;;  %15925 = vmatpush3.bf16.msra.mxu1 %v15922_v28  ;;  %v10231_v3 = vld [vmem:[#allocation2 + $0x2a8] sm:$0xff] }
 0x558   : > { %9038 = vst.msk [vmem:[#allocation2 + $0x2e8] sm:$0xff] %vm8944_vm3, %v8893_v54  ;;  %v8751_v14 = vadd.f32 %v19576_v59, %v15289_v12  ;;  %v8256_v11 = vpop.f32.mrb[167].mxu0  ;;  %15927 = vmatprep.subr.bf16.mxu1 %v19714_v44  ;;  %v12691_v12 = vld [vmem:[%s20009_s5 + $0x1c8] sm:$0xff] }
 0x559   : > { %9037 = vst.msk [vmem:[#allocation2 + $0x2e0] sm:$0xff] %vm8944_vm3, %v8892_v21  ;;  %v8750_v62 = vadd.f32 %v19576_v59, %v8256_v11  ;;  %v12690_v21 = vld [vmem:[%s20009_s5 + $0x1c0] sm:$0xff]  ;;  %v10232_v11 = vld [vmem:[#allocation2 + $0x2b0] sm:$0xff] }
 0x55a   : > { %v8895_v25 = vmax.f32 %v8751_v14, 0.0  ;;  %15551 = vmatmul.mubr.msk.f32.gmra.mrb[112].mxu1 %vm8944_vm3, %v10001_v32 }
 0x55b   : > { %v8894_v61 = vmax.f32 %v8750_v62, 0.0  ;;  %v15292_v29 = vpop.f32.mrb[168].mxu0  ;;  %15553 = vmatprep.mubr.msk.f32.mxu1 %vm8944_vm3, %v10002_v58 }
 0x55c   : > { %9040 = vst.msk [vmem:[#allocation2 + $0x2f8] sm:$0xff] %vm8944_vm3, %v8895_v25  ;;  %v8753_v15 = vadd.f32 %v19576_v59, %v15292_v29  ;;  %v8266_v1 = vpop.f32.mrb[169].mxu0 }
 0x55d   : > { %9039 = vst.msk [vmem:[#allocation2 + $0x2f0] sm:$0xff] %vm8944_vm3, %v8894_v61  ;;  %v8752_v22 = vadd.f32 %v19576_v59, %v8266_v1  ;;  %v19790_v61 = vpack.c.bf16 %v12691_v12, %v12690_v21 }
 0x55e   : > { %v8897_v17 = vmax.f32 %v8753_v15, 0.0  ;;  %15554 = vmatmul.mubr.msk.f32.gmra.mrb[114].mxu1 %vm8944_vm3, %v10003_v47  ;;  %v10233_v15 = vld [vmem:[#allocation2 + $0x2b8] sm:$0xff] }
 0x55f   : > { %v8896_v57 = vmax.f32 %v8752_v22, 0.0  ;;  %v15295_v0 = vpop.f32.mrb[170].mxu0  ;;  %15556 = vmatprep.mubr.msk.f32.mxu1 %vm8944_vm3, %v10004_v27  ;;  %v10234_v22 = vld [vmem:[#allocation2 + $0x2c0] sm:$0xff] }
 0x560   : > { %9042 = vst.msk [vmem:[#allocation2 + $0x308] sm:$0xff] %vm8944_vm3, %v8897_v17  ;;  %v8755_v49 = vadd.f32 %v19576_v59, %v15295_v0  ;;  %v8276_v56 = vpop.f32.mrb[171].mxu0 }
 0x561   : > { %9041 = vst.msk [vmem:[#allocation2 + $0x300] sm:$0xff] %vm8944_vm3, %v8896_v57  ;;  %v8754_v16 = vadd.f32 %v19576_v59, %v8276_v56 }
 0x562   : > { %v8899_v42 = vmax.f32 %v8755_v49, 0.0  ;;  %15557 = vmatmul.mubr.msk.f32.gmra.mrb[116].mxu1 %vm8944_vm3, %v10005_v9  ;;  %v10235_v49 = vld [vmem:[#allocation2 + $0x2c8] sm:$0xff] }
 0x563   : > { %v8898_v55 = vmax.f32 %v8754_v16, 0.0  ;;  %v15298_v45 = vpop.f32.mrb[172].mxu0  ;;  %15559 = vmatprep.mubr.msk.f32.mxu1 %vm8944_vm3, %v10006_v43  ;;  %v10236_v16 = vld [vmem:[#allocation2 + $0x2d0] sm:$0xff]  ;;  %v10241_v53 = vld [vmem:[#allocation2 + $0x2f8] sm:$0x1] }
 0x564   : > { %9044 = vst.msk [vmem:[#allocation2 + $0x318] sm:$0xff] %vm8944_vm3, %v8899_v42  ;;  %v8757_v19 = vadd.f32 %v19576_v59, %v15298_v45  ;;  %v8286_v10 = vpop.f32.mrb[173].mxu0 }
 0x565   : > { %9043 = vst.msk [vmem:[#allocation2 + $0x310] sm:$0xff] %vm8944_vm3, %v8898_v55  ;;  %v8756_v6 = vadd.f32 %v19576_v59, %v8286_v10 }
 0x566   : > { %v8901_v30 = vmax.f32 %v8757_v19, 0.0  ;;  %15560 = vmatmul.mubr.msk.f32.gmra.mrb[118].mxu1 %vm8944_vm3, %v10007_v63  ;;  %v10237_v19 = vld [vmem:[#allocation2 + $0x2d8] sm:$0xff] }
 0x567   : > { %v8900_v40 = vmax.f32 %v8756_v6, 0.0  ;;  %v15301_v52 = vpop.f32.mrb[174].mxu0  ;;  %15578 = vmatprep.mubr.msk.f32.mxu1 %vm8944_vm3, %v10226_v41  ;;  %v10238_v6 = vld [vmem:[#allocation2 + $0x2e0] sm:$0xff]  ;;  %v10461_v34 = vld [vmem:[#allocation2 + $0x308] sm:$0xff] }
 0x568   : > { %9046 = vst.msk [vmem:[#allocation2 + $0x328] sm:$0xff] %vm8944_vm3, %v8901_v30  ;;  %v8759_v60 = vadd.f32 %v19576_v59, %v15301_v52  ;;  %v8296_v37 = vpop.f32.mrb[175].mxu0 }
 0x569   : > { %9045 = vst.msk [vmem:[#allocation2 + $0x320] sm:$0xff] %vm8944_vm3, %v8900_v40  ;;  %v8758_v4 = vadd.f32 %v19576_v59, %v8296_v37  ;;  %v10239_v40 = vld [vmem:[#allocation2 + $0x2e8] sm:$0xff] }
 0x56a   : > { %v8903_v13 = vmax.f32 %v8759_v60, 0.0  ;;  %15579 = vmatmul.mubr.msk.f32.vlgmr.msra.gmra.mrb[104].mxu1 %vm8944_vm3, %v10227_v8  ;;  %v10240_v60 = vld [vmem:[#allocation2 + $0x2f0] sm:$0xff] }
 0x56b   : > { %v8902_v31 = vmax.f32 %v8758_v4, 0.0  ;;  %v15304_v51 = vpop.f32.mrb[176].mxu0  ;;  %15581 = vmatprep.mubr.msk.f32.mxu1 %vm8944_vm3, %v10228_v26  ;;  %15929 = vmatpush3.bf16.msra.mxu1 %v19714_v44  ;;  %v12693_v26 = vld [vmem:[%s20009_s5 + $0x1d8] sm:$0xff] }
 0x56c   : > { %9048 = vst.msk [vmem:[#allocation2 + $0x338] sm:$0xff] %vm8944_vm3, %v8903_v13  ;;  %v8761_v28 = vadd.f32 %v19576_v59, %v15304_v51  ;;  %v8306_v23 = vpop.f32.mrb[177].mxu0  ;;  %15931 = vmatprep.subr.bf16.mxu1 %v15930_v36  ;;  %v12692_v13 = vld [vmem:[%s20009_s5 + $0x1d0] sm:$0xff]  ;;  %v10460_v51 = vld [vmem:[#allocation2 + $0x300] sm:$0xff]  ;;  %v10463_v12 = vld [vmem:[#allocation2 + $0x318] sm:$0xff] }
 0x56d   : > { %9047 = vst.msk [vmem:[#allocation2 + $0x330] sm:$0xff] %vm8944_vm3, %v8902_v31  ;;  %v8760_v18 = vadd.f32 %v19576_v59, %v8306_v23 }
 0x56e   : > { %v8905_v46 = vmax.f32 %v8761_v28, 0.0  ;;  %15582 = vmatmul.mubr.msk.f32.gmra.mrb[106].mxu1 %vm8944_vm3, %v10229_v39  ;;  %v15946_v39 = vpack.c.bf16 %v12693_v26, %v12692_v13 }
 0x56f   : > { %v8904_v2 = vmax.f32 %v8760_v18, 0.0  ;;  %v15307_v33 = vpop.f32.mrb[178].mxu0  ;;  %15584 = vmatprep.mubr.msk.f32.mxu1 %vm8944_vm3, %v10230_v20  ;;  %15933 = vmatpush3.bf16.msra.mxu1 %v15930_v36  ;;  %v12695_v20 = vld [vmem:[%s20009_s5 + $0x1e8] sm:$0xff] }
 0x570   : > { %9050 = vst.msk [vmem:[#allocation2 + $0x348] sm:$0xff] %vm8944_vm3, %v8905_v46  ;;  %v8763_v44 = vadd.f32 %v19576_v59, %v15307_v33  ;;  %v8316_v7 = vpop.f32.mrb[179].mxu0  ;;  %15935 = vmatprep.subr.bf16.mxu1 %v15934_v48  ;;  %v12694_v46 = vld [vmem:[%s20009_s5 + $0x1e0] sm:$0xff]  ;;  %v10462_v33 = vld [vmem:[#allocation2 + $0x310] sm:$0xff] }
 0x571   : > { %9049 = vst.msk [vmem:[#allocation2 + $0x340] sm:$0xff] %vm8944_vm3, %v8904_v2  ;;  %v8762_v54 = vadd.f32 %v19576_v59, %v8316_v7 }
 0x572   : > { %v8907_v14 = vmax.f32 %v8763_v44, 0.0  ;;  %15585 = vmatmul.mubr.msk.f32.gmra.mrb[108].mxu1 %vm8944_vm3, %v10231_v3  ;;  %v15950_v3 = vpack.c.bf16 %v12695_v20, %v12694_v46 }
 0x573   : > { %v8906_v62 = vmax.f32 %v8762_v54, 0.0  ;;  %v15310_v32 = vpop.f32.mrb[180].mxu0  ;;  %15587 = vmatprep.mubr.msk.f32.mxu1 %vm8944_vm3, %v10232_v11  ;;  %15937 = vmatpush3.bf16.msra.mxu1 %v15934_v48  ;;  %v12697_v11 = vld [vmem:[%s20009_s5 + $0x1f8] sm:$0xff] }
 0x574   : > { %9052 = vst.msk [vmem:[#allocation2 + $0x358] sm:$0xff] %vm8944_vm3, %v8907_v14  ;;  %v8765_v25 = vadd.f32 %v19576_v59, %v15310_v32  ;;  %v8326_v58 = vpop.f32.mrb[181].mxu0  ;;  %15939 = vmatprep.subr.bf16.mxu1 %v15938_v50  ;;  %v12696_v14 = vld [vmem:[%s20009_s5 + $0x1f0] sm:$0xff]  ;;  %v10464_v32 = vld [vmem:[#allocation2 + $0x320] sm:$0xff] }
 0x575   : > { %9051 = vst.msk [vmem:[#allocation2 + $0x350] sm:$0xff] %vm8944_vm3, %v8906_v62  ;;  %v8764_v29 = vadd.f32 %v19576_v59, %v8326_v58 }
 0x576   : > { %v8909_v1 = vmax.f32 %v8765_v25, 0.0  ;;  %15588 = vmatmul.mubr.msk.f32.gmra.mrb[110].mxu1 %vm8944_vm3, %v10233_v15  ;;  %v15954_v15 = vpack.c.bf16 %v12697_v11, %v12696_v14 }
 0x577   : > { %v8908_v47 = vmax.f32 %v8764_v29, 0.0  ;;  %v15313_v17 = vpop.f32.mrb[182].mxu0  ;;  %15590 = vmatprep.mubr.msk.f32.mxu1 %vm8944_vm3, %v10234_v22  ;;  %15941 = vmatpush3.bf16.msra.mxu1 %v15938_v50  ;;  %v10465_v22 = vld [vmem:[#allocation2 + $0x328] sm:$0xff] }
 0x578   : > { %9054 = vst.msk [vmem:[#allocation2 + $0x368] sm:$0xff] %vm8944_vm3, %v8909_v1  ;;  %v8767_v27 = vadd.f32 %v19576_v59, %v15313_v17  ;;  %v8336_v57 = vpop.f32.mrb[183].mxu0  ;;  %15943 = vmatprep.subr.bf16.mxu1 %v19790_v61  ;;  %v12715_v17 = vld [vmem:[%s20009_s5 + $0x208] sm:$0xff] }
 0x579   : > { %9053 = vst.msk [vmem:[#allocation2 + $0x360] sm:$0xff] %vm8944_vm3, %v8908_v47  ;;  %v8766_v0 = vadd.f32 %v19576_v59, %v8336_v57  ;;  %v12714_v47 = vld [vmem:[%s20009_s5 + $0x200] sm:$0xff]  ;;  %v10466_v57 = vld [vmem:[#allocation2 + $0x330] sm:$0xff] }
 0x57a   : > { %v8911_v56 = vmax.f32 %v8767_v27, 0.0  ;;  %15591 = vmatmul.mubr.msk.f32.gmra.mrb[112].mxu1 %vm8944_vm3, %v10235_v49 }
 0x57b   : > { %v8910_v9 = vmax.f32 %v8766_v0, 0.0  ;;  %v15316_v42 = vpop.f32.mrb[184].mxu0  ;;  %15593 = vmatprep.mubr.msk.f32.mxu1 %vm8944_vm3, %v10236_v16 }
 0x57c   : > { %9056 = vst.msk [vmem:[#allocation2 + $0x378] sm:$0xff] %vm8944_vm3, %v8911_v56  ;;  %v8769_v43 = vadd.f32 %v19576_v59, %v15316_v42  ;;  %v8346_v55 = vpop.f32.mrb[185].mxu0 }
 0x57d   : > { %9055 = vst.msk [vmem:[#allocation2 + $0x370] sm:$0xff] %vm8944_vm3, %v8910_v9  ;;  %v8768_v45 = vadd.f32 %v19576_v59, %v8346_v55  ;;  %v19866_v9 = vpack.c.bf16 %v12715_v17, %v12714_v47 }
 0x57e   : > { %v8913_v10 = vmax.f32 %v8769_v43, 0.0  ;;  %15594 = vmatmul.mubr.msk.f32.gmra.mrb[114].mxu1 %vm8944_vm3, %v10237_v19  ;;  %v10467_v43 = vld [vmem:[#allocation2 + $0x338] sm:$0xff] }
 0x57f   : > { %v8912_v63 = vmax.f32 %v8768_v45, 0.0  ;;  %v15319_v35 = vpop.f32.mrb[186].mxu0  ;;  %15596 = vmatprep.mubr.msk.f32.mxu1 %vm8944_vm3, %v10238_v6  ;;  %v10468_v45 = vld [vmem:[#allocation2 + $0x340] sm:$0xff] }
 0x580   : > { %9058 = vst.msk [vmem:[#allocation2 + $0x388] sm:$0xff] %vm8944_vm3, %v8913_v10  ;;  %v8771_v38 = vadd.f32 %v19576_v59, %v15319_v35  ;;  %v8356_v30 = vpop.f32.mrb[187].mxu0 }
 0x581   : > { %9057 = vst.msk [vmem:[#allocation2 + $0x380] sm:$0xff] %vm8944_vm3, %v8912_v63  ;;  %v8770_v41 = vadd.f32 %v19576_v59, %v8356_v30 }
 0x582   : > { %v8915_v52 = vmax.f32 %v8771_v38, 0.0  ;;  %15597 = vmatmul.mubr.msk.f32.gmra.mrb[116].mxu1 %vm8944_vm3, %v10239_v40  ;;  %v10469_v38 = vld [vmem:[#allocation2 + $0x348] sm:$0xff] }
 0x583   : > { %v8914_v37 = vmax.f32 %v8770_v41, 0.0  ;;  %v15322_v36 = vpop.f32.mrb[188].mxu0  ;;  %15599 = vmatprep.mubr.msk.f32.mxu1 %vm8944_vm3, %v10240_v60  ;;  %v10470_v41 = vld [vmem:[#allocation2 + $0x350] sm:$0xff]  ;;  %v10475_v20 = vld [vmem:[#allocation2 + $0x378] sm:$0x1] }
 0x584   : > { %9060 = vst.msk [vmem:[#allocation2 + $0x398] sm:$0xff] %vm8944_vm3, %v8915_v52  ;;  %v8773_v4 = vadd.f32 %v19576_v59, %v15322_v36  ;;  %v8366_v8 = vpop.f32.mrb[189].mxu0 }
 0x585   : > { %9059 = vst.msk [vmem:[#allocation2 + $0x390] sm:$0xff] %vm8944_vm3, %v8914_v37  ;;  %v8772_v5 = vadd.f32 %v19576_v59, %v8366_v8 }
 0x586   : > { %v8917_v31 = vmax.f32 %v8773_v4, 0.0  ;;  %15600 = vmatmul.mubr.msk.f32.gmra.mrb[118].mxu1 %vm8944_vm3, %v10241_v53  ;;  %v10471_v4 = vld [vmem:[#allocation2 + $0x358] sm:$0xff] }
 0x587   : > { %v8916_v28 = vmax.f32 %v8772_v5, 0.0  ;;  %v15325_v23 = vpop.f32.mrb[190].mxu0  ;;  %15618 = vmatprep.mubr.msk.f32.mxu1 %vm8944_vm3, %v10460_v51  ;;  %v10472_v5 = vld [vmem:[#allocation2 + $0x360] sm:$0xff]  ;;  %v10695_v11 = vld [vmem:[#allocation2 + $0x388] sm:$0xff] }
 0x588   : > { %9062 = vst.msk [vmem:[#allocation2 + $0x3a8] sm:$0xff] %vm8944_vm3, %v8917_v31  ;;  %v8775_v48 = vadd.f32 %v19576_v59, %v15325_v23  ;;  %v8376_v18 = vpop.f32.mrb[191].mxu0 }
 0x589   : > { %9061 = vst.msk [vmem:[#allocation2 + $0x3a0] sm:$0xff] %vm8944_vm3, %v8916_v28  ;;  %v8774_v24 = vadd.f32 %v19576_v59, %v8376_v18  ;;  %v10473_v28 = vld [vmem:[#allocation2 + $0x368] sm:$0xff] }
 0x58a   : > { %v8919_v2 = vmax.f32 %v8775_v48, 0.0  ;;  %15619 = vmatmul.mubr.msk.f32.vlgmr.msra.gmra.mrb[104].mxu1 %vm8944_vm3, %v10461_v34  ;;  %v10474_v48 = vld [vmem:[#allocation2 + $0x370] sm:$0xff] }
 0x58b   : > { %v8918_v44 = vmax.f32 %v8774_v24, 0.0  ;;  %v15328_v7 = vpop.f32.mrb[192].mxu0  ;;  %15621 = vmatprep.mubr.msk.f32.mxu1 %vm8944_vm3, %v10462_v33  ;;  %15945 = vmatpush3.bf16.msra.mxu1 %v19790_v61  ;;  %v12717_v33 = vld [vmem:[%s20009_s5 + $0x218] sm:$0xff] }
 0x58c   : > { %9064 = vst.msk [vmem:[#allocation2 + $0x3b8] sm:$0xff] %vm8944_vm3, %v8919_v2  ;;  %v8777_v50 = vadd.f32 %v19576_v59, %v15328_v7  ;;  %v8386_v54 = vpop.f32.mrb[193].mxu0  ;;  %15947 = vmatprep.subr.bf16.mxu1 %v15946_v39  ;;  %v12716_v2 = vld [vmem:[%s20009_s5 + $0x210] sm:$0xff]  ;;  %v10694_v7 = vld [vmem:[#allocation2 + $0x380] sm:$0xff]  ;;  %v10697_v17 = vld [vmem:[#allocation2 + $0x398] sm:$0xff] }
 0x58d   : > { %9063 = vst.msk [vmem:[#allocation2 + $0x3b0] sm:$0xff] %vm8944_vm3, %v8918_v44  ;;  %v8776_v21 = vadd.f32 %v19576_v59, %v8386_v54 }
 0x58e   : > { %v8921_v62 = vmax.f32 %v8777_v50, 0.0  ;;  %15622 = vmatmul.mubr.msk.f32.gmra.mrb[106].mxu1 %vm8944_vm3, %v10463_v12  ;;  %v15962_v12 = vpack.c.bf16 %v12717_v33, %v12716_v2 }
 0x58f   : > { %v8920_v25 = vmax.f32 %v8776_v21, 0.0  ;;  %v15331_v58 = vpop.f32.mrb[194].mxu0  ;;  %15624 = vmatprep.mubr.msk.f32.mxu1 %vm8944_vm3, %v10464_v32  ;;  %15949 = vmatpush3.bf16.msra.mxu1 %v15946_v39  ;;  %v12719_v32 = vld [vmem:[%s20009_s5 + $0x228] sm:$0xff] }
 0x590   : > { %9066 = vst.msk [vmem:[#allocation2 + $0x3c8] sm:$0xff] %vm8944_vm3, %v8921_v62  ;;  %v8779_v61 = vadd.f32 %v19576_v59, %v15331_v58  ;;  %v8396_v29 = vpop.f32.mrb[195].mxu0  ;;  %15951 = vmatprep.subr.bf16.mxu1 %v15950_v3  ;;  %v12718_v62 = vld [vmem:[%s20009_s5 + $0x220] sm:$0xff]  ;;  %v10696_v58 = vld [vmem:[#allocation2 + $0x390] sm:$0xff] }
 0x591   : > { %9065 = vst.msk [vmem:[#allocation2 + $0x3c0] sm:$0xff] %vm8944_vm3, %v8920_v25  ;;  %v8778_v1 = vadd.f32 %v19576_v59, %v8396_v29 }
 0x592   : > { %v8923_v27 = vmax.f32 %v8779_v61, 0.0  ;;  %15625 = vmatmul.mubr.msk.f32.gmra.mrb[108].mxu1 %vm8944_vm3, %v10465_v22  ;;  %v15966_v22 = vpack.c.bf16 %v12719_v32, %v12718_v62 }
 0x593   : > { %v8922_v0 = vmax.f32 %v8778_v1, 0.0  ;;  %v15334_v49 = vpop.f32.mrb[196].mxu0  ;;  %15627 = vmatprep.mubr.msk.f32.mxu1 %vm8944_vm3, %v10466_v57  ;;  %15953 = vmatpush3.bf16.msra.mxu1 %v15950_v3  ;;  %v12721_v57 = vld [vmem:[%s20009_s5 + $0x238] sm:$0xff] }
 0x594   : > { %9068 = vst.msk [vmem:[#allocation2 + $0x3d8] sm:$0xff] %vm8944_vm3, %v8923_v27  ;;  %v8781_v56 = vadd.f32 %v19576_v59, %v15334_v49  ;;  %v8406_v16 = vpop.f32.mrb[197].mxu0  ;;  %15955 = vmatprep.subr.bf16.mxu1 %v15954_v15  ;;  %v12720_v27 = vld [vmem:[%s20009_s5 + $0x230] sm:$0xff]  ;;  %v10698_v49 = vld [vmem:[#allocation2 + $0x3a0] sm:$0xff] }
 0x595   : > { %9067 = vst.msk [vmem:[#allocation2 + $0x3d0] sm:$0xff] %vm8944_vm3, %v8922_v0  ;;  %v8780_v42 = vadd.f32 %v19576_v59, %v8406_v16 }
 0x596   : > { %v8925_v55 = vmax.f32 %v8781_v56, 0.0  ;;  %15628 = vmatmul.mubr.msk.f32.gmra.mrb[110].mxu1 %vm8944_vm3, %v10467_v43  ;;  %v15970_v43 = vpack.c.bf16 %v12721_v57, %v12720_v27 }
 0x597   : > { %v8924_v19 = vmax.f32 %v8780_v42, 0.0  ;;  %v15337_v10 = vpop.f32.mrb[198].mxu0  ;;  %15630 = vmatprep.mubr.msk.f32.mxu1 %vm8944_vm3, %v10468_v45  ;;  %15957 = vmatpush3.bf16.msra.mxu1 %v15954_v15  ;;  %v10699_v45 = vld [vmem:[#allocation2 + $0x3a8] sm:$0xff] }
 0x598   : > { %9070 = vst.msk [vmem:[#allocation2 + $0x3e8] sm:$0xff] %vm8944_vm3, %v8925_v55  ;;  %v8783_v6 = vadd.f32 %v19576_v59, %v15337_v10  ;;  %v8416_v63 = vpop.f32.mrb[199].mxu0  ;;  %15959 = vmatprep.subr.bf16.mxu1 %v19866_v9  ;;  %v10700_v10 = vld [vmem:[#allocation2 + $0x3b0] sm:$0xff] }
 0x599   : > { %9069 = vst.msk [vmem:[#allocation2 + $0x3e0] sm:$0xff] %vm8944_vm3, %v8924_v19  ;;  %v8782_v35 = vadd.f32 %v19576_v59, %v8416_v63 }
 0x59a   : > { %v8927_v30 = vmax.f32 %v8783_v6, 0.0  ;;  %15631 = vmatmul.mubr.msk.f32.gmra.mrb[112].mxu1 %vm8944_vm3, %v10469_v38 }
 0x59b   : > { %v8926_v40 = vmax.f32 %v8782_v35, 0.0  ;;  %v15340_v52 = vpop.f32.mrb[200].mxu0  ;;  %15633 = vmatprep.mubr.msk.f32.mxu1 %vm8944_vm3, %v10470_v41  ;;  %v10701_v41 = vld [vmem:[#allocation2 + $0x3b8] sm:$0xff] }
 0x59c   : > { %9072 = vst.msk [vmem:[#allocation2 + $0x3f8] sm:$0xff] %vm8944_vm3, %v8927_v30  ;;  %v8785_v60 = vadd.f32 %v19576_v59, %v15340_v52  ;;  %v8426_v37 = vpop.f32.mrb[201].mxu0  ;;  %v10702_v52 = vld [vmem:[#allocation2 + $0x3c0] sm:$0xff] }
 0x59d   : > { %9071 = vst.msk [vmem:[#allocation2 + $0x3f0] sm:$0xff] %vm8944_vm3, %v8926_v40  ;;  %v8784_v36 = vadd.f32 %v19576_v59, %v8426_v37 }
 0x59e   : > { %v8929_v8 = vmax.f32 %v8785_v60, 0.0  ;;  %15634 = vmatmul.mubr.msk.f32.gmra.mrb[114].mxu1 %vm8944_vm3, %v10471_v4 }
 0x59f   : > { %v8928_v53 = vmax.f32 %v8784_v36, 0.0  ;;  %v15343_v13 = vpop.f32.mrb[202].mxu0  ;;  %15636 = vmatprep.mubr.msk.f32.mxu1 %vm8944_vm3, %v10472_v5  ;;  %v10703_v5 = vld [vmem:[#allocation2 + $0x3c8] sm:$0xff] }
 0x5a0   : > { %9074 = vst.msk [vmem:[#allocation2 + $0x408] sm:$0xff] %vm8944_vm3, %v8929_v8  ;;  %v8787_v26 = vadd.f32 %v19576_v59, %v15343_v13  ;;  %v8436_v31 = vpop.f32.mrb[203].mxu0  ;;  %v10704_v13 = vld [vmem:[#allocation2 + $0x3d0] sm:$0xff] }
 0x5a1   : > { %9073 = vst.msk [vmem:[#allocation2 + $0x400] sm:$0xff] %vm8944_vm3, %v8928_v53  ;;  %v8786_v51 = vadd.f32 %v19576_v59, %v8436_v31  ;;  %v10705_v31 = vld [vmem:[#allocation2 + $0x3d8] sm:$0xff] }
 0x5a2   : > { %v8931_v23 = vmax.f32 %v8787_v26, 0.0  ;;  %15637 = vmatmul.mubr.msk.f32.gmra.mrb[116].mxu1 %vm8944_vm3, %v10473_v28  ;;  %v10707_v28 = vld [vmem:[#allocation2 + $0x3e8] sm:$0xff] }
 0x5a3   : > { %v8930_v18 = vmax.f32 %v8786_v51, 0.0  ;;  %v15346_v39 = vpop.f32.mrb[204].mxu0  ;;  %15639 = vmatprep.mubr.msk.f32.mxu1 %vm8944_vm3, %v10474_v48  ;;  %v10706_v51 = vld [vmem:[#allocation2 + $0x3e0] sm:$0xff]  ;;  %v10709_v48 = vld [vmem:[#allocation2 + $0x3f8] sm:$0x1] }
 0x5a4   : > { %9076 = vst.msk [vmem:[#allocation2 + $0x418] sm:$0xff] %vm8944_vm3, %v8931_v23  ;;  %v8789_v24 = vadd.f32 %v19576_v59, %v15346_v39  ;;  %v8446_v34 = vpop.f32.mrb[205].mxu0  ;;  %v10708_v23 = vld [vmem:[#allocation2 + $0x3f0] sm:$0xff] }
 0x5a5   : > { %9075 = vst.msk [vmem:[#allocation2 + $0x410] sm:$0xff] %vm8944_vm3, %v8930_v18  ;;  %v8788_v46 = vadd.f32 %v19576_v59, %v8446_v34 }
 0x5a6   : > { %v8933_v44 = vmax.f32 %v8789_v24, 0.0  ;;  %15640 = vmatmul.mubr.msk.f32.gmra.mrb[118].mxu1 %vm8944_vm3, %v10475_v20 }
 0x5a7   : > { %v8932_v50 = vmax.f32 %v8788_v46, 0.0  ;;  %v15349_v54 = vpop.f32.mrb[206].mxu0  ;;  %15658 = vmatprep.mubr.msk.f32.mxu1 %vm8944_vm3, %v10694_v7  ;;  %v10929_v39 = vld [vmem:[#allocation2 + $0x408] sm:$0xff] }
 0x5a8   : > { %9078 = vst.msk [vmem:[#allocation2 + $0x428] sm:$0xff] %vm8944_vm3, %v8933_v44  ;;  %v8791_v3 = vadd.f32 %v19576_v59, %v15349_v54  ;;  %v8456_v21 = vpop.f32.mrb[207].mxu0  ;;  %v10928_v18 = vld [vmem:[#allocation2 + $0x400] sm:$0xff] }
 0x5a9   : > { %9077 = vst.msk [vmem:[#allocation2 + $0x420] sm:$0xff] %vm8944_vm3, %v8932_v50  ;;  %v8790_v14 = vadd.f32 %v19576_v59, %v8456_v21  ;;  %v16412_v59 = vld [vmem:[%s20008_s4] ss:$0 sm:$0xff] }
 0x5aa   : > { %v8935_v25 = vmax.f32 %v8791_v3, 0.0  ;;  %15659 = vmatmul.mubr.msk.f32.vlgmr.msra.gmra.mrb[104].mxu1 %vm8944_vm3, %v10695_v11  ;;  %v19967_v11 = vld [vmem:[%s20010_s6] ss:$0 sm:$0xff] }
 0x5ab   : > { %v8934_v61 = vmax.f32 %v8790_v14, 0.0  ;;  %v15352_v29 = vpop.f32.mrb[208].mxu0  ;;  %15661 = vmatprep.mubr.msk.f32.mxu1 %vm8944_vm3, %v10696_v58  ;;  %15961 = vmatpush3.bf16.msra.mxu1 %v19866_v9  ;;  %v10931_v34 = vld [vmem:[#allocation2 + $0x418] sm:$0xff] }
 0x5ac   : > { %9080 = vst.msk [vmem:[#allocation2 + $0x438] sm:$0xff] %vm8944_vm3, %v8935_v25  ;;  %v8793_v15 = vadd.f32 %v16412_v59, %v15352_v29  ;;  %v8466_v1 = vpop.f32.mrb[209].mxu0  ;;  %15963 = vmatprep.subr.bf16.mxu1 %v15962_v12  ;;  %v10930_v24 = vld [vmem:[#allocation2 + $0x410] sm:$0xff] }
 0x5ad   : > { %9079 = vst.msk [vmem:[#allocation2 + $0x430] sm:$0xff] %vm8944_vm3, %v8934_v61  ;;  %v8792_v47 = vadd.f32 %v16412_v59, %v8466_v1 }
 0x5ae   : > { %v8937_v0 = vmax.f32 %v8793_v15, 0.0  ;;  %15662 = vmatmul.mubr.msk.f32.gmra.mrb[106].mxu1 %vm8944_vm3, %v10697_v17 }
 0x5af   : > { %v8936_v56 = vmax.f32 %v8792_v47, 0.0  ;;  %v15355_v16 = vpop.f32.mrb[210].mxu0  ;;  %15664 = vmatprep.mubr.msk.f32.mxu1 %vm8944_vm3, %v10698_v49  ;;  %15965 = vmatpush3.bf16.msra.mxu1 %v15962_v12  ;;  %v10933_v20 = vld [vmem:[#allocation2 + $0x428] sm:$0xff] }
 0x5b0   : > { %9082 = vst.msk [vmem:[#allocation2 + $0x448] sm:$0xff] %vm8944_vm3, %v8937_v0  ;;  %v8795_v9 = vadd.f32 %v16412_v59, %v15355_v16  ;;  %v8476_v42 = vpop.f32.mrb[211].mxu0  ;;  %15967 = vmatprep.subr.bf16.mxu1 %v15966_v22  ;;  %v10932_v46 = vld [vmem:[#allocation2 + $0x420] sm:$0xff] }
 0x5b1   : > { %9081 = vst.msk [vmem:[#allocation2 + $0x440] sm:$0xff] %vm8944_vm3, %v8936_v56  ;;  %v8794_v55 = vadd.f32 %v16412_v59, %v8476_v42 }
 0x5b2   : > { %v8939_v19 = vmax.f32 %v8795_v9, 0.0  ;;  %15665 = vmatmul.mubr.msk.f32.gmra.mrb[108].mxu1 %vm8944_vm3, %v10699_v45 }
 0x5b3   : > { %v8938_v6 = vmax.f32 %v8794_v55, 0.0  ;;  %v15358_v63 = vpop.f32.mrb[212].mxu0  ;;  %15667 = vmatprep.mubr.msk.f32.mxu1 %vm8944_vm3, %v10700_v10  ;;  %15969 = vmatpush3.bf16.msra.mxu1 %v15966_v22  ;;  %v10935_v33 = vld [vmem:[#allocation2 + $0x438] sm:$0xff] }
 0x5b4   : > { %9084 = vst.msk [vmem:[#allocation2 + $0x458] sm:$0xff] %vm8944_vm3, %v8939_v19  ;;  %v8797_v35 = vadd.f32 %v16412_v59, %v15358_v63  ;;  %v8486_v38 = vpop.f32.mrb[213].mxu0  ;;  %15971 = vmatprep.subr.bf16.mxu1 %v15970_v43  ;;  %v10934_v2 = vld [vmem:[#allocation2 + $0x430] sm:$0xff] }
 0x5b5   : > { %9083 = vst.msk [vmem:[#allocation2 + $0x450] sm:$0xff] %vm8944_vm3, %v8938_v6  ;;  %v8796_v30 = vadd.f32 %v16412_v59, %v8486_v38 }
 0x5b6   : > { %v8941_v40 = vmax.f32 %v8797_v35, 0.0  ;;  %15668 = vmatmul.mubr.msk.f32.gmra.mrb[110].mxu1 %vm8944_vm3, %v10701_v41 }
 0x5b7   : > { %v8940_v60 = vmax.f32 %v8796_v30, 0.0  ;;  %v15361_v37 = vpop.f32.mrb[214].mxu0  ;;  %15670 = vmatprep.mubr.msk.f32.mxu1 %vm8944_vm3, %v10702_v52  ;;  %15973 = vmatpush3.bf16.msra.mxu1 %v15970_v43  ;;  %v10937_v7 = vld [vmem:[#allocation2 + $0x448] sm:$0xff] }
 0x5b8   : > { %9086 = vst.msk [vmem:[#allocation2 + $0x468] sm:$0xff] %vm8944_vm3, %v8941_v40  ;;  %v8799_v36 = vadd.f32 %v16412_v59, %v15361_v37  ;;  %v8496_v4 = vpop.f32.mrb[215].mxu0  ;;  %v10936_v44 = vld [vmem:[#allocation2 + $0x440] sm:$0xff] }
 0x5b9   : > { %9085 = vst.msk [vmem:[#allocation2 + $0x460] sm:$0xff] %vm8944_vm3, %v8940_v60  ;;  %v8798_v8 = vadd.f32 %v16412_v59, %v8496_v4 }
 0x5ba   : > { %v8943_v53 = vmax.f32 %v8799_v36, 0.0  ;;  %15671 = vmatmul.mubr.msk.f32.gmra.mrb[112].mxu1 %vm8944_vm3, %v10703_v5 }
 0x5bb   : > { %v8942_v26 = vmax.f32 %v8798_v8, 0.0  ;;  %15673 = vmatprep.mubr.msk.f32.mxu1 %vm8944_vm3, %v10704_v13  ;;  %v10939_v54 = vld [vmem:[#allocation2 + $0x458] sm:$0xff] }
 0x5bc   : > { %9088 = vst.msk [vmem:[#allocation2 + $0x478] sm:$0xff] %vm8944_vm3, %v8943_v53  ;;  %v10938_v50 = vld [vmem:[#allocation2 + $0x450] sm:$0xff] }
 0x5bd   : > { %9087 = vst.msk [vmem:[#allocation2 + $0x470] sm:$0xff] %vm8944_vm3, %v8942_v26 }
 0x5be   : > { %15674 = vmatmul.mubr.msk.f32.gmra.mrb[114].mxu1 %vm8944_vm3, %v10705_v31 }
 0x5bf   : > { %15676 = vmatprep.mubr.msk.f32.mxu1 %vm8944_vm3, %v10706_v51  ;;  %v10941_v21 = vld [vmem:[#allocation2 + $0x468] sm:$0xff] }
 0x5c0   : > { %v10940_v3 = vld [vmem:[#allocation2 + $0x460] sm:$0xff] }
 0x5c2   : > { %15677 = vmatmul.mubr.msk.f32.gmra.mrb[116].mxu1 %vm8944_vm3, %v10707_v28 }
 0x5c3   : > { %15679 = vmatprep.mubr.msk.f32.mxu1 %vm8944_vm3, %v10708_v23  ;;  %v10943_v14 = vld [vmem:[#allocation2 + $0x478] sm:$0x1] }
 0x5c4   : > { %v10942_v12 = vld [vmem:[#allocation2 + $0x470] sm:$0xff] }
 0x5c6   : > { %15680 = vmatmul.mubr.msk.f32.gmra.mrb[118].mxu1 %vm8944_vm3, %v10709_v48 }
 0x5c7   : > { %15698 = vmatprep.mubr.msk.f32.mxu1 %vm8944_vm3, %v10928_v18 }
 0x5ca   : > { %15699 = vmatmul.mubr.msk.f32.vlgmr.msra.gmra.mrb[104].mxu1 %vm8944_vm3, %v10929_v39 }
 0x5cb   : > { %15701 = vmatprep.mubr.msk.f32.mxu1 %vm8944_vm3, %v10930_v24 }
 0x5ce   : > { %15702 = vmatmul.mubr.msk.f32.gmra.mrb[106].mxu1 %vm8944_vm3, %v10931_v34 }
 0x5cf   : > { %15704 = vmatprep.mubr.msk.f32.mxu1 %vm8944_vm3, %v10932_v46 }
 0x5d2   : > { %15705 = vmatmul.mubr.msk.f32.gmra.mrb[108].mxu1 %vm8944_vm3, %v10933_v20 }
 0x5d3   : > { %15707 = vmatprep.mubr.msk.f32.mxu1 %vm8944_vm3, %v10934_v2 }
 0x5d6   : > { %15708 = vmatmul.mubr.msk.f32.gmra.mrb[110].mxu1 %vm8944_vm3, %v10935_v33  ;;  %v11283_v33 = vld [vmem:[%s19975_s9 + $0x3c] sm:$0x1] }
 0x5d7   : > { %15710 = vmatprep.mubr.msk.f32.mxu1 %vm8944_vm3, %v10936_v44 }
 0x5da   : > { %15711 = vmatmul.mubr.msk.f32.gmra.mrb[112].mxu1 %vm8944_vm3, %v10937_v7 }
 0x5db   : > { %15713 = vmatprep.mubr.msk.f32.mxu1 %vm8944_vm3, %v10938_v50 }
 0x5de   : > { %15714 = vmatmul.mubr.msk.f32.gmra.mrb[114].mxu1 %vm8944_vm3, %v10939_v54 }
 0x5df   : > { %15716 = vmatprep.mubr.msk.f32.mxu1 %vm8944_vm3, %v10940_v3 }
 0x5e2   : > { %15717 = vmatmul.mubr.msk.f32.gmra.mrb[116].mxu1 %vm8944_vm3, %v10941_v21 }
 0x5e3   : > { %15719 = vmatprep.mubr.msk.f32.mxu1 %vm8944_vm3, %v10942_v12 }
 0x5e6   : > { %15720 = vmatmul.mubr.msk.f32.gmra.mrb[118].mxu1 %vm8944_vm3, %v10943_v14 }
 0x69d   : > { %v15700_v62 = vpop.f32.mrb[104].mxu1 }
 0x69e   : > { %v11170_v32 = vadd.f32 %v15700_v62, %v19967_v11  ;;  %v11067_v25 = vpop.f32.mrb[105].mxu1 }
 0x69f   : > { %v11169_v58 = vadd.f32 %v19967_v11, %v11067_v25 }
 0x6a0   : > { %v11186_v61 = vmax.f32 %v11170_v32, 0.0 }
 0x6a1   : > { %v11185_v29 = vmax.f32 %v11169_v58, 0.0  ;;  %v15703_v59 = vpop.f32.mrb[106].mxu1 }
 0x6a2   : > { %v11172_v15 = vadd.f32 %v15703_v59, %v19967_v11  ;;  %v11077_v1 = vpop.f32.mrb[107].mxu1 }
 0x6a3   : > { %v12777_v22 = vpack.c.bf16 %v11186_v61, %v11185_v29  ;;  %v11171_v47 = vadd.f32 %v19967_v11, %v11077_v1 }
 0x6a4   : > { %v11188_v17 = vmax.f32 %v11172_v15, 0.0 }
 0x6a5   : > { %12778 = vst [vmem:[%s19975_s9] sm:$0xff] %v12777_v22   ;;  %v11187_v27 = vmax.f32 %v11171_v47, 0.0  ;;  %v15706_v57 = vpop.f32.mrb[108].mxu1 }
 0x6a6   : > { %v11174_v0 = vadd.f32 %v15706_v57, %v19967_v11  ;;  %v11087_v49 = vpop.f32.mrb[109].mxu1 }
 0x6a7   : > { %v12782_v56 = vpack.c.bf16 %v11188_v17, %v11187_v27  ;;  %v11173_v16 = vadd.f32 %v19967_v11, %v11087_v49 }
 0x6a8   : > { %v11190_v9 = vmax.f32 %v11174_v0, 0.0 }
 0x6a9   : > { %12809 = vst [vmem:[%s19975_s9 + $0x8] sm:$0xff] %v12782_v56   ;;  %v11189_v42 = vmax.f32 %v11173_v16, 0.0  ;;  %v15709_v43 = vpop.f32.mrb[110].mxu1 }
 0x6aa   : > { %v11176_v55 = vadd.f32 %v15709_v43, %v19967_v11  ;;  %v11097_v45 = vpop.f32.mrb[111].mxu1 }
 0x6ab   : > { %v12787_v19 = vpack.c.bf16 %v11190_v9, %v11189_v42  ;;  %v11175_v10 = vadd.f32 %v19967_v11, %v11097_v45 }
 0x6ac   : > { %v11192_v6 = vmax.f32 %v11176_v55, 0.0 }
 0x6ad   : > { %12810 = vst [vmem:[%s19975_s9 + $0x10] sm:$0xff] %v12787_v19   ;;  %v11191_v63 = vmax.f32 %v11175_v10, 0.0  ;;  %v15712_v35 = vpop.f32.mrb[112].mxu1 }
 0x6ae   : > { %v11178_v38 = vadd.f32 %v15712_v35, %v19967_v11  ;;  %v11107_v30 = vpop.f32.mrb[113].mxu1 }
 0x6af   : > { %v12792_v41 = vpack.c.bf16 %v11192_v6, %v11191_v63  ;;  %v11177_v40 = vadd.f32 %v19967_v11, %v11107_v30 }
 0x6b0   : > { %v11194_v52 = vmax.f32 %v11178_v38, 0.0 }
 0x6b1   : > { %12811 = vst [vmem:[%s19975_s9 + $0x18] sm:$0xff] %v12792_v41   ;;  %v11193_v60 = vmax.f32 %v11177_v40, 0.0  ;;  %v15715_v37 = vpop.f32.mrb[114].mxu1 }
 0x6b2   : > { %v11180_v36 = vadd.f32 %v15715_v37, %v19967_v11  ;;  %v11117_v4 = vpop.f32.mrb[115].mxu1 }
 0x6b3   : > { %v12797_v8 = vpack.c.bf16 %v11194_v52, %v11193_v60  ;;  %v11179_v5 = vadd.f32 %v19967_v11, %v11117_v4 }
 0x6b4   : > { %v11196_v53 = vmax.f32 %v11180_v36, 0.0 }
 0x6b5   : > { %12812 = vst [vmem:[%s19975_s9 + $0x20] sm:$0xff] %v12797_v8   ;;  %v11195_v13 = vmax.f32 %v11179_v5, 0.0  ;;  %v15718_v26 = vpop.f32.mrb[116].mxu1 }
 0x6b6   : > { %v11182_v31 = vadd.f32 %v15718_v26, %v19967_v11  ;;  %v11127_v51 = vpop.f32.mrb[117].mxu1 }
 0x6b7   : > { %v12802_v28 = vpack.c.bf16 %v11196_v53, %v11195_v13  ;;  %v11181_v23 = vadd.f32 %v19967_v11, %v11127_v51 }
 0x6b8   : > { %v11198_v48 = vmax.f32 %v11182_v31, 0.0 }
 0x6b9   : > { %12813 = vst [vmem:[%s19975_s9 + $0x28] sm:$0xff] %v12802_v28   ;;  %v11197_v18 = vmax.f32 %v11181_v23, 0.0  ;;  %v15721_v39 = vpop.f32.mrb[118].mxu1 }
 0x6ba   : > { %v11184_v24 = vadd.f32 %v15721_v39, %v19967_v11  ;;  %v11137_v34 = vpop.f32.mrb[119].mxu1 }
 0x6bb   : > { %v12807_v46 = vpack.c.bf16 %v11198_v48, %v11197_v18  ;;  %v11183_v20 = vadd.f32 %v19967_v11, %v11137_v34 }
 0x6bc   : > { %v11200_v2 = vmax.f32 %v11184_v24, 0.0 }
 0x6bd   : > { %12814 = vst [vmem:[%s19975_s9 + $0x30] sm:$0xff] %v12807_v46   ;;  %v11199_v44 = vmax.f32 %v11183_v20, 0.0 }
 0x6be   : > { %v12773_v7 = vpack.c.bf16 %v11200_v2, %v11200_v2 }
 0x6bf   : > { %v12772_v50 = vpack.c.bf16 %v11199_v44, %v11199_v44 }
 0x6c0   : > { %v11284_v54 = vsel %vm11282_vm6, %v12773_v7, %v11283_v33 }
 0x6c1   : > { %11285 = vst [vmem:[%s19975_s9 + $0x3c] sm:$0x1] %v11284_v54  ;;  %11279 = vst [vmem:[%s19975_s9 + $0x38] sm:$0xf] %v12772_v50 }
 0x6c2 PF: > { %s17_s24 = sadd.s32 1, %s16419_s24  }
 0x6c3   : > { %p14_p4 = scmp.ge.s32.totalorder %s17_s24, 4  }
 0x6c5   :  { %16 = sbr.rel (!%p14_p4) target bundleno = 1 (0x1), region = 90 }

// kernel: policy_conv_forward.3
= control target key start
LH: loop header
LB: loop body
LE: loop exit
PB: predicated region body
PF: predicated region fallthrough
CT: control target
= control target key end

     0   :  { %v2001_v27 = vlaneseq  ;;  %v14609_v35 = vmov 1966171168   ;;  %vm14611_vm0 = vmmov 0   ;;  %s17875_s0 = inlined_call_operand.vmem [shape: bf16[2,15488], index: 0, kind: input, shape index: {}]   ;;  %s17876_s1 = inlined_call_operand.vmem [shape: bf16[15488,64], index: 1, kind: input, shape index: {}]   ;;  %s17877_s2 = inlined_call_operand.vmem [shape: f32[1,64], index: 2, kind: input, shape index: {}]   ;;  %s17878_s3 = inlined_call_operand.vmem [shape: f32[64,3], index: 3, kind: input, shape index: {}]   ;;  %s17879_s4 = inlined_call_operand.vmem [shape: f32[1,3], index: 4, kind: input, shape index: {}]   ;;  %s17880_s5 = inlined_call_operand.hbm [shape: f32[2,3], index: 5, kind: output, shape index: {}]  }
   0x1   :  { %v13598_v0 = vld [vmem:[%s17876_s1 + $0x40] sm:$0xff]   ;;  %v13602_v4 = vld [vmem:[%s17876_s1 + $0x48] sm:$0xff]   ;;  %v13606_v8 = vld [vmem:[%s17876_s1 + $0x50] sm:$0xff]   ;;  %v1999_v36 = vunpack.c.l.s4 %v14609_v35 }
   0x2   :  { %v13599_v1 = vld [vmem:[%s17876_s1] sm:$0xff]   ;;  %12204 = vmatprep.subr.bf16.mxu0 %v13598_v0  ;;  %v13603_v5 = vld [vmem:[%s17876_s1 + $0x8] sm:$0xff]   ;;  %v13607_v9 = vld [vmem:[%s17876_s1 + $0x10] sm:$0xff]   ;;  %v2002_v32 = vshrl.u32 %v2001_v27, 7 }
   0x3   :  { %v13600_v2 = vld [vmem:[%s17876_s1 + $0xc0] sm:$0xff]   ;;  %12205 = vmatpush3.bf16.msra.mxu0 %v13599_v1  ;;  %v13604_v6 = vld [vmem:[%s17876_s1 + $0xc8] sm:$0xff]   ;;  %v13608_v10 = vld [vmem:[%s17876_s1 + $0xd0] sm:$0xff]   ;;  %v2000_v39 = vunpack.c.0.s8 %v1999_v36 }
   0x4   :  { %v13601_v3 = vld [vmem:[%s17876_s1 + $0x80] sm:$0xff]   ;;  %12226 = vmatprep.subr.bf16.mxu1 %v13600_v2  ;;  %12206 = vmatprep.subr.bf16.mxu0 %v13602_v4  ;;  %v13605_v7 = vld [vmem:[%s17876_s1 + $0x88] sm:$0xff]   ;;  %v13609_v11 = vld [vmem:[%s17876_s1 + $0x90] sm:$0xff]  }
   0x5   :  { %12227 = vmatpush3.bf16.msra.mxu1 %v13601_v3  ;;  %v13610_v12 = vld [vmem:[%s17876_s1 + $0x58] sm:$0xff]   ;;  %v13614_v16 = vld [vmem:[%s17876_s1 + $0x60] sm:$0xff]   ;;  %v13618_v20 = vld [vmem:[%s17876_s1 + $0x68] sm:$0xff]   ;;  %v14749_v41 = vsub.s32 %v2000_v39, %v2002_v32 }
   0x6   :  { %12228 = vmatprep.subr.bf16.mxu1 %v13604_v6  ;;  %v13611_v13 = vld [vmem:[%s17876_s1 + $0x18] sm:$0xff]   ;;  %v13615_v17 = vld [vmem:[%s17876_s1 + $0x20] sm:$0xff]   ;;  %v13619_v21 = vld [vmem:[%s17876_s1 + $0x28] sm:$0xff]  }
   0x7   :  { %12207 = vmatpush3.bf16.msra.mxu0 %v13603_v5  ;;  %v13612_v14 = vld [vmem:[%s17876_s1 + $0xd8] sm:$0xff]   ;;  %v13616_v18 = vld [vmem:[%s17876_s1 + $0xe0] sm:$0xff]   ;;  %v13620_v22 = vld [vmem:[%s17876_s1 + $0xe8] sm:$0xff]  }
   0x8   :  { %12208 = vmatprep.subr.bf16.mxu0 %v13606_v8  ;;  %v13613_v15 = vld [vmem:[%s17876_s1 + $0x98] sm:$0xff]   ;;  %v13617_v19 = vld [vmem:[%s17876_s1 + $0xa0] sm:$0xff]   ;;  %v13621_v23 = vld [vmem:[%s17876_s1 + $0xa8] sm:$0xff]  }
   0x9   :  { %12229 = vmatpush3.bf16.msra.mxu1 %v13605_v7  ;;  %v13622_v24 = vld [vmem:[%s17876_s1 + $0x70] sm:$0xff]   ;;  %v13626_v29 = vld [vmem:[%s17876_s1 + $0x78] sm:$0xff]   ;;  %v22_v33 = vld [vmem:[%s17875_s0] sm:$0xff] }
   0xa   :  { %12230 = vmatprep.subr.bf16.mxu1 %v13608_v10  ;;  %v13623_v25 = vld [vmem:[%s17876_s1 + $0x30] sm:$0xff]   ;;  %v13627_v30 = vld [vmem:[%s17876_s1 + $0x38] sm:$0xff]   ;;  %v13631_v37 = vld [vmem:[%s17876_s1 + $0x140] sm:$0xff]   ;;  %v1997_v38 = vcombine.high %v22_v33, %v22_v33  ;;  %v2004_v42 = vrot.slane %v22_v33, %v14749_v41 }
   0xb   :  { %12209 = vmatpush3.bf16.msra.mxu0 %v13607_v9  ;;  %v13624_v26 = vld [vmem:[%s17876_s1 + $0xf0] sm:$0xff]   ;;  %v13628_v31 = vld [vmem:[%s17876_s1 + $0xf8] sm:$0xff]   ;;  %v13633_v40 = vld [vmem:[%s17876_s1 + $0x1c0] sm:$0xff]  }
   0xc   :  { %12210 = vmatprep.subr.bf16.mxu0 %v13610_v12  ;;  %v13625_v28 = vld [vmem:[%s17876_s1 + $0xb0] sm:$0xff]   ;;  %v13630_v34 = vld [vmem:[%s17876_s1 + $0xb8] sm:$0xff]   ;;  %v14753_v43 = vrot.slane %v1997_v38, %v14749_v41  ;;  %v2012_v44 = vcombine.high %v2004_v42, %v2004_v42  ;;  %v2020_v45 = vrot.slane %v2004_v42, %v14749_v41  ;;  %v13632_v47 = vld [vmem:[%s17876_s1 + $0x100] sm:$0xff]  }
   0xd   :  { %12231 = vmatpush3.bf16.msra.mxu1 %v13609_v11  ;;  %v13634_v49 = vld [vmem:[%s17876_s1 + $0x180] sm:$0xff]   ;;  %v13635_v52 = vld [vmem:[%s17876_s1 + $0x148] sm:$0xff]   ;;  %v13639_v58 = vld [vmem:[%s17876_s1 + $0x150] sm:$0xff]  }
   0xe   :  { %12232 = vmatprep.subr.bf16.mxu1 %v13612_v14  ;;  %v2013_v46 = vcombine.high %v14753_v43, %v14753_v43  ;;  %v2034_v48 = vrot.slane %v2012_v44, %v14749_v41  ;;  %v2042_v51 = vcombine.high %v2020_v45, %v2020_v45  ;;  %v13636_v54 = vld [vmem:[%s17876_s1 + $0x108] sm:$0xff]   ;;  %v13640_v59 = vld [vmem:[%s17876_s1 + $0x110] sm:$0xff]   ;;  %v13643_v62 = vld [vmem:[%s17876_s1 + $0x158] sm:$0xff]  }
   0xf   :  { %12211 = vmatpush3.bf16.msra.mxu0 %v13611_v13  ;;  %v13637_v55 = vld [vmem:[%s17876_s1 + $0x1c8] sm:$0xff]   ;;  %v13641_v60 = vld [vmem:[%s17876_s1 + $0x1d0] sm:$0xff]   ;;  %v13644_v63 = vld [vmem:[%s17876_s1 + $0x118] sm:$0xff]  }
  0x10   :  { %12212 = vmatprep.subr.bf16.mxu0 %v13614_v16  ;;  %v2041_v50 = vrot.slane %v2013_v46, %v14749_v41  ;;  %8707 = vmatprep.mubr.bf16.mxu0 %v2034_v48  ;;  %v2044_v53 = vcombine.high %v2034_v48, %v2034_v48  ;;  %v13638_v57 = vld [vmem:[%s17876_s1 + $0x188] sm:$0xff]   ;;  %v13642_v61 = vld [vmem:[%s17876_s1 + $0x190] sm:$0xff]   ;;  %v13645_v0 = vld [vmem:[%s17876_s1 + $0x1d8] sm:$0xff]  }
  0x11   :  { %12233 = vmatpush3.bf16.msra.mxu1 %v13613_v15  ;;  %v13646_v1 = vld [vmem:[%s17876_s1 + $0x198] sm:$0xff]   ;;  %v13647_v2 = vld [vmem:[%s17876_s1 + $0x160] sm:$0xff]   ;;  %v13651_v6 = vld [vmem:[%s17876_s1 + $0x168] sm:$0xff]  }
  0x12   :  { %12234 = vmatprep.subr.bf16.mxu1 %v13616_v18  ;;  %v2045_v56 = vcombine.high %v2041_v50, %v2041_v50  ;;  %8747 = vmatprep.mubr.bf16.mxu1 %v2044_v53  ;;  %v13648_v3 = vld [vmem:[%s17876_s1 + $0x120] sm:$0xff]   ;;  %v13652_v7 = vld [vmem:[%s17876_s1 + $0x128] sm:$0xff]   ;;  %v13655_v10 = vld [vmem:[%s17876_s1 + $0x170] sm:$0xff]   ;;  %v2027_v18 = vrot.slane %v14753_v43, %v14749_v41 }
  0x13   :  { %12213 = vmatpush3.bf16.msra.mxu0 %v13615_v17  ;;  %v13649_v4 = vld [vmem:[%s17876_s1 + $0x1e0] sm:$0xff]   ;;  %v13653_v8 = vld [vmem:[%s17876_s1 + $0x1e8] sm:$0xff]   ;;  %v13656_v11 = vld [vmem:[%s17876_s1 + $0x130] sm:$0xff]  }
  0x14   :  { %12214 = vmatprep.subr.bf16.mxu0 %v13618_v20  ;;  %v13650_v5 = vld [vmem:[%s17876_s1 + $0x1a0] sm:$0xff]   ;;  %v13654_v9 = vld [vmem:[%s17876_s1 + $0x1a8] sm:$0xff]   ;;  %v13657_v12 = vld [vmem:[%s17876_s1 + $0x1f0] sm:$0xff]  }
  0x15   :  { %12235 = vmatpush3.bf16.msra.mxu1 %v13617_v19  ;;  %v13658_v13 = vld [vmem:[%s17876_s1 + $0x1b0] sm:$0xff]   ;;  %v13659_v14 = vld [vmem:[%s17876_s1 + $0x178] sm:$0xff]   ;;  %v13663_v19 = vld [vmem:[%s17876_s1 + $0x240] sm:$0xff]  }
  0x16   :  { %12236 = vmatprep.subr.bf16.mxu1 %v13620_v22  ;;  %v13660_v15 = vld [vmem:[%s17876_s1 + $0x138] sm:$0xff]   ;;  %v13664_v20 = vld [vmem:[%s17876_s1 + $0x200] sm:$0xff]   ;;  %v13670_v27 = vld [vmem:[%s17876_s1 + $0x288] sm:$0xff]  }
  0x17   :  { %12215 = vmatpush3.bf16.msra.mxu0 %v13619_v21  ;;  %v13661_v16 = vld [vmem:[%s17876_s1 + $0x1f8] sm:$0xff]   ;;  %v13665_v21 = vld [vmem:[%s17876_s1 + $0x2c0] sm:$0xff]   ;;  %v13684_v42 = vld [vmem:[%s17876_s1 + $0x228] sm:$0xff]  }
  0x18   :  { %12216 = vmatprep.subr.bf16.mxu0 %v13622_v24  ;;  %v13662_v17 = vld [vmem:[%s17876_s1 + $0x1b8] sm:$0xff]   ;;  %v13666_v22 = vld [vmem:[%s17876_s1 + $0x280] sm:$0xff]   ;;  %v13667_v24 = vld [vmem:[%s17876_s1 + $0x248] sm:$0xff]  }
  0x19   :  { %12237 = vmatpush3.bf16.msra.mxu1 %v13621_v23  ;;  %v2043_v23 = vcombine.high %v2027_v18, %v2027_v18  ;;  %v13675_v32 = vld [vmem:[%s17876_s1 + $0x258] sm:$0xff]   ;;  %v13679_v36 = vld [vmem:[%s17876_s1 + $0x260] sm:$0xff]   ;;  %v13685_v43 = vld [vmem:[%s17876_s1 + $0x2e8] sm:$0xff]  }
  0x1a   :  { %12238 = vmatprep.subr.bf16.mxu1 %v13624_v26  ;;  %v13669_v26 = vld [vmem:[%s17876_s1 + $0x2c8] sm:$0xff]   ;;  %v13676_v33 = vld [vmem:[%s17876_s1 + $0x218] sm:$0xff]   ;;  %v13681_v38 = vld [vmem:[%s17876_s1 + $0x2e0] sm:$0xff]  }
  0x1b   :  { %12217 = vmatpush3.bf16.msra.mxu0 %v13623_v25  ;;  %v13668_v25 = vld [vmem:[%s17876_s1 + $0x208] sm:$0xff]   ;;  %v13678_v35 = vld [vmem:[%s17876_s1 + $0x298] sm:$0xff]   ;;  %v13682_v39 = vld [vmem:[%s17876_s1 + $0x2a0] sm:$0xff]  }
  0x1c   :  { %12218 = vmatprep.subr.bf16.mxu0 %v13626_v29  ;;  %v13672_v29 = vld [vmem:[%s17876_s1 + $0x210] sm:$0xff]   ;;  %v13686_v44 = vld [vmem:[%s17876_s1 + $0x2a8] sm:$0xff]  }
  0x1d   :  { %12239 = vmatpush3.bf16.msra.mxu1 %v13625_v28  ;;  %v13671_v28 = vld [vmem:[%s17876_s1 + $0x250] sm:$0xff]   ;;  %v23_v46 = vld [vmem:[%s17875_s0 + $0x8] sm:$0xff] }
  0x1e   :  { %12240 = vmatprep.subr.bf16.mxu1 %v13628_v31  ;;  %v13674_v31 = vld [vmem:[%s17876_s1 + $0x290] sm:$0xff]   ;;  %v2053_v48 = vrot.slane %v23_v46, %v14749_v41 }
  0x1f   :  { %12219 = vmatpush3.bf16.msra.mxu0 %v13627_v30  ;;  %v13673_v30 = vld [vmem:[%s17876_s1 + $0x2d0] sm:$0xff]  }
  0x20   :  { %12248 = vmatprep.subr.bf16.mxu0 %v13631_v37  ;;  %v13680_v37 = vld [vmem:[%s17876_s1 + $0x220] sm:$0xff]  }
  0x21   :  { %12241 = vmatpush3.bf16.msra.mxu1 %v13630_v34  ;;  %v13677_v34 = vld [vmem:[%s17876_s1 + $0x2d8] sm:$0xff]  }
  0x22   :  { %12270 = vmatprep.subr.bf16.mxu1 %v13633_v40  ;;  %8708 = vmatmul.mubr.bf16.vlgmr.msra.gmra.mrb[0].mxu0 %v2020_v45  ;;  %v13683_v40 = vld [vmem:[%s17876_s1 + $0x268] sm:$0xff]   ;;  %v13687_v45 = vld [vmem:[%s17876_s1 + $0x270] sm:$0xff]  }
  0x23   :  { %12249 = vmatpush3.bf16.msra.mxu0 %v13632_v47  ;;  %8787 = vmatprep.mubr.bf16.mxu0 %v2041_v50  ;;  %v13688_v47 = vld [vmem:[%s17876_s1 + $0x230] sm:$0xff]  }
  0x24   :  { %8748 = vmatmul.mubr.bf16.vlgmr.msra.gmra.mrb[0].mxu1 %v2042_v51  ;;  %12250 = vmatprep.subr.bf16.mxu0 %v13635_v52  ;;  %v13689_v50 = vld [vmem:[%s17876_s1 + $0x2f0] sm:$0xff]   ;;  %v2061_v52 = vcombine.high %v2053_v48, %v2053_v48 }
  0x25   :  { %12271 = vmatpush3.bf16.msra.mxu1 %v13634_v49  ;;  %8827 = vmatprep.mubr.bf16.mxu1 %v2045_v56  ;;  %v2046_v49 = vcombine.high %v23_v46, %v23_v46  ;;  %v13690_v51 = vld [vmem:[%s17876_s1 + $0x2b0] sm:$0xff]  }
  0x26   :  { %12272 = vmatprep.subr.bf16.mxu1 %v13637_v55  ;;  %v13692_v55 = vld [vmem:[%s17876_s1 + $0x238] sm:$0xff]   ;;  %v2083_v56 = vrot.slane %v2061_v52, %v14749_v41  ;;  %v13738_v46 = vld [vmem:[%s17876_s1 + $0x4d0] sm:$0xff]   ;;  %v13744_v52 = vld [vmem:[%s17876_s1 + $0x460] sm:$0xff]  }
  0x27   :  { %12251 = vmatpush3.bf16.msra.mxu0 %v13636_v54  ;;  %v14941_v53 = vrot.slane %v2046_v49, %v14749_v41  ;;  %v13691_v54 = vld [vmem:[%s17876_s1 + $0x278] sm:$0xff]  }
  0x28   :  { %12252 = vmatprep.subr.bf16.mxu0 %v13639_v58  ;;  %v13693_v58 = vld [vmem:[%s17876_s1 + $0x2f8] sm:$0xff]  }
  0x29   :  { %12273 = vmatpush3.bf16.msra.mxu1 %v13638_v57  ;;  %v2062_v57 = vcombine.high %v14941_v53, %v14941_v53  ;;  %v13741_v49 = vld [vmem:[%s17876_s1 + $0x418] sm:$0xff]  }
  0x2a   :  { %12274 = vmatprep.subr.bf16.mxu1 %v13641_v60  ;;  %v2093_v60 = vcombine.high %v2083_v56, %v2083_v56 }
  0x2b   :  { %12253 = vmatpush3.bf16.msra.mxu0 %v13640_v59  ;;  %v13694_v59 = vld [vmem:[%s17876_s1 + $0x2b8] sm:$0xff]  }
  0x2c   :  { %12254 = vmatprep.subr.bf16.mxu0 %v13643_v62  ;;  %v13695_v62 = vld [vmem:[%s17876_s1 + $0x340] sm:$0xff]  }
  0x2d   :  { %12275 = vmatpush3.bf16.msra.mxu1 %v13642_v61  ;;  %v2069_v61 = vrot.slane %v2053_v48, %v14749_v41  ;;  %v13740_v48 = vld [vmem:[%s17876_s1 + $0x458] sm:$0xff]  }
  0x2e   :  { %12276 = vmatprep.subr.bf16.mxu1 %v13645_v0  ;;  %v2090_v0 = vrot.slane %v2062_v57, %v14749_v41  ;;  %v13749_v57 = vld [vmem:[%s17876_s1 + $0x428] sm:$0xff]  }
  0x2f   :  { %12255 = vmatpush3.bf16.msra.mxu0 %v13644_v63  ;;  %v13696_v63 = vld [vmem:[%s17876_s1 + $0x300] sm:$0xff]  }
  0x30   :  { %12256 = vmatprep.subr.bf16.mxu0 %v13647_v2  ;;  %v13698_v2 = vld [vmem:[%s17876_s1 + $0x380] sm:$0xff]  }
  0x31   :  { %12277 = vmatpush3.bf16.msra.mxu1 %v13646_v1  ;;  %v13697_v1 = vld [vmem:[%s17876_s1 + $0x3c0] sm:$0xff]  }
  0x32   :  { %12278 = vmatprep.subr.bf16.mxu1 %v13649_v4  ;;  %v13699_v4 = vld [vmem:[%s17876_s1 + $0x348] sm:$0xff]  }
  0x33   :  { %12257 = vmatpush3.bf16.msra.mxu0 %v13648_v3  ;;  %v2091_v3 = vcombine.high %v2069_v61, %v2069_v61 }
  0x34   :  { %12258 = vmatprep.subr.bf16.mxu0 %v13651_v6  ;;  %v2094_v6 = vcombine.high %v2090_v0, %v2090_v0 }
  0x35   :  { %12279 = vmatpush3.bf16.msra.mxu1 %v13650_v5  ;;  %v13700_v5 = vld [vmem:[%s17876_s1 + $0x308] sm:$0xff]  }
  0x36   :  { %12280 = vmatprep.subr.bf16.mxu1 %v13653_v8  ;;  %v13702_v8 = vld [vmem:[%s17876_s1 + $0x388] sm:$0xff]  }
  0x37   :  { %12259 = vmatpush3.bf16.msra.mxu0 %v13652_v7  ;;  %v13701_v7 = vld [vmem:[%s17876_s1 + $0x3c8] sm:$0xff]  }
  0x38   :  { %12260 = vmatprep.subr.bf16.mxu0 %v13655_v10  ;;  %v13704_v10 = vld [vmem:[%s17876_s1 + $0x310] sm:$0xff]  }
  0x39   :  { %12281 = vmatpush3.bf16.msra.mxu1 %v13654_v9  ;;  %v13703_v9 = vld [vmem:[%s17876_s1 + $0x350] sm:$0xff]  }
  0x3a   :  { %12282 = vmatprep.subr.bf16.mxu1 %v13657_v12  ;;  %v13706_v12 = vld [vmem:[%s17876_s1 + $0x390] sm:$0xff]  }
  0x3b   :  { %12261 = vmatpush3.bf16.msra.mxu0 %v13656_v11  ;;  %v13705_v11 = vld [vmem:[%s17876_s1 + $0x3d0] sm:$0xff]  }
  0x3c   :  { %12262 = vmatprep.subr.bf16.mxu0 %v13659_v14  ;;  %v13708_v14 = vld [vmem:[%s17876_s1 + $0x318] sm:$0xff]  }
  0x3d   :  { %12283 = vmatpush3.bf16.msra.mxu1 %v13658_v13  ;;  %v13707_v13 = vld [vmem:[%s17876_s1 + $0x358] sm:$0xff]  }
  0x3e   :  { %12284 = vmatprep.subr.bf16.mxu1 %v13661_v16  ;;  %v13710_v16 = vld [vmem:[%s17876_s1 + $0x398] sm:$0xff]  }
  0x3f   :  { %12263 = vmatpush3.bf16.msra.mxu0 %v13660_v15  ;;  %v13709_v15 = vld [vmem:[%s17876_s1 + $0x3d8] sm:$0xff]  }
  0x40   :  { %12292 = vmatprep.subr.bf16.mxu0 %v13663_v19  ;;  %v13713_v19 = vld [vmem:[%s17876_s1 + $0x3e0] sm:$0xff]  }
  0x41   :  { %12285 = vmatpush3.bf16.msra.mxu1 %v13662_v17  ;;  %v13711_v17 = vld [vmem:[%s17876_s1 + $0x360] sm:$0xff]  }
  0x42   :  { %8788 = vmatmul.mubr.bf16.vlgmr.msra.gmra.mrb[4].mxu0 %v2027_v18  ;;  %12314 = vmatprep.subr.bf16.mxu1 %v13665_v21  ;;  %v13712_v18 = vld [vmem:[%s17876_s1 + $0x320] sm:$0xff]   ;;  %v13715_v21 = vld [vmem:[%s17876_s1 + $0x368] sm:$0xff]  }
  0x43   :  { %12293 = vmatpush3.bf16.msra.mxu0 %v13664_v20  ;;  %8867 = vmatprep.mubr.bf16.mxu0 %v2083_v56  ;;  %v13714_v20 = vld [vmem:[%s17876_s1 + $0x3a0] sm:$0xff]   ;;  %v13748_v56 = vld [vmem:[%s17876_s1 + $0x468] sm:$0xff]  }
  0x44   :  { %8828 = vmatmul.mubr.bf16.vlgmr.msra.gmra.mrb[4].mxu1 %v2043_v23  ;;  %12294 = vmatprep.subr.bf16.mxu0 %v13667_v24  ;;  %v13717_v23 = vld [vmem:[%s17876_s1 + $0x3e8] sm:$0xff]  }
  0x45   :  { %12315 = vmatpush3.bf16.msra.mxu1 %v13666_v22  ;;  %8907 = vmatprep.mubr.bf16.mxu1 %v2093_v60  ;;  %v13716_v22 = vld [vmem:[%s17876_s1 + $0x328] sm:$0xff]   ;;  %v13752_v60 = vld [vmem:[%s17876_s1 + $0x470] sm:$0xff]  }
  0x46   :  { %12316 = vmatprep.subr.bf16.mxu1 %v13669_v26  ;;  %v13718_v24 = vld [vmem:[%s17876_s1 + $0x3a8] sm:$0xff]   ;;  %v13720_v26 = vld [vmem:[%s17876_s1 + $0x330] sm:$0xff]  }
  0x47   :  { %12295 = vmatpush3.bf16.msra.mxu0 %v13668_v25  ;;  %v13719_v25 = vld [vmem:[%s17876_s1 + $0x370] sm:$0xff]  }
  0x48   :  { %12296 = vmatprep.subr.bf16.mxu0 %v13671_v28  ;;  %v13722_v28 = vld [vmem:[%s17876_s1 + $0x3b0] sm:$0xff]  }
  0x49   :  { %12317 = vmatpush3.bf16.msra.mxu1 %v13670_v27  ;;  %v13721_v27 = vld [vmem:[%s17876_s1 + $0x3f0] sm:$0xff]  }
  0x4a   :  { %12318 = vmatprep.subr.bf16.mxu1 %v13673_v30  ;;  %v13724_v30 = vld [vmem:[%s17876_s1 + $0x338] sm:$0xff]  }
  0x4b   :  { %12297 = vmatpush3.bf16.msra.mxu0 %v13672_v29  ;;  %v13723_v29 = vld [vmem:[%s17876_s1 + $0x378] sm:$0xff]  }
  0x4c   :  { %12298 = vmatprep.subr.bf16.mxu0 %v13675_v32  ;;  %v13727_v32 = vld [vmem:[%s17876_s1 + $0x3b8] sm:$0xff]  }
  0x4d   :  { %12319 = vmatpush3.bf16.msra.mxu1 %v13674_v31  ;;  %v13725_v31 = vld [vmem:[%s17876_s1 + $0x3f8] sm:$0xff]  }
  0x4e   :  { %12320 = vmatprep.subr.bf16.mxu1 %v13677_v34  ;;  %v13728_v34 = vld [vmem:[%s17876_s1 + $0x440] sm:$0xff]  }
  0x4f   :  { %12299 = vmatpush3.bf16.msra.mxu0 %v13676_v33  ;;  %v2076_v33 = vrot.slane %v14941_v53, %v14749_v41  ;;  %v13745_v53 = vld [vmem:[%s17876_s1 + $0x420] sm:$0xff]  }
  0x50   :  { %12300 = vmatprep.subr.bf16.mxu0 %v13679_v36  ;;  %v13730_v36 = vld [vmem:[%s17876_s1 + $0x4c0] sm:$0xff]  }
  0x51   :  { %12321 = vmatpush3.bf16.msra.mxu1 %v13678_v35  ;;  %v13729_v35 = vld [vmem:[%s17876_s1 + $0x400] sm:$0xff]  }
  0x52   :  { %12322 = vmatprep.subr.bf16.mxu1 %v13681_v38  ;;  %v2092_v38 = vcombine.high %v2076_v33, %v2076_v33 }
  0x53   :  { %12301 = vmatpush3.bf16.msra.mxu0 %v13680_v37  ;;  %v13731_v37 = vld [vmem:[%s17876_s1 + $0x480] sm:$0xff]  }
  0x54   :  { %12302 = vmatprep.subr.bf16.mxu0 %v13683_v40  ;;  %v13733_v40 = vld [vmem:[%s17876_s1 + $0x408] sm:$0xff]  }
  0x55   :  { %12323 = vmatpush3.bf16.msra.mxu1 %v13682_v39  ;;  %v13732_v39 = vld [vmem:[%s17876_s1 + $0x448] sm:$0xff]  }
  0x56   :  { %12324 = vmatprep.subr.bf16.mxu1 %v13685_v43  ;;  %v13735_v43 = vld [vmem:[%s17876_s1 + $0x488] sm:$0xff]  }
  0x57   :  { %12303 = vmatpush3.bf16.msra.mxu0 %v13684_v42  ;;  %v13734_v42 = vld [vmem:[%s17876_s1 + $0x4c8] sm:$0xff]  }
  0x58   :  { %12304 = vmatprep.subr.bf16.mxu0 %v13687_v45  ;;  %v13737_v45 = vld [vmem:[%s17876_s1 + $0x410] sm:$0xff]  }
  0x59   :  { %12325 = vmatpush3.bf16.msra.mxu1 %v13686_v44  ;;  %v13736_v44 = vld [vmem:[%s17876_s1 + $0x450] sm:$0xff]  }
  0x5a   :  { %12326 = vmatprep.subr.bf16.mxu1 %v13689_v50  ;;  %v13742_v50 = vld [vmem:[%s17876_s1 + $0x4d8] sm:$0xff]  }
  0x5b   :  { %12305 = vmatpush3.bf16.msra.mxu0 %v13688_v47  ;;  %v13739_v47 = vld [vmem:[%s17876_s1 + $0x490] sm:$0xff]  }
  0x5c   :  { %12306 = vmatprep.subr.bf16.mxu0 %v13691_v54  ;;  %v13746_v54 = vld [vmem:[%s17876_s1 + $0x4e0] sm:$0xff]  }
  0x5d   :  { %12327 = vmatpush3.bf16.msra.mxu1 %v13690_v51  ;;  %v13743_v51 = vld [vmem:[%s17876_s1 + $0x498] sm:$0xff]  }
  0x5e   :  { %12328 = vmatprep.subr.bf16.mxu1 %v13693_v58  ;;  %v13750_v58 = vld [vmem:[%s17876_s1 + $0x4e8] sm:$0xff]  }
  0x5f   :  { %12307 = vmatpush3.bf16.msra.mxu0 %v13692_v55  ;;  %v13747_v55 = vld [vmem:[%s17876_s1 + $0x4a0] sm:$0xff]  }
  0x60   :  { %12336 = vmatprep.subr.bf16.mxu0 %v13695_v62  ;;  %v13753_v62 = vld [vmem:[%s17876_s1 + $0x430] sm:$0xff]  }
  0x61   :  { %12329 = vmatpush3.bf16.msra.mxu1 %v13694_v59  ;;  %v13751_v59 = vld [vmem:[%s17876_s1 + $0x4a8] sm:$0xff]  }
  0x62   :  { %8868 = vmatmul.mubr.bf16.vlgmr.msra.gmra.mrb[8].mxu0 %v2069_v61  ;;  %12358 = vmatprep.subr.bf16.mxu1 %v13697_v1  ;;  %v24_v61 = vld [vmem:[%s17875_s0 + $0x10] sm:$0xff] }
  0x63   :  { %12337 = vmatpush3.bf16.msra.mxu0 %v13696_v63  ;;  %8947 = vmatprep.mubr.bf16.mxu0 %v2090_v0  ;;  %v2102_v63 = vrot.slane %v24_v61, %v14749_v41  ;;  %v2095_v0 = vcombine.high %v24_v61, %v24_v61  ;;  %v13754_v1 = vld [vmem:[%s17876_s1 + $0x4f0] sm:$0xff]  }
  0x64   :  { %8908 = vmatmul.mubr.bf16.vlgmr.msra.gmra.mrb[8].mxu1 %v2091_v3  ;;  %12338 = vmatprep.subr.bf16.mxu0 %v13699_v4  ;;  %v13803_v61 = vld [vmem:[%s17876_s1 + $0x6d0] sm:$0xff]  }
  0x65   :  { %12359 = vmatpush3.bf16.msra.mxu1 %v13698_v2  ;;  %8987 = vmatprep.mubr.bf16.mxu1 %v2094_v6  ;;  %v13755_v2 = vld [vmem:[%s17876_s1 + $0x4b0] sm:$0xff]   ;;  %v2110_v3 = vcombine.high %v2102_v63, %v2102_v63  ;;  %v15147_v4 = vrot.slane %v2095_v0, %v14749_v41  ;;  %v13757_v6 = vld [vmem:[%s17876_s1 + $0x438] sm:$0xff]  }
  0x66   :  { %12360 = vmatprep.subr.bf16.mxu1 %v13701_v7  ;;  %v13806_v0 = vld [vmem:[%s17876_s1 + $0x618] sm:$0xff]  }
  0x67   :  { %12339 = vmatpush3.bf16.msra.mxu0 %v13700_v5  ;;  %v13756_v5 = vld [vmem:[%s17876_s1 + $0x478] sm:$0xff]   ;;  %v2132_v7 = vrot.slane %v2110_v3, %v14749_v41  ;;  %v13809_v3 = vld [vmem:[%s17876_s1 + $0x660] sm:$0xff]  }
  0x68   :  { %12340 = vmatprep.subr.bf16.mxu0 %v13703_v9  ;;  %v13758_v9 = vld [vmem:[%s17876_s1 + $0x4f8] sm:$0xff]  }
  0x69   :  { %12361 = vmatpush3.bf16.msra.mxu1 %v13702_v8  ;;  %v2111_v8 = vcombine.high %v15147_v4, %v15147_v4 }
  0x6a   :  { %12362 = vmatprep.subr.bf16.mxu1 %v13705_v11  ;;  %v2142_v11 = vcombine.high %v2132_v7, %v2132_v7 }
  0x6b   :  { %12341 = vmatpush3.bf16.msra.mxu0 %v13704_v10  ;;  %v13759_v10 = vld [vmem:[%s17876_s1 + $0x4b8] sm:$0xff]  }
  0x6c   :  { %12342 = vmatprep.subr.bf16.mxu0 %v13707_v13  ;;  %v13760_v13 = vld [vmem:[%s17876_s1 + $0x540] sm:$0xff]  }
  0x6d   :  { %12363 = vmatpush3.bf16.msra.mxu1 %v13706_v12  ;;  %v2118_v12 = vrot.slane %v2102_v63, %v14749_v41  ;;  %v13805_v63 = vld [vmem:[%s17876_s1 + $0x658] sm:$0xff]  }
  0x6e   :  { %12364 = vmatprep.subr.bf16.mxu1 %v13709_v15  ;;  %v2139_v15 = vrot.slane %v2111_v8, %v14749_v41  ;;  %v13814_v8 = vld [vmem:[%s17876_s1 + $0x628] sm:$0xff]  }
  0x6f   :  { %12343 = vmatpush3.bf16.msra.mxu0 %v13708_v14  ;;  %v13761_v14 = vld [vmem:[%s17876_s1 + $0x500] sm:$0xff]  }
  0x70   :  { %12344 = vmatprep.subr.bf16.mxu0 %v13711_v17  ;;  %v13763_v17 = vld [vmem:[%s17876_s1 + $0x580] sm:$0xff]  }
  0x71   :  { %12365 = vmatpush3.bf16.msra.mxu1 %v13710_v16  ;;  %v13762_v16 = vld [vmem:[%s17876_s1 + $0x5c0] sm:$0xff]  }
  0x72   :  { %12366 = vmatprep.subr.bf16.mxu1 %v13713_v19  ;;  %v13764_v19 = vld [vmem:[%s17876_s1 + $0x548] sm:$0xff]  }
  0x73   :  { %12345 = vmatpush3.bf16.msra.mxu0 %v13712_v18  ;;  %v2140_v18 = vcombine.high %v2118_v12, %v2118_v12 }
  0x74   :  { %12346 = vmatprep.subr.bf16.mxu0 %v13715_v21  ;;  %v2143_v21 = vcombine.high %v2139_v15, %v2139_v15 }
  0x75   :  { %12367 = vmatpush3.bf16.msra.mxu1 %v13714_v20  ;;  %v13765_v20 = vld [vmem:[%s17876_s1 + $0x508] sm:$0xff]  }
  0x76   :  { %12368 = vmatprep.subr.bf16.mxu1 %v13717_v23  ;;  %v13767_v23 = vld [vmem:[%s17876_s1 + $0x588] sm:$0xff]  }
  0x77   :  { %12347 = vmatpush3.bf16.msra.mxu0 %v13716_v22  ;;  %v13766_v22 = vld [vmem:[%s17876_s1 + $0x5c8] sm:$0xff]  }
  0x78   :  { %12348 = vmatprep.subr.bf16.mxu0 %v13719_v25  ;;  %v13769_v25 = vld [vmem:[%s17876_s1 + $0x510] sm:$0xff]  }
  0x79   :  { %12369 = vmatpush3.bf16.msra.mxu1 %v13718_v24  ;;  %v13768_v24 = vld [vmem:[%s17876_s1 + $0x550] sm:$0xff]  }
  0x7a   :  { %12370 = vmatprep.subr.bf16.mxu1 %v13721_v27  ;;  %v13771_v27 = vld [vmem:[%s17876_s1 + $0x590] sm:$0xff]  }
  0x7b   :  { %12349 = vmatpush3.bf16.msra.mxu0 %v13720_v26  ;;  %v13770_v26 = vld [vmem:[%s17876_s1 + $0x5d0] sm:$0xff]  }
  0x7c   :  { %12350 = vmatprep.subr.bf16.mxu0 %v13723_v29  ;;  %v13773_v29 = vld [vmem:[%s17876_s1 + $0x518] sm:$0xff]  }
  0x7d   :  { %12371 = vmatpush3.bf16.msra.mxu1 %v13722_v28  ;;  %v13772_v28 = vld [vmem:[%s17876_s1 + $0x558] sm:$0xff]  }
  0x7e   :  { %12372 = vmatprep.subr.bf16.mxu1 %v13725_v31  ;;  %v13775_v31 = vld [vmem:[%s17876_s1 + $0x598] sm:$0xff]  }
  0x7f   :  { %12351 = vmatpush3.bf16.msra.mxu0 %v13724_v30  ;;  %v13774_v30 = vld [vmem:[%s17876_s1 + $0x5d8] sm:$0xff]  }
  0x80   :  { %12380 = vmatprep.subr.bf16.mxu0 %v13728_v34  ;;  %v13778_v34 = vld [vmem:[%s17876_s1 + $0x5e0] sm:$0xff]  }
  0x81   :  { %12373 = vmatpush3.bf16.msra.mxu1 %v13727_v32  ;;  %v13776_v32 = vld [vmem:[%s17876_s1 + $0x560] sm:$0xff]  }
  0x82   :  { %8948 = vmatmul.mubr.bf16.vlgmr.msra.gmra.mrb[12].mxu0 %v2076_v33  ;;  %12402 = vmatprep.subr.bf16.mxu1 %v13730_v36  ;;  %v13777_v33 = vld [vmem:[%s17876_s1 + $0x520] sm:$0xff]   ;;  %v13780_v36 = vld [vmem:[%s17876_s1 + $0x568] sm:$0xff]  }
  0x83   :  { %12381 = vmatpush3.bf16.msra.mxu0 %v13729_v35  ;;  %9027 = vmatprep.mubr.bf16.mxu0 %v2132_v7  ;;  %v13779_v35 = vld [vmem:[%s17876_s1 + $0x5a0] sm:$0xff]   ;;  %v13813_v7 = vld [vmem:[%s17876_s1 + $0x668] sm:$0xff]  }
  0x84   :  { %8988 = vmatmul.mubr.bf16.vlgmr.msra.gmra.mrb[12].mxu1 %v2092_v38  ;;  %12382 = vmatprep.subr.bf16.mxu0 %v13732_v39  ;;  %v13782_v38 = vld [vmem:[%s17876_s1 + $0x5e8] sm:$0xff]  }
  0x85   :  { %12403 = vmatpush3.bf16.msra.mxu1 %v13731_v37  ;;  %9067 = vmatprep.mubr.bf16.mxu1 %v2142_v11  ;;  %v13781_v37 = vld [vmem:[%s17876_s1 + $0x528] sm:$0xff]   ;;  %v13817_v11 = vld [vmem:[%s17876_s1 + $0x670] sm:$0xff]  }
  0x86   :  { %12404 = vmatprep.subr.bf16.mxu1 %v13734_v42  ;;  %v13783_v39 = vld [vmem:[%s17876_s1 + $0x5a8] sm:$0xff]   ;;  %v13785_v42 = vld [vmem:[%s17876_s1 + $0x530] sm:$0xff]  }
  0x87   :  { %12383 = vmatpush3.bf16.msra.mxu0 %v13733_v40  ;;  %v13784_v40 = vld [vmem:[%s17876_s1 + $0x570] sm:$0xff]  }
  0x88   :  { %12384 = vmatprep.subr.bf16.mxu0 %v13736_v44  ;;  %v13787_v44 = vld [vmem:[%s17876_s1 + $0x5b0] sm:$0xff]  }
  0x89   :  { %12405 = vmatpush3.bf16.msra.mxu1 %v13735_v43  ;;  %v13786_v43 = vld [vmem:[%s17876_s1 + $0x5f0] sm:$0xff]  }
  0x8a   :  { %12406 = vmatprep.subr.bf16.mxu1 %v13738_v46  ;;  %v13789_v46 = vld [vmem:[%s17876_s1 + $0x538] sm:$0xff]  }
  0x8b   :  { %12385 = vmatpush3.bf16.msra.mxu0 %v13737_v45  ;;  %v13788_v45 = vld [vmem:[%s17876_s1 + $0x578] sm:$0xff]  }
  0x8c   :  { %12386 = vmatprep.subr.bf16.mxu0 %v13740_v48  ;;  %v13792_v48 = vld [vmem:[%s17876_s1 + $0x5b8] sm:$0xff]  }
  0x8d   :  { %12407 = vmatpush3.bf16.msra.mxu1 %v13739_v47  ;;  %v13790_v47 = vld [vmem:[%s17876_s1 + $0x5f8] sm:$0xff]  }
  0x8e   :  { %12408 = vmatprep.subr.bf16.mxu1 %v13742_v50  ;;  %v13793_v50 = vld [vmem:[%s17876_s1 + $0x640] sm:$0xff]  }
  0x8f   :  { %12387 = vmatpush3.bf16.msra.mxu0 %v13741_v49  ;;  %v2125_v49 = vrot.slane %v15147_v4, %v14749_v41  ;;  %v13810_v4 = vld [vmem:[%s17876_s1 + $0x620] sm:$0xff]  }
  0x90   :  { %12388 = vmatprep.subr.bf16.mxu0 %v13744_v52  ;;  %v13795_v52 = vld [vmem:[%s17876_s1 + $0x6c0] sm:$0xff]  }
  0x91   :  { %12409 = vmatpush3.bf16.msra.mxu1 %v13743_v51  ;;  %v13794_v51 = vld [vmem:[%s17876_s1 + $0x600] sm:$0xff]  }
  0x92   :  { %12410 = vmatprep.subr.bf16.mxu1 %v13746_v54  ;;  %v2141_v54 = vcombine.high %v2125_v49, %v2125_v49 }
  0x93   :  { %12389 = vmatpush3.bf16.msra.mxu0 %v13745_v53  ;;  %v13796_v53 = vld [vmem:[%s17876_s1 + $0x680] sm:$0xff]  }
  0x94   :  { %12390 = vmatprep.subr.bf16.mxu0 %v13748_v56  ;;  %v13798_v56 = vld [vmem:[%s17876_s1 + $0x608] sm:$0xff]  }
  0x95   :  { %12411 = vmatpush3.bf16.msra.mxu1 %v13747_v55  ;;  %v13797_v55 = vld [vmem:[%s17876_s1 + $0x648] sm:$0xff]  }
  0x96   :  { %12412 = vmatprep.subr.bf16.mxu1 %v13750_v58  ;;  %v13800_v58 = vld [vmem:[%s17876_s1 + $0x688] sm:$0xff]  }
  0x97   :  { %12391 = vmatpush3.bf16.msra.mxu0 %v13749_v57  ;;  %v13799_v57 = vld [vmem:[%s17876_s1 + $0x6c8] sm:$0xff]  }
  0x98   :  { %12392 = vmatprep.subr.bf16.mxu0 %v13752_v60  ;;  %v13802_v60 = vld [vmem:[%s17876_s1 + $0x610] sm:$0xff]  }
  0x99   :  { %12413 = vmatpush3.bf16.msra.mxu1 %v13751_v59  ;;  %v13801_v59 = vld [vmem:[%s17876_s1 + $0x650] sm:$0xff]  }
  0x9a   :  { %12414 = vmatprep.subr.bf16.mxu1 %v13754_v1  ;;  %v13807_v1 = vld [vmem:[%s17876_s1 + $0x6d8] sm:$0xff]  }
  0x9b   :  { %12393 = vmatpush3.bf16.msra.mxu0 %v13753_v62  ;;  %v13804_v62 = vld [vmem:[%s17876_s1 + $0x690] sm:$0xff]  }
  0x9c   :  { %12394 = vmatprep.subr.bf16.mxu0 %v13756_v5  ;;  %v13811_v5 = vld [vmem:[%s17876_s1 + $0x6e0] sm:$0xff]  }
  0x9d   :  { %12415 = vmatpush3.bf16.msra.mxu1 %v13755_v2  ;;  %v13808_v2 = vld [vmem:[%s17876_s1 + $0x698] sm:$0xff]  }
  0x9e   :  { %12416 = vmatprep.subr.bf16.mxu1 %v13758_v9  ;;  %v13815_v9 = vld [vmem:[%s17876_s1 + $0x6e8] sm:$0xff]  }
  0x9f   :  { %12395 = vmatpush3.bf16.msra.mxu0 %v13757_v6  ;;  %v13812_v6 = vld [vmem:[%s17876_s1 + $0x6a0] sm:$0xff]  }
  0xa0   :  { %12424 = vmatprep.subr.bf16.mxu0 %v13760_v13  ;;  %v13819_v13 = vld [vmem:[%s17876_s1 + $0x6f0] sm:$0xff]  }
  0xa1   :  { %12417 = vmatpush3.bf16.msra.mxu1 %v13759_v10  ;;  %v13816_v10 = vld [vmem:[%s17876_s1 + $0x6a8] sm:$0xff]  }
  0xa2   :  { %9028 = vmatmul.mubr.bf16.vlgmr.msra.gmra.mrb[16].mxu0 %v2118_v12  ;;  %12446 = vmatprep.subr.bf16.mxu1 %v13762_v16  ;;  %v25_v12 = vld [vmem:[%s17875_s0 + $0x18] sm:$0xff]  ;;  %v13818_v16 = vld [vmem:[%s17876_s1 + $0x630] sm:$0xff]  }
  0xa3   :  { %12425 = vmatpush3.bf16.msra.mxu0 %v13761_v14  ;;  %9107 = vmatprep.mubr.bf16.mxu0 %v2139_v15  ;;  %v2151_v14 = vrot.slane %v25_v12, %v14749_v41  ;;  %v2144_v15 = vcombine.high %v25_v12, %v25_v12  ;;  %v13857_v12 = vld [vmem:[%s17876_s1 + $0x7b8] sm:$0xff]  }
  0xa4   :  { %9068 = vmatmul.mubr.bf16.vlgmr.msra.gmra.mrb[16].mxu1 %v2140_v18  ;;  %12426 = vmatprep.subr.bf16.mxu0 %v13764_v19 }
  0xa5   :  { %12447 = vmatpush3.bf16.msra.mxu1 %v13763_v17  ;;  %9147 = vmatprep.mubr.bf16.mxu1 %v2143_v21  ;;  %v13821_v17 = vld [vmem:[%s17876_s1 + $0x678] sm:$0xff]   ;;  %v2159_v18 = vcombine.high %v2151_v14, %v2151_v14  ;;  %v15353_v19 = vrot.slane %v2144_v15, %v14749_v41  ;;  %v13859_v15 = vld [vmem:[%s17876_s1 + $0x800] sm:$0xff]  }
  0xa6   :  { %12448 = vmatprep.subr.bf16.mxu1 %v13766_v22  ;;  %v13823_v21 = vld [vmem:[%s17876_s1 + $0x6f8] sm:$0xff]  }
  0xa7   :  { %12427 = vmatpush3.bf16.msra.mxu0 %v13765_v20  ;;  %v13820_v20 = vld [vmem:[%s17876_s1 + $0x6b0] sm:$0xff]   ;;  %v2181_v22 = vrot.slane %v2159_v18, %v14749_v41 }
  0xa8   :  { %12428 = vmatprep.subr.bf16.mxu0 %v13768_v24  ;;  %v13822_v24 = vld [vmem:[%s17876_s1 + $0x638] sm:$0xff]  }
  0xa9   :  { %12449 = vmatpush3.bf16.msra.mxu1 %v13767_v23  ;;  %v2160_v23 = vcombine.high %v15353_v19, %v15353_v19 }
  0xaa   :  { %12450 = vmatprep.subr.bf16.mxu1 %v13770_v26  ;;  %v13825_v26 = vld [vmem:[%s17876_s1 + $0x740] sm:$0xff]  }
  0xab   :  { %12429 = vmatpush3.bf16.msra.mxu0 %v13769_v25  ;;  %v2167_v25 = vrot.slane %v2151_v14, %v14749_v41  ;;  %v13858_v14 = vld [vmem:[%s17876_s1 + $0x840] sm:$0xff]  }
  0xac   :  { %12430 = vmatprep.subr.bf16.mxu0 %v13772_v28  ;;  %v13824_v28 = vld [vmem:[%s17876_s1 + $0x6b8] sm:$0xff]  }
  0xad   :  { %12451 = vmatpush3.bf16.msra.mxu1 %v13771_v27  ;;  %v2191_v27 = vcombine.high %v2181_v22, %v2181_v22 }
  0xae   :  { %12452 = vmatprep.subr.bf16.mxu1 %v13774_v30  ;;  %v13827_v30 = vld [vmem:[%s17876_s1 + $0x7c0] sm:$0xff]  }
  0xaf   :  { %12431 = vmatpush3.bf16.msra.mxu0 %v13773_v29  ;;  %v2188_v29 = vrot.slane %v2160_v23, %v14749_v41  ;;  %v13866_v23 = vld [vmem:[%s17876_s1 + $0x850] sm:$0xff]  }
  0xb0   :  { %12432 = vmatprep.subr.bf16.mxu0 %v13776_v32  ;;  %v2189_v32 = vcombine.high %v2167_v25, %v2167_v25 }
  0xb1   :  { %12453 = vmatpush3.bf16.msra.mxu1 %v13775_v31  ;;  %v13826_v31 = vld [vmem:[%s17876_s1 + $0x700] sm:$0xff]  }
  0xb2   :  { %12454 = vmatprep.subr.bf16.mxu1 %v13778_v34  ;;  %v13828_v34 = vld [vmem:[%s17876_s1 + $0x780] sm:$0xff]  }
  0xb3   :  { %12433 = vmatpush3.bf16.msra.mxu0 %v13777_v33  ;;  %v13829_v33 = vld [vmem:[%s17876_s1 + $0x748] sm:$0xff]  }
  0xb4   :  { %12434 = vmatprep.subr.bf16.mxu0 %v13780_v36  ;;  %v13831_v36 = vld [vmem:[%s17876_s1 + $0x7c8] sm:$0xff]  }
  0xb5   :  { %12455 = vmatpush3.bf16.msra.mxu1 %v13779_v35  ;;  %v2192_v35 = vcombine.high %v2188_v29, %v2188_v29 }
  0xb6   :  { %12456 = vmatprep.subr.bf16.mxu1 %v13782_v38  ;;  %v13833_v38 = vld [vmem:[%s17876_s1 + $0x750] sm:$0xff]  }
  0xb7   :  { %12435 = vmatpush3.bf16.msra.mxu0 %v13781_v37  ;;  %v13830_v37 = vld [vmem:[%s17876_s1 + $0x708] sm:$0xff]  }
  0xb8   :  { %12436 = vmatprep.subr.bf16.mxu0 %v13784_v40  ;;  %v13835_v40 = vld [vmem:[%s17876_s1 + $0x7d0] sm:$0xff]  }
  0xb9   :  { %12457 = vmatpush3.bf16.msra.mxu1 %v13783_v39  ;;  %v13832_v39 = vld [vmem:[%s17876_s1 + $0x788] sm:$0xff]  }
  0xba   :  { %12458 = vmatprep.subr.bf16.mxu1 %v13786_v43  ;;  %v13837_v43 = vld [vmem:[%s17876_s1 + $0x758] sm:$0xff]  }
  0xbb   :  { %12437 = vmatpush3.bf16.msra.mxu0 %v13785_v42  ;;  %v13834_v42 = vld [vmem:[%s17876_s1 + $0x710] sm:$0xff]  }
  0xbc   :  { %12438 = vmatprep.subr.bf16.mxu0 %v13788_v45  ;;  %v13838_v45 = vld [vmem:[%s17876_s1 + $0x718] sm:$0xff]  }
  0xbd   :  { %12459 = vmatpush3.bf16.msra.mxu1 %v13787_v44  ;;  %v13836_v44 = vld [vmem:[%s17876_s1 + $0x790] sm:$0xff]  }
  0xbe   :  { %12460 = vmatprep.subr.bf16.mxu1 %v13790_v47  ;;  %v13840_v47 = vld [vmem:[%s17876_s1 + $0x798] sm:$0xff]  }
  0xbf   :  { %12439 = vmatpush3.bf16.msra.mxu0 %v13789_v46  ;;  %v13839_v46 = vld [vmem:[%s17876_s1 + $0x7d8] sm:$0xff]  }
  0xc0   :  { %12468 = vmatprep.subr.bf16.mxu0 %v13793_v50  ;;  %v13843_v50 = vld [vmem:[%s17876_s1 + $0x7e0] sm:$0xff]  }
  0xc1   :  { %12461 = vmatpush3.bf16.msra.mxu1 %v13792_v48  ;;  %v13841_v48 = vld [vmem:[%s17876_s1 + $0x760] sm:$0xff]  }
  0xc2   :  { %9108 = vmatmul.mubr.bf16.vlgmr.msra.gmra.mrb[20].mxu0 %v2125_v49  ;;  %12490 = vmatprep.subr.bf16.mxu1 %v13795_v52  ;;  %v13842_v49 = vld [vmem:[%s17876_s1 + $0x720] sm:$0xff]   ;;  %v13845_v52 = vld [vmem:[%s17876_s1 + $0x768] sm:$0xff]  }
  0xc3   :  { %12469 = vmatpush3.bf16.msra.mxu0 %v13794_v51  ;;  %9187 = vmatprep.mubr.bf16.mxu0 %v2181_v22  ;;  %v13844_v51 = vld [vmem:[%s17876_s1 + $0x7a0] sm:$0xff]   ;;  %v13865_v22 = vld [vmem:[%s17876_s1 + $0x888] sm:$0xff]  }
  0xc4   :  { %9148 = vmatmul.mubr.bf16.vlgmr.msra.gmra.mrb[20].mxu1 %v2141_v54  ;;  %12470 = vmatprep.subr.bf16.mxu0 %v13797_v55  ;;  %v13847_v54 = vld [vmem:[%s17876_s1 + $0x7e8] sm:$0xff]  }
  0xc5   :  { %12491 = vmatpush3.bf16.msra.mxu1 %v13796_v53  ;;  %9227 = vmatprep.mubr.bf16.mxu1 %v2191_v27  ;;  %v13846_v53 = vld [vmem:[%s17876_s1 + $0x728] sm:$0xff]   ;;  %v13870_v27 = vld [vmem:[%s17876_s1 + $0x858] sm:$0xff]  }
  0xc6   :  { %12492 = vmatprep.subr.bf16.mxu1 %v13799_v57  ;;  %v13848_v55 = vld [vmem:[%s17876_s1 + $0x7a8] sm:$0xff]   ;;  %v13849_v57 = vld [vmem:[%s17876_s1 + $0x770] sm:$0xff]  }
  0xc7   :  { %12471 = vmatpush3.bf16.msra.mxu0 %v13798_v56  ;;  %v11232_v56 = vld [vmem:[%s17877_s2] ss:$0 sm:$0xff] }
  0xc8   :  { %12472 = vmatprep.subr.bf16.mxu0 %v13801_v59  ;;  %v13850_v59 = vld [vmem:[%s17876_s1 + $0x730] sm:$0xff]  }
  0xc9   :  { %12493 = vmatpush3.bf16.msra.mxu1 %v13800_v58 }
  0xca   :  { %12494 = vmatprep.subr.bf16.mxu1 %v13803_v61  ;;  %v13851_v61 = vld [vmem:[%s17876_s1 + $0x7f0] sm:$0xff]  }
  0xcb   :  { %12473 = vmatpush3.bf16.msra.mxu0 %v13802_v60 }
  0xcc   :  { %12474 = vmatprep.subr.bf16.mxu0 %v13805_v63 }
  0xcd   :  { %12495 = vmatpush3.bf16.msra.mxu1 %v13804_v62 }
  0xce   :  { %12496 = vmatprep.subr.bf16.mxu1 %v13807_v1  ;;  %v13852_v1 = vld [vmem:[%s17876_s1 + $0x7b0] sm:$0xff]  }
  0xcf   :  { %12475 = vmatpush3.bf16.msra.mxu0 %v13806_v0 }
  0xd0   :  { %12476 = vmatprep.subr.bf16.mxu0 %v13809_v3 }
  0xd1   :  { %12497 = vmatpush3.bf16.msra.mxu1 %v13808_v2  ;;  %v13853_v2 = vld [vmem:[%s17876_s1 + $0x778] sm:$0xff]  }
  0xd2   :  { %12498 = vmatprep.subr.bf16.mxu1 %v13811_v5 }
  0xd3   :  { %12477 = vmatpush3.bf16.msra.mxu0 %v13810_v4 }
  0xd4   :  { %12478 = vmatprep.subr.bf16.mxu0 %v13813_v7  ;;  %v13854_v7 = vld [vmem:[%s17876_s1 + $0x738] sm:$0xff]  }
  0xd5   :  { %12499 = vmatpush3.bf16.msra.mxu1 %v13812_v6 }
  0xd6   :  { %12500 = vmatprep.subr.bf16.mxu1 %v13815_v9  ;;  %v13855_v9 = vld [vmem:[%s17876_s1 + $0x7f8] sm:$0xff]  }
  0xd7   :  { %12479 = vmatpush3.bf16.msra.mxu0 %v13814_v8 }
  0xd8   :  { %12480 = vmatprep.subr.bf16.mxu0 %v13817_v11 }
  0xd9   :  { %12501 = vmatpush3.bf16.msra.mxu1 %v13816_v10 }
  0xda   :  { %12502 = vmatprep.subr.bf16.mxu1 %v13819_v13  ;;  %v2174_v13 = vrot.slane %v15353_v19, %v14749_v41  ;;  %v13862_v19 = vld [vmem:[%s17876_s1 + $0x848] sm:$0xff]  }
  0xdb   :  { %12481 = vmatpush3.bf16.msra.mxu0 %v13818_v16  ;;  %v13860_v16 = vld [vmem:[%s17876_s1 + $0x8c0] sm:$0xff]  }
  0xdc   :  { %12482 = vmatprep.subr.bf16.mxu0 %v13821_v17  ;;  %v13861_v17 = vld [vmem:[%s17876_s1 + $0x880] sm:$0xff]   ;;  %v2190_v18 = vcombine.high %v2174_v13, %v2174_v13 }
  0xdd   :  { %12503 = vmatpush3.bf16.msra.mxu1 %v13820_v20  ;;  %v13863_v20 = vld [vmem:[%s17876_s1 + $0x808] sm:$0xff]  }
  0xde   :  { %12504 = vmatprep.subr.bf16.mxu1 %v13823_v21  ;;  %v13864_v21 = vld [vmem:[%s17876_s1 + $0x8c8] sm:$0xff]  }
  0xdf   :  { %12483 = vmatpush3.bf16.msra.mxu0 %v13822_v24  ;;  %v13867_v24 = vld [vmem:[%s17876_s1 + $0x810] sm:$0xff]  }
  0xe0   :  { %12512 = vmatprep.subr.bf16.mxu0 %v13825_v26  ;;  %v13869_v26 = vld [vmem:[%s17876_s1 + $0x890] sm:$0xff]  }
  0xe1   :  { %12505 = vmatpush3.bf16.msra.mxu1 %v13824_v28  ;;  %v13871_v28 = vld [vmem:[%s17876_s1 + $0x818] sm:$0xff]  }
  0xe2   :  { %9188 = vmatmul.mubr.bf16.vlgmr.msra.gmra.mrb[24].mxu0 %v2167_v25  ;;  %12534 = vmatprep.subr.bf16.mxu1 %v13827_v30  ;;  %v13868_v25 = vld [vmem:[%s17876_s1 + $0x8d0] sm:$0xff]   ;;  %v13873_v30 = vld [vmem:[%s17876_s1 + $0x898] sm:$0xff]  }
  0xe3   :  { %12513 = vmatpush3.bf16.msra.mxu0 %v13826_v31  ;;  %9267 = vmatprep.mubr.bf16.mxu0 %v2188_v29  ;;  %v13872_v29 = vld [vmem:[%s17876_s1 + $0x8d8] sm:$0xff]   ;;  %v13874_v31 = vld [vmem:[%s17876_s1 + $0x860] sm:$0xff]  }
  0xe4   :  { %9228 = vmatmul.mubr.bf16.vlgmr.msra.gmra.mrb[24].mxu1 %v2189_v32  ;;  %12514 = vmatprep.subr.bf16.mxu0 %v13829_v33  ;;  %v13875_v32 = vld [vmem:[%s17876_s1 + $0x820] sm:$0xff]  }
  0xe5   :  { %12535 = vmatpush3.bf16.msra.mxu1 %v13828_v34  ;;  %9307 = vmatprep.mubr.bf16.mxu1 %v2192_v35  ;;  %v13876_v33 = vld [vmem:[%s17876_s1 + $0x8e0] sm:$0xff]   ;;  %v13878_v35 = vld [vmem:[%s17876_s1 + $0x868] sm:$0xff]  }
  0xe6   :  { %12536 = vmatprep.subr.bf16.mxu1 %v13831_v36  ;;  %v13877_v34 = vld [vmem:[%s17876_s1 + $0x8a0] sm:$0xff]   ;;  %v13879_v36 = vld [vmem:[%s17876_s1 + $0x828] sm:$0xff]  }
  0xe7   :  { %12515 = vmatpush3.bf16.msra.mxu0 %v13830_v37  ;;  %v13880_v37 = vld [vmem:[%s17876_s1 + $0x8e8] sm:$0xff]  }
  0xe8   :  { %12516 = vmatprep.subr.bf16.mxu0 %v13833_v38  ;;  %v13881_v38 = vld [vmem:[%s17876_s1 + $0x8a8] sm:$0xff]  }
  0xe9   :  { %12537 = vmatpush3.bf16.msra.mxu1 %v13832_v39  ;;  %v13882_v39 = vld [vmem:[%s17876_s1 + $0x870] sm:$0xff]  }
  0xea   :  { %12538 = vmatprep.subr.bf16.mxu1 %v13835_v40 }
  0xeb   :  { %12517 = vmatpush3.bf16.msra.mxu0 %v13834_v42  ;;  %v13883_v42 = vld [vmem:[%s17876_s1 + $0x830] sm:$0xff]  }
  0xec   :  { %12518 = vmatprep.subr.bf16.mxu0 %v13837_v43  ;;  %v13884_v43 = vld [vmem:[%s17876_s1 + $0x8f0] sm:$0xff]  }
  0xed   :  { %12539 = vmatpush3.bf16.msra.mxu1 %v13836_v44 }
  0xee   :  { %12540 = vmatprep.subr.bf16.mxu1 %v13839_v46 }
  0xef   :  { %12519 = vmatpush3.bf16.msra.mxu0 %v13838_v45  ;;  %v26_v45 = vld [vmem:[%s17875_s0 + $0x20] sm:$0xff] }
  0xf0   :  { %12520 = vmatprep.subr.bf16.mxu0 %v13841_v48 }
  0xf1   :  { %12541 = vmatpush3.bf16.msra.mxu1 %v13840_v47 }
  0xf2   :  { %12542 = vmatprep.subr.bf16.mxu1 %v13843_v50  ;;  %v13886_v50 = vld [vmem:[%s17876_s1 + $0x878] sm:$0xff]  }
  0xf3   :  { %12521 = vmatpush3.bf16.msra.mxu0 %v13842_v49  ;;  %v13885_v49 = vld [vmem:[%s17876_s1 + $0x8b0] sm:$0xff]  }
  0xf4   :  { %12522 = vmatprep.subr.bf16.mxu0 %v13845_v52  ;;  %v2193_v52 = vcombine.high %v26_v45, %v26_v45 }
  0xf5   :  { %v12220_v58 = vpop.f32.mrb[0].mxu0  ;;  %12543 = vmatpush3.bf16.msra.mxu1 %v13844_v51  ;;  %v2200_v51 = vrot.slane %v26_v45, %v14749_v41 }
  0xf6   :  { %v12221_v60 = vpop.f32.mrb[1].mxu0  ;;  %12544 = vmatprep.subr.bf16.mxu1 %v13847_v54 }
  0xf7   :  { %v12222_v62 = vadd.f32 %v12221_v60, %v12220_v58  ;;  %v12223_v63 = vpop.f32.mrb[2].mxu0  ;;  %v12242_v0 = vpop.f32.mrb[0].mxu1  ;;  %12523 = vmatpush3.bf16.msra.mxu0 %v13846_v53  ;;  %v2208_v58 = vcombine.high %v2200_v51, %v2200_v51  ;;  %v13888_v60 = vld [vmem:[%s17876_s1 + $0x8f8] sm:$0xff]  }
  0xf8   :  { %v12224_v3 = vpop.f32.mrb[3].mxu0  ;;  %v12243_v4 = vpop.f32.mrb[1].mxu1  ;;  %12524 = vmatprep.subr.bf16.mxu0 %v13849_v57  ;;  %v13887_v57 = vld [vmem:[%s17876_s1 + $0x838] sm:$0xff]  }
  0xf9   :  { %v8710_v5 = vadd.f32 %v12222_v62, %v11232_v56  ;;  %v12244_v6 = vadd.f32 %v12243_v4, %v12242_v0  ;;  %12545 = vmatpush3.bf16.msra.mxu1 %v13848_v55  ;;  %v12245_v8 = vpop.f32.mrb[2].mxu1  ;;  %v15574_v62 = vrot.slane %v2193_v52, %v14749_v41  ;;  %v2230_v0 = vrot.slane %v2208_v58, %v14749_v41  ;;  %v13890_v3 = vld [vmem:[%s17876_s1 + $0x940] sm:$0xff]   ;;  %v13922_v52 = vld [vmem:[%s17876_s1 + $0x9b8] sm:$0xff]  }
  0xfa   :  { %12546 = vmatprep.subr.bf16.mxu1 %v13851_v61  ;;  %v12246_v10 = vpop.f32.mrb[3].mxu1 }
  0xfb   :  { %v15468_v11 = vadd.f32 %v12244_v6, %v8710_v5  ;;  %12525 = vmatpush3.bf16.msra.mxu0 %v13850_v59  ;;  %v2209_v4 = vcombine.high %v15574_v62, %v15574_v62  ;;  %v2240_v5 = vcombine.high %v2230_v0, %v2230_v0  ;;  %v13891_v6 = vld [vmem:[%s17876_s1 + $0x900] sm:$0xff]  }
  0xfc   :  { %12526 = vmatprep.subr.bf16.mxu0 %v13853_v2  ;;  %v2216_v2 = vrot.slane %v2200_v51, %v14749_v41 }
  0xfd   :  { %12547 = vmatpush3.bf16.msra.mxu1 %v13852_v1  ;;  %v13889_v1 = vld [vmem:[%s17876_s1 + $0x8b8] sm:$0xff]   ;;  %v2237_v8 = vrot.slane %v2209_v4, %v14749_v41 }
  0xfe   :  { %12548 = vmatprep.subr.bf16.mxu1 %v13855_v9  ;;  %v13893_v9 = vld [vmem:[%s17876_s1 + $0x980] sm:$0xff]   ;;  %v2238_v10 = vcombine.high %v2216_v2, %v2216_v2  ;;  %v13936_v4 = vld [vmem:[%s17876_s1 + $0xa18] sm:$0xff]  }
  0xff   :  { %12527 = vmatpush3.bf16.msra.mxu0 %v13854_v7  ;;  %v13892_v7 = vld [vmem:[%s17876_s1 + $0x9c0] sm:$0xff]  }
 0x100   :  { %12556 = vmatprep.subr.bf16.mxu0 %v13858_v14  ;;  %v13896_v14 = vld [vmem:[%s17876_s1 + $0x9c8] sm:$0xff]  }
 0x101   :  { %12549 = vmatpush3.bf16.msra.mxu1 %v13857_v12  ;;  %v13895_v12 = vld [vmem:[%s17876_s1 + $0x908] sm:$0xff]  }
 0x102   :  { %9268 = vmatmul.mubr.bf16.vlgmr.msra.gmra.mrb[28].mxu0 %v2174_v13  ;;  %12578 = vmatprep.subr.bf16.mxu1 %v13860_v16  ;;  %v2241_v13 = vcombine.high %v2237_v8, %v2237_v8  ;;  %v13898_v16 = vld [vmem:[%s17876_s1 + $0x950] sm:$0xff]  }
 0x103   :  { %12557 = vmatpush3.bf16.msra.mxu0 %v13859_v15  ;;  %9347 = vmatprep.mubr.bf16.mxu0 %v2230_v0  ;;  %v13897_v15 = vld [vmem:[%s17876_s1 + $0x988] sm:$0xff]   ;;  %v13932_v0 = vld [vmem:[%s17876_s1 + $0xa10] sm:$0xff]  }
 0x104   :  { %9308 = vmatmul.mubr.bf16.vlgmr.msra.gmra.mrb[28].mxu1 %v2190_v18  ;;  %12558 = vmatprep.subr.bf16.mxu0 %v13862_v19  ;;  %v13900_v18 = vld [vmem:[%s17876_s1 + $0x9d0] sm:$0xff]  }
 0x105   :  { %12579 = vmatpush3.bf16.msra.mxu1 %v13861_v17  ;;  %9387 = vmatprep.mubr.bf16.mxu1 %v2240_v5  ;;  %v13899_v17 = vld [vmem:[%s17876_s1 + $0x910] sm:$0xff]   ;;  %v13937_v5 = vld [vmem:[%s17876_s1 + $0xad8] sm:$0xff]  }
 0x106   :  { %12580 = vmatprep.subr.bf16.mxu1 %v13864_v21  ;;  %v13901_v19 = vld [vmem:[%s17876_s1 + $0x990] sm:$0xff]   ;;  %v13903_v21 = vld [vmem:[%s17876_s1 + $0x918] sm:$0xff]  }
 0x107   :  { %12559 = vmatpush3.bf16.msra.mxu0 %v13863_v20  ;;  %v13902_v20 = vld [vmem:[%s17876_s1 + $0x958] sm:$0xff]  }
 0x108   :  { %12560 = vmatprep.subr.bf16.mxu0 %v13866_v23  ;;  %v13905_v23 = vld [vmem:[%s17876_s1 + $0x998] sm:$0xff]  }
 0x109   :  { %12581 = vmatpush3.bf16.msra.mxu1 %v13865_v22  ;;  %v13904_v22 = vld [vmem:[%s17876_s1 + $0x9d8] sm:$0xff]  }
 0x10a   :  { %12582 = vmatprep.subr.bf16.mxu1 %v13868_v25  ;;  %v13907_v25 = vld [vmem:[%s17876_s1 + $0x920] sm:$0xff]  }
 0x10b   :  { %12561 = vmatpush3.bf16.msra.mxu0 %v13867_v24  ;;  %v13906_v24 = vld [vmem:[%s17876_s1 + $0x960] sm:$0xff]  }
 0x10c   :  { %12562 = vmatprep.subr.bf16.mxu0 %v13870_v27  ;;  %v13909_v27 = vld [vmem:[%s17876_s1 + $0x9a0] sm:$0xff]  }
 0x10d   :  { %12583 = vmatpush3.bf16.msra.mxu1 %v13869_v26  ;;  %v13908_v26 = vld [vmem:[%s17876_s1 + $0x9e0] sm:$0xff]  }
 0x10e   :  { %12584 = vmatprep.subr.bf16.mxu1 %v13872_v29  ;;  %v13911_v29 = vld [vmem:[%s17876_s1 + $0x928] sm:$0xff]  }
 0x10f   :  { %12563 = vmatpush3.bf16.msra.mxu0 %v13871_v28  ;;  %v13910_v28 = vld [vmem:[%s17876_s1 + $0x968] sm:$0xff]  }
 0x110   :  { %12564 = vmatprep.subr.bf16.mxu0 %v13874_v31  ;;  %v13913_v31 = vld [vmem:[%s17876_s1 + $0x9a8] sm:$0xff]  }
 0x111   :  { %12585 = vmatpush3.bf16.msra.mxu1 %v13873_v30  ;;  %v13912_v30 = vld [vmem:[%s17876_s1 + $0x9e8] sm:$0xff]  }
 0x112   :  { %12586 = vmatprep.subr.bf16.mxu1 %v13876_v33 }
 0x113   :  { %12565 = vmatpush3.bf16.msra.mxu0 %v13875_v32  ;;  %v13914_v32 = vld [vmem:[%s17876_s1 + $0x970] sm:$0xff]  }
 0x114   :  { %12566 = vmatprep.subr.bf16.mxu0 %v13878_v35 }
 0x115   :  { %v12264_v40 = vpop.f32.mrb[4].mxu0  ;;  %12587 = vmatpush3.bf16.msra.mxu1 %v13877_v34  ;;  %v13915_v34 = vld [vmem:[%s17876_s1 + $0x930] sm:$0xff]  }
 0x116   :  { %v12265_v44 = vpop.f32.mrb[5].mxu0  ;;  %12588 = vmatprep.subr.bf16.mxu1 %v13880_v37 }
 0x117   :  { %v12266_v46 = vadd.f32 %v12265_v44, %v12264_v40  ;;  %v12267_v47 = vpop.f32.mrb[6].mxu0  ;;  %v12286_v48 = vpop.f32.mrb[4].mxu1  ;;  %12567 = vmatpush3.bf16.msra.mxu0 %v13879_v36  ;;  %v13916_v36 = vld [vmem:[%s17876_s1 + $0x9f0] sm:$0xff]  }
 0x118   :  { %v12268_v53 = vpop.f32.mrb[7].mxu0  ;;  %v12287_v54 = vpop.f32.mrb[5].mxu1  ;;  %12568 = vmatprep.subr.bf16.mxu0 %v13882_v39  ;;  %v13917_v40 = vld [vmem:[%s17876_s1 + $0x9b0] sm:$0xff]   ;;  %v13919_v47 = vld [vmem:[%s17876_s1 + $0x938] sm:$0xff]  }
 0x119   :  { %v8790_v55 = vadd.f32 %v12266_v46, %v15468_v11  ;;  %v12288_v56 = vadd.f32 %v12287_v54, %v12286_v48  ;;  %12589 = vmatpush3.bf16.msra.mxu1 %v13881_v38  ;;  %v12289_v59 = vpop.f32.mrb[6].mxu1  ;;  %v13894_v11 = vld [vmem:[%s17876_s1 + $0x948] sm:$0xff]   ;;  %v2223_v53 = vrot.slane %v15574_v62, %v14749_v41  ;;  %v13923_v54 = vld [vmem:[%s17876_s1 + $0xa40] sm:$0xff]  }
 0x11a   :  { %12590 = vmatprep.subr.bf16.mxu1 %v13884_v43  ;;  %v12290_v61 = vpop.f32.mrb[7].mxu1  ;;  %v13927_v59 = vld [vmem:[%s17876_s1 + $0xa48] sm:$0xff]  }
 0x11b   :  { %v15576_v63 = vadd.f32 %v12288_v56, %v8790_v55  ;;  %12569 = vmatpush3.bf16.msra.mxu0 %v13883_v42  ;;  %v13918_v42 = vld [vmem:[%s17876_s1 + $0x978] sm:$0xff]   ;;  %v13924_v55 = vld [vmem:[%s17876_s1 + $0xa00] sm:$0xff]   ;;  %v2239_v58 = vcombine.high %v2223_v53, %v2223_v53  ;;  %v13929_v61 = vld [vmem:[%s17876_s1 + $0xac8] sm:$0xff]  }
 0x11c   :  { %12570 = vmatprep.subr.bf16.mxu0 %v13886_v50  ;;  %v13925_v56 = vld [vmem:[%s17876_s1 + $0xac0] sm:$0xff]   ;;  %v13930_v62 = vld [vmem:[%s17876_s1 + $0xa88] sm:$0xff]  }
 0x11d   :  { %12591 = vmatpush3.bf16.msra.mxu1 %v13885_v49  ;;  %v13920_v49 = vld [vmem:[%s17876_s1 + $0x9f8] sm:$0xff]  }
 0x11e   :  { %12592 = vmatprep.subr.bf16.mxu1 %v13888_v60  ;;  %v13928_v60 = vld [vmem:[%s17876_s1 + $0xa08] sm:$0xff]  }
 0x11f   :  { %12571 = vmatpush3.bf16.msra.mxu0 %v13887_v57  ;;  %v13926_v57 = vld [vmem:[%s17876_s1 + $0xa80] sm:$0xff]  }
 0x120   :  { %12600 = vmatprep.subr.bf16.mxu0 %v13890_v3  ;;  %v13935_v3 = vld [vmem:[%s17876_s1 + $0xa58] sm:$0xff]  }
 0x121   :  { %12593 = vmatpush3.bf16.msra.mxu1 %v13889_v1  ;;  %v13933_v1 = vld [vmem:[%s17876_s1 + $0xad0] sm:$0xff]  }
 0x122   :  { %9348 = vmatmul.mubr.bf16.vlgmr.msra.gmra.mrb[32].mxu0 %v2216_v2  ;;  %12622 = vmatprep.subr.bf16.mxu1 %v13892_v7  ;;  %v13934_v2 = vld [vmem:[%s17876_s1 + $0xa90] sm:$0xff]   ;;  %v13939_v7 = vld [vmem:[%s17876_s1 + $0xa60] sm:$0xff]  }
 0x123   :  { %12601 = vmatpush3.bf16.msra.mxu0 %v13891_v6  ;;  %9427 = vmatprep.mubr.bf16.mxu0 %v2237_v8  ;;  %v13938_v6 = vld [vmem:[%s17876_s1 + $0xa98] sm:$0xff]   ;;  %v13940_v8 = vld [vmem:[%s17876_s1 + $0xa20] sm:$0xff]  }
 0x124   :  { %9388 = vmatmul.mubr.bf16.vlgmr.msra.gmra.mrb[32].mxu1 %v2238_v10  ;;  %12602 = vmatprep.subr.bf16.mxu0 %v13894_v11  ;;  %v13942_v10 = vld [vmem:[%s17876_s1 + $0xaa0] sm:$0xff]   ;;  %v13943_v11 = vld [vmem:[%s17876_s1 + $0xa68] sm:$0xff]  }
 0x125   :  { %12623 = vmatpush3.bf16.msra.mxu1 %v13893_v9  ;;  %9467 = vmatprep.mubr.bf16.mxu1 %v2241_v13  ;;  %v13941_v9 = vld [vmem:[%s17876_s1 + $0xae0] sm:$0xff]   ;;  %v13945_v13 = vld [vmem:[%s17876_s1 + $0xae8] sm:$0xff]  }
 0x126   :  { %12624 = vmatprep.subr.bf16.mxu1 %v13896_v14  ;;  %v13946_v14 = vld [vmem:[%s17876_s1 + $0xaa8] sm:$0xff]  }
 0x127   :  { %12603 = vmatpush3.bf16.msra.mxu0 %v13895_v12  ;;  %v13944_v12 = vld [vmem:[%s17876_s1 + $0xa28] sm:$0xff]  }
 0x128   :  { %12604 = vmatprep.subr.bf16.mxu0 %v13898_v16 }
 0x129   :  { %12625 = vmatpush3.bf16.msra.mxu1 %v13897_v15  ;;  %v13947_v15 = vld [vmem:[%s17876_s1 + $0xa70] sm:$0xff]  }
 0x12a   :  { %12626 = vmatprep.subr.bf16.mxu1 %v13900_v18 }
 0x12b   :  { %12605 = vmatpush3.bf16.msra.mxu0 %v13899_v17  ;;  %v13948_v17 = vld [vmem:[%s17876_s1 + $0xa30] sm:$0xff]  }
 0x12c   :  { %12606 = vmatprep.subr.bf16.mxu0 %v13902_v20 }
 0x12d   :  { %12627 = vmatpush3.bf16.msra.mxu1 %v13901_v19  ;;  %v13949_v19 = vld [vmem:[%s17876_s1 + $0xaf0] sm:$0xff]  }
 0x12e   :  { %12628 = vmatprep.subr.bf16.mxu1 %v13904_v22 }
 0x12f   :  { %12607 = vmatpush3.bf16.msra.mxu0 %v13903_v21 }
 0x130   :  { %12608 = vmatprep.subr.bf16.mxu0 %v13906_v24  ;;  %v13951_v24 = vld [vmem:[%s17876_s1 + $0xa78] sm:$0xff]  }
 0x131   :  { %12629 = vmatpush3.bf16.msra.mxu1 %v13905_v23  ;;  %v13950_v23 = vld [vmem:[%s17876_s1 + $0xab0] sm:$0xff]  }
 0x132   :  { %12630 = vmatprep.subr.bf16.mxu1 %v13908_v26 }
 0x133   :  { %12609 = vmatpush3.bf16.msra.mxu0 %v13907_v25  ;;  %v27_v25 = vld [vmem:[%s17875_s0 + $0x28] sm:$0xff] }
 0x134   :  { %12610 = vmatprep.subr.bf16.mxu0 %v13910_v28  ;;  %v2249_v28 = vrot.slane %v27_v25, %v14749_v41 }
 0x135   :  { %v12308_v33 = vpop.f32.mrb[8].mxu0  ;;  %12631 = vmatpush3.bf16.msra.mxu1 %v13909_v27 }
 0x136   :  { %v12309_v35 = vpop.f32.mrb[9].mxu0  ;;  %12632 = vmatprep.subr.bf16.mxu1 %v13912_v30 }
 0x137   :  { %v12310_v37 = vadd.f32 %v12309_v35, %v12308_v33  ;;  %v12311_v38 = vpop.f32.mrb[10].mxu0  ;;  %v12330_v39 = vpop.f32.mrb[8].mxu1  ;;  %12611 = vmatpush3.bf16.msra.mxu0 %v13911_v29  ;;  %v2242_v29 = vcombine.high %v27_v25, %v27_v25  ;;  %v2257_v35 = vcombine.high %v2249_v28, %v2249_v28 }
 0x138   :  { %v12312_v43 = vpop.f32.mrb[11].mxu0  ;;  %v12331_v44 = vpop.f32.mrb[9].mxu1  ;;  %12612 = vmatprep.subr.bf16.mxu0 %v13914_v32  ;;  %v13952_v32 = vld [vmem:[%s17876_s1 + $0xa38] sm:$0xff]  }
 0x139   :  { %v8870_v45 = vadd.f32 %v12310_v37, %v15576_v63  ;;  %v12332_v46 = vadd.f32 %v12331_v44, %v12330_v39  ;;  %12633 = vmatpush3.bf16.msra.mxu1 %v13913_v31  ;;  %v12333_v48 = vpop.f32.mrb[10].mxu1  ;;  %v13931_v63 = vld [vmem:[%s17876_s1 + $0xa50] sm:$0xff]   ;;  %v15786_v37 = vrot.slane %v2242_v29, %v14749_v41  ;;  %v13954_v39 = vld [vmem:[%s17876_s1 + $0xab8] sm:$0xff]   ;;  %v13955_v43 = vld [vmem:[%s17876_s1 + $0xb40] sm:$0xff]  }
 0x13a   :  { %12634 = vmatprep.subr.bf16.mxu1 %v13916_v36  ;;  %v12334_v50 = vpop.f32.mrb[11].mxu1  ;;  %v13988_v29 = vld [vmem:[%s17876_s1 + $0xc40] sm:$0xff]  }
 0x13b   :  { %v15680_v51 = vadd.f32 %v12332_v46, %v8870_v45  ;;  %12613 = vmatpush3.bf16.msra.mxu0 %v13915_v34  ;;  %v13953_v34 = vld [vmem:[%s17876_s1 + $0xaf8] sm:$0xff]   ;;  %v2258_v44 = vcombine.high %v15786_v37, %v15786_v37  ;;  %v13956_v45 = vld [vmem:[%s17876_s1 + $0xb00] sm:$0xff]  }
 0x13c   :  { %12614 = vmatprep.subr.bf16.mxu0 %v13918_v42  ;;  %v2265_v42 = vrot.slane %v2249_v28, %v14749_v41  ;;  %v2272_v28 = vrot.slane %v15786_v37, %v14749_v41  ;;  %v13995_v37 = vld [vmem:[%s17876_s1 + $0xc88] sm:$0xff]  }
 0x13d   :  { %12635 = vmatpush3.bf16.msra.mxu1 %v13917_v40  ;;  %v2279_v40 = vrot.slane %v2257_v35, %v14749_v41  ;;  %v2286_v48 = vrot.slane %v2258_v44, %v14749_v41  ;;  %v13993_v35 = vld [vmem:[%s17876_s1 + $0xc08] sm:$0xff]   ;;  %v14001_v44 = vld [vmem:[%s17876_s1 + $0xc18] sm:$0xff]  }
 0x13e   :  { %12636 = vmatprep.subr.bf16.mxu1 %v13920_v49  ;;  %v13958_v49 = vld [vmem:[%s17876_s1 + $0xb80] sm:$0xff]   ;;  %v2287_v50 = vcombine.high %v2265_v42, %v2265_v42 }
 0x13f   :  { %12615 = vmatpush3.bf16.msra.mxu0 %v13919_v47  ;;  %v2289_v46 = vcombine.high %v2279_v40, %v2279_v40  ;;  %v13957_v47 = vld [vmem:[%s17876_s1 + $0xbc0] sm:$0xff]  }
 0x140   :  { %12644 = vmatprep.subr.bf16.mxu0 %v13923_v54  ;;  %v13961_v54 = vld [vmem:[%s17876_s1 + $0xbc8] sm:$0xff]  }
 0x141   :  { %12637 = vmatpush3.bf16.msra.mxu1 %v13922_v52  ;;  %v13960_v52 = vld [vmem:[%s17876_s1 + $0xb08] sm:$0xff]  }
 0x142   :  { %9428 = vmatmul.mubr.bf16.vlgmr.msra.gmra.mrb[36].mxu0 %v2223_v53  ;;  %12666 = vmatprep.subr.bf16.mxu1 %v13925_v56  ;;  %v2290_v53 = vcombine.high %v2286_v48, %v2286_v48  ;;  %v13963_v56 = vld [vmem:[%s17876_s1 + $0xb50] sm:$0xff]  }
 0x143   :  { %12645 = vmatpush3.bf16.msra.mxu0 %v13924_v55  ;;  %9507 = vmatprep.mubr.bf16.mxu0 %v2279_v40  ;;  %v13962_v55 = vld [vmem:[%s17876_s1 + $0xb88] sm:$0xff]   ;;  %v13998_v40 = vld [vmem:[%s17876_s1 + $0xcd0] sm:$0xff]  }
 0x144   :  { %9468 = vmatmul.mubr.bf16.vlgmr.msra.gmra.mrb[36].mxu1 %v2239_v58  ;;  %12646 = vmatprep.subr.bf16.mxu0 %v13927_v59  ;;  %v13965_v58 = vld [vmem:[%s17876_s1 + $0xbd0] sm:$0xff]  }
 0x145   :  { %12667 = vmatpush3.bf16.msra.mxu1 %v13926_v57  ;;  %9547 = vmatprep.mubr.bf16.mxu1 %v2289_v46  ;;  %v13964_v57 = vld [vmem:[%s17876_s1 + $0xb10] sm:$0xff]   ;;  %v14003_v46 = vld [vmem:[%s17876_s1 + $0xc98] sm:$0xff]  }
 0x146   :  { %12668 = vmatprep.subr.bf16.mxu1 %v13929_v61  ;;  %v13966_v59 = vld [vmem:[%s17876_s1 + $0xb90] sm:$0xff]   ;;  %v13968_v61 = vld [vmem:[%s17876_s1 + $0xb18] sm:$0xff]  }
 0x147   :  { %12647 = vmatpush3.bf16.msra.mxu0 %v13928_v60  ;;  %v13967_v60 = vld [vmem:[%s17876_s1 + $0xb58] sm:$0xff]  }
 0x148   :  { %12648 = vmatprep.subr.bf16.mxu0 %v13931_v63  ;;  %v13970_v63 = vld [vmem:[%s17876_s1 + $0xb98] sm:$0xff]  }
 0x149   :  { %12669 = vmatpush3.bf16.msra.mxu1 %v13930_v62  ;;  %v13969_v62 = vld [vmem:[%s17876_s1 + $0xbd8] sm:$0xff]  }
 0x14a   :  { %12670 = vmatprep.subr.bf16.mxu1 %v13933_v1  ;;  %v13972_v1 = vld [vmem:[%s17876_s1 + $0xb20] sm:$0xff]  }
 0x14b   :  { %12649 = vmatpush3.bf16.msra.mxu0 %v13932_v0  ;;  %v13971_v0 = vld [vmem:[%s17876_s1 + $0xb60] sm:$0xff]  }
 0x14c   :  { %12650 = vmatprep.subr.bf16.mxu0 %v13935_v3  ;;  %v13974_v3 = vld [vmem:[%s17876_s1 + $0xba0] sm:$0xff]  }
 0x14d   :  { %12671 = vmatpush3.bf16.msra.mxu1 %v13934_v2  ;;  %v13973_v2 = vld [vmem:[%s17876_s1 + $0xbe0] sm:$0xff]  }
 0x14e   :  { %12672 = vmatprep.subr.bf16.mxu1 %v13937_v5  ;;  %v13976_v5 = vld [vmem:[%s17876_s1 + $0xb28] sm:$0xff]  }
 0x14f   :  { %12651 = vmatpush3.bf16.msra.mxu0 %v13936_v4  ;;  %v13975_v4 = vld [vmem:[%s17876_s1 + $0xb68] sm:$0xff]  }
 0x150   :  { %12652 = vmatprep.subr.bf16.mxu0 %v13939_v7  ;;  %v13978_v7 = vld [vmem:[%s17876_s1 + $0xba8] sm:$0xff]  }
 0x151   :  { %12673 = vmatpush3.bf16.msra.mxu1 %v13938_v6  ;;  %v13977_v6 = vld [vmem:[%s17876_s1 + $0xbe8] sm:$0xff]  }
 0x152   :  { %12674 = vmatprep.subr.bf16.mxu1 %v13941_v9 }
 0x153   :  { %12653 = vmatpush3.bf16.msra.mxu0 %v13940_v8  ;;  %v13979_v8 = vld [vmem:[%s17876_s1 + $0xb70] sm:$0xff]  }
 0x154   :  { %12654 = vmatprep.subr.bf16.mxu0 %v13943_v11 }
 0x155   :  { %v12352_v16 = vpop.f32.mrb[12].mxu0  ;;  %12675 = vmatpush3.bf16.msra.mxu1 %v13942_v10  ;;  %v13980_v10 = vld [vmem:[%s17876_s1 + $0xb30] sm:$0xff]  }
 0x156   :  { %v12353_v18 = vpop.f32.mrb[13].mxu0  ;;  %12676 = vmatprep.subr.bf16.mxu1 %v13945_v13 }
 0x157   :  { %v12354_v20 = vadd.f32 %v12353_v18, %v12352_v16  ;;  %v12355_v21 = vpop.f32.mrb[14].mxu0  ;;  %v12374_v22 = vpop.f32.mrb[12].mxu1  ;;  %12655 = vmatpush3.bf16.msra.mxu0 %v13944_v12  ;;  %v13981_v12 = vld [vmem:[%s17876_s1 + $0xbf0] sm:$0xff]  }
 0x158   :  { %v12356_v26 = vpop.f32.mrb[15].mxu0  ;;  %v12375_v27 = vpop.f32.mrb[13].mxu1  ;;  %12656 = vmatprep.subr.bf16.mxu0 %v13947_v15  ;;  %v13982_v16 = vld [vmem:[%s17876_s1 + $0xbb0] sm:$0xff]  }
 0x159   :  { %v8950_v30 = vadd.f32 %v12354_v20, %v15680_v51  ;;  %v12376_v31 = vadd.f32 %v12375_v27, %v12374_v22  ;;  %12677 = vmatpush3.bf16.msra.mxu1 %v13946_v14  ;;  %v12377_v33 = vpop.f32.mrb[14].mxu1  ;;  %v13959_v51 = vld [vmem:[%s17876_s1 + $0xb48] sm:$0xff]   ;;  %v13984_v22 = vld [vmem:[%s17876_s1 + $0xb38] sm:$0xff]  }
 0x15a   :  { %12678 = vmatprep.subr.bf16.mxu1 %v13949_v19  ;;  %v12378_v36 = vpop.f32.mrb[15].mxu1  ;;  %v13987_v27 = vld [vmem:[%s17876_s1 + $0xbb8] sm:$0xff]   ;;  %v2288_v33 = vcombine.high %v2272_v28, %v2272_v28 }
 0x15b   :  { %v15788_v38 = vadd.f32 %v12376_v31, %v8950_v30  ;;  %12657 = vmatpush3.bf16.msra.mxu0 %v13948_v17  ;;  %v13983_v17 = vld [vmem:[%s17876_s1 + $0xb78] sm:$0xff]   ;;  %v13989_v30 = vld [vmem:[%s17876_s1 + $0xc00] sm:$0xff]   ;;  %v13994_v36 = vld [vmem:[%s17876_s1 + $0xcc8] sm:$0xff]  }
 0x15c   :  { %12658 = vmatprep.subr.bf16.mxu0 %v13951_v24  ;;  %v13985_v24 = vld [vmem:[%s17876_s1 + $0xbf8] sm:$0xff]   ;;  %v13990_v31 = vld [vmem:[%s17876_s1 + $0xcc0] sm:$0xff]  }
 0x15d   :  { %12679 = vmatpush3.bf16.msra.mxu1 %v13950_v23 }
 0x15e   :  { %12680 = vmatprep.subr.bf16.mxu1 %v13953_v34  ;;  %v13992_v34 = vld [vmem:[%s17876_s1 + $0xc48] sm:$0xff]  }
 0x15f   :  { %12659 = vmatpush3.bf16.msra.mxu0 %v13952_v32  ;;  %v13991_v32 = vld [vmem:[%s17876_s1 + $0xc80] sm:$0xff]  }
 0x160   :  { %12688 = vmatprep.subr.bf16.mxu0 %v13955_v43  ;;  %v14000_v43 = vld [vmem:[%s17876_s1 + $0xc58] sm:$0xff]  }
 0x161   :  { %12681 = vmatpush3.bf16.msra.mxu1 %v13954_v39  ;;  %v13997_v39 = vld [vmem:[%s17876_s1 + $0xc10] sm:$0xff]  }
 0x162   :  { %9508 = vmatmul.mubr.bf16.vlgmr.msra.gmra.mrb[40].mxu0 %v2265_v42  ;;  %12710 = vmatprep.subr.bf16.mxu1 %v13957_v47  ;;  %v13999_v42 = vld [vmem:[%s17876_s1 + $0xc90] sm:$0xff]   ;;  %v14004_v47 = vld [vmem:[%s17876_s1 + $0xc60] sm:$0xff]  }
 0x163   :  { %12689 = vmatpush3.bf16.msra.mxu0 %v13956_v45  ;;  %9587 = vmatprep.mubr.bf16.mxu0 %v2286_v48  ;;  %v14002_v45 = vld [vmem:[%s17876_s1 + $0xcd8] sm:$0xff]   ;;  %v14005_v48 = vld [vmem:[%s17876_s1 + $0xc20] sm:$0xff]  }
 0x164   :  { %9548 = vmatmul.mubr.bf16.vlgmr.msra.gmra.mrb[40].mxu1 %v2287_v50  ;;  %12690 = vmatprep.subr.bf16.mxu0 %v13959_v51  ;;  %v14007_v50 = vld [vmem:[%s17876_s1 + $0xca0] sm:$0xff]   ;;  %v14008_v51 = vld [vmem:[%s17876_s1 + $0xc68] sm:$0xff]  }
 0x165   :  { %12711 = vmatpush3.bf16.msra.mxu1 %v13958_v49  ;;  %9627 = vmatprep.mubr.bf16.mxu1 %v2290_v53  ;;  %v14006_v49 = vld [vmem:[%s17876_s1 + $0xce0] sm:$0xff]   ;;  %v14010_v53 = vld [vmem:[%s17876_s1 + $0xce8] sm:$0xff]  }
 0x166   :  { %12712 = vmatprep.subr.bf16.mxu1 %v13961_v54  ;;  %v14011_v54 = vld [vmem:[%s17876_s1 + $0xca8] sm:$0xff]  }
 0x167   :  { %12691 = vmatpush3.bf16.msra.mxu0 %v13960_v52  ;;  %v14009_v52 = vld [vmem:[%s17876_s1 + $0xc28] sm:$0xff]  }
 0x168   :  { %12692 = vmatprep.subr.bf16.mxu0 %v13963_v56 }
 0x169   :  { %12713 = vmatpush3.bf16.msra.mxu1 %v13962_v55  ;;  %v14012_v55 = vld [vmem:[%s17876_s1 + $0xc70] sm:$0xff]  }
 0x16a   :  { %12714 = vmatprep.subr.bf16.mxu1 %v13965_v58 }
 0x16b   :  { %12693 = vmatpush3.bf16.msra.mxu0 %v13964_v57  ;;  %v14013_v57 = vld [vmem:[%s17876_s1 + $0xc30] sm:$0xff]  }
 0x16c   :  { %12694 = vmatprep.subr.bf16.mxu0 %v13967_v60 }
 0x16d   :  { %12715 = vmatpush3.bf16.msra.mxu1 %v13966_v59  ;;  %v14014_v59 = vld [vmem:[%s17876_s1 + $0xcf0] sm:$0xff]  }
 0x16e   :  { %12716 = vmatprep.subr.bf16.mxu1 %v13969_v62 }
 0x16f   :  { %12695 = vmatpush3.bf16.msra.mxu0 %v13968_v61 }
 0x170   :  { %12696 = vmatprep.subr.bf16.mxu0 %v13971_v0 }
 0x171   :  { %12717 = vmatpush3.bf16.msra.mxu1 %v13970_v63  ;;  %v14015_v63 = vld [vmem:[%s17876_s1 + $0xcb0] sm:$0xff]  }
 0x172   :  { %12718 = vmatprep.subr.bf16.mxu1 %v13973_v2  ;;  %v14016_v2 = vld [vmem:[%s17876_s1 + $0xc78] sm:$0xff]  }
 0x173   :  { %12697 = vmatpush3.bf16.msra.mxu0 %v13972_v1 }
 0x174   :  { %12698 = vmatprep.subr.bf16.mxu0 %v13975_v4 }
 0x175   :  { %v12396_v9 = vpop.f32.mrb[16].mxu0  ;;  %12719 = vmatpush3.bf16.msra.mxu1 %v13974_v3  ;;  %v28_v3 = vld [vmem:[%s17875_s0 + $0x30] sm:$0xff] }
 0x176   :  { %v12397_v11 = vpop.f32.mrb[17].mxu0  ;;  %12720 = vmatprep.subr.bf16.mxu1 %v13977_v6  ;;  %v14017_v6 = vld [vmem:[%s17876_s1 + $0xc38] sm:$0xff]  }
 0x177   :  { %v12398_v13 = vadd.f32 %v12397_v11, %v12396_v9  ;;  %v12399_v14 = vpop.f32.mrb[18].mxu0  ;;  %v12418_v15 = vpop.f32.mrb[16].mxu1  ;;  %12699 = vmatpush3.bf16.msra.mxu0 %v13976_v5  ;;  %v2291_v9 = vcombine.high %v28_v3, %v28_v3 }
 0x178   :  { %v12400_v18 = vpop.f32.mrb[19].mxu0  ;;  %v12419_v19 = vpop.f32.mrb[17].mxu1  ;;  %12700 = vmatprep.subr.bf16.mxu0 %v13979_v8  ;;  %v14019_v14 = vld [vmem:[%s17876_s1 + $0xcb8] sm:$0xff]  }
 0x179   :  { %v9030_v20 = vadd.f32 %v12398_v13, %v15788_v38  ;;  %v12420_v21 = vadd.f32 %v12419_v19, %v12418_v15  ;;  %12721 = vmatpush3.bf16.msra.mxu1 %v13978_v7  ;;  %v12421_v23 = vpop.f32.mrb[18].mxu1  ;;  %v13996_v38 = vld [vmem:[%s17876_s1 + $0xc50] sm:$0xff]   ;;  %v2298_v7 = vrot.slane %v28_v3, %v14749_v41  ;;  %v16003_v15 = vrot.slane %v2291_v9, %v14749_v41  ;;  %v14021_v19 = vld [vmem:[%s17876_s1 + $0xd00] sm:$0xff]   ;;  %v14052_v3 = vld [vmem:[%s17876_s1 + $0xdb8] sm:$0xff]  }
 0x17a   :  { %12722 = vmatprep.subr.bf16.mxu1 %v13981_v12  ;;  %v12422_v25 = vpop.f32.mrb[19].mxu1  ;;  %v14023_v23 = vld [vmem:[%s17876_s1 + $0xd80] sm:$0xff]  }
 0x17b   :  { %v15892_v26 = vadd.f32 %v12420_v21, %v9030_v20  ;;  %12701 = vmatpush3.bf16.msra.mxu0 %v13980_v10  ;;  %v14018_v10 = vld [vmem:[%s17876_s1 + $0xcf8] sm:$0xff]   ;;  %v2306_v13 = vcombine.high %v2298_v7, %v2298_v7  ;;  %v2307_v20 = vcombine.high %v16003_v15, %v16003_v15  ;;  %v14022_v21 = vld [vmem:[%s17876_s1 + $0xdc0] sm:$0xff]  }
 0x17c   :  { %12702 = vmatprep.subr.bf16.mxu0 %v13983_v17  ;;  %v14020_v17 = vld [vmem:[%s17876_s1 + $0xd40] sm:$0xff]  }
 0x17d   :  { %12723 = vmatpush3.bf16.msra.mxu1 %v13982_v16  ;;  %v2314_v16 = vrot.slane %v2298_v7, %v14749_v41  ;;  %v2328_v18 = vrot.slane %v2306_v13, %v14749_v41  ;;  %v14055_v7 = vld [vmem:[%s17876_s1 + $0xec0] sm:$0xff]   ;;  %v14060_v13 = vld [vmem:[%s17876_s1 + $0xe88] sm:$0xff]  }
 0x17e   :  { %12724 = vmatprep.subr.bf16.mxu1 %v13985_v24  ;;  %v2335_v24 = vrot.slane %v2307_v20, %v14749_v41  ;;  %v14067_v20 = vld [vmem:[%s17876_s1 + $0xed8] sm:$0xff]  }
 0x17f   :  { %12703 = vmatpush3.bf16.msra.mxu0 %v13984_v22  ;;  %v2338_v22 = vcombine.high %v2328_v18, %v2328_v18  ;;  %v2336_v25 = vcombine.high %v2314_v16, %v2314_v16 }
 0x180   :  { %12732 = vmatprep.subr.bf16.mxu0 %v13988_v29  ;;  %v14026_v29 = vld [vmem:[%s17876_s1 + $0xdc8] sm:$0xff]  }
 0x181   :  { %12725 = vmatpush3.bf16.msra.mxu1 %v13987_v27  ;;  %v14025_v27 = vld [vmem:[%s17876_s1 + $0xd08] sm:$0xff]  }
 0x182   :  { %9588 = vmatmul.mubr.bf16.vlgmr.msra.gmra.mrb[44].mxu0 %v2272_v28  ;;  %12754 = vmatprep.subr.bf16.mxu1 %v13990_v31  ;;  %v2339_v28 = vcombine.high %v2335_v24, %v2335_v24  ;;  %v14028_v31 = vld [vmem:[%s17876_s1 + $0xd50] sm:$0xff]  }
 0x183   :  { %12733 = vmatpush3.bf16.msra.mxu0 %v13989_v30  ;;  %9667 = vmatprep.mubr.bf16.mxu0 %v2328_v18  ;;  %v14027_v30 = vld [vmem:[%s17876_s1 + $0xd88] sm:$0xff]   ;;  %v14065_v18 = vld [vmem:[%s17876_s1 + $0xe58] sm:$0xff]  }
 0x184   :  { %9628 = vmatmul.mubr.bf16.vlgmr.msra.gmra.mrb[44].mxu1 %v2288_v33  ;;  %12734 = vmatprep.subr.bf16.mxu0 %v13992_v34  ;;  %v14030_v33 = vld [vmem:[%s17876_s1 + $0xdd0] sm:$0xff]  }
 0x185   :  { %12755 = vmatpush3.bf16.msra.mxu1 %v13991_v32  ;;  %9707 = vmatprep.mubr.bf16.mxu1 %v2338_v22  ;;  %v14029_v32 = vld [vmem:[%s17876_s1 + $0xd10] sm:$0xff]   ;;  %v14069_v22 = vld [vmem:[%s17876_s1 + $0xe60] sm:$0xff]  }
 0x186   :  { %12756 = vmatprep.subr.bf16.mxu1 %v13994_v36  ;;  %v14031_v34 = vld [vmem:[%s17876_s1 + $0xd90] sm:$0xff]   ;;  %v14033_v36 = vld [vmem:[%s17876_s1 + $0xd18] sm:$0xff]  }
 0x187   :  { %12735 = vmatpush3.bf16.msra.mxu0 %v13993_v35  ;;  %v14032_v35 = vld [vmem:[%s17876_s1 + $0xd58] sm:$0xff]  }
 0x188   :  { %12736 = vmatprep.subr.bf16.mxu0 %v13996_v38  ;;  %v14035_v38 = vld [vmem:[%s17876_s1 + $0xd98] sm:$0xff]  }
 0x189   :  { %12757 = vmatpush3.bf16.msra.mxu1 %v13995_v37  ;;  %v14034_v37 = vld [vmem:[%s17876_s1 + $0xdd8] sm:$0xff]  }
 0x18a   :  { %12758 = vmatprep.subr.bf16.mxu1 %v13998_v40  ;;  %v14037_v40 = vld [vmem:[%s17876_s1 + $0xd20] sm:$0xff]  }
 0x18b   :  { %12737 = vmatpush3.bf16.msra.mxu0 %v13997_v39  ;;  %v14036_v39 = vld [vmem:[%s17876_s1 + $0xd60] sm:$0xff]  }
 0x18c   :  { %12738 = vmatprep.subr.bf16.mxu0 %v14000_v43  ;;  %v14039_v43 = vld [vmem:[%s17876_s1 + $0xda0] sm:$0xff]  }
 0x18d   :  { %12759 = vmatpush3.bf16.msra.mxu1 %v13999_v42  ;;  %v14038_v42 = vld [vmem:[%s17876_s1 + $0xde0] sm:$0xff]  }
 0x18e   :  { %12760 = vmatprep.subr.bf16.mxu1 %v14002_v45  ;;  %v14041_v45 = vld [vmem:[%s17876_s1 + $0xd28] sm:$0xff]  }
 0x18f   :  { %12739 = vmatpush3.bf16.msra.mxu0 %v14001_v44  ;;  %v14040_v44 = vld [vmem:[%s17876_s1 + $0xd68] sm:$0xff]  }
 0x190   :  { %12740 = vmatprep.subr.bf16.mxu0 %v14004_v47  ;;  %v14043_v47 = vld [vmem:[%s17876_s1 + $0xda8] sm:$0xff]  }
 0x191   :  { %12761 = vmatpush3.bf16.msra.mxu1 %v14003_v46  ;;  %v14042_v46 = vld [vmem:[%s17876_s1 + $0xde8] sm:$0xff]  }
 0x192   :  { %12762 = vmatprep.subr.bf16.mxu1 %v14006_v49 }
 0x193   :  { %12741 = vmatpush3.bf16.msra.mxu0 %v14005_v48  ;;  %v14044_v48 = vld [vmem:[%s17876_s1 + $0xd70] sm:$0xff]  }
 0x194   :  { %12742 = vmatprep.subr.bf16.mxu0 %v14008_v51 }
 0x195   :  { %v12440_v56 = vpop.f32.mrb[20].mxu0  ;;  %12763 = vmatpush3.bf16.msra.mxu1 %v14007_v50  ;;  %v14045_v50 = vld [vmem:[%s17876_s1 + $0xd30] sm:$0xff]  }
 0x196   :  { %v12441_v58 = vpop.f32.mrb[21].mxu0  ;;  %12764 = vmatprep.subr.bf16.mxu1 %v14010_v53 }
 0x197   :  { %v12442_v60 = vadd.f32 %v12441_v58, %v12440_v56  ;;  %v12443_v61 = vpop.f32.mrb[22].mxu0  ;;  %v12462_v62 = vpop.f32.mrb[20].mxu1  ;;  %12743 = vmatpush3.bf16.msra.mxu0 %v14009_v52  ;;  %v14046_v52 = vld [vmem:[%s17876_s1 + $0xdf0] sm:$0xff]  }
 0x198   :  { %v12444_v0 = vpop.f32.mrb[23].mxu0  ;;  %v12463_v1 = vpop.f32.mrb[21].mxu1  ;;  %12744 = vmatprep.subr.bf16.mxu0 %v14012_v55  ;;  %v14047_v56 = vld [vmem:[%s17876_s1 + $0xdb0] sm:$0xff]  }
 0x199   :  { %v9110_v4 = vadd.f32 %v12442_v60, %v15892_v26  ;;  %v12464_v5 = vadd.f32 %v12463_v1, %v12462_v62  ;;  %12765 = vmatpush3.bf16.msra.mxu1 %v14011_v54  ;;  %v12465_v8 = vpop.f32.mrb[22].mxu1  ;;  %v14024_v26 = vld [vmem:[%s17876_s1 + $0xd48] sm:$0xff]   ;;  %v14049_v62 = vld [vmem:[%s17876_s1 + $0xd38] sm:$0xff]  }
 0x19a   :  { %12766 = vmatprep.subr.bf16.mxu1 %v14014_v59  ;;  %v12466_v11 = vpop.f32.mrb[23].mxu1  ;;  %v14050_v0 = vld [vmem:[%s17876_s1 + $0xdf8] sm:$0xff]   ;;  %v14056_v8 = vld [vmem:[%s17876_s1 + $0xe80] sm:$0xff]  }
 0x19b   :  { %v15997_v12 = vadd.f32 %v12464_v5, %v9110_v4  ;;  %12745 = vmatpush3.bf16.msra.mxu0 %v14013_v57  ;;  %v14048_v57 = vld [vmem:[%s17876_s1 + $0xd78] sm:$0xff]   ;;  %v2321_v4 = vrot.slane %v16003_v15, %v14749_v41  ;;  %v14053_v5 = vld [vmem:[%s17876_s1 + $0xe40] sm:$0xff]   ;;  %v14058_v11 = vld [vmem:[%s17876_s1 + $0xe08] sm:$0xff]  }
 0x19c   :  { %12746 = vmatprep.subr.bf16.mxu0 %v14016_v2  ;;  %v14062_v15 = vld [vmem:[%s17876_s1 + $0xe10] sm:$0xff]  }
 0x19d   :  { %12767 = vmatpush3.bf16.msra.mxu1 %v14015_v63  ;;  %v2337_v9 = vcombine.high %v2321_v4, %v2321_v4 }
 0x19e   :  { %12768 = vmatprep.subr.bf16.mxu1 %v14018_v10  ;;  %v14057_v10 = vld [vmem:[%s17876_s1 + $0xe48] sm:$0xff]  }
 0x19f   :  { %12747 = vmatpush3.bf16.msra.mxu0 %v14017_v6  ;;  %v14054_v6 = vld [vmem:[%s17876_s1 + $0xe00] sm:$0xff]  }
 0x1a0   :  { %12776 = vmatprep.subr.bf16.mxu0 %v14020_v17  ;;  %v14064_v17 = vld [vmem:[%s17876_s1 + $0xe90] sm:$0xff]  }
 0x1a1   :  { %12769 = vmatpush3.bf16.msra.mxu1 %v14019_v14  ;;  %v14061_v14 = vld [vmem:[%s17876_s1 + $0xe50] sm:$0xff]  }
 0x1a2   :  { %9668 = vmatmul.mubr.bf16.vlgmr.msra.gmra.mrb[48].mxu0 %v2314_v16  ;;  %12798 = vmatprep.subr.bf16.mxu1 %v14022_v21  ;;  %v14063_v16 = vld [vmem:[%s17876_s1 + $0xed0] sm:$0xff]   ;;  %v14068_v21 = vld [vmem:[%s17876_s1 + $0xe98] sm:$0xff]  }
 0x1a3   :  { %12777 = vmatpush3.bf16.msra.mxu0 %v14021_v19  ;;  %9747 = vmatprep.mubr.bf16.mxu0 %v2335_v24  ;;  %v14066_v19 = vld [vmem:[%s17876_s1 + $0xe18] sm:$0xff]   ;;  %v14071_v24 = vld [vmem:[%s17876_s1 + $0xee0] sm:$0xff]  }
 0x1a4   :  { %9708 = vmatmul.mubr.bf16.vlgmr.msra.gmra.mrb[48].mxu1 %v2336_v25  ;;  %12778 = vmatprep.subr.bf16.mxu0 %v14024_v26  ;;  %v14072_v25 = vld [vmem:[%s17876_s1 + $0xea0] sm:$0xff]   ;;  %v14073_v26 = vld [vmem:[%s17876_s1 + $0xe68] sm:$0xff]  }
 0x1a5   :  { %12799 = vmatpush3.bf16.msra.mxu1 %v14023_v23  ;;  %9787 = vmatprep.mubr.bf16.mxu1 %v2339_v28  ;;  %v14070_v23 = vld [vmem:[%s17876_s1 + $0xe20] sm:$0xff]   ;;  %v14075_v28 = vld [vmem:[%s17876_s1 + $0xee8] sm:$0xff]  }
 0x1a6   :  { %12800 = vmatprep.subr.bf16.mxu1 %v14026_v29  ;;  %v14076_v29 = vld [vmem:[%s17876_s1 + $0xea8] sm:$0xff]  }
 0x1a7   :  { %12779 = vmatpush3.bf16.msra.mxu0 %v14025_v27  ;;  %v14074_v27 = vld [vmem:[%s17876_s1 + $0xe28] sm:$0xff]  }
 0x1a8   :  { %12780 = vmatprep.subr.bf16.mxu0 %v14028_v31 }
 0x1a9   :  { %12801 = vmatpush3.bf16.msra.mxu1 %v14027_v30  ;;  %v14077_v30 = vld [vmem:[%s17876_s1 + $0xe70] sm:$0xff]  }
 0x1aa   :  { %12802 = vmatprep.subr.bf16.mxu1 %v14030_v33 }
 0x1ab   :  { %12781 = vmatpush3.bf16.msra.mxu0 %v14029_v32  ;;  %v14078_v32 = vld [vmem:[%s17876_s1 + $0xe30] sm:$0xff]  }
 0x1ac   :  { %12782 = vmatprep.subr.bf16.mxu0 %v14032_v35 }
 0x1ad   :  { %12803 = vmatpush3.bf16.msra.mxu1 %v14031_v34  ;;  %v14079_v34 = vld [vmem:[%s17876_s1 + $0xef0] sm:$0xff]  }
 0x1ae   :  { %12804 = vmatprep.subr.bf16.mxu1 %v14034_v37 }
 0x1af   :  { %12783 = vmatpush3.bf16.msra.mxu0 %v14033_v36 }
 0x1b0   :  { %12784 = vmatprep.subr.bf16.mxu0 %v14036_v39 }
 0x1b1   :  { %12805 = vmatpush3.bf16.msra.mxu1 %v14035_v38 }
 0x1b2   :  { %12806 = vmatprep.subr.bf16.mxu1 %v14038_v42  ;;  %v14081_v42 = vld [vmem:[%s17876_s1 + $0xe78] sm:$0xff]  }
 0x1b3   :  { %12785 = vmatpush3.bf16.msra.mxu0 %v14037_v40  ;;  %v14080_v40 = vld [vmem:[%s17876_s1 + $0xeb0] sm:$0xff]  }
 0x1b4   :  { %12786 = vmatprep.subr.bf16.mxu0 %v14040_v44 }
 0x1b5   :  { %v12484_v49 = vpop.f32.mrb[24].mxu0  ;;  %12807 = vmatpush3.bf16.msra.mxu1 %v14039_v43 }
 0x1b6   :  { %v12485_v51 = vpop.f32.mrb[25].mxu0  ;;  %12808 = vmatprep.subr.bf16.mxu1 %v14042_v46  ;;  %v29_v46 = vld [vmem:[%s17875_s0 + $0x38] sm:$0xff] }
 0x1b7   :  { %v12486_v53 = vadd.f32 %v12485_v51, %v12484_v49  ;;  %v12487_v54 = vpop.f32.mrb[26].mxu0  ;;  %v12506_v55 = vpop.f32.mrb[24].mxu1  ;;  %12787 = vmatpush3.bf16.msra.mxu0 %v14041_v45  ;;  %v14082_v45 = vld [vmem:[%s17876_s1 + $0xe38] sm:$0xff]   ;;  %v2347_v49 = vrot.slane %v29_v46, %v14749_v41  ;;  %v2340_v51 = vcombine.high %v29_v46, %v29_v46  ;;  %v14119_v46 = vld [vmem:[%s17876_s1 + $0x1000] sm:$0xff]  }
 0x1b8   :  { %v12488_v58 = vpop.f32.mrb[27].mxu0  ;;  %v12507_v59 = vpop.f32.mrb[25].mxu1  ;;  %12788 = vmatprep.subr.bf16.mxu0 %v14044_v48  ;;  %v14083_v48 = vld [vmem:[%s17876_s1 + $0xef8] sm:$0xff]  }
 0x1b9   :  { %v9190_v60 = vadd.f32 %v12486_v53, %v15997_v12  ;;  %v12508_v61 = vadd.f32 %v12507_v59, %v12506_v55  ;;  %12809 = vmatpush3.bf16.msra.mxu1 %v14043_v47  ;;  %v12509_v63 = vpop.f32.mrb[26].mxu1  ;;  %v14059_v12 = vld [vmem:[%s17876_s1 + $0xec8] sm:$0xff]   ;;  %v14084_v53 = vld [vmem:[%s17876_s1 + $0xeb8] sm:$0xff]   ;;  %v2355_v54 = vcombine.high %v2347_v49, %v2347_v49  ;;  %v2363_v55 = vrot.slane %v2347_v49, %v14749_v41  ;;  %v14086_v58 = vld [vmem:[%s17876_s1 + $0xf00] sm:$0xff]  }
 0x1ba   :  { %12810 = vmatprep.subr.bf16.mxu1 %v14046_v52  ;;  %v12510_v1 = vpop.f32.mrb[27].mxu1 }
 0x1bb   :  { %v16104_v2 = vadd.f32 %v12508_v61, %v9190_v60  ;;  %12789 = vmatpush3.bf16.msra.mxu0 %v14045_v50  ;;  %v2377_v59 = vrot.slane %v2355_v54, %v14749_v41  ;;  %v14087_v60 = vld [vmem:[%s17876_s1 + $0xfc0] sm:$0xff]   ;;  %v14089_v1 = vld [vmem:[%s17876_s1 + $0xf48] sm:$0xff]   ;;  %v14126_v54 = vld [vmem:[%s17876_s1 + $0x1050] sm:$0xff]  }
 0x1bc   :  { %12790 = vmatprep.subr.bf16.mxu0 %v14048_v57  ;;  %v16219_v57 = vrot.slane %v2340_v51, %v14749_v41  ;;  %v14123_v51 = vld [vmem:[%s17876_s1 + $0x1008] sm:$0xff]  }
 0x1bd   :  { %12811 = vmatpush3.bf16.msra.mxu1 %v14047_v56  ;;  %v14085_v56 = vld [vmem:[%s17876_s1 + $0xf40] sm:$0xff]   ;;  %v2387_v63 = vcombine.high %v2377_v59, %v2377_v59 }
 0x1be   :  { %12812 = vmatprep.subr.bf16.mxu1 %v14050_v0  ;;  %v2356_v61 = vcombine.high %v16219_v57, %v16219_v57  ;;  %v2385_v0 = vcombine.high %v2363_v55, %v2363_v55 }
 0x1bf   :  { %12791 = vmatpush3.bf16.msra.mxu0 %v14049_v62  ;;  %v14088_v62 = vld [vmem:[%s17876_s1 + $0xf80] sm:$0xff]  }
 0x1c0   :  { %12820 = vmatprep.subr.bf16.mxu0 %v14053_v5 }
 0x1c1   :  { %12813 = vmatpush3.bf16.msra.mxu1 %v14052_v3  ;;  %v14090_v3 = vld [vmem:[%s17876_s1 + $0xf08] sm:$0xff]  }
 0x1c2   :  { %9748 = vmatmul.mubr.bf16.vlgmr.msra.gmra.mrb[52].mxu0 %v2321_v4  ;;  %12842 = vmatprep.subr.bf16.mxu1 %v14055_v7  ;;  %v14091_v4 = vld [vmem:[%s17876_s1 + $0xfc8] sm:$0xff]   ;;  %v14093_v7 = vld [vmem:[%s17876_s1 + $0xf50] sm:$0xff]  }
 0x1c3   :  { %12821 = vmatpush3.bf16.msra.mxu0 %v14054_v6  ;;  %9827 = vmatprep.mubr.bf16.mxu0 %v2377_v59  ;;  %v14092_v6 = vld [vmem:[%s17876_s1 + $0xf88] sm:$0xff]   ;;  %v14131_v59 = vld [vmem:[%s17876_s1 + $0x1018] sm:$0xff]  }
 0x1c4   :  { %9788 = vmatmul.mubr.bf16.vlgmr.msra.gmra.mrb[52].mxu1 %v2337_v9  ;;  %12822 = vmatprep.subr.bf16.mxu0 %v14057_v10  ;;  %v14095_v9 = vld [vmem:[%s17876_s1 + $0xfd0] sm:$0xff]  }
 0x1c5   :  { %12843 = vmatpush3.bf16.msra.mxu1 %v14056_v8  ;;  %9867 = vmatprep.mubr.bf16.mxu1 %v2387_v63  ;;  %v14094_v8 = vld [vmem:[%s17876_s1 + $0xf10] sm:$0xff]   ;;  %v14135_v63 = vld [vmem:[%s17876_s1 + $0x1020] sm:$0xff]  }
 0x1c6   :  { %12844 = vmatprep.subr.bf16.mxu1 %v14059_v12  ;;  %v14096_v10 = vld [vmem:[%s17876_s1 + $0xf90] sm:$0xff]   ;;  %v14098_v12 = vld [vmem:[%s17876_s1 + $0xf18] sm:$0xff]  }
 0x1c7   :  { %12823 = vmatpush3.bf16.msra.mxu0 %v14058_v11  ;;  %v14097_v11 = vld [vmem:[%s17876_s1 + $0xf58] sm:$0xff]  }
 0x1c8   :  { %12824 = vmatprep.subr.bf16.mxu0 %v14061_v14  ;;  %v14100_v14 = vld [vmem:[%s17876_s1 + $0xf98] sm:$0xff]  }
 0x1c9   :  { %12845 = vmatpush3.bf16.msra.mxu1 %v14060_v13  ;;  %v14099_v13 = vld [vmem:[%s17876_s1 + $0xfd8] sm:$0xff]  }
 0x1ca   :  { %12846 = vmatprep.subr.bf16.mxu1 %v14063_v16  ;;  %v14102_v16 = vld [vmem:[%s17876_s1 + $0xf20] sm:$0xff]  }
 0x1cb   :  { %12825 = vmatpush3.bf16.msra.mxu0 %v14062_v15  ;;  %v14101_v15 = vld [vmem:[%s17876_s1 + $0xf60] sm:$0xff]  }
 0x1cc   :  { %12826 = vmatprep.subr.bf16.mxu0 %v14065_v18  ;;  %v14104_v18 = vld [vmem:[%s17876_s1 + $0xfa0] sm:$0xff]  }
 0x1cd   :  { %12847 = vmatpush3.bf16.msra.mxu1 %v14064_v17  ;;  %v14103_v17 = vld [vmem:[%s17876_s1 + $0xfe0] sm:$0xff]  }
 0x1ce   :  { %12848 = vmatprep.subr.bf16.mxu1 %v14067_v20  ;;  %v14106_v20 = vld [vmem:[%s17876_s1 + $0xf28] sm:$0xff]  }
 0x1cf   :  { %12827 = vmatpush3.bf16.msra.mxu0 %v14066_v19  ;;  %v14105_v19 = vld [vmem:[%s17876_s1 + $0xf68] sm:$0xff]  }
 0x1d0   :  { %12828 = vmatprep.subr.bf16.mxu0 %v14069_v22  ;;  %v14108_v22 = vld [vmem:[%s17876_s1 + $0xfa8] sm:$0xff]  }
 0x1d1   :  { %12849 = vmatpush3.bf16.msra.mxu1 %v14068_v21  ;;  %v14107_v21 = vld [vmem:[%s17876_s1 + $0xfe8] sm:$0xff]  }
 0x1d2   :  { %12850 = vmatprep.subr.bf16.mxu1 %v14071_v24 }
 0x1d3   :  { %12829 = vmatpush3.bf16.msra.mxu0 %v14070_v23  ;;  %v14109_v23 = vld [vmem:[%s17876_s1 + $0xf70] sm:$0xff]  }
 0x1d4   :  { %12830 = vmatprep.subr.bf16.mxu0 %v14073_v26 }
 0x1d5   :  { %v12528_v31 = vpop.f32.mrb[28].mxu0  ;;  %12851 = vmatpush3.bf16.msra.mxu1 %v14072_v25  ;;  %v14110_v25 = vld [vmem:[%s17876_s1 + $0xf30] sm:$0xff]  }
 0x1d6   :  { %v12529_v33 = vpop.f32.mrb[29].mxu0  ;;  %12852 = vmatprep.subr.bf16.mxu1 %v14075_v28 }
 0x1d7   :  { %v12530_v35 = vadd.f32 %v12529_v33, %v12528_v31  ;;  %v12531_v36 = vpop.f32.mrb[30].mxu0  ;;  %v12550_v37 = vpop.f32.mrb[28].mxu1  ;;  %12831 = vmatpush3.bf16.msra.mxu0 %v14074_v27  ;;  %v14111_v27 = vld [vmem:[%s17876_s1 + $0xff0] sm:$0xff]  }
 0x1d8   :  { %v12532_v38 = vpop.f32.mrb[31].mxu0  ;;  %v12551_v39 = vpop.f32.mrb[29].mxu1  ;;  %12832 = vmatprep.subr.bf16.mxu0 %v14077_v30  ;;  %v14112_v31 = vld [vmem:[%s17876_s1 + $0xfb0] sm:$0xff]  }
 0x1d9   :  { %v9270_v43 = vadd.f32 %v12530_v35, %v16104_v2  ;;  %v12552_v44 = vadd.f32 %v12551_v39, %v12550_v37  ;;  %12853 = vmatpush3.bf16.msra.mxu1 %v14076_v29  ;;  %v12553_v47 = vpop.f32.mrb[30].mxu1  ;;  %v2384_v2 = vrot.slane %v2356_v61, %v14749_v41  ;;  %v14114_v37 = vld [vmem:[%s17876_s1 + $0xf38] sm:$0xff]  }
 0x1da   :  { %12854 = vmatprep.subr.bf16.mxu1 %v14079_v34  ;;  %v12554_v50 = vpop.f32.mrb[31].mxu1  ;;  %v14115_v39 = vld [vmem:[%s17876_s1 + $0xff8] sm:$0xff]   ;;  %v14120_v47 = vld [vmem:[%s17876_s1 + $0x10c0] sm:$0xff]  }
 0x1db   :  { %v16209_v52 = vadd.f32 %v12552_v44, %v9270_v43  ;;  %12833 = vmatpush3.bf16.msra.mxu0 %v14078_v32  ;;  %v2388_v5 = vcombine.high %v2384_v2, %v2384_v2  ;;  %v14113_v32 = vld [vmem:[%s17876_s1 + $0xf78] sm:$0xff]   ;;  %v2370_v44 = vrot.slane %v16219_v57, %v14749_v41  ;;  %v14122_v50 = vld [vmem:[%s17876_s1 + $0x1048] sm:$0xff]   ;;  %v14129_v57 = vld [vmem:[%s17876_s1 + $0x1090] sm:$0xff]  }
 0x1dc   :  { %12834 = vmatprep.subr.bf16.mxu0 %v14081_v42  ;;  %v14117_v43 = vld [vmem:[%s17876_s1 + $0xfb8] sm:$0xff]  }
 0x1dd   :  { %12855 = vmatpush3.bf16.msra.mxu1 %v14080_v40  ;;  %v2386_v49 = vcombine.high %v2370_v44, %v2370_v44  ;;  %v14133_v61 = vld [vmem:[%s17876_s1 + $0x1098] sm:$0xff]  }
 0x1de   :  { %12856 = vmatprep.subr.bf16.mxu1 %v14083_v48  ;;  %v14121_v48 = vld [vmem:[%s17876_s1 + $0x1080] sm:$0xff]  }
 0x1df   :  { %12835 = vmatpush3.bf16.msra.mxu0 %v14082_v45  ;;  %v14118_v45 = vld [vmem:[%s17876_s1 + $0x1040] sm:$0xff]  }
 0x1e0   :  { %12864 = vmatprep.subr.bf16.mxu0 %v14085_v56  ;;  %v14128_v56 = vld [vmem:[%s17876_s1 + $0x10d0] sm:$0xff]  }
 0x1e1   :  { %12857 = vmatpush3.bf16.msra.mxu1 %v14084_v53  ;;  %v14125_v53 = vld [vmem:[%s17876_s1 + $0x1088] sm:$0xff]  }
 0x1e2   :  { %9828 = vmatmul.mubr.bf16.vlgmr.msra.gmra.mrb[56].mxu0 %v2363_v55  ;;  %12886 = vmatprep.subr.bf16.mxu1 %v14087_v60  ;;  %v14127_v55 = vld [vmem:[%s17876_s1 + $0x1010] sm:$0xff]   ;;  %v14132_v60 = vld [vmem:[%s17876_s1 + $0x10d8] sm:$0xff]  }
 0x1e3   :  { %12865 = vmatpush3.bf16.msra.mxu0 %v14086_v58  ;;  %9907 = vmatprep.mubr.bf16.mxu0 %v2384_v2  ;;  %v14130_v58 = vld [vmem:[%s17876_s1 + $0x1058] sm:$0xff]   ;;  %v14138_v2 = vld [vmem:[%s17876_s1 + $0x1068] sm:$0xff]  }
 0x1e4   :  { %9868 = vmatmul.mubr.bf16.vlgmr.msra.gmra.mrb[56].mxu1 %v2385_v0  ;;  %12866 = vmatprep.subr.bf16.mxu0 %v14089_v1  ;;  %v14136_v0 = vld [vmem:[%s17876_s1 + $0x10e0] sm:$0xff]  }
 0x1e5   :  { %12887 = vmatpush3.bf16.msra.mxu1 %v14088_v62  ;;  %9947 = vmatprep.mubr.bf16.mxu1 %v2388_v5  ;;  %v14134_v62 = vld [vmem:[%s17876_s1 + $0x1060] sm:$0xff]   ;;  %v14141_v5 = vld [vmem:[%s17876_s1 + $0x10a8] sm:$0xff]  }
 0x1e6   :  { %12888 = vmatprep.subr.bf16.mxu1 %v14091_v4  ;;  %v14137_v1 = vld [vmem:[%s17876_s1 + $0x10a0] sm:$0xff]   ;;  %v14140_v4 = vld [vmem:[%s17876_s1 + $0x10e8] sm:$0xff]  }
 0x1e7   :  { %12867 = vmatpush3.bf16.msra.mxu0 %v14090_v3  ;;  %v14139_v3 = vld [vmem:[%s17876_s1 + $0x1028] sm:$0xff]  }
 0x1e8   :  { %12868 = vmatprep.subr.bf16.mxu0 %v14093_v7 }
 0x1e9   :  { %12889 = vmatpush3.bf16.msra.mxu1 %v14092_v6  ;;  %v14142_v6 = vld [vmem:[%s17876_s1 + $0x1070] sm:$0xff]  }
 0x1ea   :  { %12890 = vmatprep.subr.bf16.mxu1 %v14095_v9 }
 0x1eb   :  { %12869 = vmatpush3.bf16.msra.mxu0 %v14094_v8  ;;  %v14143_v8 = vld [vmem:[%s17876_s1 + $0x1030] sm:$0xff]  }
 0x1ec   :  { %12870 = vmatprep.subr.bf16.mxu0 %v14097_v11 }
 0x1ed   :  { %12891 = vmatpush3.bf16.msra.mxu1 %v14096_v10  ;;  %v14144_v10 = vld [vmem:[%s17876_s1 + $0x10f0] sm:$0xff]  }
 0x1ee   :  { %12892 = vmatprep.subr.bf16.mxu1 %v14099_v13 }
 0x1ef   :  { %12871 = vmatpush3.bf16.msra.mxu0 %v14098_v12 }
 0x1f0   :  { %12872 = vmatprep.subr.bf16.mxu0 %v14101_v15 }
 0x1f1   :  { %12893 = vmatpush3.bf16.msra.mxu1 %v14100_v14 }
 0x1f2   :  { %12894 = vmatprep.subr.bf16.mxu1 %v14103_v17  ;;  %v14146_v17 = vld [vmem:[%s17876_s1 + $0x1078] sm:$0xff]  }
 0x1f3   :  { %12873 = vmatpush3.bf16.msra.mxu0 %v14102_v16  ;;  %v14145_v16 = vld [vmem:[%s17876_s1 + $0x10b0] sm:$0xff]  }
 0x1f4   :  { %12874 = vmatprep.subr.bf16.mxu0 %v14105_v19 }
 0x1f5   :  { %v12572_v24 = vpop.f32.mrb[32].mxu0  ;;  %12895 = vmatpush3.bf16.msra.mxu1 %v14104_v18 }
 0x1f6   :  { %v12573_v26 = vpop.f32.mrb[33].mxu0  ;;  %12896 = vmatprep.subr.bf16.mxu1 %v14107_v21  ;;  %v14148_v21 = vld [vmem:[%s17876_s1 + $0x10f8] sm:$0xff]  }
 0x1f7   :  { %v12574_v28 = vadd.f32 %v12573_v26, %v12572_v24  ;;  %v12575_v29 = vpop.f32.mrb[34].mxu0  ;;  %v12594_v30 = vpop.f32.mrb[32].mxu1  ;;  %12875 = vmatpush3.bf16.msra.mxu0 %v14106_v20  ;;  %v14147_v20 = vld [vmem:[%s17876_s1 + $0x1038] sm:$0xff]  }
 0x1f8   :  { %v12576_v33 = vpop.f32.mrb[35].mxu0  ;;  %v12595_v34 = vpop.f32.mrb[33].mxu1  ;;  %12876 = vmatprep.subr.bf16.mxu0 %v14109_v23  ;;  %v14149_v26 = vld [vmem:[%s17876_s1 + $0x10b8] sm:$0xff]   ;;  %v14150_v29 = vld [vmem:[%s17876_s1 + $0x1140] sm:$0xff]  }
 0x1f9   :  { %v9350_v35 = vadd.f32 %v12574_v28, %v16209_v52  ;;  %v12596_v36 = vadd.f32 %v12595_v34, %v12594_v30  ;;  %12897 = vmatpush3.bf16.msra.mxu1 %v14108_v22  ;;  %v12597_v38 = vpop.f32.mrb[34].mxu1  ;;  %v14124_v52 = vld [vmem:[%s17876_s1 + $0x10c8] sm:$0xff]   ;;  %v30_v22 = vld [vmem:[%s17875_s0 + $0x40] sm:$0xff] }
 0x1fa   :  { %12898 = vmatprep.subr.bf16.mxu1 %v14111_v27  ;;  %v12598_v40 = vpop.f32.mrb[35].mxu1  ;;  %v2389_v28 = vcombine.high %v30_v22, %v30_v22  ;;  %v14152_v34 = vld [vmem:[%s17876_s1 + $0x11c0] sm:$0xff]  }
 0x1fb   :  { %v16316_v42 = vadd.f32 %v12596_v36, %v9350_v35  ;;  %12877 = vmatpush3.bf16.msra.mxu0 %v14110_v25  ;;  %v2396_v25 = vrot.slane %v30_v22, %v14749_v41  ;;  %v14153_v36 = vld [vmem:[%s17876_s1 + $0x1180] sm:$0xff]  }
 0x1fc   :  { %12878 = vmatprep.subr.bf16.mxu0 %v14113_v32  ;;  %v14151_v32 = vld [vmem:[%s17876_s1 + $0x1100] sm:$0xff]   ;;  %v16434_v33 = vrot.slane %v2389_v28, %v14749_v41  ;;  %v14190_v28 = vld [vmem:[%s17876_s1 + $0x1288] sm:$0xff]  }
 0x1fd   :  { %12899 = vmatpush3.bf16.msra.mxu1 %v14112_v31  ;;  %v2404_v30 = vcombine.high %v2396_v25, %v2396_v25  ;;  %v2412_v31 = vrot.slane %v2396_v25, %v14749_v41  ;;  %v14185_v22 = vld [vmem:[%s17876_s1 + $0x12c0] sm:$0xff]   ;;  %v14187_v25 = vld [vmem:[%s17876_s1 + $0x1248] sm:$0xff]  }
 0x1fe   :  { %12900 = vmatprep.subr.bf16.mxu1 %v14115_v39  ;;  %v14154_v39 = vld [vmem:[%s17876_s1 + $0x1148] sm:$0xff]  }
 0x1ff   :  { %12879 = vmatpush3.bf16.msra.mxu0 %v14114_v37  ;;  %v2426_v35 = vrot.slane %v2404_v30, %v14749_v41  ;;  %v2405_v37 = vcombine.high %v16434_v33, %v16434_v33  ;;  %v2434_v38 = vcombine.high %v2412_v31, %v2412_v31  ;;  %v14192_v30 = vld [vmem:[%s17876_s1 + $0x1210] sm:$0xff]  }
 0x200   :  { %12908 = vmatprep.subr.bf16.mxu0 %v14118_v45  ;;  %v14157_v45 = vld [vmem:[%s17876_s1 + $0x1188] sm:$0xff]  }
 0x201   :  { %12901 = vmatpush3.bf16.msra.mxu1 %v14117_v43  ;;  %v2436_v40 = vcombine.high %v2426_v35, %v2426_v35  ;;  %v2433_v43 = vrot.slane %v2405_v37, %v14749_v41  ;;  %v14199_v37 = vld [vmem:[%s17876_s1 + $0x1260] sm:$0xff]  }
 0x202   :  { %9908 = vmatmul.mubr.bf16.vlgmr.msra.gmra.mrb[60].mxu0 %v2370_v44  ;;  %12930 = vmatprep.subr.bf16.mxu1 %v14120_v47  ;;  %v14156_v44 = vld [vmem:[%s17876_s1 + $0x11c8] sm:$0xff]   ;;  %v14158_v47 = vld [vmem:[%s17876_s1 + $0x1150] sm:$0xff]  }
 0x203   :  { %12909 = vmatpush3.bf16.msra.mxu0 %v14119_v46  ;;  %9987 = vmatprep.mubr.bf16.mxu0 %v2426_v35  ;;  %v2437_v46 = vcombine.high %v2433_v43, %v2433_v43  ;;  %v14197_v35 = vld [vmem:[%s17876_s1 + $0x12d8] sm:$0xff]  }
 0x204   :  { %9948 = vmatmul.mubr.bf16.vlgmr.msra.gmra.mrb[60].mxu1 %v2386_v49  ;;  %12910 = vmatprep.subr.bf16.mxu0 %v14122_v50  ;;  %v14160_v49 = vld [vmem:[%s17876_s1 + $0x11d0] sm:$0xff]  }
 0x205   :  { %12931 = vmatpush3.bf16.msra.mxu1 %v14121_v48  ;;  %10027 = vmatprep.mubr.bf16.mxu1 %v2436_v40  ;;  %v14159_v48 = vld [vmem:[%s17876_s1 + $0x1110] sm:$0xff]   ;;  %v14202_v40 = vld [vmem:[%s17876_s1 + $0x12a0] sm:$0xff]  }
 0x206   :  { %12932 = vmatprep.subr.bf16.mxu1 %v14124_v52  ;;  %v14161_v50 = vld [vmem:[%s17876_s1 + $0x1190] sm:$0xff]   ;;  %v14163_v52 = vld [vmem:[%s17876_s1 + $0x1118] sm:$0xff]  }
 0x207   :  { %12911 = vmatpush3.bf16.msra.mxu0 %v14123_v51  ;;  %v14162_v51 = vld [vmem:[%s17876_s1 + $0x1158] sm:$0xff]  }
 0x208   :  { %12912 = vmatprep.subr.bf16.mxu0 %v14126_v54  ;;  %v14165_v54 = vld [vmem:[%s17876_s1 + $0x1198] sm:$0xff]  }
 0x209   :  { %12933 = vmatpush3.bf16.msra.mxu1 %v14125_v53  ;;  %v14164_v53 = vld [vmem:[%s17876_s1 + $0x11d8] sm:$0xff]  }
 0x20a   :  { %12934 = vmatprep.subr.bf16.mxu1 %v14128_v56  ;;  %v14167_v56 = vld [vmem:[%s17876_s1 + $0x1120] sm:$0xff]  }
 0x20b   :  { %12913 = vmatpush3.bf16.msra.mxu0 %v14127_v55  ;;  %v14166_v55 = vld [vmem:[%s17876_s1 + $0x1160] sm:$0xff]  }
 0x20c   :  { %12914 = vmatprep.subr.bf16.mxu0 %v14130_v58  ;;  %v14169_v58 = vld [vmem:[%s17876_s1 + $0x11a0] sm:$0xff]  }
 0x20d   :  { %12935 = vmatpush3.bf16.msra.mxu1 %v14129_v57  ;;  %v14168_v57 = vld [vmem:[%s17876_s1 + $0x11e0] sm:$0xff]  }
 0x20e   :  { %12936 = vmatprep.subr.bf16.mxu1 %v14132_v60  ;;  %v14171_v60 = vld [vmem:[%s17876_s1 + $0x1128] sm:$0xff]  }
 0x20f   :  { %12915 = vmatpush3.bf16.msra.mxu0 %v14131_v59  ;;  %v14170_v59 = vld [vmem:[%s17876_s1 + $0x1168] sm:$0xff]  }
 0x210   :  { %12916 = vmatprep.subr.bf16.mxu0 %v14134_v62  ;;  %v14173_v62 = vld [vmem:[%s17876_s1 + $0x11a8] sm:$0xff]  }
 0x211   :  { %12937 = vmatpush3.bf16.msra.mxu1 %v14133_v61  ;;  %v14172_v61 = vld [vmem:[%s17876_s1 + $0x11e8] sm:$0xff]  }
 0x212   :  { %12938 = vmatprep.subr.bf16.mxu1 %v14136_v0 }
 0x213   :  { %12917 = vmatpush3.bf16.msra.mxu0 %v14135_v63  ;;  %v14174_v63 = vld [vmem:[%s17876_s1 + $0x1170] sm:$0xff]  }
 0x214   :  { %12918 = vmatprep.subr.bf16.mxu0 %v14138_v2 }
 0x215   :  { %v12616_v7 = vpop.f32.mrb[36].mxu0  ;;  %12939 = vmatpush3.bf16.msra.mxu1 %v14137_v1  ;;  %v14175_v1 = vld [vmem:[%s17876_s1 + $0x1130] sm:$0xff]  }
 0x216   :  { %v12617_v9 = vpop.f32.mrb[37].mxu0  ;;  %12940 = vmatprep.subr.bf16.mxu1 %v14140_v4 }
 0x217   :  { %v12618_v11 = vadd.f32 %v12617_v9, %v12616_v7  ;;  %v12619_v12 = vpop.f32.mrb[38].mxu0  ;;  %v12638_v13 = vpop.f32.mrb[36].mxu1  ;;  %12919 = vmatpush3.bf16.msra.mxu0 %v14139_v3  ;;  %v14176_v3 = vld [vmem:[%s17876_s1 + $0x11f0] sm:$0xff]  }
 0x218   :  { %v12620_v14 = vpop.f32.mrb[39].mxu0  ;;  %v12639_v15 = vpop.f32.mrb[37].mxu1  ;;  %12920 = vmatprep.subr.bf16.mxu0 %v14142_v6  ;;  %v14177_v7 = vld [vmem:[%s17876_s1 + $0x11b0] sm:$0xff]  }
 0x219   :  { %v9430_v18 = vadd.f32 %v12618_v11, %v16316_v42  ;;  %v12640_v19 = vadd.f32 %v12639_v15, %v12638_v13  ;;  %12941 = vmatpush3.bf16.msra.mxu1 %v14141_v5  ;;  %v12641_v23 = vpop.f32.mrb[38].mxu1  ;;  %v14155_v42 = vld [vmem:[%s17876_s1 + $0x1108] sm:$0xff]   ;;  %v14179_v13 = vld [vmem:[%s17876_s1 + $0x1138] sm:$0xff]  }
 0x21a   :  { %12942 = vmatprep.subr.bf16.mxu1 %v14144_v10  ;;  %v12642_v27 = vpop.f32.mrb[39].mxu1  ;;  %v14180_v15 = vld [vmem:[%s17876_s1 + $0x11f8] sm:$0xff]   ;;  %v14186_v23 = vld [vmem:[%s17876_s1 + $0x1280] sm:$0xff]  }
 0x21b   :  { %v16420_v24 = vadd.f32 %v12640_v19, %v9430_v18  ;;  %12921 = vmatpush3.bf16.msra.mxu0 %v14143_v8  ;;  %v14178_v8 = vld [vmem:[%s17876_s1 + $0x1178] sm:$0xff]   ;;  %v2419_v19 = vrot.slane %v16434_v33, %v14749_v41  ;;  %v14189_v27 = vld [vmem:[%s17876_s1 + $0x12c8] sm:$0xff]  }
 0x21c   :  { %12922 = vmatprep.subr.bf16.mxu0 %v14146_v17  ;;  %v14182_v18 = vld [vmem:[%s17876_s1 + $0x11b8] sm:$0xff]  }
 0x21d   :  { %12943 = vmatpush3.bf16.msra.mxu1 %v14145_v16  ;;  %v14195_v33 = vld [vmem:[%s17876_s1 + $0x1258] sm:$0xff]  }
 0x21e   :  { %12944 = vmatprep.subr.bf16.mxu1 %v14148_v21  ;;  %v14184_v21 = vld [vmem:[%s17876_s1 + $0x1200] sm:$0xff]  }
 0x21f   :  { %12923 = vmatpush3.bf16.msra.mxu0 %v14147_v20  ;;  %v14183_v20 = vld [vmem:[%s17876_s1 + $0x1240] sm:$0xff]  }
 0x220   :  { %12952 = vmatprep.subr.bf16.mxu0 %v14150_v29  ;;  %v14191_v29 = vld [vmem:[%s17876_s1 + $0x1250] sm:$0xff]  }
 0x221   :  { %12945 = vmatpush3.bf16.msra.mxu1 %v14149_v26  ;;  %v14188_v26 = vld [vmem:[%s17876_s1 + $0x1208] sm:$0xff]  }
 0x222   :  { %9988 = vmatmul.mubr.bf16.vlgmr.msra.gmra.mrb[64].mxu0 %v2412_v31  ;;  %12974 = vmatprep.subr.bf16.mxu1 %v14152_v34  ;;  %v14193_v31 = vld [vmem:[%s17876_s1 + $0x12d0] sm:$0xff]   ;;  %v14196_v34 = vld [vmem:[%s17876_s1 + $0x1218] sm:$0xff]  }
 0x223   :  { %12953 = vmatpush3.bf16.msra.mxu0 %v14151_v32  ;;  %10067 = vmatprep.mubr.bf16.mxu0 %v2433_v43  ;;  %v14194_v32 = vld [vmem:[%s17876_s1 + $0x1290] sm:$0xff]   ;;  %v14204_v43 = vld [vmem:[%s17876_s1 + $0x1228] sm:$0xff]  }
 0x224   :  { %10028 = vmatmul.mubr.bf16.vlgmr.msra.gmra.mrb[64].mxu1 %v2434_v38  ;;  %12954 = vmatprep.subr.bf16.mxu0 %v14154_v39  ;;  %v14200_v38 = vld [vmem:[%s17876_s1 + $0x1220] sm:$0xff]  }
 0x225   :  { %12975 = vmatpush3.bf16.msra.mxu1 %v14153_v36  ;;  %10107 = vmatprep.mubr.bf16.mxu1 %v2437_v46  ;;  %v14198_v36 = vld [vmem:[%s17876_s1 + $0x1298] sm:$0xff]   ;;  %v14201_v39 = vld [vmem:[%s17876_s1 + $0x12e0] sm:$0xff]   ;;  %v14207_v46 = vld [vmem:[%s17876_s1 + $0x1270] sm:$0xff]  }
 0x226   :  { %12976 = vmatprep.subr.bf16.mxu1 %v14156_v44  ;;  %v14205_v44 = vld [vmem:[%s17876_s1 + $0x12e8] sm:$0xff]  }
 0x227   :  { %12955 = vmatpush3.bf16.msra.mxu0 %v14155_v42  ;;  %v14203_v42 = vld [vmem:[%s17876_s1 + $0x1268] sm:$0xff]  }
 0x228   :  { %12956 = vmatprep.subr.bf16.mxu0 %v14158_v47 }
 0x229   :  { %12977 = vmatpush3.bf16.msra.mxu1 %v14157_v45  ;;  %v14206_v45 = vld [vmem:[%s17876_s1 + $0x12a8] sm:$0xff]  }
 0x22a   :  { %12978 = vmatprep.subr.bf16.mxu1 %v14160_v49 }
 0x22b   :  { %12957 = vmatpush3.bf16.msra.mxu0 %v14159_v48  ;;  %v14208_v48 = vld [vmem:[%s17876_s1 + $0x1230] sm:$0xff]  }
 0x22c   :  { %12958 = vmatprep.subr.bf16.mxu0 %v14162_v51 }
 0x22d   :  { %12979 = vmatpush3.bf16.msra.mxu1 %v14161_v50  ;;  %v14209_v50 = vld [vmem:[%s17876_s1 + $0x12f0] sm:$0xff]  }
 0x22e   :  { %12980 = vmatprep.subr.bf16.mxu1 %v14164_v53 }
 0x22f   :  { %12959 = vmatpush3.bf16.msra.mxu0 %v14163_v52 }
 0x230   :  { %12960 = vmatprep.subr.bf16.mxu0 %v14166_v55 }
 0x231   :  { %12981 = vmatpush3.bf16.msra.mxu1 %v14165_v54 }
 0x232   :  { %12982 = vmatprep.subr.bf16.mxu1 %v14168_v57  ;;  %v14211_v57 = vld [vmem:[%s17876_s1 + $0x1278] sm:$0xff]  }
 0x233   :  { %12961 = vmatpush3.bf16.msra.mxu0 %v14167_v56  ;;  %v14210_v56 = vld [vmem:[%s17876_s1 + $0x12b0] sm:$0xff]  }
 0x234   :  { %12962 = vmatprep.subr.bf16.mxu0 %v14170_v59 }
 0x235   :  { %v12660_v0 = vpop.f32.mrb[40].mxu0  ;;  %12983 = vmatpush3.bf16.msra.mxu1 %v14169_v58 }
 0x236   :  { %v12661_v2 = vpop.f32.mrb[41].mxu0  ;;  %12984 = vmatprep.subr.bf16.mxu1 %v14172_v61 }
 0x237   :  { %v12662_v4 = vadd.f32 %v12661_v2, %v12660_v0  ;;  %v12663_v5 = vpop.f32.mrb[42].mxu0  ;;  %v12682_v6 = vpop.f32.mrb[40].mxu1  ;;  %12963 = vmatpush3.bf16.msra.mxu0 %v14171_v60  ;;  %v14212_v60 = vld [vmem:[%s17876_s1 + $0x1238] sm:$0xff]   ;;  %v31_v0 = vld [vmem:[%s17875_s0 + $0x48] sm:$0xff] }
 0x238   :  { %v12664_v9 = vpop.f32.mrb[43].mxu0  ;;  %v12683_v10 = vpop.f32.mrb[41].mxu1  ;;  %12964 = vmatprep.subr.bf16.mxu0 %v14174_v63  ;;  %v14213_v63 = vld [vmem:[%s17876_s1 + $0x12f8] sm:$0xff]   ;;  %v2445_v2 = vrot.slane %v31_v0, %v14749_v41  ;;  %v14215_v5 = vld [vmem:[%s17876_s1 + $0x1340] sm:$0xff]  }
 0x239   :  { %v9510_v11 = vadd.f32 %v12662_v4, %v16420_v24  ;;  %v12684_v12 = vadd.f32 %v12683_v10, %v12682_v6  ;;  %12985 = vmatpush3.bf16.msra.mxu1 %v14173_v62  ;;  %v12685_v14 = vpop.f32.mrb[42].mxu1  ;;  %v2435_v24 = vcombine.high %v2419_v19, %v2419_v19  ;;  %v2438_v4 = vcombine.high %v31_v0, %v31_v0  ;;  %v14217_v9 = vld [vmem:[%s17876_s1 + $0x13c0] sm:$0xff]  }
 0x23a   :  { %12986 = vmatprep.subr.bf16.mxu1 %v14176_v3  ;;  %v12686_v16 = vpop.f32.mrb[43].mxu1  ;;  %v14214_v3 = vld [vmem:[%s17876_s1 + $0x12b8] sm:$0xff]   ;;  %v2453_v6 = vcombine.high %v2445_v2, %v2445_v2  ;;  %v14219_v14 = vld [vmem:[%s17876_s1 + $0x1348] sm:$0xff]  }
 0x23b   :  { %v16528_v17 = vadd.f32 %v12684_v12, %v9510_v11  ;;  %12965 = vmatpush3.bf16.msra.mxu0 %v14175_v1  ;;  %v14216_v11 = vld [vmem:[%s17876_s1 + $0x1300] sm:$0xff]  }
 0x23c   :  { %12966 = vmatprep.subr.bf16.mxu0 %v14178_v8  ;;  %v16643_v8 = vrot.slane %v2438_v4, %v14749_v41  ;;  %v2475_v10 = vrot.slane %v2453_v6, %v14749_v41  ;;  %v14218_v16 = vld [vmem:[%s17876_s1 + $0x1380] sm:$0xff]   ;;  %v14255_v4 = vld [vmem:[%s17876_s1 + $0x1488] sm:$0xff]   ;;  %v14257_v6 = vld [vmem:[%s17876_s1 + $0x1410] sm:$0xff]  }
 0x23d   :  { %12987 = vmatpush3.bf16.msra.mxu1 %v14177_v7  ;;  %v2461_v7 = vrot.slane %v2445_v2, %v14749_v41  ;;  %v14253_v2 = vld [vmem:[%s17876_s1 + $0x1408] sm:$0xff]  }
 0x23e   :  { %12988 = vmatprep.subr.bf16.mxu1 %v14180_v15  ;;  %v2454_v12 = vcombine.high %v16643_v8, %v16643_v8  ;;  %v2485_v15 = vcombine.high %v2475_v10, %v2475_v10 }
 0x23f   :  { %12967 = vmatpush3.bf16.msra.mxu0 %v14179_v13  ;;  %v2483_v13 = vcombine.high %v2461_v7, %v2461_v7 }
 0x240   :  { %12996 = vmatprep.subr.bf16.mxu0 %v14183_v20 }
 0x241   :  { %12989 = vmatpush3.bf16.msra.mxu1 %v14182_v18  ;;  %v14221_v18 = vld [vmem:[%s17876_s1 + $0x13c8] sm:$0xff]  }
 0x242   :  { %10068 = vmatmul.mubr.bf16.vlgmr.msra.gmra.mrb[68].mxu0 %v2419_v19  ;;  %13018 = vmatprep.subr.bf16.mxu1 %v14185_v22  ;;  %v14220_v19 = vld [vmem:[%s17876_s1 + $0x1308] sm:$0xff]  }
 0x243   :  { %12997 = vmatpush3.bf16.msra.mxu0 %v14184_v21  ;;  %10147 = vmatprep.mubr.bf16.mxu0 %v2475_v10  ;;  %v14223_v21 = vld [vmem:[%s17876_s1 + $0x1350] sm:$0xff]   ;;  %v14222_v22 = vld [vmem:[%s17876_s1 + $0x1388] sm:$0xff]   ;;  %v14261_v10 = vld [vmem:[%s17876_s1 + $0x1418] sm:$0xff]  }
 0x244   :  { %10108 = vmatmul.mubr.bf16.vlgmr.msra.gmra.mrb[68].mxu1 %v2435_v24  ;;  %12998 = vmatprep.subr.bf16.mxu0 %v14187_v25  ;;  %v14224_v24 = vld [vmem:[%s17876_s1 + $0x1310] sm:$0xff]   ;;  %v14227_v25 = vld [vmem:[%s17876_s1 + $0x1358] sm:$0xff]  }
 0x245   :  { %13019 = vmatpush3.bf16.msra.mxu1 %v14186_v23  ;;  %10187 = vmatprep.mubr.bf16.mxu1 %v2485_v15  ;;  %v14225_v23 = vld [vmem:[%s17876_s1 + $0x13d0] sm:$0xff]   ;;  %v14266_v15 = vld [vmem:[%s17876_s1 + $0x14e0] sm:$0xff]  }
 0x246   :  { %13020 = vmatprep.subr.bf16.mxu1 %v14189_v27  ;;  %v14229_v27 = vld [vmem:[%s17876_s1 + $0x13d8] sm:$0xff]  }
 0x247   :  { %12999 = vmatpush3.bf16.msra.mxu0 %v14188_v26  ;;  %v14226_v26 = vld [vmem:[%s17876_s1 + $0x1390] sm:$0xff]  }
 0x248   :  { %13000 = vmatprep.subr.bf16.mxu0 %v14191_v29  ;;  %v14231_v29 = vld [vmem:[%s17876_s1 + $0x1360] sm:$0xff]  }
 0x249   :  { %13021 = vmatpush3.bf16.msra.mxu1 %v14190_v28  ;;  %v14228_v28 = vld [vmem:[%s17876_s1 + $0x1318] sm:$0xff]  }
 0x24a   :  { %13022 = vmatprep.subr.bf16.mxu1 %v14193_v31  ;;  %v14233_v31 = vld [vmem:[%s17876_s1 + $0x13e0] sm:$0xff]  }
 0x24b   :  { %13001 = vmatpush3.bf16.msra.mxu0 %v14192_v30  ;;  %v14230_v30 = vld [vmem:[%s17876_s1 + $0x1398] sm:$0xff]  }
 0x24c   :  { %13002 = vmatprep.subr.bf16.mxu0 %v14195_v33  ;;  %v14235_v33 = vld [vmem:[%s17876_s1 + $0x1368] sm:$0xff]  }
 0x24d   :  { %13023 = vmatpush3.bf16.msra.mxu1 %v14194_v32  ;;  %v14232_v32 = vld [vmem:[%s17876_s1 + $0x1320] sm:$0xff]  }
 0x24e   :  { %13024 = vmatprep.subr.bf16.mxu1 %v14197_v35  ;;  %v14237_v35 = vld [vmem:[%s17876_s1 + $0x13e8] sm:$0xff]  }
 0x24f   :  { %13003 = vmatpush3.bf16.msra.mxu0 %v14196_v34  ;;  %v14234_v34 = vld [vmem:[%s17876_s1 + $0x13a0] sm:$0xff]  }
 0x250   :  { %13004 = vmatprep.subr.bf16.mxu0 %v14199_v37 }
 0x251   :  { %13025 = vmatpush3.bf16.msra.mxu1 %v14198_v36  ;;  %v14236_v36 = vld [vmem:[%s17876_s1 + $0x1328] sm:$0xff]  }
 0x252   :  { %13026 = vmatprep.subr.bf16.mxu1 %v14201_v39 }
 0x253   :  { %13005 = vmatpush3.bf16.msra.mxu0 %v14200_v38  ;;  %v14239_v38 = vld [vmem:[%s17876_s1 + $0x1370] sm:$0xff]  }
 0x254   :  { %13006 = vmatprep.subr.bf16.mxu0 %v14203_v42 }
 0x255   :  { %v12704_v47 = vpop.f32.mrb[44].mxu0  ;;  %13027 = vmatpush3.bf16.msra.mxu1 %v14202_v40  ;;  %v14238_v40 = vld [vmem:[%s17876_s1 + $0x13a8] sm:$0xff]  }
 0x256   :  { %v12705_v49 = vpop.f32.mrb[45].mxu0  ;;  %13028 = vmatprep.subr.bf16.mxu1 %v14205_v44 }
 0x257   :  { %v12706_v51 = vadd.f32 %v12705_v49, %v12704_v47  ;;  %v12707_v52 = vpop.f32.mrb[46].mxu0  ;;  %v12726_v53 = vpop.f32.mrb[44].mxu1  ;;  %13007 = vmatpush3.bf16.msra.mxu0 %v14204_v43  ;;  %v14242_v49 = vld [vmem:[%s17876_s1 + $0x13b0] sm:$0xff]  }
 0x258   :  { %v12708_v54 = vpop.f32.mrb[47].mxu0  ;;  %v12727_v55 = vpop.f32.mrb[45].mxu1  ;;  %13008 = vmatprep.subr.bf16.mxu0 %v14207_v46  ;;  %v14241_v46 = vld [vmem:[%s17876_s1 + $0x13f0] sm:$0xff]   ;;  %v14243_v52 = vld [vmem:[%s17876_s1 + $0x1378] sm:$0xff]  }
 0x259   :  { %v9590_v58 = vadd.f32 %v12706_v51, %v16528_v17  ;;  %v12728_v59 = vadd.f32 %v12727_v55, %v12726_v53  ;;  %13029 = vmatpush3.bf16.msra.mxu1 %v14206_v45  ;;  %v12729_v61 = vpop.f32.mrb[46].mxu1  ;;  %v2482_v17 = vrot.slane %v2454_v12, %v14749_v41  ;;  %v14240_v45 = vld [vmem:[%s17876_s1 + $0x1330] sm:$0xff]   ;;  %v14244_v54 = vld [vmem:[%s17876_s1 + $0x1338] sm:$0xff]  }
 0x25a   :  { %13030 = vmatprep.subr.bf16.mxu1 %v14209_v50  ;;  %v12730_v1 = vpop.f32.mrb[47].mxu1  ;;  %v14249_v61 = vld [vmem:[%s17876_s1 + $0x1400] sm:$0xff]   ;;  %v14263_v12 = vld [vmem:[%s17876_s1 + $0x1498] sm:$0xff]  }
 0x25b   :  { %v16626_v62 = vadd.f32 %v12728_v59, %v9590_v58  ;;  %13009 = vmatpush3.bf16.msra.mxu0 %v14208_v48  ;;  %v2486_v20 = vcombine.high %v2482_v17, %v2482_v17  ;;  %v14247_v58 = vld [vmem:[%s17876_s1 + $0x13b8] sm:$0xff]   ;;  %v2468_v59 = vrot.slane %v16643_v8, %v14749_v41  ;;  %v14252_v1 = vld [vmem:[%s17876_s1 + $0x1448] sm:$0xff]   ;;  %v14259_v8 = vld [vmem:[%s17876_s1 + $0x1490] sm:$0xff]  }
 0x25c   :  { %13010 = vmatprep.subr.bf16.mxu0 %v14211_v57  ;;  %v14245_v57 = vld [vmem:[%s17876_s1 + $0x13f8] sm:$0xff]  }
 0x25d   :  { %13031 = vmatpush3.bf16.msra.mxu1 %v14210_v56  ;;  %v2484_v0 = vcombine.high %v2468_v59, %v2468_v59 }
 0x25e   :  { %13032 = vmatprep.subr.bf16.mxu1 %v14213_v63  ;;  %v14251_v63 = vld [vmem:[%s17876_s1 + $0x1480] sm:$0xff]  }
 0x25f   :  { %13011 = vmatpush3.bf16.msra.mxu0 %v14212_v60  ;;  %v14248_v60 = vld [vmem:[%s17876_s1 + $0x1440] sm:$0xff]  }
 0x260   :  { %13040 = vmatprep.subr.bf16.mxu0 %v14215_v5  ;;  %v14256_v5 = vld [vmem:[%s17876_s1 + $0x1450] sm:$0xff]  }
 0x261   :  { %13033 = vmatpush3.bf16.msra.mxu1 %v14214_v3  ;;  %v14254_v3 = vld [vmem:[%s17876_s1 + $0x14c8] sm:$0xff]  }
 0x262   :  { %13062 = vmatprep.subr.bf16.mxu1 %v14217_v9  ;;  %10148 = vmatmul.mubr.bf16.vlgmr.msra.gmra.mrb[72].mxu0 %v2461_v7  ;;  %v14258_v7 = vld [vmem:[%s17876_s1 + $0x14d0] sm:$0xff]   ;;  %v14260_v9 = vld [vmem:[%s17876_s1 + $0x1458] sm:$0xff]  }
 0x263   :  { %13041 = vmatpush3.bf16.msra.mxu0 %v14216_v11  ;;  %10227 = vmatprep.mubr.bf16.mxu0 %v2482_v17  ;;  %v14262_v11 = vld [vmem:[%s17876_s1 + $0x14d8] sm:$0xff]   ;;  %v14268_v17 = vld [vmem:[%s17876_s1 + $0x1468] sm:$0xff]  }
 0x264   :  { %10188 = vmatmul.mubr.bf16.vlgmr.msra.gmra.mrb[72].mxu1 %v2483_v13  ;;  %13042 = vmatprep.subr.bf16.mxu0 %v14219_v14  ;;  %v14264_v13 = vld [vmem:[%s17876_s1 + $0x1460] sm:$0xff]  }
 0x265   :  { %13063 = vmatpush3.bf16.msra.mxu1 %v14218_v16  ;;  %10267 = vmatprep.mubr.bf16.mxu1 %v2486_v20  ;;  %v14265_v14 = vld [vmem:[%s17876_s1 + $0x1420] sm:$0xff]   ;;  %v14271_v20 = vld [vmem:[%s17876_s1 + $0x14a8] sm:$0xff]  }
 0x266   :  { %13064 = vmatprep.subr.bf16.mxu1 %v14221_v18  ;;  %v14267_v16 = vld [vmem:[%s17876_s1 + $0x14a0] sm:$0xff]   ;;  %v14269_v18 = vld [vmem:[%s17876_s1 + $0x1428] sm:$0xff]  }
 0x267   :  { %13043 = vmatpush3.bf16.msra.mxu0 %v14220_v19  ;;  %v14270_v19 = vld [vmem:[%s17876_s1 + $0x14e8] sm:$0xff]  }
 0x268   :  { %13044 = vmatprep.subr.bf16.mxu0 %v14223_v21 }
 0x269   :  { %13065 = vmatpush3.bf16.msra.mxu1 %v14222_v22  ;;  %v14272_v22 = vld [vmem:[%s17876_s1 + $0x1470] sm:$0xff]  }
 0x26a   :  { %13066 = vmatprep.subr.bf16.mxu1 %v14225_v23 }
 0x26b   :  { %13045 = vmatpush3.bf16.msra.mxu0 %v14224_v24  ;;  %v14273_v24 = vld [vmem:[%s17876_s1 + $0x1430] sm:$0xff]  }
 0x26c   :  { %13046 = vmatprep.subr.bf16.mxu0 %v14227_v25 }
 0x26d   :  { %13067 = vmatpush3.bf16.msra.mxu1 %v14226_v26 }
 0x26e   :  { %13068 = vmatprep.subr.bf16.mxu1 %v14229_v27 }
 0x26f   :  { %13047 = vmatpush3.bf16.msra.mxu0 %v14228_v28 }
 0x270   :  { %13048 = vmatprep.subr.bf16.mxu0 %v14231_v29 }
 0x271   :  { %13069 = vmatpush3.bf16.msra.mxu1 %v14230_v30  ;;  %v14274_v30 = vld [vmem:[%s17876_s1 + $0x14f0] sm:$0xff]  }
 0x272   :  { %13070 = vmatprep.subr.bf16.mxu1 %v14233_v31  ;;  %v14275_v31 = vld [vmem:[%s17876_s1 + $0x14b0] sm:$0xff]  }
 0x273   :  { %13049 = vmatpush3.bf16.msra.mxu0 %v14232_v32 }
 0x274   :  { %13050 = vmatprep.subr.bf16.mxu0 %v14235_v33 }
 0x275   :  { %v12748_v37 = vpop.f32.mrb[48].mxu0  ;;  %13071 = vmatpush3.bf16.msra.mxu1 %v14234_v34  ;;  %v14276_v34 = vld [vmem:[%s17876_s1 + $0x1478] sm:$0xff]  }
 0x276   :  { %v12749_v39 = vpop.f32.mrb[49].mxu0  ;;  %13072 = vmatprep.subr.bf16.mxu1 %v14237_v35 }
 0x277   :  { %v12750_v42 = vadd.f32 %v12749_v39, %v12748_v37  ;;  %v12751_v43 = vpop.f32.mrb[50].mxu0  ;;  %v12770_v44 = vpop.f32.mrb[48].mxu1  ;;  %13051 = vmatpush3.bf16.msra.mxu0 %v14236_v36  ;;  %v14277_v37 = vld [vmem:[%s17876_s1 + $0x1438] sm:$0xff]  }
 0x278   :  { %v12752_v47 = vpop.f32.mrb[51].mxu0  ;;  %v12771_v48 = vpop.f32.mrb[49].mxu1  ;;  %13052 = vmatprep.subr.bf16.mxu0 %v14239_v38  ;;  %v14278_v39 = vld [vmem:[%s17876_s1 + $0x14f8] sm:$0xff]  }
 0x279   :  { %v9670_v50 = vadd.f32 %v12750_v42, %v16626_v62  ;;  %v12772_v51 = vadd.f32 %v12771_v48, %v12770_v44  ;;  %v12773_v53 = vpop.f32.mrb[50].mxu1  ;;  %13073 = vmatpush3.bf16.msra.mxu1 %v14238_v40  ;;  %v14250_v62 = vld [vmem:[%s17876_s1 + $0x14c0] sm:$0xff]   ;;  %v32_v40 = vld [vmem:[%s17875_s0 + $0x50] sm:$0xff]  ;;  %v14279_v43 = vld [vmem:[%s17876_s1 + $0x14b8] sm:$0xff]  }
 0x27a   :  { %v12774_v55 = vpop.f32.mrb[51].mxu1  ;;  %13074 = vmatprep.subr.bf16.mxu1 %v14241_v46  ;;  %v2494_v42 = vrot.slane %v32_v40, %v14749_v41  ;;  %v2487_v44 = vcombine.high %v32_v40, %v32_v40  ;;  %v14281_v48 = vld [vmem:[%s17876_s1 + $0x1500] sm:$0xff]   ;;  %v14317_v40 = vld [vmem:[%s17876_s1 + $0x1648] sm:$0xff]  }
 0x27b   :  { %v16737_v56 = vadd.f32 %v12772_v51, %v9670_v50  ;;  %13053 = vmatpush3.bf16.msra.mxu0 %v14240_v45  ;;  %v14280_v45 = vld [vmem:[%s17876_s1 + $0x1540] sm:$0xff]   ;;  %v14284_v55 = vld [vmem:[%s17876_s1 + $0x1548] sm:$0xff]  }
 0x27c   :  { %13054 = vmatprep.subr.bf16.mxu0 %v14243_v52  ;;  %v2502_v46 = vcombine.high %v2494_v42, %v2494_v42  ;;  %v2510_v47 = vrot.slane %v2494_v42, %v14749_v41  ;;  %v14282_v50 = vld [vmem:[%s17876_s1 + $0x15c0] sm:$0xff]   ;;  %v14318_v42 = vld [vmem:[%s17876_s1 + $0x1608] sm:$0xff]  }
 0x27d   :  { %13075 = vmatpush3.bf16.msra.mxu1 %v14242_v49  ;;  %v16858_v49 = vrot.slane %v2487_v44, %v14749_v41  ;;  %v14283_v52 = vld [vmem:[%s17876_s1 + $0x1580] sm:$0xff]   ;;  %v14320_v44 = vld [vmem:[%s17876_s1 + $0x1688] sm:$0xff]  }
 0x27e   :  { %13076 = vmatprep.subr.bf16.mxu1 %v14245_v57  ;;  %v2524_v51 = vrot.slane %v2502_v46, %v14749_v41  ;;  %v14285_v57 = vld [vmem:[%s17876_s1 + $0x1508] sm:$0xff]   ;;  %v14322_v46 = vld [vmem:[%s17876_s1 + $0x1610] sm:$0xff]  }
 0x27f   :  { %13055 = vmatpush3.bf16.msra.mxu0 %v14244_v54  ;;  %v2503_v53 = vcombine.high %v16858_v49, %v16858_v49  ;;  %v2532_v54 = vcombine.high %v2510_v47, %v2510_v47 }
 0x280   :  { %13084 = vmatprep.subr.bf16.mxu0 %v14248_v60  ;;  %v14287_v60 = vld [vmem:[%s17876_s1 + $0x1588] sm:$0xff]  }
 0x281   :  { %13077 = vmatpush3.bf16.msra.mxu1 %v14247_v58  ;;  %v2531_v58 = vrot.slane %v2503_v53, %v14749_v41  ;;  %v14329_v53 = vld [vmem:[%s17876_s1 + $0x1660] sm:$0xff]  }
 0x282   :  { %10228 = vmatmul.mubr.bf16.vlgmr.msra.gmra.mrb[76].mxu0 %v2468_v59  ;;  %13106 = vmatprep.subr.bf16.mxu1 %v14250_v62  ;;  %v14286_v59 = vld [vmem:[%s17876_s1 + $0x15c8] sm:$0xff]   ;;  %v14288_v62 = vld [vmem:[%s17876_s1 + $0x1550] sm:$0xff]  }
 0x283   :  { %13085 = vmatpush3.bf16.msra.mxu0 %v14249_v61  ;;  %10307 = vmatprep.mubr.bf16.mxu0 %v2524_v51  ;;  %v2535_v61 = vcombine.high %v2531_v58, %v2531_v58 }
 0x284   :  { %10268 = vmatmul.mubr.bf16.vlgmr.msra.gmra.mrb[76].mxu1 %v2484_v0  ;;  %13086 = vmatprep.subr.bf16.mxu0 %v14252_v1  ;;  %v14290_v0 = vld [vmem:[%s17876_s1 + $0x15d0] sm:$0xff]  }
 0x285   :  { %13107 = vmatpush3.bf16.msra.mxu1 %v14251_v63  ;;  %v14289_v63 = vld [vmem:[%s17876_s1 + $0x1510] sm:$0xff]  }
 0x286   :  { %13108 = vmatprep.subr.bf16.mxu1 %v14254_v3  ;;  %v14291_v1 = vld [vmem:[%s17876_s1 + $0x1590] sm:$0xff]   ;;  %v14293_v3 = vld [vmem:[%s17876_s1 + $0x1518] sm:$0xff]  }
 0x287   :  { %13087 = vmatpush3.bf16.msra.mxu0 %v14253_v2  ;;  %v14292_v2 = vld [vmem:[%s17876_s1 + $0x1558] sm:$0xff]  }
 0x288   :  { %13088 = vmatprep.subr.bf16.mxu0 %v14256_v5  ;;  %v14295_v5 = vld [vmem:[%s17876_s1 + $0x1598] sm:$0xff]  }
 0x289   :  { %13109 = vmatpush3.bf16.msra.mxu1 %v14255_v4  ;;  %v14294_v4 = vld [vmem:[%s17876_s1 + $0x15d8] sm:$0xff]  }
 0x28a   :  { %13110 = vmatprep.subr.bf16.mxu1 %v14258_v7  ;;  %v14297_v7 = vld [vmem:[%s17876_s1 + $0x1520] sm:$0xff]  }
 0x28b   :  { %13089 = vmatpush3.bf16.msra.mxu0 %v14257_v6  ;;  %v14296_v6 = vld [vmem:[%s17876_s1 + $0x1560] sm:$0xff]  }
 0x28c   :  { %13090 = vmatprep.subr.bf16.mxu0 %v14260_v9  ;;  %v14299_v9 = vld [vmem:[%s17876_s1 + $0x15a0] sm:$0xff]  }
 0x28d   :  { %13111 = vmatpush3.bf16.msra.mxu1 %v14259_v8  ;;  %v14298_v8 = vld [vmem:[%s17876_s1 + $0x15e0] sm:$0xff]  }
 0x28e   :  { %13112 = vmatprep.subr.bf16.mxu1 %v14262_v11  ;;  %v14301_v11 = vld [vmem:[%s17876_s1 + $0x1528] sm:$0xff]  }
 0x28f   :  { %13091 = vmatpush3.bf16.msra.mxu0 %v14261_v10  ;;  %v14300_v10 = vld [vmem:[%s17876_s1 + $0x1568] sm:$0xff]  }
 0x290   :  { %13092 = vmatprep.subr.bf16.mxu0 %v14264_v13 }
 0x291   :  { %13113 = vmatpush3.bf16.msra.mxu1 %v14263_v12  ;;  %v14302_v12 = vld [vmem:[%s17876_s1 + $0x15e8] sm:$0xff]  }
 0x292   :  { %13114 = vmatprep.subr.bf16.mxu1 %v14266_v15 }
 0x293   :  { %13093 = vmatpush3.bf16.msra.mxu0 %v14265_v14  ;;  %v14303_v14 = vld [vmem:[%s17876_s1 + $0x15a8] sm:$0xff]  }
 0x294   :  { %13094 = vmatprep.subr.bf16.mxu0 %v14268_v17 }
 0x295   :  { %v12792_v21 = vpop.f32.mrb[52].mxu0  ;;  %13115 = vmatpush3.bf16.msra.mxu1 %v14267_v16  ;;  %v14304_v16 = vld [vmem:[%s17876_s1 + $0x1570] sm:$0xff]  }
 0x296   :  { %v12793_v23 = vpop.f32.mrb[53].mxu0  ;;  %13116 = vmatprep.subr.bf16.mxu1 %v14270_v19 }
 0x297   :  { %v12794_v25 = vadd.f32 %v12793_v23, %v12792_v21  ;;  %v12795_v26 = vpop.f32.mrb[54].mxu0  ;;  %v12814_v27 = vpop.f32.mrb[52].mxu1  ;;  %13095 = vmatpush3.bf16.msra.mxu0 %v14269_v18  ;;  %v14306_v21 = vld [vmem:[%s17876_s1 + $0x15f0] sm:$0xff]  }
 0x298   :  { %v12796_v28 = vpop.f32.mrb[55].mxu0  ;;  %v12815_v29 = vpop.f32.mrb[53].mxu1  ;;  %13096 = vmatprep.subr.bf16.mxu0 %v14272_v22  ;;  %v14307_v26 = vld [vmem:[%s17876_s1 + $0x15b0] sm:$0xff]  }
 0x299   :  { %v9750_v32 = vadd.f32 %v12794_v25, %v16737_v56  ;;  %v12816_v33 = vadd.f32 %v12815_v29, %v12814_v27  ;;  %13117 = vmatpush3.bf16.msra.mxu1 %v14271_v20  ;;  %v12817_v35 = vpop.f32.mrb[54].mxu1  ;;  %v2534_v56 = vcombine.high %v2524_v51, %v2524_v51  ;;  %v14305_v20 = vld [vmem:[%s17876_s1 + $0x1530] sm:$0xff]   ;;  %v14308_v28 = vld [vmem:[%s17876_s1 + $0x1578] sm:$0xff]  }
 0x29a   :  { %13118 = vmatprep.subr.bf16.mxu1 %v14274_v30  ;;  %v12818_v38 = vpop.f32.mrb[55].mxu1  ;;  %v14313_v35 = vld [vmem:[%s17876_s1 + $0x1640] sm:$0xff]   ;;  %v14327_v51 = vld [vmem:[%s17876_s1 + $0x16d8] sm:$0xff]  }
 0x29b   :  { %v16835_v36 = vadd.f32 %v12816_v33, %v9750_v32  ;;  %13097 = vmatpush3.bf16.msra.mxu0 %v14273_v24  ;;  %10347 = vmatprep.mubr.bf16.mxu1 %v2534_v56  ;;  %v14310_v32 = vld [vmem:[%s17876_s1 + $0x15f8] sm:$0xff]   ;;  %v14316_v38 = vld [vmem:[%s17876_s1 + $0x1680] sm:$0xff]  }
 0x29c   :  { %13098 = vmatprep.subr.bf16.mxu0 %v14276_v34  ;;  %v14312_v33 = vld [vmem:[%s17876_s1 + $0x15b8] sm:$0xff]   ;;  %v2517_v34 = vrot.slane %v16858_v49, %v14749_v41  ;;  %v14332_v56 = vld [vmem:[%s17876_s1 + $0x16a0] sm:$0xff]  }
 0x29d   :  { %13119 = vmatpush3.bf16.msra.mxu1 %v14275_v31  ;;  %v14309_v31 = vld [vmem:[%s17876_s1 + $0x1538] sm:$0xff]  }
 0x29e   :  { %13120 = vmatprep.subr.bf16.mxu1 %v14278_v39  ;;  %v2533_v39 = vcombine.high %v2517_v34, %v2517_v34  ;;  %v14325_v49 = vld [vmem:[%s17876_s1 + $0x1658] sm:$0xff]  }
 0x29f   :  { %13099 = vmatpush3.bf16.msra.mxu0 %v14277_v37  ;;  %v14315_v37 = vld [vmem:[%s17876_s1 + $0x16c0] sm:$0xff]  }
 0x2a0   :  { %13128 = vmatprep.subr.bf16.mxu0 %v14280_v45  ;;  %v14321_v45 = vld [vmem:[%s17876_s1 + $0x1650] sm:$0xff]  }
 0x2a1   :  { %13121 = vmatpush3.bf16.msra.mxu1 %v14279_v43  ;;  %v14319_v43 = vld [vmem:[%s17876_s1 + $0x16c8] sm:$0xff]  }
 0x2a2   :  { %13150 = vmatprep.subr.bf16.mxu1 %v14282_v50  ;;  %10308 = vmatmul.mubr.bf16.vlgmr.msra.gmra.mrb[80].mxu0 %v2510_v47  ;;  %v14323_v47 = vld [vmem:[%s17876_s1 + $0x16d0] sm:$0xff]   ;;  %v14326_v50 = vld [vmem:[%s17876_s1 + $0x1618] sm:$0xff]  }
 0x2a3   :  { %13129 = vmatpush3.bf16.msra.mxu0 %v14281_v48  ;;  %10387 = vmatprep.mubr.bf16.mxu0 %v2531_v58  ;;  %v14324_v48 = vld [vmem:[%s17876_s1 + $0x1690] sm:$0xff]   ;;  %v14334_v58 = vld [vmem:[%s17876_s1 + $0x1628] sm:$0xff]  }
 0x2a4   :  { %10348 = vmatmul.mubr.bf16.vlgmr.msra.gmra.mrb[80].mxu1 %v2532_v54  ;;  %13130 = vmatprep.subr.bf16.mxu0 %v14284_v55  ;;  %v14330_v54 = vld [vmem:[%s17876_s1 + $0x1620] sm:$0xff]  }
 0x2a5   :  { %13151 = vmatpush3.bf16.msra.mxu1 %v14283_v52  ;;  %10427 = vmatprep.mubr.bf16.mxu1 %v2535_v61  ;;  %v14328_v52 = vld [vmem:[%s17876_s1 + $0x1698] sm:$0xff]   ;;  %v14331_v55 = vld [vmem:[%s17876_s1 + $0x16e0] sm:$0xff]   ;;  %v14336_v61 = vld [vmem:[%s17876_s1 + $0x16a8] sm:$0xff]  }
 0x2a6   :  { %13152 = vmatprep.subr.bf16.mxu1 %v14286_v59  ;;  %v14335_v59 = vld [vmem:[%s17876_s1 + $0x16e8] sm:$0xff]  }
 0x2a7   :  { %13131 = vmatpush3.bf16.msra.mxu0 %v14285_v57  ;;  %v14333_v57 = vld [vmem:[%s17876_s1 + $0x1668] sm:$0xff]  }
 0x2a8   :  { %13132 = vmatprep.subr.bf16.mxu0 %v14288_v62 }
 0x2a9   :  { %13153 = vmatpush3.bf16.msra.mxu1 %v14287_v60 }
 0x2aa   :  { %13154 = vmatprep.subr.bf16.mxu1 %v14290_v0 }
 0x2ab   :  { %13133 = vmatpush3.bf16.msra.mxu0 %v14289_v63  ;;  %v14337_v63 = vld [vmem:[%s17876_s1 + $0x1670] sm:$0xff]  }
 0x2ac   :  { %13134 = vmatprep.subr.bf16.mxu0 %v14292_v2 }
 0x2ad   :  { %13155 = vmatpush3.bf16.msra.mxu1 %v14291_v1 }
 0x2ae   :  { %13156 = vmatprep.subr.bf16.mxu1 %v14294_v4 }
 0x2af   :  { %13135 = vmatpush3.bf16.msra.mxu0 %v14293_v3 }
 0x2b0   :  { %13136 = vmatprep.subr.bf16.mxu0 %v14296_v6  ;;  %v14339_v6 = vld [vmem:[%s17876_s1 + $0x16f0] sm:$0xff]  }
 0x2b1   :  { %13157 = vmatpush3.bf16.msra.mxu1 %v14295_v5  ;;  %v14338_v5 = vld [vmem:[%s17876_s1 + $0x1630] sm:$0xff]  }
 0x2b2   :  { %13158 = vmatprep.subr.bf16.mxu1 %v14298_v8 }
 0x2b3   :  { %13137 = vmatpush3.bf16.msra.mxu0 %v14297_v7 }
 0x2b4   :  { %13138 = vmatprep.subr.bf16.mxu0 %v14300_v10 }
 0x2b5   :  { %v12836_v13 = vpop.f32.mrb[56].mxu0  ;;  %13159 = vmatpush3.bf16.msra.mxu1 %v14299_v9  ;;  %v14340_v9 = vld [vmem:[%s17876_s1 + $0x16b0] sm:$0xff]  }
 0x2b6   :  { %v12837_v15 = vpop.f32.mrb[57].mxu0  ;;  %13160 = vmatprep.subr.bf16.mxu1 %v14302_v12  ;;  %v14341_v12 = vld [vmem:[%s17876_s1 + $0x1678] sm:$0xff]  }
 0x2b7   :  { %v12838_v17 = vadd.f32 %v12837_v15, %v12836_v13  ;;  %v12839_v18 = vpop.f32.mrb[58].mxu0  ;;  %v12858_v19 = vpop.f32.mrb[56].mxu1  ;;  %13139 = vmatpush3.bf16.msra.mxu0 %v14301_v11  ;;  %v14343_v15 = vld [vmem:[%s17876_s1 + $0x16f8] sm:$0xff]  }
 0x2b8   :  { %v12840_v22 = vpop.f32.mrb[59].mxu0  ;;  %v12859_v23 = vpop.f32.mrb[57].mxu1  ;;  %13140 = vmatprep.subr.bf16.mxu0 %v14304_v16  ;;  %v33_v16 = vld [vmem:[%s17875_s0 + $0x58] sm:$0xff] }
 0x2b9   :  { %v9830_v24 = vadd.f32 %v12838_v17, %v16835_v36  ;;  %v12860_v25 = vadd.f32 %v12859_v23, %v12858_v19  ;;  %v12861_v27 = vpop.f32.mrb[58].mxu1  ;;  %13161 = vmatpush3.bf16.msra.mxu1 %v14303_v14  ;;  %v14314_v36 = vld [vmem:[%s17876_s1 + $0x1600] sm:$0xff]   ;;  %v14342_v14 = vld [vmem:[%s17876_s1 + $0x1638] sm:$0xff]   ;;  %v2543_v17 = vrot.slane %v33_v16, %v14749_v41  ;;  %v2536_v19 = vcombine.high %v33_v16, %v33_v16  ;;  %v14382_v16 = vld [vmem:[%s17876_s1 + $0x1848] sm:$0xff]  }
 0x2ba   :  { %v12862_v29 = vpop.f32.mrb[59].mxu1  ;;  %13162 = vmatprep.subr.bf16.mxu1 %v14306_v21  ;;  %v14344_v18 = vld [vmem:[%s17876_s1 + $0x16b8] sm:$0xff]  }
 0x2bb   :  { %v16946_v30 = vadd.f32 %v12860_v25, %v9830_v24  ;;  %13141 = vmatpush3.bf16.msra.mxu0 %v14305_v20  ;;  %v14345_v20 = vld [vmem:[%s17876_s1 + $0x1740] sm:$0xff]   ;;  %v2551_v21 = vcombine.high %v2543_v17, %v2543_v17  ;;  %v2559_v22 = vrot.slane %v2543_v17, %v14749_v41  ;;  %v17067_v23 = vrot.slane %v2536_v19, %v14749_v41  ;;  %v14349_v29 = vld [vmem:[%s17876_s1 + $0x1748] sm:$0xff]  }
 0x2bc   :  { %13142 = vmatprep.subr.bf16.mxu0 %v14308_v28  ;;  %v14347_v24 = vld [vmem:[%s17876_s1 + $0x17c0] sm:$0xff]   ;;  %v14383_v17 = vld [vmem:[%s17876_s1 + $0x1808] sm:$0xff]  }
 0x2bd   :  { %13163 = vmatpush3.bf16.msra.mxu1 %v14307_v26  ;;  %v2573_v25 = vrot.slane %v2551_v21, %v14749_v41  ;;  %v14346_v26 = vld [vmem:[%s17876_s1 + $0x1700] sm:$0xff]   ;;  %v2552_v27 = vcombine.high %v17067_v23, %v17067_v23  ;;  %v2581_v28 = vcombine.high %v2559_v22, %v2559_v22  ;;  %v14385_v19 = vld [vmem:[%s17876_s1 + $0x1888] sm:$0xff]   ;;  %v14387_v21 = vld [vmem:[%s17876_s1 + $0x1810] sm:$0xff]  }
 0x2be   :  { %13164 = vmatprep.subr.bf16.mxu1 %v14310_v32 }
 0x2bf   :  { %13143 = vmatpush3.bf16.msra.mxu0 %v14309_v31  ;;  %v14348_v31 = vld [vmem:[%s17876_s1 + $0x1780] sm:$0xff]   ;;  %v2580_v32 = vrot.slane %v2552_v27, %v14749_v41  ;;  %v14393_v27 = vld [vmem:[%s17876_s1 + $0x1898] sm:$0xff]  }
 0x2c0   :  { %13172 = vmatprep.subr.bf16.mxu0 %v14313_v35 }
 0x2c1   :  { %13165 = vmatpush3.bf16.msra.mxu1 %v14312_v33  ;;  %v14351_v33 = vld [vmem:[%s17876_s1 + $0x17c8] sm:$0xff]   ;;  %v2584_v35 = vcombine.high %v2580_v32, %v2580_v32 }
 0x2c2   :  { %10388 = vmatmul.mubr.bf16.vlgmr.msra.gmra.mrb[84].mxu0 %v2517_v34  ;;  %13194 = vmatprep.subr.bf16.mxu1 %v14315_v37  ;;  %v14350_v34 = vld [vmem:[%s17876_s1 + $0x1708] sm:$0xff]  }
 0x2c3   :  { %13173 = vmatpush3.bf16.msra.mxu0 %v14314_v36  ;;  %10467 = vmatprep.mubr.bf16.mxu0 %v2573_v25  ;;  %v14353_v36 = vld [vmem:[%s17876_s1 + $0x1750] sm:$0xff]   ;;  %v14352_v37 = vld [vmem:[%s17876_s1 + $0x1788] sm:$0xff]  }
 0x2c4   :  { %10428 = vmatmul.mubr.bf16.vlgmr.msra.gmra.mrb[84].mxu1 %v2533_v39  ;;  %13174 = vmatprep.subr.bf16.mxu0 %v14317_v40  ;;  %v14354_v39 = vld [vmem:[%s17876_s1 + $0x1710] sm:$0xff]   ;;  %v14357_v40 = vld [vmem:[%s17876_s1 + $0x1758] sm:$0xff]  }
 0x2c5   :  { %13195 = vmatpush3.bf16.msra.mxu1 %v14316_v38  ;;  %v14355_v38 = vld [vmem:[%s17876_s1 + $0x17d0] sm:$0xff]  }
 0x2c6   :  { %13196 = vmatprep.subr.bf16.mxu1 %v14319_v43  ;;  %v14359_v43 = vld [vmem:[%s17876_s1 + $0x17d8] sm:$0xff]  }
 0x2c7   :  { %13175 = vmatpush3.bf16.msra.mxu0 %v14318_v42  ;;  %v14356_v42 = vld [vmem:[%s17876_s1 + $0x1790] sm:$0xff]  }
 0x2c8   :  { %13176 = vmatprep.subr.bf16.mxu0 %v14321_v45  ;;  %v14361_v45 = vld [vmem:[%s17876_s1 + $0x1760] sm:$0xff]  }
 0x2c9   :  { %13197 = vmatpush3.bf16.msra.mxu1 %v14320_v44  ;;  %v14358_v44 = vld [vmem:[%s17876_s1 + $0x1718] sm:$0xff]  }
 0x2ca   :  { %13198 = vmatprep.subr.bf16.mxu1 %v14323_v47  ;;  %v14363_v47 = vld [vmem:[%s17876_s1 + $0x17e0] sm:$0xff]  }
 0x2cb   :  { %13177 = vmatpush3.bf16.msra.mxu0 %v14322_v46  ;;  %v14360_v46 = vld [vmem:[%s17876_s1 + $0x1798] sm:$0xff]  }
 0x2cc   :  { %13178 = vmatprep.subr.bf16.mxu0 %v14325_v49  ;;  %v14365_v49 = vld [vmem:[%s17876_s1 + $0x1768] sm:$0xff]  }
 0x2cd   :  { %13199 = vmatpush3.bf16.msra.mxu1 %v14324_v48  ;;  %v14362_v48 = vld [vmem:[%s17876_s1 + $0x1720] sm:$0xff]  }
 0x2ce   :  { %13200 = vmatprep.subr.bf16.mxu1 %v14327_v51 }
 0x2cf   :  { %13179 = vmatpush3.bf16.msra.mxu0 %v14326_v50  ;;  %v14364_v50 = vld [vmem:[%s17876_s1 + $0x17a0] sm:$0xff]  }
 0x2d0   :  { %13180 = vmatprep.subr.bf16.mxu0 %v14329_v53 }
 0x2d1   :  { %13201 = vmatpush3.bf16.msra.mxu1 %v14328_v52  ;;  %v14367_v52 = vld [vmem:[%s17876_s1 + $0x17e8] sm:$0xff]  }
 0x2d2   :  { %13202 = vmatprep.subr.bf16.mxu1 %v14331_v55 }
 0x2d3   :  { %13181 = vmatpush3.bf16.msra.mxu0 %v14330_v54  ;;  %v14366_v54 = vld [vmem:[%s17876_s1 + $0x1728] sm:$0xff]  }
 0x2d4   :  { %13182 = vmatprep.subr.bf16.mxu0 %v14333_v57 }
 0x2d5   :  { %v12880_v60 = vpop.f32.mrb[60].mxu0  ;;  %13203 = vmatpush3.bf16.msra.mxu1 %v14332_v56 }
 0x2d6   :  { %v12881_v62 = vpop.f32.mrb[61].mxu0  ;;  %13204 = vmatprep.subr.bf16.mxu1 %v14335_v59  ;;  %v14369_v59 = vld [vmem:[%s17876_s1 + $0x1770] sm:$0xff]  }
 0x2d7   :  { %v12882_v0 = vadd.f32 %v12881_v62, %v12880_v60  ;;  %v12883_v1 = vpop.f32.mrb[62].mxu0  ;;  %v12902_v2 = vpop.f32.mrb[60].mxu1  ;;  %13183 = vmatpush3.bf16.msra.mxu0 %v14334_v58  ;;  %v14368_v58 = vld [vmem:[%s17876_s1 + $0x17a8] sm:$0xff]   ;;  %v14370_v62 = vld [vmem:[%s17876_s1 + $0x1730] sm:$0xff]  }
 0x2d8   :  { %v12884_v3 = vpop.f32.mrb[63].mxu0  ;;  %v12903_v4 = vpop.f32.mrb[61].mxu1  ;;  %13184 = vmatprep.subr.bf16.mxu0 %v14337_v63  ;;  %v14371_v1 = vld [vmem:[%s17876_s1 + $0x17f0] sm:$0xff]  }
 0x2d9   :  { %v9910_v7 = vadd.f32 %v12882_v0, %v16946_v30  ;;  %v12904_v8 = vadd.f32 %v12903_v4, %v12902_v2  ;;  %v12905_v10 = vpop.f32.mrb[62].mxu1  ;;  %13205 = vmatpush3.bf16.msra.mxu1 %v14336_v61  ;;  %v2583_v30 = vcombine.high %v2573_v25, %v2573_v25  ;;  %v14372_v3 = vld [vmem:[%s17876_s1 + $0x17b0] sm:$0xff]   ;;  %v14391_v25 = vld [vmem:[%s17876_s1 + $0x1818] sm:$0xff]  }
 0x2da   :  { %v12906_v13 = vpop.f32.mrb[63].mxu1  ;;  %13206 = vmatprep.subr.bf16.mxu1 %v14339_v6  ;;  %v14373_v6 = vld [vmem:[%s17876_s1 + $0x1778] sm:$0xff]   ;;  %v2566_v10 = vrot.slane %v17067_v23, %v14749_v41  ;;  %v14389_v23 = vld [vmem:[%s17876_s1 + $0x1890] sm:$0xff]  }
 0x2db   :  { %v17044_v11 = vadd.f32 %v12904_v8, %v9910_v7  ;;  %13185 = vmatpush3.bf16.msra.mxu0 %v14338_v5  ;;  %10507 = vmatprep.mubr.bf16.mxu1 %v2583_v30  ;;  %v14374_v7 = vld [vmem:[%s17876_s1 + $0x1738] sm:$0xff]   ;;  %v14380_v13 = vld [vmem:[%s17876_s1 + $0x18c0] sm:$0xff]  }
 0x2dc   :  { %13186 = vmatprep.subr.bf16.mxu0 %v14341_v12  ;;  %v14375_v8 = vld [vmem:[%s17876_s1 + $0x17f8] sm:$0xff]   ;;  %v14379_v12 = vld [vmem:[%s17876_s1 + $0x1800] sm:$0xff]  }
 0x2dd   :  { %13207 = vmatpush3.bf16.msra.mxu1 %v14340_v9  ;;  %v14377_v9 = vld [vmem:[%s17876_s1 + $0x17b8] sm:$0xff]   ;;  %v14396_v30 = vld [vmem:[%s17876_s1 + $0x18e0] sm:$0xff]  }
 0x2de   :  { %13208 = vmatprep.subr.bf16.mxu1 %v14343_v15  ;;  %v2582_v15 = vcombine.high %v2566_v10, %v2566_v10 }
 0x2df   :  { %13187 = vmatpush3.bf16.msra.mxu0 %v14342_v14  ;;  %v14381_v14 = vld [vmem:[%s17876_s1 + $0x1880] sm:$0xff]  }
 0x2e0   :  { %13216 = vmatprep.subr.bf16.mxu0 %v14345_v20  ;;  %v14386_v20 = vld [vmem:[%s17876_s1 + $0x1850] sm:$0xff]  }
 0x2e1   :  { %13209 = vmatpush3.bf16.msra.mxu1 %v14344_v18  ;;  %v14384_v18 = vld [vmem:[%s17876_s1 + $0x18c8] sm:$0xff]  }
 0x2e2   :  { %13238 = vmatprep.subr.bf16.mxu1 %v14347_v24  ;;  %10468 = vmatmul.mubr.bf16.vlgmr.msra.gmra.mrb[88].mxu0 %v2559_v22  ;;  %v14388_v22 = vld [vmem:[%s17876_s1 + $0x18d0] sm:$0xff]   ;;  %v14390_v24 = vld [vmem:[%s17876_s1 + $0x1858] sm:$0xff]  }
 0x2e3   :  { %13217 = vmatpush3.bf16.msra.mxu0 %v14346_v26  ;;  %10547 = vmatprep.mubr.bf16.mxu0 %v2580_v32  ;;  %v14392_v26 = vld [vmem:[%s17876_s1 + $0x18d8] sm:$0xff]   ;;  %v14398_v32 = vld [vmem:[%s17876_s1 + $0x1868] sm:$0xff]  }
 0x2e4   :  { %10508 = vmatmul.mubr.bf16.vlgmr.msra.gmra.mrb[88].mxu1 %v2581_v28  ;;  %13218 = vmatprep.subr.bf16.mxu0 %v14349_v29  ;;  %v14394_v28 = vld [vmem:[%s17876_s1 + $0x1860] sm:$0xff]  }
 0x2e5   :  { %13239 = vmatpush3.bf16.msra.mxu1 %v14348_v31  ;;  %10587 = vmatprep.mubr.bf16.mxu1 %v2584_v35  ;;  %v14395_v29 = vld [vmem:[%s17876_s1 + $0x1820] sm:$0xff]   ;;  %v14400_v35 = vld [vmem:[%s17876_s1 + $0x18e8] sm:$0xff]  }
 0x2e6   :  { %13240 = vmatprep.subr.bf16.mxu1 %v14351_v33  ;;  %v14397_v31 = vld [vmem:[%s17876_s1 + $0x18a0] sm:$0xff]   ;;  %v14399_v33 = vld [vmem:[%s17876_s1 + $0x1828] sm:$0xff]  }
 0x2e7   :  { %13219 = vmatpush3.bf16.msra.mxu0 %v14350_v34 }
 0x2e8   :  { %13220 = vmatprep.subr.bf16.mxu0 %v14353_v36 }
 0x2e9   :  { %13241 = vmatpush3.bf16.msra.mxu1 %v14352_v37  ;;  %v14401_v37 = vld [vmem:[%s17876_s1 + $0x18a8] sm:$0xff]  }
 0x2ea   :  { %13242 = vmatprep.subr.bf16.mxu1 %v14355_v38 }
 0x2eb   :  { %13221 = vmatpush3.bf16.msra.mxu0 %v14354_v39 }
 0x2ec   :  { %13222 = vmatprep.subr.bf16.mxu0 %v14357_v40 }
 0x2ed   :  { %13243 = vmatpush3.bf16.msra.mxu1 %v14356_v42 }
 0x2ee   :  { %13244 = vmatprep.subr.bf16.mxu1 %v14359_v43 }
 0x2ef   :  { %13223 = vmatpush3.bf16.msra.mxu0 %v14358_v44  ;;  %v14402_v44 = vld [vmem:[%s17876_s1 + $0x1870] sm:$0xff]  }
 0x2f0   :  { %13224 = vmatprep.subr.bf16.mxu0 %v14361_v45  ;;  %v14403_v45 = vld [vmem:[%s17876_s1 + $0x1830] sm:$0xff]  }
 0x2f1   :  { %13245 = vmatpush3.bf16.msra.mxu1 %v14360_v46 }
 0x2f2   :  { %13246 = vmatprep.subr.bf16.mxu1 %v14363_v47 }
 0x2f3   :  { %13225 = vmatpush3.bf16.msra.mxu0 %v14362_v48  ;;  %v14404_v48 = vld [vmem:[%s17876_s1 + $0x18f0] sm:$0xff]  }
 0x2f4   :  { %13226 = vmatprep.subr.bf16.mxu0 %v14365_v49 }
 0x2f5   :  { %v12924_v51 = vpop.f32.mrb[64].mxu0  ;;  %13247 = vmatpush3.bf16.msra.mxu1 %v14364_v50 }
 0x2f6   :  { %v12925_v53 = vpop.f32.mrb[65].mxu0  ;;  %13248 = vmatprep.subr.bf16.mxu1 %v14367_v52 }
 0x2f7   :  { %v12926_v55 = vadd.f32 %v12925_v53, %v12924_v51  ;;  %v12927_v56 = vpop.f32.mrb[66].mxu0  ;;  %v12946_v57 = vpop.f32.mrb[64].mxu1  ;;  %13227 = vmatpush3.bf16.msra.mxu0 %v14366_v54  ;;  %v14405_v51 = vld [vmem:[%s17876_s1 + $0x18b0] sm:$0xff]   ;;  %v14406_v53 = vld [vmem:[%s17876_s1 + $0x1878] sm:$0xff]  }
 0x2f8   :  { %v12928_v60 = vpop.f32.mrb[67].mxu0  ;;  %v12947_v61 = vpop.f32.mrb[65].mxu1  ;;  %13228 = vmatprep.subr.bf16.mxu0 %v14369_v59  ;;  %v14407_v54 = vld [vmem:[%s17876_s1 + $0x1838] sm:$0xff]   ;;  %v34_v56 = vld [vmem:[%s17875_s0 + $0x60] sm:$0xff] }
 0x2f9   :  { %v9990_v63 = vadd.f32 %v12926_v55, %v17044_v11  ;;  %v12948_v0 = vadd.f32 %v12947_v61, %v12946_v57  ;;  %v12949_v2 = vpop.f32.mrb[66].mxu1  ;;  %13249 = vmatpush3.bf16.msra.mxu1 %v14368_v58  ;;  %v14378_v11 = vld [vmem:[%s17876_s1 + $0x1840] sm:$0xff]   ;;  %v14408_v55 = vld [vmem:[%s17876_s1 + $0x18f8] sm:$0xff]   ;;  %v2592_v57 = vrot.slane %v34_v56, %v14749_v41  ;;  %v2585_v59 = vcombine.high %v34_v56, %v34_v56  ;;  %v14447_v56 = vld [vmem:[%s17876_s1 + $0x1a48] sm:$0xff]  }
 0x2fa   :  { %v12950_v4 = vpop.f32.mrb[67].mxu1  ;;  %13250 = vmatprep.subr.bf16.mxu1 %v14371_v1  ;;  %v14409_v58 = vld [vmem:[%s17876_s1 + $0x18b8] sm:$0xff]   ;;  %v14410_v60 = vld [vmem:[%s17876_s1 + $0x1940] sm:$0xff]  }
 0x2fb   :  { %v17155_v5 = vadd.f32 %v12948_v0, %v9990_v63  ;;  %13229 = vmatpush3.bf16.msra.mxu0 %v14370_v62  ;;  %v2600_v61 = vcombine.high %v2592_v57, %v2592_v57  ;;  %v2608_v62 = vrot.slane %v2592_v57, %v14749_v41  ;;  %v17279_v63 = vrot.slane %v2585_v59, %v14749_v41  ;;  %v14412_v0 = vld [vmem:[%s17876_s1 + $0x19c0] sm:$0xff]   ;;  %v14448_v57 = vld [vmem:[%s17876_s1 + $0x1a08] sm:$0xff]  }
 0x2fc   :  { %13230 = vmatprep.subr.bf16.mxu0 %v14373_v6  ;;  %v14411_v2 = vld [vmem:[%s17876_s1 + $0x1900] sm:$0xff]   ;;  %v14450_v59 = vld [vmem:[%s17876_s1 + $0x1a88] sm:$0xff]  }
 0x2fd   :  { %13251 = vmatpush3.bf16.msra.mxu1 %v14372_v3  ;;  %v2622_v1 = vrot.slane %v2600_v61, %v14749_v41  ;;  %v2601_v3 = vcombine.high %v17279_v63, %v17279_v63  ;;  %v2630_v4 = vcombine.high %v2608_v62, %v2608_v62  ;;  %v14452_v61 = vld [vmem:[%s17876_s1 + $0x1a10] sm:$0xff]  }
 0x2fe   :  { %13252 = vmatprep.subr.bf16.mxu1 %v14375_v8 }
 0x2ff   :  { %13231 = vmatpush3.bf16.msra.mxu0 %v14374_v7  ;;  %v2632_v6 = vcombine.high %v2622_v1, %v2622_v1  ;;  %v14413_v7 = vld [vmem:[%s17876_s1 + $0x1980] sm:$0xff]   ;;  %v2629_v8 = vrot.slane %v2601_v3, %v14749_v41  ;;  %v14458_v3 = vld [vmem:[%s17876_s1 + $0x1a98] sm:$0xff]  }
 0x300   :  { %13260 = vmatprep.subr.bf16.mxu0 %v14378_v11 }
 0x301   :  { %13253 = vmatpush3.bf16.msra.mxu1 %v14377_v9  ;;  %v14416_v9 = vld [vmem:[%s17876_s1 + $0x19c8] sm:$0xff]   ;;  %v2633_v11 = vcombine.high %v2629_v8, %v2629_v8 }
 0x302   :  { %10548 = vmatmul.mubr.bf16.vlgmr.msra.gmra.mrb[92].mxu0 %v2566_v10  ;;  %13282 = vmatprep.subr.bf16.mxu1 %v14380_v13  ;;  %v14415_v10 = vld [vmem:[%s17876_s1 + $0x1908] sm:$0xff]  }
 0x303   :  { %13261 = vmatpush3.bf16.msra.mxu0 %v14379_v12  ;;  %10627 = vmatprep.mubr.bf16.mxu0 %v2622_v1  ;;  %v14418_v12 = vld [vmem:[%s17876_s1 + $0x1950] sm:$0xff]   ;;  %v14417_v13 = vld [vmem:[%s17876_s1 + $0x1988] sm:$0xff]   ;;  %v14456_v1 = vld [vmem:[%s17876_s1 + $0x1a18] sm:$0xff]  }
 0x304   :  { %10588 = vmatmul.mubr.bf16.vlgmr.msra.gmra.mrb[92].mxu1 %v2582_v15  ;;  %13262 = vmatprep.subr.bf16.mxu0 %v14382_v16  ;;  %v14419_v15 = vld [vmem:[%s17876_s1 + $0x1910] sm:$0xff]   ;;  %v14422_v16 = vld [vmem:[%s17876_s1 + $0x1958] sm:$0xff]  }
 0x305   :  { %13283 = vmatpush3.bf16.msra.mxu1 %v14381_v14  ;;  %10667 = vmatprep.mubr.bf16.mxu1 %v2632_v6  ;;  %v14420_v14 = vld [vmem:[%s17876_s1 + $0x19d0] sm:$0xff]   ;;  %v14461_v6 = vld [vmem:[%s17876_s1 + $0x1ae0] sm:$0xff]  }
 0x306   :  { %13284 = vmatprep.subr.bf16.mxu1 %v14384_v18  ;;  %v14424_v18 = vld [vmem:[%s17876_s1 + $0x19d8] sm:$0xff]  }
 0x307   :  { %13263 = vmatpush3.bf16.msra.mxu0 %v14383_v17  ;;  %v14421_v17 = vld [vmem:[%s17876_s1 + $0x1990] sm:$0xff]  }
 0x308   :  { %13264 = vmatprep.subr.bf16.mxu0 %v14386_v20  ;;  %v14426_v20 = vld [vmem:[%s17876_s1 + $0x1960] sm:$0xff]  }
 0x309   :  { %13285 = vmatpush3.bf16.msra.mxu1 %v14385_v19  ;;  %v14423_v19 = vld [vmem:[%s17876_s1 + $0x1918] sm:$0xff]  }
 0x30a   :  { %13286 = vmatprep.subr.bf16.mxu1 %v14388_v22  ;;  %v14428_v22 = vld [vmem:[%s17876_s1 + $0x19e0] sm:$0xff]  }
 0x30b   :  { %13265 = vmatpush3.bf16.msra.mxu0 %v14387_v21  ;;  %v14425_v21 = vld [vmem:[%s17876_s1 + $0x1998] sm:$0xff]  }
 0x30c   :  { %13266 = vmatprep.subr.bf16.mxu0 %v14390_v24  ;;  %v14430_v24 = vld [vmem:[%s17876_s1 + $0x1968] sm:$0xff]  }
 0x30d   :  { %13287 = vmatpush3.bf16.msra.mxu1 %v14389_v23  ;;  %v14427_v23 = vld [vmem:[%s17876_s1 + $0x1920] sm:$0xff]  }
 0x30e   :  { %13288 = vmatprep.subr.bf16.mxu1 %v14392_v26 }
 0x30f   :  { %13267 = vmatpush3.bf16.msra.mxu0 %v14391_v25  ;;  %v14429_v25 = vld [vmem:[%s17876_s1 + $0x19a0] sm:$0xff]  }
 0x310   :  { %13268 = vmatprep.subr.bf16.mxu0 %v14394_v28 }
 0x311   :  { %13289 = vmatpush3.bf16.msra.mxu1 %v14393_v27  ;;  %v14432_v27 = vld [vmem:[%s17876_s1 + $0x19e8] sm:$0xff]  }
 0x312   :  { %13290 = vmatprep.subr.bf16.mxu1 %v14396_v30 }
 0x313   :  { %13269 = vmatpush3.bf16.msra.mxu0 %v14395_v29  ;;  %v14431_v29 = vld [vmem:[%s17876_s1 + $0x1928] sm:$0xff]  }
 0x314   :  { %13270 = vmatprep.subr.bf16.mxu0 %v14398_v32 }
 0x315   :  { %v12968_v34 = vpop.f32.mrb[68].mxu0  ;;  %13291 = vmatpush3.bf16.msra.mxu1 %v14397_v31 }
 0x316   :  { %v12969_v36 = vpop.f32.mrb[69].mxu0  ;;  %13292 = vmatprep.subr.bf16.mxu1 %v14400_v35 }
 0x317   :  { %v12970_v38 = vadd.f32 %v12969_v36, %v12968_v34  ;;  %v12971_v39 = vpop.f32.mrb[70].mxu0  ;;  %v12990_v40 = vpop.f32.mrb[68].mxu1  ;;  %13271 = vmatpush3.bf16.msra.mxu0 %v14399_v33  ;;  %v14433_v33 = vld [vmem:[%s17876_s1 + $0x19a8] sm:$0xff]   ;;  %v14434_v34 = vld [vmem:[%s17876_s1 + $0x1970] sm:$0xff]  }
 0x318   :  { %v12972_v42 = vpop.f32.mrb[71].mxu0  ;;  %v12991_v43 = vpop.f32.mrb[69].mxu1  ;;  %13272 = vmatprep.subr.bf16.mxu0 %v14402_v44 }
 0x319   :  { %v10070_v46 = vadd.f32 %v12970_v38, %v17155_v5  ;;  %v12992_v47 = vadd.f32 %v12991_v43, %v12990_v40  ;;  %v12993_v49 = vpop.f32.mrb[70].mxu1  ;;  %13293 = vmatpush3.bf16.msra.mxu1 %v14401_v37  ;;  %v14414_v5 = vld [vmem:[%s17876_s1 + $0x1948] sm:$0xff]   ;;  %v14435_v37 = vld [vmem:[%s17876_s1 + $0x1930] sm:$0xff]  }
 0x31a   :  { %v12994_v52 = vpop.f32.mrb[71].mxu1  ;;  %13294 = vmatprep.subr.bf16.mxu1 %v14404_v48  ;;  %v14436_v40 = vld [vmem:[%s17876_s1 + $0x19f0] sm:$0xff]   ;;  %v14440_v48 = vld [vmem:[%s17876_s1 + $0x19f8] sm:$0xff]  }
 0x31b   :  { %v17253_v50 = vadd.f32 %v12992_v47, %v10070_v46  ;;  %13273 = vmatpush3.bf16.msra.mxu0 %v14403_v45  ;;  %v14437_v43 = vld [vmem:[%s17876_s1 + $0x19b0] sm:$0xff]   ;;  %v14438_v46 = vld [vmem:[%s17876_s1 + $0x1978] sm:$0xff]   ;;  %v14444_v52 = vld [vmem:[%s17876_s1 + $0x1a00] sm:$0xff]  }
 0x31c   :  { %13274 = vmatprep.subr.bf16.mxu0 %v14406_v53  ;;  %v14439_v47 = vld [vmem:[%s17876_s1 + $0x1938] sm:$0xff]   ;;  %v14445_v53 = vld [vmem:[%s17876_s1 + $0x1ac0] sm:$0xff]  }
 0x31d   :  { %13295 = vmatpush3.bf16.msra.mxu1 %v14405_v51  ;;  %v14442_v49 = vld [vmem:[%s17876_s1 + $0x19b8] sm:$0xff]   ;;  %v14443_v51 = vld [vmem:[%s17876_s1 + $0x1a40] sm:$0xff]  }
 0x31e   :  { %13296 = vmatprep.subr.bf16.mxu1 %v14408_v55 }
 0x31f   :  { %13275 = vmatpush3.bf16.msra.mxu0 %v14407_v54  ;;  %v14446_v54 = vld [vmem:[%s17876_s1 + $0x1a80] sm:$0xff]  }
 0x320   :  { %13304 = vmatprep.subr.bf16.mxu0 %v14410_v60  ;;  %v14451_v60 = vld [vmem:[%s17876_s1 + $0x1a50] sm:$0xff]  }
 0x321   :  { %13297 = vmatpush3.bf16.msra.mxu1 %v14409_v58  ;;  %v14449_v58 = vld [vmem:[%s17876_s1 + $0x1ac8] sm:$0xff]  }
 0x322   :  { %13326 = vmatprep.subr.bf16.mxu1 %v14412_v0  ;;  %10628 = vmatmul.mubr.bf16.vlgmr.msra.gmra.mrb[96].mxu0 %v2608_v62  ;;  %v14453_v62 = vld [vmem:[%s17876_s1 + $0x1ad0] sm:$0xff]   ;;  %v14455_v0 = vld [vmem:[%s17876_s1 + $0x1a58] sm:$0xff]  }
 0x323   :  { %13305 = vmatpush3.bf16.msra.mxu0 %v14411_v2  ;;  %10707 = vmatprep.mubr.bf16.mxu0 %v2629_v8  ;;  %v14457_v2 = vld [vmem:[%s17876_s1 + $0x1ad8] sm:$0xff]   ;;  %v14463_v8 = vld [vmem:[%s17876_s1 + $0x1a68] sm:$0xff]  }
 0x324   :  { %10668 = vmatmul.mubr.bf16.vlgmr.msra.gmra.mrb[96].mxu1 %v2630_v4  ;;  %13306 = vmatprep.subr.bf16.mxu0 %v14414_v5  ;;  %v14459_v4 = vld [vmem:[%s17876_s1 + $0x1a60] sm:$0xff]  }
 0x325   :  { %13327 = vmatpush3.bf16.msra.mxu1 %v14413_v7  ;;  %10747 = vmatprep.mubr.bf16.mxu1 %v2633_v11  ;;  %v14460_v5 = vld [vmem:[%s17876_s1 + $0x1a20] sm:$0xff]   ;;  %v14465_v11 = vld [vmem:[%s17876_s1 + $0x1ae8] sm:$0xff]  }
 0x326   :  { %13328 = vmatprep.subr.bf16.mxu1 %v14416_v9  ;;  %v14462_v7 = vld [vmem:[%s17876_s1 + $0x1aa0] sm:$0xff]   ;;  %v14464_v9 = vld [vmem:[%s17876_s1 + $0x1a28] sm:$0xff]  }
 0x327   :  { %13307 = vmatpush3.bf16.msra.mxu0 %v14415_v10 }
 0x328   :  { %13308 = vmatprep.subr.bf16.mxu0 %v14418_v12 }
 0x329   :  { %13329 = vmatpush3.bf16.msra.mxu1 %v14417_v13  ;;  %v14466_v13 = vld [vmem:[%s17876_s1 + $0x1aa8] sm:$0xff]  }
 0x32a   :  { %13330 = vmatprep.subr.bf16.mxu1 %v14420_v14 }
 0x32b   :  { %13309 = vmatpush3.bf16.msra.mxu0 %v14419_v15 }
 0x32c   :  { %13310 = vmatprep.subr.bf16.mxu0 %v14422_v16 }
 0x32d   :  { %13331 = vmatpush3.bf16.msra.mxu1 %v14421_v17 }
 0x32e   :  { %13332 = vmatprep.subr.bf16.mxu1 %v14424_v18 }
 0x32f   :  { %13311 = vmatpush3.bf16.msra.mxu0 %v14423_v19  ;;  %v14467_v19 = vld [vmem:[%s17876_s1 + $0x1a70] sm:$0xff]  }
 0x330   :  { %13312 = vmatprep.subr.bf16.mxu0 %v14426_v20  ;;  %v14468_v20 = vld [vmem:[%s17876_s1 + $0x1a30] sm:$0xff]  }
 0x331   :  { %13333 = vmatpush3.bf16.msra.mxu1 %v14425_v21 }
 0x332   :  { %13334 = vmatprep.subr.bf16.mxu1 %v14428_v22 }
 0x333   :  { %13313 = vmatpush3.bf16.msra.mxu0 %v14427_v23  ;;  %v14469_v23 = vld [vmem:[%s17876_s1 + $0x1af0] sm:$0xff]  }
 0x334   :  { %13314 = vmatprep.subr.bf16.mxu0 %v14430_v24 }
 0x335   :  { %v13012_v26 = vpop.f32.mrb[72].mxu0  ;;  %13335 = vmatpush3.bf16.msra.mxu1 %v14429_v25 }
 0x336   :  { %v13013_v28 = vpop.f32.mrb[73].mxu0  ;;  %13336 = vmatprep.subr.bf16.mxu1 %v14432_v27 }
 0x337   :  { %v13014_v30 = vadd.f32 %v13013_v28, %v13012_v26  ;;  %v13015_v31 = vpop.f32.mrb[74].mxu0  ;;  %v13034_v32 = vpop.f32.mrb[72].mxu1  ;;  %13315 = vmatpush3.bf16.msra.mxu0 %v14431_v29  ;;  %v14470_v26 = vld [vmem:[%s17876_s1 + $0x1ab0] sm:$0xff]   ;;  %v14471_v28 = vld [vmem:[%s17876_s1 + $0x1a78] sm:$0xff]  }
 0x338   :  { %v13016_v35 = vpop.f32.mrb[75].mxu0  ;;  %v13035_v36 = vpop.f32.mrb[73].mxu1  ;;  %13316 = vmatprep.subr.bf16.mxu0 %v14434_v34  ;;  %v14472_v29 = vld [vmem:[%s17876_s1 + $0x1a38] sm:$0xff]   ;;  %v35_v31 = vld [vmem:[%s17875_s0 + $0x68] sm:$0xff] }
 0x339   :  { %v10150_v38 = vadd.f32 %v13014_v30, %v17253_v50  ;;  %v13036_v39 = vadd.f32 %v13035_v36, %v13034_v32  ;;  %v13037_v42 = vpop.f32.mrb[74].mxu1  ;;  %13337 = vmatpush3.bf16.msra.mxu1 %v14433_v33  ;;  %v2615_v50 = vrot.slane %v17279_v63, %v14749_v41  ;;  %v14454_v63 = vld [vmem:[%s17876_s1 + $0x1a90] sm:$0xff]   ;;  %v14473_v30 = vld [vmem:[%s17876_s1 + $0x1af8] sm:$0xff]   ;;  %v2641_v32 = vrot.slane %v35_v31, %v14749_v41  ;;  %v14475_v35 = vld [vmem:[%s17876_s1 + $0x1b40] sm:$0xff]  }
 0x33a   :  { %v13038_v44 = vpop.f32.mrb[75].mxu1  ;;  %13338 = vmatprep.subr.bf16.mxu1 %v14436_v40  ;;  %v14474_v33 = vld [vmem:[%s17876_s1 + $0x1ab8] sm:$0xff]   ;;  %v2634_v34 = vcombine.high %v35_v31, %v35_v31  ;;  %v14476_v42 = vld [vmem:[%s17876_s1 + $0x1b00] sm:$0xff]   ;;  %v14512_v31 = vld [vmem:[%s17876_s1 + $0x1c48] sm:$0xff]  }
 0x33b   :  { %v17367_v45 = vadd.f32 %v13036_v39, %v10150_v38  ;;  %13317 = vmatpush3.bf16.msra.mxu0 %v14435_v37  ;;  %v2631_v55 = vcombine.high %v2615_v50, %v2615_v50  ;;  %v2649_v36 = vcombine.high %v2641_v32, %v2641_v32  ;;  %v2657_v37 = vrot.slane %v2641_v32, %v14749_v41  ;;  %v14477_v39 = vld [vmem:[%s17876_s1 + $0x1bc0] sm:$0xff]   ;;  %v14513_v32 = vld [vmem:[%s17876_s1 + $0x1c08] sm:$0xff]  }
 0x33c   :  { %13318 = vmatprep.subr.bf16.mxu0 %v14438_v46  ;;  %v17491_v38 = vrot.slane %v2634_v34, %v14749_v41  ;;  %v14515_v34 = vld [vmem:[%s17876_s1 + $0x1c88] sm:$0xff]  }
 0x33d   :  { %13339 = vmatpush3.bf16.msra.mxu1 %v14437_v43  ;;  %v2671_v40 = vrot.slane %v2649_v36, %v14749_v41  ;;  %v2679_v44 = vcombine.high %v2657_v37, %v2657_v37  ;;  %v14517_v36 = vld [vmem:[%s17876_s1 + $0x1c10] sm:$0xff]  }
 0x33e   :  { %13340 = vmatprep.subr.bf16.mxu1 %v14440_v48  ;;  %v2650_v43 = vcombine.high %v17491_v38, %v17491_v38 }
 0x33f   :  { %13319 = vmatpush3.bf16.msra.mxu0 %v14439_v47  ;;  %v2681_v46 = vcombine.high %v2671_v40, %v2671_v40  ;;  %v14478_v47 = vld [vmem:[%s17876_s1 + $0x1b80] sm:$0xff]  }
 0x340   :  { %13348 = vmatprep.subr.bf16.mxu0 %v14443_v51  ;;  %v2678_v48 = vrot.slane %v2650_v43, %v14749_v41  ;;  %v14523_v43 = vld [vmem:[%s17876_s1 + $0x1c98] sm:$0xff]  }
 0x341   :  { %13341 = vmatpush3.bf16.msra.mxu1 %v14442_v49  ;;  %v14481_v49 = vld [vmem:[%s17876_s1 + $0x1bc8] sm:$0xff]  }
 0x342   :  { %10708 = vmatmul.mubr.bf16.vlgmr.msra.gmra.mrb[100].mxu0 %v2615_v50  ;;  %13370 = vmatprep.subr.bf16.mxu1 %v14445_v53  ;;  %v14480_v50 = vld [vmem:[%s17876_s1 + $0x1b08] sm:$0xff]   ;;  %v2682_v51 = vcombine.high %v2678_v48, %v2678_v48 }
 0x343   :  { %13349 = vmatpush3.bf16.msra.mxu0 %v14444_v52  ;;  %10787 = vmatprep.mubr.bf16.mxu0 %v2671_v40  ;;  %v14483_v52 = vld [vmem:[%s17876_s1 + $0x1b50] sm:$0xff]   ;;  %v14482_v53 = vld [vmem:[%s17876_s1 + $0x1b88] sm:$0xff]   ;;  %v14521_v40 = vld [vmem:[%s17876_s1 + $0x1c18] sm:$0xff]  }
 0x344   :  { %10748 = vmatmul.mubr.bf16.vlgmr.msra.gmra.mrb[100].mxu1 %v2631_v55  ;;  %13350 = vmatprep.subr.bf16.mxu0 %v14447_v56  ;;  %v14484_v55 = vld [vmem:[%s17876_s1 + $0x1b10] sm:$0xff]   ;;  %v14487_v56 = vld [vmem:[%s17876_s1 + $0x1b58] sm:$0xff]  }
 0x345   :  { %13371 = vmatpush3.bf16.msra.mxu1 %v14446_v54  ;;  %10827 = vmatprep.mubr.bf16.mxu1 %v2681_v46  ;;  %v14485_v54 = vld [vmem:[%s17876_s1 + $0x1bd0] sm:$0xff]   ;;  %v14526_v46 = vld [vmem:[%s17876_s1 + $0x1ce0] sm:$0xff]  }
 0x346   :  { %13372 = vmatprep.subr.bf16.mxu1 %v14449_v58  ;;  %v14489_v58 = vld [vmem:[%s17876_s1 + $0x1bd8] sm:$0xff]  }
 0x347   :  { %13351 = vmatpush3.bf16.msra.mxu0 %v14448_v57  ;;  %v14486_v57 = vld [vmem:[%s17876_s1 + $0x1b90] sm:$0xff]  }
 0x348   :  { %13352 = vmatprep.subr.bf16.mxu0 %v14451_v60  ;;  %v14491_v60 = vld [vmem:[%s17876_s1 + $0x1b60] sm:$0xff]  }
 0x349   :  { %13373 = vmatpush3.bf16.msra.mxu1 %v14450_v59  ;;  %v14488_v59 = vld [vmem:[%s17876_s1 + $0x1b18] sm:$0xff]  }
 0x34a   :  { %13374 = vmatprep.subr.bf16.mxu1 %v14453_v62  ;;  %v14493_v62 = vld [vmem:[%s17876_s1 + $0x1be0] sm:$0xff]  }
 0x34b   :  { %13353 = vmatpush3.bf16.msra.mxu0 %v14452_v61  ;;  %v14490_v61 = vld [vmem:[%s17876_s1 + $0x1b98] sm:$0xff]  }
 0x34c   :  { %13354 = vmatprep.subr.bf16.mxu0 %v14455_v0  ;;  %v14495_v0 = vld [vmem:[%s17876_s1 + $0x1b68] sm:$0xff]  }
 0x34d   :  { %13375 = vmatpush3.bf16.msra.mxu1 %v14454_v63  ;;  %v14492_v63 = vld [vmem:[%s17876_s1 + $0x1b20] sm:$0xff]  }
 0x34e   :  { %13376 = vmatprep.subr.bf16.mxu1 %v14457_v2 }
 0x34f   :  { %13355 = vmatpush3.bf16.msra.mxu0 %v14456_v1  ;;  %v14494_v1 = vld [vmem:[%s17876_s1 + $0x1ba0] sm:$0xff]  }
 0x350   :  { %13356 = vmatprep.subr.bf16.mxu0 %v14459_v4 }
 0x351   :  { %13377 = vmatpush3.bf16.msra.mxu1 %v14458_v3  ;;  %v14497_v3 = vld [vmem:[%s17876_s1 + $0x1be8] sm:$0xff]  }
 0x352   :  { %13378 = vmatprep.subr.bf16.mxu1 %v14461_v6 }
 0x353   :  { %13357 = vmatpush3.bf16.msra.mxu0 %v14460_v5  ;;  %v14496_v5 = vld [vmem:[%s17876_s1 + $0x1b28] sm:$0xff]  }
 0x354   :  { %13358 = vmatprep.subr.bf16.mxu0 %v14463_v8 }
 0x355   :  { %v13056_v10 = vpop.f32.mrb[76].mxu0  ;;  %13379 = vmatpush3.bf16.msra.mxu1 %v14462_v7 }
 0x356   :  { %v13057_v12 = vpop.f32.mrb[77].mxu0  ;;  %13380 = vmatprep.subr.bf16.mxu1 %v14465_v11 }
 0x357   :  { %v13058_v14 = vadd.f32 %v13057_v12, %v13056_v10  ;;  %v13059_v15 = vpop.f32.mrb[78].mxu0  ;;  %v13078_v16 = vpop.f32.mrb[76].mxu1  ;;  %13359 = vmatpush3.bf16.msra.mxu0 %v14464_v9  ;;  %v14498_v9 = vld [vmem:[%s17876_s1 + $0x1ba8] sm:$0xff]   ;;  %v14499_v10 = vld [vmem:[%s17876_s1 + $0x1b70] sm:$0xff]  }
 0x358   :  { %v13060_v17 = vpop.f32.mrb[79].mxu0  ;;  %v13079_v18 = vpop.f32.mrb[77].mxu1  ;;  %13360 = vmatprep.subr.bf16.mxu0 %v14467_v19 }
 0x359   :  { %v10230_v21 = vadd.f32 %v13058_v14, %v17367_v45  ;;  %v13080_v22 = vadd.f32 %v13079_v18, %v13078_v16  ;;  %v13081_v24 = vpop.f32.mrb[78].mxu1  ;;  %13381 = vmatpush3.bf16.msra.mxu1 %v14466_v13  ;;  %v14479_v45 = vld [vmem:[%s17876_s1 + $0x1b48] sm:$0xff]   ;;  %v14500_v13 = vld [vmem:[%s17876_s1 + $0x1b30] sm:$0xff]  }
 0x35a   :  { %v13082_v27 = vpop.f32.mrb[79].mxu1  ;;  %13382 = vmatprep.subr.bf16.mxu1 %v14469_v23  ;;  %v14501_v16 = vld [vmem:[%s17876_s1 + $0x1bf0] sm:$0xff]   ;;  %v14505_v23 = vld [vmem:[%s17876_s1 + $0x1bf8] sm:$0xff]  }
 0x35b   :  { %v17465_v25 = vadd.f32 %v13080_v22, %v10230_v21  ;;  %13361 = vmatpush3.bf16.msra.mxu0 %v14468_v20  ;;  %v14502_v18 = vld [vmem:[%s17876_s1 + $0x1bb0] sm:$0xff]   ;;  %v14503_v21 = vld [vmem:[%s17876_s1 + $0x1b78] sm:$0xff]   ;;  %v14509_v27 = vld [vmem:[%s17876_s1 + $0x1c00] sm:$0xff]  }
 0x35c   :  { %13362 = vmatprep.subr.bf16.mxu0 %v14471_v28  ;;  %v14504_v22 = vld [vmem:[%s17876_s1 + $0x1b38] sm:$0xff]   ;;  %v14510_v28 = vld [vmem:[%s17876_s1 + $0x1cc0] sm:$0xff]  }
 0x35d   :  { %13383 = vmatpush3.bf16.msra.mxu1 %v14470_v26  ;;  %v14507_v24 = vld [vmem:[%s17876_s1 + $0x1bb8] sm:$0xff]   ;;  %v14508_v26 = vld [vmem:[%s17876_s1 + $0x1c40] sm:$0xff]  }
 0x35e   :  { %13384 = vmatprep.subr.bf16.mxu1 %v14473_v30 }
 0x35f   :  { %13363 = vmatpush3.bf16.msra.mxu0 %v14472_v29  ;;  %v14511_v29 = vld [vmem:[%s17876_s1 + $0x1c80] sm:$0xff]  }
 0x360   :  { %13392 = vmatprep.subr.bf16.mxu0 %v14475_v35  ;;  %v14516_v35 = vld [vmem:[%s17876_s1 + $0x1c50] sm:$0xff]  }
 0x361   :  { %13385 = vmatpush3.bf16.msra.mxu1 %v14474_v33  ;;  %v14514_v33 = vld [vmem:[%s17876_s1 + $0x1cc8] sm:$0xff]  }
 0x362   :  { %13414 = vmatprep.subr.bf16.mxu1 %v14477_v39  ;;  %10788 = vmatmul.mubr.bf16.vlgmr.msra.gmra.mrb[104].mxu0 %v2657_v37  ;;  %v14518_v37 = vld [vmem:[%s17876_s1 + $0x1cd0] sm:$0xff]   ;;  %v14520_v39 = vld [vmem:[%s17876_s1 + $0x1c58] sm:$0xff]  }
 0x363   :  { %13393 = vmatpush3.bf16.msra.mxu0 %v14476_v42  ;;  %10867 = vmatprep.mubr.bf16.mxu0 %v2678_v48  ;;  %v14522_v42 = vld [vmem:[%s17876_s1 + $0x1cd8] sm:$0xff]   ;;  %v14528_v48 = vld [vmem:[%s17876_s1 + $0x1c68] sm:$0xff]  }
 0x364   :  { %10828 = vmatmul.mubr.bf16.vlgmr.msra.gmra.mrb[104].mxu1 %v2679_v44  ;;  %13394 = vmatprep.subr.bf16.mxu0 %v14479_v45  ;;  %v14524_v44 = vld [vmem:[%s17876_s1 + $0x1c60] sm:$0xff]  }
 0x365   :  { %13415 = vmatpush3.bf16.msra.mxu1 %v14478_v47  ;;  %10907 = vmatprep.mubr.bf16.mxu1 %v2682_v51  ;;  %v14525_v45 = vld [vmem:[%s17876_s1 + $0x1c20] sm:$0xff]   ;;  %v14530_v51 = vld [vmem:[%s17876_s1 + $0x1ce8] sm:$0xff]  }
 0x366   :  { %13416 = vmatprep.subr.bf16.mxu1 %v14481_v49  ;;  %v14527_v47 = vld [vmem:[%s17876_s1 + $0x1ca0] sm:$0xff]   ;;  %v14529_v49 = vld [vmem:[%s17876_s1 + $0x1c28] sm:$0xff]  }
 0x367   :  { %13395 = vmatpush3.bf16.msra.mxu0 %v14480_v50 }
 0x368   :  { %13396 = vmatprep.subr.bf16.mxu0 %v14483_v52 }
 0x369   :  { %13417 = vmatpush3.bf16.msra.mxu1 %v14482_v53  ;;  %v14531_v53 = vld [vmem:[%s17876_s1 + $0x1ca8] sm:$0xff]  }
 0x36a   :  { %13418 = vmatprep.subr.bf16.mxu1 %v14485_v54 }
 0x36b   :  { %13397 = vmatpush3.bf16.msra.mxu0 %v14484_v55 }
 0x36c   :  { %13398 = vmatprep.subr.bf16.mxu0 %v14487_v56 }
 0x36d   :  { %13419 = vmatpush3.bf16.msra.mxu1 %v14486_v57 }
 0x36e   :  { %13420 = vmatprep.subr.bf16.mxu1 %v14489_v58 }
 0x36f   :  { %13399 = vmatpush3.bf16.msra.mxu0 %v14488_v59  ;;  %v14532_v59 = vld [vmem:[%s17876_s1 + $0x1c70] sm:$0xff]  }
 0x370   :  { %13400 = vmatprep.subr.bf16.mxu0 %v14491_v60  ;;  %v14533_v60 = vld [vmem:[%s17876_s1 + $0x1c30] sm:$0xff]  }
 0x371   :  { %13421 = vmatpush3.bf16.msra.mxu1 %v14490_v61 }
 0x372   :  { %13422 = vmatprep.subr.bf16.mxu1 %v14493_v62 }
 0x373   :  { %13401 = vmatpush3.bf16.msra.mxu0 %v14492_v63  ;;  %v14534_v63 = vld [vmem:[%s17876_s1 + $0x1cf0] sm:$0xff]  }
 0x374   :  { %13402 = vmatprep.subr.bf16.mxu0 %v14495_v0 }
 0x375   :  { %v13100_v2 = vpop.f32.mrb[80].mxu0  ;;  %13423 = vmatpush3.bf16.msra.mxu1 %v14494_v1 }
 0x376   :  { %v13101_v4 = vpop.f32.mrb[81].mxu0  ;;  %13424 = vmatprep.subr.bf16.mxu1 %v14497_v3 }
 0x377   :  { %v13102_v6 = vadd.f32 %v13101_v4, %v13100_v2  ;;  %v13103_v7 = vpop.f32.mrb[82].mxu0  ;;  %v13122_v8 = vpop.f32.mrb[80].mxu1  ;;  %13403 = vmatpush3.bf16.msra.mxu0 %v14496_v5  ;;  %v14535_v2 = vld [vmem:[%s17876_s1 + $0x1cb0] sm:$0xff]   ;;  %v14536_v4 = vld [vmem:[%s17876_s1 + $0x1c78] sm:$0xff]  }
 0x378   :  { %v13104_v11 = vpop.f32.mrb[83].mxu0  ;;  %v13123_v12 = vpop.f32.mrb[81].mxu1  ;;  %13404 = vmatprep.subr.bf16.mxu0 %v14499_v10  ;;  %v14537_v5 = vld [vmem:[%s17876_s1 + $0x1c38] sm:$0xff]   ;;  %v36_v7 = vld [vmem:[%s17875_s0 + $0x70] sm:$0xff] }
 0x379   :  { %v10310_v14 = vadd.f32 %v13102_v6, %v17465_v25  ;;  %v13124_v15 = vadd.f32 %v13123_v12, %v13122_v8  ;;  %v13125_v17 = vpop.f32.mrb[82].mxu1  ;;  %13425 = vmatpush3.bf16.msra.mxu1 %v14498_v9  ;;  %v2664_v25 = vrot.slane %v17491_v38, %v14749_v41  ;;  %v14519_v38 = vld [vmem:[%s17876_s1 + $0x1c90] sm:$0xff]   ;;  %v14538_v6 = vld [vmem:[%s17876_s1 + $0x1cf8] sm:$0xff]   ;;  %v2690_v8 = vrot.slane %v36_v7, %v14749_v41  ;;  %v14540_v11 = vld [vmem:[%s17876_s1 + $0x1d40] sm:$0xff]  }
 0x37a   :  { %v13126_v19 = vpop.f32.mrb[83].mxu1  ;;  %13426 = vmatprep.subr.bf16.mxu1 %v14501_v16  ;;  %v14539_v9 = vld [vmem:[%s17876_s1 + $0x1cb8] sm:$0xff]   ;;  %v2683_v10 = vcombine.high %v36_v7, %v36_v7  ;;  %v14541_v17 = vld [vmem:[%s17876_s1 + $0x1d00] sm:$0xff]  }
 0x37b   :  { %v17579_v20 = vadd.f32 %v13124_v15, %v10310_v14  ;;  %13405 = vmatpush3.bf16.msra.mxu0 %v14500_v13  ;;  %v2680_v30 = vcombine.high %v2664_v25, %v2664_v25  ;;  %v2698_v12 = vcombine.high %v2690_v8, %v2690_v8  ;;  %v2706_v13 = vrot.slane %v2690_v8, %v14749_v41  ;;  %v14542_v15 = vld [vmem:[%s17876_s1 + $0x1dc0] sm:$0xff]  }
 0x37c   :  { %13406 = vmatprep.subr.bf16.mxu0 %v14503_v21  ;;  %v17703_v14 = vrot.slane %v2683_v10, %v14749_v41 }
 0x37d   :  { %13427 = vmatpush3.bf16.msra.mxu1 %v14502_v18  ;;  %v2720_v16 = vrot.slane %v2698_v12, %v14749_v41  ;;  %v2728_v19 = vcombine.high %v2706_v13, %v2706_v13 }
 0x37e   :  { %13428 = vmatprep.subr.bf16.mxu1 %v14505_v23  ;;  %v2699_v18 = vcombine.high %v17703_v14, %v17703_v14 }
 0x37f   :  { %13407 = vmatpush3.bf16.msra.mxu0 %v14504_v22  ;;  %v2730_v21 = vcombine.high %v2720_v16, %v2720_v16  ;;  %v14543_v22 = vld [vmem:[%s17876_s1 + $0x1d80] sm:$0xff]  }
 0x380   :  { %13436 = vmatprep.subr.bf16.mxu0 %v14508_v26  ;;  %v2727_v23 = vrot.slane %v2699_v18, %v14749_v41 }
 0x381   :  { %13429 = vmatpush3.bf16.msra.mxu1 %v14507_v24  ;;  %v14546_v24 = vld [vmem:[%s17876_s1 + $0x1dc8] sm:$0xff]  }
 0x382   :  { %10868 = vmatmul.mubr.bf16.vlgmr.msra.gmra.mrb[108].mxu0 %v2664_v25  ;;  %13458 = vmatprep.subr.bf16.mxu1 %v14510_v28  ;;  %v14545_v25 = vld [vmem:[%s17876_s1 + $0x1d08] sm:$0xff]   ;;  %v2731_v26 = vcombine.high %v2727_v23, %v2727_v23 }
 0x383   :  { %13437 = vmatpush3.bf16.msra.mxu0 %v14509_v27  ;;  %10947 = vmatprep.mubr.bf16.mxu0 %v2720_v16  ;;  %v14548_v27 = vld [vmem:[%s17876_s1 + $0x1d50] sm:$0xff]   ;;  %v14547_v28 = vld [vmem:[%s17876_s1 + $0x1d88] sm:$0xff]  }
 0x384   :  { %10908 = vmatmul.mubr.bf16.vlgmr.msra.gmra.mrb[108].mxu1 %v2680_v30  ;;  %13438 = vmatprep.subr.bf16.mxu0 %v14512_v31  ;;  %v14549_v30 = vld [vmem:[%s17876_s1 + $0x1d10] sm:$0xff]   ;;  %v14552_v31 = vld [vmem:[%s17876_s1 + $0x1d58] sm:$0xff]  }
 0x385   :  { %13459 = vmatpush3.bf16.msra.mxu1 %v14511_v29  ;;  %10987 = vmatprep.mubr.bf16.mxu1 %v2730_v21  ;;  %v14550_v29 = vld [vmem:[%s17876_s1 + $0x1dd0] sm:$0xff]  }
 0x386   :  { %13460 = vmatprep.subr.bf16.mxu1 %v14514_v33  ;;  %v14554_v33 = vld [vmem:[%s17876_s1 + $0x1dd8] sm:$0xff]  }
 0x387   :  { %13439 = vmatpush3.bf16.msra.mxu0 %v14513_v32  ;;  %v14551_v32 = vld [vmem:[%s17876_s1 + $0x1d90] sm:$0xff]  }
 0x388   :  { %13440 = vmatprep.subr.bf16.mxu0 %v14516_v35  ;;  %v14556_v35 = vld [vmem:[%s17876_s1 + $0x1d60] sm:$0xff]  }
 0x389   :  { %13461 = vmatpush3.bf16.msra.mxu1 %v14515_v34  ;;  %v14553_v34 = vld [vmem:[%s17876_s1 + $0x1d18] sm:$0xff]  }
 0x38a   :  { %13462 = vmatprep.subr.bf16.mxu1 %v14518_v37  ;;  %v14558_v37 = vld [vmem:[%s17876_s1 + $0x1de0] sm:$0xff]  }
 0x38b   :  { %13441 = vmatpush3.bf16.msra.mxu0 %v14517_v36  ;;  %v14555_v36 = vld [vmem:[%s17876_s1 + $0x1d98] sm:$0xff]  }
 0x38c   :  { %13442 = vmatprep.subr.bf16.mxu0 %v14520_v39  ;;  %v14560_v39 = vld [vmem:[%s17876_s1 + $0x1d68] sm:$0xff]  }
 0x38d   :  { %13463 = vmatpush3.bf16.msra.mxu1 %v14519_v38  ;;  %v14557_v38 = vld [vmem:[%s17876_s1 + $0x1d20] sm:$0xff]  }
 0x38e   :  { %13464 = vmatprep.subr.bf16.mxu1 %v14522_v42 }
 0x38f   :  { %13443 = vmatpush3.bf16.msra.mxu0 %v14521_v40  ;;  %v14559_v40 = vld [vmem:[%s17876_s1 + $0x1da0] sm:$0xff]  }
 0x390   :  { %13444 = vmatprep.subr.bf16.mxu0 %v14524_v44 }
 0x391   :  { %13465 = vmatpush3.bf16.msra.mxu1 %v14523_v43  ;;  %v14562_v43 = vld [vmem:[%s17876_s1 + $0x1de8] sm:$0xff]  }
 0x392   :  { %13466 = vmatprep.subr.bf16.mxu1 %v14526_v46 }
 0x393   :  { %13445 = vmatpush3.bf16.msra.mxu0 %v14525_v45  ;;  %v14561_v45 = vld [vmem:[%s17876_s1 + $0x1d28] sm:$0xff]  }
 0x394   :  { %13446 = vmatprep.subr.bf16.mxu0 %v14528_v48 }
 0x395   :  { %v13144_v50 = vpop.f32.mrb[84].mxu0  ;;  %13467 = vmatpush3.bf16.msra.mxu1 %v14527_v47 }
 0x396   :  { %v13145_v52 = vpop.f32.mrb[85].mxu0  ;;  %13468 = vmatprep.subr.bf16.mxu1 %v14530_v51 }
 0x397   :  { %v13146_v54 = vadd.f32 %v13145_v52, %v13144_v50  ;;  %v13147_v55 = vpop.f32.mrb[86].mxu0  ;;  %v13166_v56 = vpop.f32.mrb[84].mxu1  ;;  %13447 = vmatpush3.bf16.msra.mxu0 %v14529_v49  ;;  %v14563_v49 = vld [vmem:[%s17876_s1 + $0x1da8] sm:$0xff]   ;;  %v14564_v50 = vld [vmem:[%s17876_s1 + $0x1d70] sm:$0xff]  }
 0x398   :  { %v13148_v57 = vpop.f32.mrb[87].mxu0  ;;  %v13167_v58 = vpop.f32.mrb[85].mxu1  ;;  %13448 = vmatprep.subr.bf16.mxu0 %v14532_v59  ;;  %v14566_v55 = vld [vmem:[%s17876_s1 + $0x1df0] sm:$0xff]  }
 0x399   :  { %v10390_v61 = vadd.f32 %v13146_v54, %v17579_v20  ;;  %v13168_v62 = vadd.f32 %v13167_v58, %v13166_v56  ;;  %v13169_v0 = vpop.f32.mrb[86].mxu1  ;;  %13469 = vmatpush3.bf16.msra.mxu1 %v14531_v53  ;;  %v14544_v20 = vld [vmem:[%s17876_s1 + $0x1d48] sm:$0xff]   ;;  %v14565_v57 = vld [vmem:[%s17876_s1 + $0x1d30] sm:$0xff]  }
 0x39a   :  { %v13170_v3 = vpop.f32.mrb[87].mxu1  ;;  %13470 = vmatprep.subr.bf16.mxu1 %v14534_v63  ;;  %v14569_v63 = vld [vmem:[%s17876_s1 + $0x1d38] sm:$0xff]   ;;  %v2713_v0 = vrot.slane %v17703_v14, %v14749_v41 }
 0x39b   :  { %v17677_v1 = vadd.f32 %v13168_v62, %v10390_v61  ;;  %13449 = vmatpush3.bf16.msra.mxu0 %v14533_v60  ;;  %v14568_v60 = vld [vmem:[%s17876_s1 + $0x1d78] sm:$0xff]   ;;  %v14567_v61 = vld [vmem:[%s17876_s1 + $0x1db0] sm:$0xff]   ;;  %v14610_v3 = vmov 0.0  }
 0x39c   :  { %13450 = vmatprep.subr.bf16.mxu0 %v14536_v4  ;;  %v14570_v62 = vld [vmem:[%s17876_s1 + $0x1df8] sm:$0xff]   ;;  %v2729_v4 = vcombine.high %v2713_v0, %v2713_v0 }
 0x39d   :  { %13471 = vmatpush3.bf16.msra.mxu1 %v14535_v2  ;;  %v14573_v2 = vld [vmem:[%s17876_s1 + $0x1e00] sm:$0xff]  }
 0x39e   :  { %13472 = vmatprep.subr.bf16.mxu1 %v14538_v6 }
 0x39f   :  { %13451 = vmatpush3.bf16.msra.mxu0 %v14537_v5  ;;  %v14574_v5 = vld [vmem:[%s17876_s1 + $0x1e08] sm:$0xff]  }
 0x3a0   :  { %13480 = vmatprep.subr.bf16.mxu0 %v14540_v11 }
 0x3a1   :  { %13473 = vmatpush3.bf16.msra.mxu1 %v14539_v9 }
 0x3a2   :  { %13502 = vmatprep.subr.bf16.mxu1 %v14542_v15  ;;  %10948 = vmatmul.mubr.bf16.vlgmr.msra.gmra.mrb[112].mxu0 %v2706_v13 }
 0x3a3   :  { %13481 = vmatpush3.bf16.msra.mxu0 %v14541_v17  ;;  %11027 = vmatprep.mubr.bf16.mxu0 %v2727_v23 }
 0x3a4   :  { %10988 = vmatmul.mubr.bf16.vlgmr.msra.gmra.mrb[112].mxu1 %v2728_v19  ;;  %13482 = vmatprep.subr.bf16.mxu0 %v14544_v20 }
 0x3a5   :  { %13503 = vmatpush3.bf16.msra.mxu1 %v14543_v22  ;;  %11067 = vmatprep.mubr.bf16.mxu1 %v2731_v26 }
 0x3a6   :  { %13504 = vmatprep.subr.bf16.mxu1 %v14546_v24 }
 0x3a7   :  { %13483 = vmatpush3.bf16.msra.mxu0 %v14545_v25 }
 0x3a8   :  { %13484 = vmatprep.subr.bf16.mxu0 %v14548_v27 }
 0x3a9   :  { %13505 = vmatpush3.bf16.msra.mxu1 %v14547_v28 }
 0x3aa   :  { %13506 = vmatprep.subr.bf16.mxu1 %v14550_v29 }
 0x3ab   :  { %13485 = vmatpush3.bf16.msra.mxu0 %v14549_v30 }
 0x3ac   :  { %13486 = vmatprep.subr.bf16.mxu0 %v14552_v31 }
 0x3ad   :  { %13507 = vmatpush3.bf16.msra.mxu1 %v14551_v32 }
 0x3ae   :  { %13508 = vmatprep.subr.bf16.mxu1 %v14554_v33 }
 0x3af   :  { %13487 = vmatpush3.bf16.msra.mxu0 %v14553_v34 }
 0x3b0   :  { %13488 = vmatprep.subr.bf16.mxu0 %v14556_v35 }
 0x3b1   :  { %13509 = vmatpush3.bf16.msra.mxu1 %v14555_v36 }
 0x3b2   :  { %13510 = vmatprep.subr.bf16.mxu1 %v14558_v37 }
 0x3b3   :  { %13489 = vmatpush3.bf16.msra.mxu0 %v14557_v38 }
 0x3b4   :  { %13490 = vmatprep.subr.bf16.mxu0 %v14560_v39 }
 0x3b5   :  { %v13188_v42 = vpop.f32.mrb[88].mxu0  ;;  %13511 = vmatpush3.bf16.msra.mxu1 %v14559_v40 }
 0x3b6   :  { %v13189_v44 = vpop.f32.mrb[89].mxu0  ;;  %13512 = vmatprep.subr.bf16.mxu1 %v14562_v43 }
 0x3b7   :  { %v13190_v46 = vadd.f32 %v13189_v44, %v13188_v42  ;;  %v13191_v47 = vpop.f32.mrb[90].mxu0  ;;  %v13210_v48 = vpop.f32.mrb[88].mxu1  ;;  %13491 = vmatpush3.bf16.msra.mxu0 %v14561_v45 }
 0x3b8   :  { %v13192_v51 = vpop.f32.mrb[91].mxu0  ;;  %v13211_v52 = vpop.f32.mrb[89].mxu1  ;;  %13492 = vmatprep.subr.bf16.mxu0 %v14564_v50 }
 0x3b9   :  { %v10470_v53 = vadd.f32 %v13190_v46, %v17677_v1  ;;  %v13212_v54 = vadd.f32 %v13211_v52, %v13210_v48  ;;  %v13213_v56 = vpop.f32.mrb[90].mxu1  ;;  %13513 = vmatpush3.bf16.msra.mxu1 %v14563_v49  ;;  %v14572_v1 = vld [vmem:[%s17876_s1 + $0x1db8] sm:$0xff]  }
 0x3ba   :  { %v13214_v58 = vpop.f32.mrb[91].mxu1  ;;  %13514 = vmatprep.subr.bf16.mxu1 %v14566_v55 }
 0x3bb   :  { %v10510_v59 = vadd.f32 %v13212_v54, %v10470_v53  ;;  %13493 = vmatpush3.bf16.msra.mxu0 %v14565_v57 }
 0x3bc   :  { %13494 = vmatprep.subr.bf16.mxu0 %v14568_v60 }
 0x3bd   :  { %13515 = vmatpush3.bf16.msra.mxu1 %v14567_v61 }
 0x3be   :  { %13516 = vmatprep.subr.bf16.mxu1 %v14570_v62 }
 0x3bf   :  { %13495 = vmatpush3.bf16.msra.mxu0 %v14569_v63 }
 0x3c0   :  { %13542 = vmatprep.subr.bf16.mxu0 %v14610_v3 }
 0x3c1   :  { %13517 = vmatpush3.bf16.msra.mxu1 %v14572_v1 }
 0x3c2   :  { %11028 = vmatmul.mubr.bf16.vlgmr.msra.gmra.mrb[116].mxu0 %v2713_v0 }
 0x3c3   :  { %13543 = vmatpush3.bf16.msra.mxu0 %v14573_v2  ;;  %13558 = vmatprep.mubr.msk.bf16.mxu0 %vm14611_vm0, %v14610_v3 }
 0x3c4   :  { %11068 = vmatmul.mubr.bf16.vlgmr.msra.gmra.mrb[116].mxu1 %v2729_v4  ;;  %13544 = vmatprep.subr.bf16.mxu0 %v14610_v3 }
 0x3c5   :  { %10 = vsyncpa [#allocation3], 0  ;;  %13578 = vmatprep.mubr.msk.f32.mxu1 %vm14611_vm0, %v14610_v3  ;;  %v14575_v6 = vld [vmem:[%s17876_s1 + $0x1e10] sm:$0xff]   ;;  %v14576_v7 = vld [vmem:[%s17876_s1 + $0x1e18] sm:$0xff]   ;;  %v14612_v53 = vmov 0.0|0.0   ;;  %vm11131_vm1 = vcmask 523264  }
 0x3c6   :  { %v14577_v8 = vld [vmem:[%s17876_s1 + $0x1e20] sm:$0xff]   ;;  %v14578_v11 = vld [vmem:[%s17876_s1 + $0x1e28] sm:$0xff]   ;;  %v14579_v20 = vld [vmem:[%s17876_s1 + $0x1e30] sm:$0xff]   ;;  %13581 = vmatprep.subr.bf16.mxu1 %v14612_v53  ;;  %vm11205_vm2 = vcmask 17408   ;;  %s14613_s21 = smov [#allocation2]  }
 0x3c7   :  { %13545 = vmatpush3.bf16.msra.mxu0 %v14574_v5  ;;  %v14580_v23 = vld [vmem:[%s17876_s1 + $0x1e38] sm:$0xff]   ;;  %v11116_v50 = vld [vmem:[%s17878_s3] sm:$0xff]  ;;  %v11117_v51 = vld [vmem:[%s17878_s3 + $0x8] sm:$0xff]  ;;  %s11224_s22 = sshll.u32 %s14613_s21, 4  ;;  %s11225_s22 = int_to_ptr.vmem [resolvable:$true] %s11224_s22 }
 0x3c8   :  { %13546 = vmatprep.subr.bf16.mxu0 %v14610_v3  ;;  %v11233_v24 = vld.sshfl [vmem:[%s17875_s0 + $0x78] sm:$0x1 pattern:$0x75316420]  ;;  %v11118_v52 = vld [vmem:[%s17878_s3 + $0x10] sm:$0xff]  ;;  %v13582_v54 = vpack.c.bf16 %v11117_v51, %v11116_v50  ;;  %v11120_v57 = vld [vmem:[%s17878_s3 + $0x20] sm:$0xff]  ;;  %p14590_p1 = scmp.lt.s32.totalorder %s11225_s22, %s11225_s22 }
 0x3c9   :  { %v2745_v25 = vrot.slane %v11233_v24, %v14749_v41  ;;  %v11119_v55 = vld [vmem:[%s17878_s3 + $0x18] sm:$0xff]  ;;  %v11121_v58 = vld [vmem:[%s17878_s3 + $0x28] sm:$0xff]  ;;  %v11122_v61 = vld [vmem:[%s17878_s3 + $0x30] sm:$0xff] }
 0x3ca   :  { %13583 = vmatpush3.bf16.msra.mxu1 %v13582_v54  ;;  %v13585_v56 = vpack.c.bf16 %v11119_v55, %v11118_v52  ;;  %v11123_v62 = vld [vmem:[%s17878_s3 + $0x38] sm:$0xff] }
 0x3cb   :  { %13547 = vmatpush3.bf16.msra.mxu0 %v14575_v6  ;;  %13584 = vmatprep.subr.bf16.mxu1 %v14612_v53  ;;  %v13591_v0 = vpack.c.bf16 %v11123_v62, %v11122_v61 }
 0x3cc   :  { %13548 = vmatprep.subr.bf16.mxu0 %v14610_v3 }
 0x3ce   :  { %13586 = vmatpush3.bf16.msra.mxu1 %v13585_v56 }
 0x3cf   :  { %13549 = vmatpush3.bf16.msra.mxu0 %v14576_v7  ;;  %13587 = vmatprep.subr.bf16.mxu1 %v14612_v53 }
 0x3d0   :  { %13550 = vmatprep.subr.bf16.mxu0 %v14610_v3 }
 0x3d3   :  { %13551 = vmatpush3.bf16.msra.mxu0 %v14577_v8 }
 0x3d4   :  { %13552 = vmatprep.subr.bf16.mxu0 %v14610_v3 }
 0x3d5   :  { %v13232_v9 = vpop.f32.mrb[92].mxu0 }
 0x3d6   :  { %v13233_v10 = vpop.f32.mrb[93].mxu0 }
 0x3d7   :  { %v13234_v12 = vadd.f32 %v13233_v10, %v13232_v9  ;;  %v13235_v13 = vpop.f32.mrb[94].mxu0  ;;  %v13254_v14 = vpop.f32.mrb[92].mxu1  ;;  %13553 = vmatpush3.bf16.msra.mxu0 %v14578_v11 }
 0x3d8   :  { %v13236_v15 = vpop.f32.mrb[95].mxu0  ;;  %v13255_v16 = vpop.f32.mrb[93].mxu1  ;;  %13554 = vmatprep.subr.bf16.mxu0 %v14610_v3 }
 0x3d9   :  { %v10550_v17 = vadd.f32 %v13234_v12, %v10510_v59  ;;  %v13256_v18 = vadd.f32 %v13255_v16, %v13254_v14  ;;  %v13257_v19 = vpop.f32.mrb[94].mxu1  ;;  %v13588_v59 = vpack.c.bf16 %v11121_v58, %v11120_v57 }
 0x3da   :  { %v13258_v21 = vpop.f32.mrb[95].mxu1 }
 0x3db   :  { %v10590_v22 = vadd.f32 %v13256_v18, %v10550_v17  ;;  %13555 = vmatpush3.bf16.msra.mxu0 %v14579_v20  ;;  %13589 = vmatpush3.bf16.msra.mxu1 %v13588_v59 }
 0x3dc   :  { %13556 = vmatprep.subr.bf16.mxu0 %v14610_v3  ;;  %13590 = vmatprep.subr.bf16.mxu1 %v14612_v53  ;;  %v12202_v53 = vld [vmem:[%s17879_s4] ss:$0 sm:$0xff]  ;;  %s14585_s4 = scalar_lea.vmem %s11225_s22, 32 }
 0x3dd   :  { %p14586_p0 = scmp.ne.s32.totalorder %s11225_s22, %s14585_s4  ;;  %p14591_p2 = scmp.lt.s32.totalorder %s14585_s4, %s14585_s4 }
 0x3df   :  { %13557 = vmatpush3.bf16.msra.mxu0 %v14580_v23  ;;  %13592 = vmatpush3.bf16.msra.mxu1 %v13591_v0  ;;  %p14592_p3 = por %p14591_p2, %p14590_p1 }
 0x3e1   :  { %p14593_p4 = pnand %p14592_p3, %p14586_p0 }
 0x3e2   :  { %13559 = vmatmul.mubr.bf16.vlgmr.msra.gmra.mrb[120].mxu0 %v2745_v25 }
 0x3f5   :  { %v13276_v26 = vpop.f32.mrb[96].mxu0 }
 0x3f6   :  { %v13277_v27 = vpop.f32.mrb[97].mxu0 }
 0x3f7   :  { %v13278_v28 = vadd.f32 %v13277_v27, %v13276_v26  ;;  %v13279_v29 = vpop.f32.mrb[98].mxu0  ;;  %v13298_v30 = vpop.f32.mrb[96].mxu1 }
 0x3f8   :  { %v13280_v31 = vpop.f32.mrb[99].mxu0  ;;  %v13299_v32 = vpop.f32.mrb[97].mxu1 }
 0x3f9   :  { %v10630_v33 = vadd.f32 %v13278_v28, %v10590_v22  ;;  %v13300_v34 = vadd.f32 %v13299_v32, %v13298_v30  ;;  %v13301_v35 = vpop.f32.mrb[98].mxu1 }
 0x3fa   :  { %v13302_v36 = vpop.f32.mrb[99].mxu1 }
 0x3fb   :  { %v10670_v37 = vadd.f32 %v13300_v34, %v10630_v33 }
 0x415   :  { %v13320_v38 = vpop.f32.mrb[100].mxu0 }
 0x416   :  { %v13321_v39 = vpop.f32.mrb[101].mxu0 }
 0x417   :  { %v13322_v40 = vadd.f32 %v13321_v39, %v13320_v38  ;;  %v13323_v42 = vpop.f32.mrb[102].mxu0  ;;  %v13342_v43 = vpop.f32.mrb[100].mxu1 }
 0x418   :  { %v13324_v41 = vpop.f32.mrb[103].mxu0  ;;  %v13343_v44 = vpop.f32.mrb[101].mxu1 }
 0x419   :  { %v10710_v45 = vadd.f32 %v13322_v40, %v10670_v37  ;;  %v13344_v46 = vadd.f32 %v13343_v44, %v13342_v43  ;;  %v13345_v47 = vpop.f32.mrb[102].mxu1 }
 0x41a   :  { %v13346_v48 = vpop.f32.mrb[103].mxu1 }
 0x41b   :  { %v10750_v49 = vadd.f32 %v13344_v46, %v10710_v45 }
 0x435   :  { %v13364_v60 = vpop.f32.mrb[104].mxu0 }
 0x436   :  { %v13365_v63 = vpop.f32.mrb[105].mxu0 }
 0x437   :  { %v13366_v1 = vadd.f32 %v13365_v63, %v13364_v60  ;;  %v13367_v2 = vpop.f32.mrb[106].mxu0  ;;  %v13386_v3 = vpop.f32.mrb[104].mxu1 }
 0x438   :  { %v13368_v4 = vpop.f32.mrb[107].mxu0  ;;  %v13387_v5 = vpop.f32.mrb[105].mxu1 }
 0x439   :  { %v10790_v6 = vadd.f32 %v13366_v1, %v10750_v49  ;;  %v13388_v7 = vadd.f32 %v13387_v5, %v13386_v3  ;;  %v13389_v8 = vpop.f32.mrb[106].mxu1 }
 0x43a   :  { %v13390_v9 = vpop.f32.mrb[107].mxu1 }
 0x43b   :  { %v10830_v10 = vadd.f32 %v13388_v7, %v10790_v6 }
 0x455   :  { %v13408_v11 = vpop.f32.mrb[108].mxu0 }
 0x456   :  { %v13409_v12 = vpop.f32.mrb[109].mxu0 }
 0x457   :  { %v13410_v13 = vadd.f32 %v13409_v12, %v13408_v11  ;;  %v13411_v14 = vpop.f32.mrb[110].mxu0  ;;  %v13430_v15 = vpop.f32.mrb[108].mxu1 }
 0x458   :  { %v13412_v16 = vpop.f32.mrb[111].mxu0  ;;  %v13431_v17 = vpop.f32.mrb[109].mxu1 }
 0x459   :  { %v10870_v18 = vadd.f32 %v13410_v13, %v10830_v10  ;;  %v13432_v19 = vadd.f32 %v13431_v17, %v13430_v15  ;;  %v13433_v20 = vpop.f32.mrb[110].mxu1 }
 0x45a   :  { %v13434_v21 = vpop.f32.mrb[111].mxu1 }
 0x45b   :  { %v10910_v22 = vadd.f32 %v13432_v19, %v10870_v18 }
 0x475   :  { %v13452_v23 = vpop.f32.mrb[112].mxu0 }
 0x476   :  { %v13453_v24 = vpop.f32.mrb[113].mxu0 }
 0x477   :  { %v13454_v25 = vadd.f32 %v13453_v24, %v13452_v23  ;;  %v13455_v26 = vpop.f32.mrb[114].mxu0  ;;  %v13474_v27 = vpop.f32.mrb[112].mxu1 }
 0x478   :  { %v13456_v28 = vpop.f32.mrb[115].mxu0  ;;  %v13475_v29 = vpop.f32.mrb[113].mxu1 }
 0x479   :  { %v10950_v30 = vadd.f32 %v13454_v25, %v10910_v22  ;;  %v13476_v31 = vadd.f32 %v13475_v29, %v13474_v27  ;;  %v13477_v32 = vpop.f32.mrb[114].mxu1 }
 0x47a   :  { %v13478_v33 = vpop.f32.mrb[115].mxu1 }
 0x47b   :  { %v10990_v34 = vadd.f32 %v13476_v31, %v10950_v30 }
 0x495   :  { %v13496_v35 = vpop.f32.mrb[116].mxu0 }
 0x496   :  { %v13497_v36 = vpop.f32.mrb[117].mxu0 }
 0x497   :  { %v13498_v37 = vadd.f32 %v13497_v36, %v13496_v35  ;;  %v13499_v38 = vpop.f32.mrb[118].mxu0  ;;  %v13518_v39 = vpop.f32.mrb[116].mxu1 }
 0x498   :  { %v13500_v40 = vpop.f32.mrb[119].mxu0  ;;  %v13519_v42 = vpop.f32.mrb[117].mxu1 }
 0x499   :  { %v11030_v43 = vadd.f32 %v13498_v37, %v10990_v34  ;;  %v13520_v41 = vadd.f32 %v13519_v42, %v13518_v39  ;;  %v13521_v44 = vpop.f32.mrb[118].mxu1 }
 0x49a   :  { %v13522_v45 = vpop.f32.mrb[119].mxu1 }
 0x49b   :  { %v11070_v46 = vadd.f32 %v13520_v41, %v11030_v43 }
 0x4b5   :  { %v11109_v47 = vpop.f32.mrb[120].mxu0 }
 0x4b6   :  { %v11110_v48 = vadd.f32 %v11109_v47, %v11070_v46  ;;  %v13560_v49 = vpop.f32.mrb[121].mxu0 }
 0x4b7   :  { %v11112_v50 = vpop.f32.mrb[122].mxu0 }
 0x4b8   :  { %v11115_v51 = vmax.f32 %v11110_v48, 0.0  ;;  %v13561_v52 = vpop.f32.mrb[123].mxu0 }
 0x4ba   :  { %13579 = vmatmul.mubr.msk.f32.vlgmr.msra.gmra.mrb[120].mxu1 %vm11131_vm1, %v11115_v51 }
 0x58d   :  { %v11201_v54 = vpop.f32.mrb[120].mxu1 }
 0x58e   :  { %v11202_v55 = vadd.f32 %v12202_v53, %v11201_v54  ;;  %v13580_v56 = vpop.f32.mrb[121].mxu1 }
 0x590   :  { %v11206_v57 = vsel %vm11205_vm2, %v11202_v55, -inf }
 0x591   :  { %11207 = vmax.xlane.f32.xlu0 %v11206_v57 }
 0x61e   :  { %v11208_v58 = vpop.xlane.xlu0 %11207 }
 0x61f   :  { %v11209_v59 = vsub.f32 %v11202_v55, %v11208_v58 }
 0x621   :  { %v11210_v60 = vmul.f32 1.442695, %v11209_v59 }
 0x623   :  { %14581 = vpow2.f32 %v11210_v60 }
 0x62d   :  { %v14582_v61 = vpop.eup %14581 }
 0x62e   :  { %v11212_v62 = vsel %vm11205_vm2, %v14582_v61, 0.0 }
 0x62f   :  { %11213 = vadd.xlane.f32.xlu0 %v11212_v62 }
 0x6bc   :  { %v11214_v63 = vpop.xlane.xlu0 %11213 }
 0x6bd   :  { %14583 = vrcp.f32 %v11214_v63 }
 0x6c7   :  { %v14584_v0 = vpop.eup %14583 }
 0x6c8   :  { %v11216_v1 = vmul.f32 %v14584_v0, %v14582_v61 }
 0x6ca   :  { %11217 = vst.msk [vmem:[#allocation2] sm:$0x3] %vm11205_vm2, %v11216_v1 }
 0x6cb   :  { %14596 = shalt.err (!%p14593_p4)
}
 0x6cc   :  { %s14597_s25 = scalar_lea.hbm %s17880_s5, 32 }
 0x6cd   :  { %p14598_p5 = scmp.ne.s32.totalorder %s17880_s5, %s14597_s25  ;;  %p14601_p6 = scmp.lt.u32.totalorder %s14597_s25, %s17880_s5 }
 0x6cf   :  { %p14603_p7 = pnand %p14601_p6, %p14598_p5 }
 0x6d1   :  { %14606 = shalt.err (!%p14603_p7)
}
 0x6d2   :  { %11227 = dma.vmem_to_hbm [thread:$0]  %s11225_s22, 32, %s17880_s5, [#allocation3]  }
 0x6d3   :  { %14607 = dma.done.wait [#allocation3], 32  }
 0x6d4   :  { %14608 = vsyncadd [#allocation3], 4294967264 }
 0x6d5   :  { %11231 = vsyncpa [#allocation3], 1 }

</bundles_post_ra>
